<compile_context>
chip_gen: v5e
topology: v5e:2x2
jax: 0.10.0
libtpu: 0.0.40
codegen_flags: <defaults>
</compile_context>

<pallas_src>
import numpy as np
import jax
import jax.numpy as jnp
from jax.experimental import pallas as pl
from jax.experimental.pallas import tpu as pltpu

N_SAMPLES = 2 ** 15               # exp.n_samples
_ROWS = 8                         # sublane-dense compute layout per chunk
_CHUNK = 512                      # lane width per chunk (multiple of 128 -> unmasked stores)
_CHUNK_ELEMS = _ROWS * _CHUNK     # 4096 samples per chunk
_NCHUNK = N_SAMPLES // _CHUNK_ELEMS   # 8 chunks

# torch.linspace(0, N, N)[i] == i * N/(N-1); fold that factor and pi into one scalar
# applied to f0 on the scalar path (wrapper + f32 reference use the same constant).
_LINSPACE_PI = float(N_SAMPLES) / float(N_SAMPLES - 1) * np.pi


def _without_cumsum_kernel(c_ref, o_ref):
    """c_ref: (1, 1) f32 in SMEM holding c = f0 * pi * N/(N-1).
       o_ref: (NCHUNK, 8, 512) f32 in VMEM; row-major flattening == sample order."""
    nchunk, rows, cols = o_ref.shape
    chunk_elems = rows * cols

    # --- hoisted (computed once, outside the hot loop) ------------------------------
    # In-chunk flattened sample index as exact f32 integers 0..chunk_elems-1.
    r_i = jax.lax.broadcasted_iota(jnp.int32, (rows, cols), 0)
    c_i = jax.lax.broadcasted_iota(jnp.int32, (rows, cols), 1)
    row_col = (r_i * cols + c_i).astype(jnp.float32)          # (8, 512), exact integers

    c = c_ref[0, 0]                                           # folded scalar (scalar path)
    c_b = jnp.broadcast_to(c, (rows, cols))                   # hoisted splat

    # --- pass 1: compute sin per chunk, store unnormalized, track running abs-max ---
    def pass1(k, acc):
        base = (k * chunk_elems).astype(jnp.float32)          # exact integer, scalar path
        idx = row_col + base                                  # exact f32 sample indices
        sig = jnp.sin(idx * c_b)                              # args bit-identical to reference
        o_ref[k] = sig                                        # dense, unmasked stores
        return jnp.maximum(acc, jnp.abs(sig))                 # running (8, 512) max (4 vregs)

    acc0 = jnp.zeros((rows, cols), jnp.float32)
    acc = jax.lax.fori_loop(0, nchunk, pass1, acc0, unroll=True)

    # --- abs-max reduction: VALU pairwise folds to one vreg, then XLU reduces -------
    half = cols // 2
    a = jnp.maximum(acc[:, :half], acc[:, half:])             # (8, 256)
    quart = cols // 4
    a = jnp.maximum(a[:, :quart], a[:, quart:])               # (8, 128) -- one vreg
    m = jnp.max(a, axis=1, keepdims=True)                     # (8, 1)  cross-lane
    m = jnp.max(m, axis=0, keepdims=True)                     # (1, 1)  cross-sublane

    inv = pl.reciprocal(m + jnp.float32(1e-8), approx=False)  # exact; applied once
    inv_b = jnp.broadcast_to(inv, (rows, cols))               # hoisted out of 2nd loop

    # --- pass 2: normalize in place ---------------------------------------------------
    def pass2(k, carry):
        o_ref[k] = o_ref[k] * inv_b
        return carry

    jax.lax.fori_loop(0, nchunk, pass2, 0, unroll=True)


def without_cumulative_sum(x, f0, *, flat_output=True):
    """Forward pass. `x` is accepted for API parity with the nn.Module but unused.

    flat_output=True returns the module's (1, n_samples) shape; note that on TPU this
    final reshape is an XLA relayout (a real copy op), so consumers that can accept
    the flat sample order directly should pass flat_output=False and get the kernel's
    native (NCHUNK, 8, 512) layout (row-major order == sample order)."""
    del x  # the PyTorch module never reads x

    # Fold all scalar factors once (scalar work, off the vector path).
    c = (f0.astype(jnp.float32) * jnp.float32(_LINSPACE_PI)).reshape(1, 1)

    out = pl.pallas_call(
        _without_cumsum_kernel,
        out_shape=jax.ShapeDtypeStruct((_NCHUNK, _ROWS, _CHUNK), jnp.float32),
        # No grid: single invocation; the whole 128 KiB signal fits in one VMEM block
        # on all generations (incl. v7x's 64 MiB), no pipeline prologue/epilogue, and
        # a 2-TC split would cost more in max-combine sync than it saves.
        in_specs=[pl.BlockSpec(memory_space=pltpu.MemorySpace.SMEM)],
        out_specs=pl.BlockSpec(memory_space=pltpu.MemorySpace.VMEM),
        cost_estimate=pl.CostEstimate(
            flops=6 * N_SAMPLES,             # idx add, arg mul, abs, max, 2x norm mul
            transcendentals=N_SAMPLES,       # one sin per sample
            bytes_accessed=4 * N_SAMPLES + 4,
        ),
    )(c)

    if flat_output:
        # (NCHUNK, 8, 512) row-major == sample order; this reshape is a relayout op.
        return out.reshape(1, N_SAMPLES)
    return out


def reference_f32(f0):
    """Pure-JAX f32 reference using the SAME folded-constant argument form as the
    kernel (bit-identical f32 sin arguments) -> isolates sin-implementation error."""
    c = (f0.astype(jnp.float32) * jnp.float32(_LINSPACE_PI)).reshape(1, 1)
    idx = jnp.arange(N_SAMPLES, dtype=jnp.float32)[None, :]   # exact integers 0..N-1
    sig = jnp.sin(idx * c)
    m = jnp.max(jnp.abs(sig), axis=-1, keepdims=True)
    return sig / (m + 1e-8)


def reference_f64(f0):
    """Independent float64, torch-op-order NumPy reference (ground truth); catches
    bugs in _LINSPACE_PI / scalar folding that the f32 reference would share."""
    f0_64 = np.asarray(f0, dtype=np.float64).reshape(1, 1)
    r = np.linspace(0.0, float(N_SAMPLES), N_SAMPLES, dtype=np.float64)[None, :]
    sig = np.sin(r * f0_64 * np.pi)
    m = np.max(np.abs(sig), axis=-1, keepdims=True)
    return sig / (m + 1e-8)


if __name__ == "__main__":
    key = jax.random.PRNGKey(0)
    k_f0, k_x = jax.random.split(key)

    # Deterministic parameter init mirroring torch.zeros(1, 1).uniform_(0, 1)
    f0 = jax.random.uniform(k_f0, (1, 1), dtype=jnp.float32, minval=0.0, maxval=1.0)

    # Dummy input (unused by the forward pass, kept for interface parity)
    x = jax.random.normal(k_x, (2, 4, 16, 16), dtype=jnp.float32)

    out = without_cumulative_sum(x, f0)
    out = jax.block_until_ready(out)
    assert out.shape == (1, N_SAMPLES)

    # Check 1: vs. f32 reference with bit-identical sin arguments.  sin at |arg| ~ 1e5
    # in f32 is conditioned to ~1e-2, so 2e-2 covers sin-implementation differences.
    ref32 = reference_f32(f0)
    np.testing.assert_allclose(np.asarray(out), np.asarray(ref32), rtol=2e-2, atol=2e-2)

    # Check 2: vs. independent float64 torch-op-order ground truth.  The f32 argument
    # rounding alone (c rel-err ~1e-7 at arg ~1e5) allows ~2e-2 deviation; 5e-2 still
    # catches any real bug (wrong constant / folding / normalization => O(1) error).
    ref64 = reference_f64(f0)
    np.testing.assert_allclose(np.asarray(out), ref64, rtol=0.0, atol=5e-2)

    # Semantic check independent of sin precision: max_norm output peaks at ~1.
    peak = float(np.max(np.abs(np.asarray(out))))
    assert abs(peak - 1.0) < 1e-3, f"max_norm peak should be ~1, got {peak}"

    print("KERNEL_OK")
</pallas_src>

<mosaic_0001>
module attributes {stable_mosaic.version = 11 : i64} {
  func.func @_without_cumsum_kernel(%arg0: memref<1x1xf32, #tpu.memory_space<smem>>, %arg1: memref<8x8x512xf32, #tpu.memory_space<vmem>>) attributes {dimension_semantics = [], scalar_prefetch = 0 : i64, scratch_operands = 0 : i64, tpu.core_type = #tpu.core_type<tc>} {
    %0 = tpu.iota {dimensions = array<i32: 0>} : vector<8x512xi32>
    %1 = tpu.iota {dimensions = array<i32: 1>} : vector<8x512xi32>
    %c512_i32 = arith.constant 512 : i32
    %2 = vector.broadcast %c512_i32 : i32 to vector<8x512xi32>
    %3 = arith.muli %0, %2 : vector<8x512xi32>
    %4 = arith.addi %3, %1 : vector<8x512xi32>
    %5 = arith.sitofp %4 : vector<8x512xi32> to vector<8x512xf32>
    %c0 = arith.constant 0 : index
    %c0_0 = arith.constant 0 : index
    %6 = memref.load %arg0[%c0, %c0_0] : memref<1x1xf32, #tpu.memory_space<smem>>
    %7 = vector.broadcast %6 : f32 to vector<8x512xf32>
    %cst = arith.constant 0.000000e+00 : f32
    %8 = vector.broadcast %cst : f32 to vector<8x512xf32>
    %c0_i32 = arith.constant 0 : i32
    %c4096_i32 = arith.constant 4096 : i32
    %9 = arith.muli %c0_i32, %c4096_i32 : i32
    %10 = arith.sitofp %9 : i32 to f32
    %11 = vector.broadcast %10 : f32 to vector<8x512xf32>
    %12 = arith.addf %5, %11 : vector<8x512xf32>
    %13 = arith.mulf %12, %7 : vector<8x512xf32>
    %14 = math.sin %13 : vector<8x512xf32>
    %15 = arith.index_cast %c0_i32 : i32 to index
    %c0_1 = arith.constant 0 : index
    %c0_2 = arith.constant 0 : index
    %16 = vector.load %arg1[%15, %c0_1, %c0_2] : memref<8x8x512xf32, #tpu.memory_space<vmem>>, vector<1x8x512xf32>
    %17 = vector.shape_cast %16 : vector<1x8x512xf32> to vector<8x512xf32>
    %18 = vector.shape_cast %14 : vector<8x512xf32> to vector<1x8x512xf32>
    tpu.vector_store %arg1[%15, %c0_1, %c0_2], %18 {strides = array<i32>} : memref<8x8x512xf32, #tpu.memory_space<vmem>>, vector<1x8x512xf32>,
    %19 = math.absf %14 : vector<8x512xf32>
    %20 = arith.maximumf %8, %19 : vector<8x512xf32>
    %c1_i32 = arith.constant 1 : i32
    %c4096_i32_3 = arith.constant 4096 : i32
    %21 = arith.muli %c1_i32, %c4096_i32_3 : i32
    %22 = arith.sitofp %21 : i32 to f32
    %23 = vector.broadcast %22 : f32 to vector<8x512xf32>
    %24 = arith.addf %5, %23 : vector<8x512xf32>
    %25 = arith.mulf %24, %7 : vector<8x512xf32>
    %26 = math.sin %25 : vector<8x512xf32>
    %27 = arith.index_cast %c1_i32 : i32 to index
    %c0_4 = arith.constant 0 : index
    %c0_5 = arith.constant 0 : index
    %28 = vector.load %arg1[%27, %c0_4, %c0_5] : memref<8x8x512xf32, #tpu.memory_space<vmem>>, vector<1x8x512xf32>
    %29 = vector.shape_cast %28 : vector<1x8x512xf32> to vector<8x512xf32>
    %30 = vector.shape_cast %26 : vector<8x512xf32> to vector<1x8x512xf32>
    tpu.vector_store %arg1[%27, %c0_4, %c0_5], %30 {strides = array<i32>} : memref<8x8x512xf32, #tpu.memory_space<vmem>>, vector<1x8x512xf32>,
    %31 = math.absf %26 : vector<8x512xf32>
    %32 = arith.maximumf %20, %31 : vector<8x512xf32>
    %c2_i32 = arith.constant 2 : i32
    %c4096_i32_6 = arith.constant 4096 : i32
    %33 = arith.muli %c2_i32, %c4096_i32_6 : i32
    %34 = arith.sitofp %33 : i32 to f32
    %35 = vector.broadcast %34 : f32 to vector<8x512xf32>
    %36 = arith.addf %5, %35 : vector<8x512xf32>
    %37 = arith.mulf %36, %7 : vector<8x512xf32>
    %38 = math.sin %37 : vector<8x512xf32>
    %39 = arith.index_cast %c2_i32 : i32 to index
    %c0_7 = arith.constant 0 : index
    %c0_8 = arith.constant 0 : index
    %40 = vector.load %arg1[%39, %c0_7, %c0_8] : memref<8x8x512xf32, #tpu.memory_space<vmem>>, vector<1x8x512xf32>
    %41 = vector.shape_cast %40 : vector<1x8x512xf32> to vector<8x512xf32>
    %42 = vector.shape_cast %38 : vector<8x512xf32> to vector<1x8x512xf32>
    tpu.vector_store %arg1[%39, %c0_7, %c0_8], %42 {strides = array<i32>} : memref<8x8x512xf32, #tpu.memory_space<vmem>>, vector<1x8x512xf32>,
    %43 = math.absf %38 : vector<8x512xf32>
    %44 = arith.maximumf %32, %43 : vector<8x512xf32>
    %c3_i32 = arith.constant 3 : i32
    %c4096_i32_9 = arith.constant 4096 : i32
    %45 = arith.muli %c3_i32, %c4096_i32_9 : i32
    %46 = arith.sitofp %45 : i32 to f32
    %47 = vector.broadcast %46 : f32 to vector<8x512xf32>
    %48 = arith.addf %5, %47 : vector<8x512xf32>
    %49 = arith.mulf %48, %7 : vector<8x512xf32>
    %50 = math.sin %49 : vector<8x512xf32>
    %51 = arith.index_cast %c3_i32 : i32 to index
    %c0_10 = arith.constant 0 : index
    %c0_11 = arith.constant 0 : index
    %52 = vector.load %arg1[%51, %c0_10, %c0_11] : memref<8x8x512xf32, #tpu.memory_space<vmem>>, vector<1x8x512xf32>
    %53 = vector.shape_cast %52 : vector<1x8x512xf32> to vector<8x512xf32>
    %54 = vector.shape_cast %50 : vector<8x512xf32> to vector<1x8x512xf32>
    tpu.vector_store %arg1[%51, %c0_10, %c0_11], %54 {strides = array<i32>} : memref<8x8x512xf32, #tpu.memory_space<vmem>>, vector<1x8x512xf32>,
    %55 = math.absf %50 : vector<8x512xf32>
    %56 = arith.maximumf %44, %55 : vector<8x512xf32>
    %c4_i32 = arith.constant 4 : i32
    %c4096_i32_12 = arith.constant 4096 : i32
    %57 = arith.muli %c4_i32, %c4096_i32_12 : i32
    %58 = arith.sitofp %57 : i32 to f32
    %59 = vector.broadcast %58 : f32 to vector<8x512xf32>
    %60 = arith.addf %5, %59 : vector<8x512xf32>
    %61 = arith.mulf %60, %7 : vector<8x512xf32>
    %62 = math.sin %61 : vector<8x512xf32>
    %63 = arith.index_cast %c4_i32 : i32 to index
    %c0_13 = arith.constant 0 : index
    %c0_14 = arith.constant 0 : index
    %64 = vector.load %arg1[%63, %c0_13, %c0_14] : memref<8x8x512xf32, #tpu.memory_space<vmem>>, vector<1x8x512xf32>
    %65 = vector.shape_cast %64 : vector<1x8x512xf32> to vector<8x512xf32>
    %66 = vector.shape_cast %62 : vector<8x512xf32> to vector<1x8x512xf32>
    tpu.vector_store %arg1[%63, %c0_13, %c0_14], %66 {strides = array<i32>} : memref<8x8x512xf32, #tpu.memory_space<vmem>>, vector<1x8x512xf32>,
    %67 = math.absf %62 : vector<8x512xf32>
    %68 = arith.maximumf %56, %67 : vector<8x512xf32>
    %c5_i32 = arith.constant 5 : i32
    %c4096_i32_15 = arith.constant 4096 : i32
    %69 = arith.muli %c5_i32, %c4096_i32_15 : i32
    %70 = arith.sitofp %69 : i32 to f32
    %71 = vector.broadcast %70 : f32 to vector<8x512xf32>
    %72 = arith.addf %5, %71 : vector<8x512xf32>
    %73 = arith.mulf %72, %7 : vector<8x512xf32>
    %74 = math.sin %73 : vector<8x512xf32>
    %75 = arith.index_cast %c5_i32 : i32 to index
    %c0_16 = arith.constant 0 : index
    %c0_17 = arith.constant 0 : index
    %76 = vector.load %arg1[%75, %c0_16, %c0_17] : memref<8x8x512xf32, #tpu.memory_space<vmem>>, vector<1x8x512xf32>
    %77 = vector.shape_cast %76 : vector<1x8x512xf32> to vector<8x512xf32>
    %78 = vector.shape_cast %74 : vector<8x512xf32> to vector<1x8x512xf32>
    tpu.vector_store %arg1[%75, %c0_16, %c0_17], %78 {strides = array<i32>} : memref<8x8x512xf32, #tpu.memory_space<vmem>>, vector<1x8x512xf32>,
    %79 = math.absf %74 : vector<8x512xf32>
    %80 = arith.maximumf %68, %79 : vector<8x512xf32>
    %c6_i32 = arith.constant 6 : i32
    %c4096_i32_18 = arith.constant 4096 : i32
    %81 = arith.muli %c6_i32, %c4096_i32_18 : i32
    %82 = arith.sitofp %81 : i32 to f32
    %83 = vector.broadcast %82 : f32 to vector<8x512xf32>
    %84 = arith.addf %5, %83 : vector<8x512xf32>
    %85 = arith.mulf %84, %7 : vector<8x512xf32>
    %86 = math.sin %85 : vector<8x512xf32>
    %87 = arith.index_cast %c6_i32 : i32 to index
    %c0_19 = arith.constant 0 : index
    %c0_20 = arith.constant 0 : index
    %88 = vector.load %arg1[%87, %c0_19, %c0_20] : memref<8x8x512xf32, #tpu.memory_space<vmem>>, vector<1x8x512xf32>
    %89 = vector.shape_cast %88 : vector<1x8x512xf32> to vector<8x512xf32>
    %90 = vector.shape_cast %86 : vector<8x512xf32> to vector<1x8x512xf32>
    tpu.vector_store %arg1[%87, %c0_19, %c0_20], %90 {strides = array<i32>} : memref<8x8x512xf32, #tpu.memory_space<vmem>>, vector<1x8x512xf32>,
    %91 = math.absf %86 : vector<8x512xf32>
    %92 = arith.maximumf %80, %91 : vector<8x512xf32>
    %c7_i32 = arith.constant 7 : i32
    %c4096_i32_21 = arith.constant 4096 : i32
    %93 = arith.muli %c7_i32, %c4096_i32_21 : i32
    %94 = arith.sitofp %93 : i32 to f32
    %95 = vector.broadcast %94 : f32 to vector<8x512xf32>
    %96 = arith.addf %5, %95 : vector<8x512xf32>
    %97 = arith.mulf %96, %7 : vector<8x512xf32>
    %98 = math.sin %97 : vector<8x512xf32>
    %99 = arith.index_cast %c7_i32 : i32 to index
    %c0_22 = arith.constant 0 : index
    %c0_23 = arith.constant 0 : index
    %100 = vector.load %arg1[%99, %c0_22, %c0_23] : memref<8x8x512xf32, #tpu.memory_space<vmem>>, vector<1x8x512xf32>
    %101 = vector.shape_cast %100 : vector<1x8x512xf32> to vector<8x512xf32>
    %102 = vector.shape_cast %98 : vector<8x512xf32> to vector<1x8x512xf32>
    tpu.vector_store %arg1[%99, %c0_22, %c0_23], %102 {strides = array<i32>} : memref<8x8x512xf32, #tpu.memory_space<vmem>>, vector<1x8x512xf32>,
    %103 = math.absf %98 : vector<8x512xf32>
    %104 = arith.maximumf %92, %103 : vector<8x512xf32>
    %c8_i32 = arith.constant 8 : i32
    %105 = vector.extract_strided_slice %104 {offsets = [0, 0], sizes = [8, 256], strides = [1, 1]} : vector<8x512xf32> to vector<8x256xf32>
    %106 = vector.extract_strided_slice %104 {offsets = [0, 256], sizes = [8, 256], strides = [1, 1]} : vector<8x512xf32> to vector<8x256xf32>
    %107 = arith.maximumf %105, %106 : vector<8x256xf32>
    %108 = vector.extract_strided_slice %107 {offsets = [0, 0], sizes = [8, 128], strides = [1, 1]} : vector<8x256xf32> to vector<8x128xf32>
    %109 = vector.extract_strided_slice %107 {offsets = [0, 128], sizes = [8, 128], strides = [1, 1]} : vector<8x256xf32> to vector<8x128xf32>
    %110 = arith.maximumf %108, %109 : vector<8x128xf32>
    %cst_24 = arith.constant dense<0xFF800000> : vector<8xf32>
    %111 = vector.multi_reduction <maximumf>, %110, %cst_24 [1] : vector<8x128xf32> to vector<8xf32>
    %112 = vector.shape_cast %111 : vector<8xf32> to vector<8x1xf32>
    %cst_25 = arith.constant dense<0xFF800000> : vector<1xf32>
    %113 = vector.multi_reduction <maximumf>, %112, %cst_25 [0] : vector<8x1xf32> to vector<1xf32>
    %114 = vector.shape_cast %113 : vector<1xf32> to vector<1x1xf32>
    %cst_26 = arith.constant 9.99999993E-9 : f32
    %115 = vector.broadcast %cst_26 : f32 to vector<1x1xf32>
    %116 = arith.addf %114, %115 : vector<1x1xf32>
    %117 = tpu.reciprocal %116 : vector<1x1xf32> -> vector<1x1xf32>
    %118 = vector.shape_cast %117 : vector<1x1xf32> to vector<1x1xf32>
    %119 = vector.broadcast %118 : vector<1x1xf32> to vector<8x512xf32>
    %c0_i32_27 = arith.constant 0 : i32
    %120 = arith.index_cast %c0_i32_27 : i32 to index
    %c0_28 = arith.constant 0 : index
    %c0_29 = arith.constant 0 : index
    %121 = vector.load %arg1[%120, %c0_28, %c0_29] : memref<8x8x512xf32, #tpu.memory_space<vmem>>, vector<1x8x512xf32>
    %122 = vector.shape_cast %121 : vector<1x8x512xf32> to vector<8x512xf32>
    %123 = arith.mulf %122, %119 : vector<8x512xf32>
    %124 = arith.index_cast %c0_i32_27 : i32 to index
    %c0_30 = arith.constant 0 : index
    %c0_31 = arith.constant 0 : index
    %125 = vector.load %arg1[%124, %c0_30, %c0_31] : memref<8x8x512xf32, #tpu.memory_space<vmem>>, vector<1x8x512xf32>
    %126 = vector.shape_cast %125 : vector<1x8x512xf32> to vector<8x512xf32>
    %127 = vector.shape_cast %123 : vector<8x512xf32> to vector<1x8x512xf32>
    tpu.vector_store %arg1[%124, %c0_30, %c0_31], %127 {strides = array<i32>} : memref<8x8x512xf32, #tpu.memory_space<vmem>>, vector<1x8x512xf32>,
    %c1_i32_32 = arith.constant 1 : i32
    %128 = arith.index_cast %c1_i32_32 : i32 to index
    %c0_33 = arith.constant 0 : index
    %c0_34 = arith.constant 0 : index
    %129 = vector.load %arg1[%128, %c0_33, %c0_34] : memref<8x8x512xf32, #tpu.memory_space<vmem>>, vector<1x8x512xf32>
    %130 = vector.shape_cast %129 : vector<1x8x512xf32> to vector<8x512xf32>
    %131 = arith.mulf %130, %119 : vector<8x512xf32>
    %132 = arith.index_cast %c1_i32_32 : i32 to index
    %c0_35 = arith.constant 0 : index
    %c0_36 = arith.constant 0 : index
    %133 = vector.load %arg1[%132, %c0_35, %c0_36] : memref<8x8x512xf32, #tpu.memory_space<vmem>>, vector<1x8x512xf32>
    %134 = vector.shape_cast %133 : vector<1x8x512xf32> to vector<8x512xf32>
    %135 = vector.shape_cast %131 : vector<8x512xf32> to vector<1x8x512xf32>
    tpu.vector_store %arg1[%132, %c0_35, %c0_36], %135 {strides = array<i32>} : memref<8x8x512xf32, #tpu.memory_space<vmem>>, vector<1x8x512xf32>,
    %c2_i32_37 = arith.constant 2 : i32
    %136 = arith.index_cast %c2_i32_37 : i32 to index
    %c0_38 = arith.constant 0 : index
    %c0_39 = arith.constant 0 : index
    %137 = vector.load %arg1[%136, %c0_38, %c0_39] : memref<8x8x512xf32, #tpu.memory_space<vmem>>, vector<1x8x512xf32>
    %138 = vector.shape_cast %137 : vector<1x8x512xf32> to vector<8x512xf32>
    %139 = arith.mulf %138, %119 : vector<8x512xf32>
    %140 = arith.index_cast %c2_i32_37 : i32 to index
    %c0_40 = arith.constant 0 : index
    %c0_41 = arith.constant 0 : index
    %141 = vector.load %arg1[%140, %c0_40, %c0_41] : memref<8x8x512xf32, #tpu.memory_space<vmem>>, vector<1x8x512xf32>
    %142 = vector.shape_cast %141 : vector<1x8x512xf32> to vector<8x512xf32>
    %143 = vector.shape_cast %139 : vector<8x512xf32> to vector<1x8x512xf32>
    tpu.vector_store %arg1[%140, %c0_40, %c0_41], %143 {strides = array<i32>} : memref<8x8x512xf32, #tpu.memory_space<vmem>>, vector<1x8x512xf32>,
    %c3_i32_42 = arith.constant 3 : i32
    %144 = arith.index_cast %c3_i32_42 : i32 to index
    %c0_43 = arith.constant 0 : index
    %c0_44 = arith.constant 0 : index
    %145 = vector.load %arg1[%144, %c0_43, %c0_44] : memref<8x8x512xf32, #tpu.memory_space<vmem>>, vector<1x8x512xf32>
    %146 = vector.shape_cast %145 : vector<1x8x512xf32> to vector<8x512xf32>
    %147 = arith.mulf %146, %119 : vector<8x512xf32>
    %148 = arith.index_cast %c3_i32_42 : i32 to index
    %c0_45 = arith.constant 0 : index
    %c0_46 = arith.constant 0 : index
    %149 = vector.load %arg1[%148, %c0_45, %c0_46] : memref<8x8x512xf32, #tpu.memory_space<vmem>>, vector<1x8x512xf32>
    %150 = vector.shape_cast %149 : vector<1x8x512xf32> to vector<8x512xf32>
    %151 = vector.shape_cast %147 : vector<8x512xf32> to vector<1x8x512xf32>
    tpu.vector_store %arg1[%148, %c0_45, %c0_46], %151 {strides = array<i32>} : memref<8x8x512xf32, #tpu.memory_space<vmem>>, vector<1x8x512xf32>,
    %c4_i32_47 = arith.constant 4 : i32
    %152 = arith.index_cast %c4_i32_47 : i32 to index
    %c0_48 = arith.constant 0 : index
    %c0_49 = arith.constant 0 : index
    %153 = vector.load %arg1[%152, %c0_48, %c0_49] : memref<8x8x512xf32, #tpu.memory_space<vmem>>, vector<1x8x512xf32>
    %154 = vector.shape_cast %153 : vector<1x8x512xf32> to vector<8x512xf32>
    %155 = arith.mulf %154, %119 : vector<8x512xf32>
    %156 = arith.index_cast %c4_i32_47 : i32 to index
    %c0_50 = arith.constant 0 : index
    %c0_51 = arith.constant 0 : index
    %157 = vector.load %arg1[%156, %c0_50, %c0_51] : memref<8x8x512xf32, #tpu.memory_space<vmem>>, vector<1x8x512xf32>
    %158 = vector.shape_cast %157 : vector<1x8x512xf32> to vector<8x512xf32>
    %159 = vector.shape_cast %155 : vector<8x512xf32> to vector<1x8x512xf32>
    tpu.vector_store %arg1[%156, %c0_50, %c0_51], %159 {strides = array<i32>} : memref<8x8x512xf32, #tpu.memory_space<vmem>>, vector<1x8x512xf32>,
    %c5_i32_52 = arith.constant 5 : i32
    %160 = arith.index_cast %c5_i32_52 : i32 to index
    %c0_53 = arith.constant 0 : index
    %c0_54 = arith.constant 0 : index
    %161 = vector.load %arg1[%160, %c0_53, %c0_54] : memref<8x8x512xf32, #tpu.memory_space<vmem>>, vector<1x8x512xf32>
    %162 = vector.shape_cast %161 : vector<1x8x512xf32> to vector<8x512xf32>
    %163 = arith.mulf %162, %119 : vector<8x512xf32>
    %164 = arith.index_cast %c5_i32_52 : i32 to index
    %c0_55 = arith.constant 0 : index
    %c0_56 = arith.constant 0 : index
    %165 = vector.load %arg1[%164, %c0_55, %c0_56] : memref<8x8x512xf32, #tpu.memory_space<vmem>>, vector<1x8x512xf32>
    %166 = vector.shape_cast %165 : vector<1x8x512xf32> to vector<8x512xf32>
    %167 = vector.shape_cast %163 : vector<8x512xf32> to vector<1x8x512xf32>
    tpu.vector_store %arg1[%164, %c0_55, %c0_56], %167 {strides = array<i32>} : memref<8x8x512xf32, #tpu.memory_space<vmem>>, vector<1x8x512xf32>,
    %c6_i32_57 = arith.constant 6 : i32
    %168 = arith.index_cast %c6_i32_57 : i32 to index
    %c0_58 = arith.constant 0 : index
    %c0_59 = arith.constant 0 : index
    %169 = vector.load %arg1[%168, %c0_58, %c0_59] : memref<8x8x512xf32, #tpu.memory_space<vmem>>, vector<1x8x512xf32>
    %170 = vector.shape_cast %169 : vector<1x8x512xf32> to vector<8x512xf32>
    %171 = arith.mulf %170, %119 : vector<8x512xf32>
    %172 = arith.index_cast %c6_i32_57 : i32 to index
    %c0_60 = arith.constant 0 : index
    %c0_61 = arith.constant 0 : index
    %173 = vector.load %arg1[%172, %c0_60, %c0_61] : memref<8x8x512xf32, #tpu.memory_space<vmem>>, vector<1x8x512xf32>
    %174 = vector.shape_cast %173 : vector<1x8x512xf32> to vector<8x512xf32>
    %175 = vector.shape_cast %171 : vector<8x512xf32> to vector<1x8x512xf32>
    tpu.vector_store %arg1[%172, %c0_60, %c0_61], %175 {strides = array<i32>} : memref<8x8x512xf32, #tpu.memory_space<vmem>>, vector<1x8x512xf32>,
    %c7_i32_62 = arith.constant 7 : i32
    %176 = arith.index_cast %c7_i32_62 : i32 to index
    %c0_63 = arith.constant 0 : index
    %c0_64 = arith.constant 0 : index
    %177 = vector.load %arg1[%176, %c0_63, %c0_64] : memref<8x8x512xf32, #tpu.memory_space<vmem>>, vector<1x8x512xf32>
    %178 = vector.shape_cast %177 : vector<1x8x512xf32> to vector<8x512xf32>
    %179 = arith.mulf %178, %119 : vector<8x512xf32>
    %180 = arith.index_cast %c7_i32_62 : i32 to index
    %c0_65 = arith.constant 0 : index
    %c0_66 = arith.constant 0 : index
    %181 = vector.load %arg1[%180, %c0_65, %c0_66] : memref<8x8x512xf32, #tpu.memory_space<vmem>>, vector<1x8x512xf32>
    %182 = vector.shape_cast %181 : vector<1x8x512xf32> to vector<8x512xf32>
    %183 = vector.shape_cast %179 : vector<8x512xf32> to vector<1x8x512xf32>
    tpu.vector_store %arg1[%180, %c0_65, %c0_66], %183 {strides = array<i32>} : memref<8x8x512xf32, #tpu.memory_space<vmem>>, vector<1x8x512xf32>,
    %c8_i32_67 = arith.constant 8 : i32
    return
  }
}

</mosaic_0001>

<bundles_post_ra>
// kernel: tpu_custom_call.1
= control target key start
LH: loop header
LB: loop body
LE: loop exit
PB: predicated region body
PF: predicated region fallthrough
CT: control target
= control target key end

     0   :  { %7 = vsyncpa [#allocation4], 0  ;;  %v10_v0 = vlaneseq  ;;  %v5429_v43 = vmov 683565275   ;;  %v5430_v45 = vmov 2475754826   ;;  %s9360_s0 = inlined_call_operand.<no memory space> [shape: f32[1,1], index: 0, kind: input, shape index: {}]   ;;  %s9361_s1 = inlined_call_operand.hbm [shape: f32[8,8,512], index: 1, kind: output, shape index: {}]  }
   0x1   :  { %v5454_v11 = vstv %s9360_s0  ;;  %v5431_v47 = vmov 2131351028   ;;  %v5432_v49 = vmov 2102212464   ;;  %v5433_v51 = vmov 920167782  }
   0x2   :  { %v11_v1 = vshrl.u32 %v10_v0, 7  ;;  %v13_v2 = vand.u32 127, %v10_v0  ;;  %v5434_v60 = vmov 1326507024   ;;  %s5436_s0 = smov [#allocation3]   ;;  %s5283_s11 = sshll.u32 %s9361_s1, 4  ;;  %s5284_s11 = int_to_ptr.hbm [resolvable:$true] %s5283_s11 }
   0x3   :  { %s5281_s8 = sshll.u32 %s5436_s0, 4  ;;  %s5437_s12 = smov 512   ;;  %s5282_s8 = int_to_ptr.vmem [resolvable:$true] %s5281_s8 }
   0x4   :  { %v14_v3 = vadd.s32 128, %v13_v2  ;;  %v15_v4 = vadd.s32 256, %v13_v2  ;;  %v16_v5 = vadd.s32 384, %v13_v2  ;;  %v17_v6 = vmul.u32 512, %v11_v1  ;;  %s5438_s13 = smov 32  }
   0x6   :  { %v18_v7 = vadd.s32 %v17_v6, %v13_v2  ;;  %v19_v8 = vadd.s32 %v17_v6, %v14_v3  ;;  %v20_v9 = vadd.s32 %v17_v6, %v15_v4  ;;  %v5449_v10 = vadd.s32 %v17_v6, %v16_v5 }
   0x8   :  { %v5456_v12 = vcvt.s32.f32 %v18_v7  ;;  %v5458_v13 = vcvt.s32.f32 %v19_v8  ;;  %v5460_v14 = vcvt.s32.f32 %v20_v9 }
   0xa   :  { %v5464_v15 = vmul.f32 %v5454_v11, %v5456_v12  ;;  %v5468_v16 = vmul.f32 %v5454_v11, %v5458_v13  ;;  %v5472_v17 = vmul.f32 %v5454_v11, %v5460_v14 }
   0xc   :  { %v36_v18 = vand.u32 2147483647, %v5464_v15  ;;  %v39_v19 = vand.u32 2139095040, %v5464_v15  ;;  %v191_v20 = vand.u32 2147483647, %v5468_v16  ;;  %v194_v21 = vand.u32 2139095040, %v5468_v16 }
   0xd   :  { %v349_v22 = vand.u32 2139095040, %v5472_v17 }
   0xe   :  { %v40_v23 = vshrl.u32 %v39_v19, 23  ;;  %v43_v24 = vand.u32 8388607, %v36_v18  ;;  %v195_v25 = vshrl.u32 %v194_v21, 23  ;;  %v198_v26 = vand.u32 8388607, %v191_v20 }
   0xf   :  { %v350_v30 = vshrl.u32 %v349_v22, 23 }
  0x10   :  { %v5295_v27 = vadd.s32 4294967169, %v40_v23  ;;  %v44_v28 = vor.u32 8388608, %v43_v24  ;;  %v5298_v29 = vadd.s32 4294967169, %v195_v25  ;;  %v199_v32 = vor.u32 8388608, %v198_v26 }
  0x11   :  { %v5301_v36 = vadd.s32 4294967169, %v350_v30 }
  0x12   :  { %v46_v31 = vadd.s32 1, %v5295_v27  ;;  %v201_v33 = vadd.s32 1, %v5298_v29  ;;  %v5483_v35 = vshll.u32 %v44_v28, 8  ;;  %v5489_v41 = vshll.u32 %v199_v32, 8 }
  0x13   :  { %v5497_v54 = vadd.s32 1, %v5301_v36 }
  0x14   :  { %vm47_vm0 = vcmp.gt.s32.totalorder %v46_v31, 0  ;;  %vm202_vm1 = vcmp.gt.s32.totalorder %v201_v33, 0  ;;  %v85_v53 = vand.u32 65535, %v5483_v35  ;;  %v86_v58 = vshrl.u32 %v5483_v35, 16 }
  0x15   :  { %v48_v34 = vsel %vm47_vm0, %v46_v31, 0  ;;  %v203_v38 = vsel %vm202_vm1, %v201_v33, 0  ;;  %vm357_vm15 = vcmp.gt.s32.totalorder %v5497_v54, 0 }
  0x16   :  { %v50_v37 = vand.u32 31, %v48_v34  ;;  %v5485_v39 = vshrl.u32 %v48_v34, 5  ;;  %v5487_v40 = vand.u32 31, %v203_v38  ;;  %v5517_v7 = vshrl.u32 %v203_v38, 5 }
  0x18   :  { %v51_v42 = vsub.s32 32, %v50_v37  ;;  %v53_v44 = vshll.u32 %v5429_v43, %v50_v37  ;;  %v56_v46 = vshll.u32 %v5430_v45, %v50_v37  ;;  %v59_v48 = vshll.u32 %v5431_v47, %v50_v37 }
  0x19   :  { %v62_v50 = vshll.u32 %v5432_v49, %v50_v37  ;;  %v65_v52 = vshll.u32 %v5433_v51, %v50_v37  ;;  %vm68_vm2 = vcmp.lt.s32.totalorder %v5485_v39, 1  ;;  %vm71_vm3 = vcmp.lt.s32.totalorder %v5485_v39, 4 }
  0x1a   :  { %v54_v55 = vshrl.u32 %v5430_v45, %v51_v42  ;;  %v57_v56 = vshrl.u32 %v5431_v47, %v51_v42  ;;  %v60_v57 = vshrl.u32 %v5432_v49, %v51_v42  ;;  %v63_v59 = vshrl.u32 %v5433_v51, %v51_v42 }
  0x1b   :  { %v66_v61 = vshrl.u32 %v5434_v60, %v51_v42  ;;  %v5508_v1 = vsub.s32 32, %v5487_v40  ;;  %v52_v2 = vshrl.u32 %v5429_v43, %v51_v42  ;;  %vm70_vm4 = vcmp.lt.s32.totalorder %v5485_v39, 3 }
  0x1c   :  { %v55_v62 = vor.u32 %v54_v55, %v53_v44  ;;  %v58_v63 = vor.u32 %v57_v56, %v56_v46  ;;  %v61_v0 = vor.u32 %v60_v57, %v59_v48  ;;  %v64_v3 = vor.u32 %v63_v59, %v62_v50 }
  0x1d   :  { %v67_v4 = vor.u32 %v66_v61, %v65_v52  ;;  %vm69_vm5 = vcmp.lt.s32.totalorder %v5485_v39, 2  ;;  %v208_v19 = vshll.u32 %v5429_v43, %v5487_v40  ;;  %v211_v21 = vshll.u32 %v5430_v45, %v5487_v40 }
  0x1e   :  { %v76_v5 = vsel %vm68_vm2, %v55_v62, %v58_v63  ;;  %v80_v6 = vsel %vm68_vm2, %v58_v63, %v61_v0  ;;  %v77_v8 = vsel %vm71_vm3, %v64_v3, 920167782  ;;  %v73_v22 = vsel %vm71_vm3, %v61_v0, 2102212464 }
  0x1f   :  { %v81_v9 = vsel %vm71_vm3, %v67_v4, 1326507024  ;;  %v78_v23 = vsel %vm70_vm4, %v61_v0, %v77_v8  ;;  %v209_v25 = vshrl.u32 %v5430_v45, %v5508_v1  ;;  %v72_v26 = vsel %vm68_vm2, %v52_v2, %v55_v62 }
  0x20   :  { %v82_v24 = vsel %vm70_vm4, %v64_v3, %v81_v9  ;;  %v79_v27 = vsel %vm69_vm5, %v76_v5, %v78_v23  ;;  %v212_v29 = vshrl.u32 %v5431_v47, %v5508_v1  ;;  %v74_v34 = vsel %vm70_vm4, %v58_v63, %v73_v22 }
  0x21   :  { %v83_v28 = vsel %vm69_vm5, %v80_v6, %v82_v24  ;;  %v109_v32 = vand.u32 65535, %v79_v27  ;;  %v110_v33 = vshrl.u32 %v79_v27, 16  ;;  %v5545_v36 = vor.u32 %v209_v25, %v208_v19 }
  0x22   :  { %v87_v30 = vand.u32 65535, %v83_v28  ;;  %v88_v31 = vshrl.u32 %v83_v28, 16  ;;  %v5547_v37 = vor.u32 %v212_v29, %v211_v21  ;;  %v214_v38 = vshll.u32 %v5431_v47, %v5487_v40 }
  0x23   :  { %v215_v48 = vshrl.u32 %v5432_v49, %v5508_v1  ;;  %v111_v52 = vmul.u32 %v109_v32, %v85_v53  ;;  %v112_v55 = vmul.u32 %v110_v33, %v85_v53  ;;  %v113_v56 = vmul.u32 %v109_v32, %v86_v58 }
  0x24   :  { %v89_v42 = vmul.u32 %v87_v30, %v85_v53  ;;  %v90_v44 = vmul.u32 %v88_v31, %v85_v53  ;;  %v91_v46 = vmul.u32 %v87_v30, %v86_v58  ;;  %v92_v50 = vmul.u32 %v88_v31, %v86_v58 }
  0x25   :  { %v114_v62 = vmul.u32 %v110_v33, %v86_v58  ;;  %v115_v0 = vshll.u32 %v112_v55, 16  ;;  %v116_v2 = vshrl.u32 %v112_v55, 16  ;;  %v117_v3 = vshll.u32 %v113_v56, 16 }
  0x26   :  { %v93_v57 = vshll.u32 %v90_v44, 16  ;;  %v94_v59 = vshrl.u32 %v90_v44, 16  ;;  %v95_v61 = vshll.u32 %v91_v46, 16  ;;  %v96_v63 = vshrl.u32 %v91_v46, 16 }
  0x27   :  { %v118_v5 = vshrl.u32 %v113_v56, 16  ;;  %v217_v6 = vshll.u32 %v5432_v49, %v5487_v40  ;;  %v5435_v8 = vmov 0   ;;  %vm119_vm7 = vc.u32 %v111_v52, %v115_v0 }
  0x28   :  { %vm97_vm6 = vc.u32 %v89_v42, %v93_v57  ;;  %v99_v4 = vadd.s32 %v93_v57, %v89_v42  ;;  %v121_v53 = vadd.s32 %v115_v0, %v111_v52  ;;  %v218_v19 = vshrl.u32 %v5433_v51, %v5508_v1 }
  0x29   :  { %v98_v9 = vsel %vm97_vm6, 1, %v5435_v8  ;;  %v120_v58 = vsel %vm119_vm7, 1, %v5435_v8  ;;  %v220_v22 = vshll.u32 %v5433_v51, %v5487_v40  ;;  %v216_v25 = vor.u32 %v215_v48, %v214_v38 }
  0x2a   :  { %v100_v21 = vadd.s32 %v98_v9, %v92_v50  ;;  %vm101_vm8 = vc.u32 %v99_v4, %v95_v61  ;;  %v122_v24 = vadd.s32 %v120_v58, %v114_v62  ;;  %vm123_vm9 = vc.u32 %v121_v53, %v117_v3 }
  0x2b   :  { %v102_v23 = vsel %vm101_vm8, 1, %v5435_v8  ;;  %v124_v28 = vsel %vm123_vm9, 1, %v5435_v8  ;;  %v219_v29 = vor.u32 %v218_v19, %v217_v6  ;;  %v221_v30 = vshrl.u32 %v5434_v60, %v5508_v1 }
  0x2c   :  { %v104_v27 = vadd.s32 %v102_v23, %v100_v21  ;;  %v5565_v31 = vadd.s32 %v121_v53, %v117_v3  ;;  %v126_v32 = vadd.s32 %v124_v28, %v122_v24  ;;  %vm223_vm10 = vcmp.lt.s32.totalorder %v5517_v7, 1 }
  0x2d   :  { %vm225_vm11 = vcmp.lt.s32.totalorder %v5517_v7, 3  ;;  %v222_v33 = vor.u32 %v221_v30, %v220_v22  ;;  %vm224_vm12 = vcmp.lt.s32.totalorder %v5517_v7, 2  ;;  %vm226_vm13 = vcmp.lt.s32.totalorder %v5517_v7, 4 }
  0x2e   :  { %v105_v40 = vadd.s32 %v104_v27, %v94_v59  ;;  %v75_v38 = vsel %vm69_vm5, %v72_v26, %v74_v34  ;;  %v127_v42 = vadd.s32 %v126_v32, %v116_v2  ;;  %v231_v44 = vsel %vm223_vm10, %v5545_v36, %v5547_v37 }
  0x2f   :  { %v232_v46 = vsel %vm226_vm13, %v219_v29, 920167782  ;;  %v235_v52 = vsel %vm223_vm10, %v5547_v37, %v216_v25  ;;  %v240_v39 = vand.u32 65535, %v5489_v41  ;;  %v236_v55 = vsel %vm226_vm13, %v222_v33, 1326507024 }
  0x30   :  { %v5579_v48 = vadd.s32 %v105_v40, %v96_v63  ;;  %v233_v50 = vsel %vm225_vm11, %v216_v25, %v232_v46  ;;  %v128_v26 = vadd.s32 %v127_v42, %v118_v5  ;;  %v241_v56 = vshrl.u32 %v5489_v41, 16 }
  0x31   :  { %v234_v34 = vsel %vm224_vm12, %v231_v44, %v233_v50  ;;  %v129_v57 = vmul.u32 %v5483_v35, %v75_v38  ;;  %v237_v59 = vsel %vm225_vm11, %v219_v29, %v236_v55  ;;  %v207_v2 = vshrl.u32 %v5429_v43, %v5508_v1 }
  0x32   :  { %vm131_vm14 = vc.u32 %v5579_v48, %v5565_v31  ;;  %v264_v61 = vand.u32 65535, %v234_v34  ;;  %v132_v62 = vadd.s32 1, %v128_v26  ;;  %v238_v63 = vsel %vm224_vm12, %v235_v52, %v237_v59 }
  0x33   :  { %v265_v0 = vshrl.u32 %v234_v34, 16  ;;  %v242_v3 = vand.u32 65535, %v238_v63  ;;  %v243_v4 = vshrl.u32 %v238_v63, 16  ;;  %v228_v5 = vsel %vm226_vm13, %v216_v25, 2102212464 }
  0x34   :  { %v133_v35 = vsel %vm131_vm14, %v132_v62, %v128_v26  ;;  %v268_v9 = vmul.u32 %v264_v61, %v241_v56  ;;  %v266_v58 = vmul.u32 %v264_v61, %v240_v39  ;;  %v346_v24 = vand.u32 2147483647, %v5472_v17 }
  0x35   :  { %v267_v6 = vmul.u32 %v265_v0, %v240_v39  ;;  %v134_v53 = vadd.s32 %v133_v35, %v129_v57  ;;  %v244_v19 = vmul.u32 %v242_v3, %v240_v39  ;;  %v245_v21 = vmul.u32 %v243_v4, %v240_v39 }
  0x36   :  { %v246_v22 = vmul.u32 %v242_v3, %v241_v56  ;;  %v358_v1 = vsel %vm357_vm15, %v5497_v54, 0  ;;  %v227_v28 = vsel %vm223_vm10, %v207_v2, %v5545_v36  ;;  %v247_v29 = vmul.u32 %v243_v4, %v241_v56 }
  0x37   :  { %v270_v23 = vshll.u32 %v267_v6, 16  ;;  %v135_v27 = vadd.s32 536870912, %v134_v53  ;;  %v248_v30 = vshll.u32 %v245_v21, 16  ;;  %v229_v25 = vsel %vm225_vm11, %v5547_v37, %v228_v5 }
  0x38   :  { %v250_v32 = vshll.u32 %v246_v22, 16  ;;  %v269_v40 = vmul.u32 %v265_v0, %v241_v56  ;;  %v272_v33 = vshll.u32 %v268_v9, 16  ;;  %v249_v44 = vshrl.u32 %v245_v21, 16 }
  0x39   :  { %v136_v38 = vshrl.u32 %v135_v27, 30  ;;  %vm252_vm0 = vc.u32 %v244_v19, %v248_v30  ;;  %v254_v42 = vadd.s32 %v248_v30, %v244_v19  ;;  %vm274_vm1 = vc.u32 %v266_v58, %v270_v23 }
  0x3a   :  { %v253_v54 = vsel %vm252_vm0, 1, %v5435_v8  ;;  %v275_v46 = vsel %vm274_vm1, 1, %v5435_v8  ;;  %v276_v50 = vadd.s32 %v270_v23, %v266_v58  ;;  %v271_v39 = vshrl.u32 %v267_v6, 16 }
  0x3b   :  { %v137_v36 = vshll.u32 %v136_v38, 30  ;;  %v255_v52 = vadd.s32 %v253_v54, %v247_v29  ;;  %vm256_vm2 = vc.u32 %v254_v42, %v250_v32  ;;  %v277_v37 = vadd.s32 %v275_v46, %v269_v40 }
  0x3c   :  { %v257_v26 = vsel %vm256_vm2, 1, %v5435_v8  ;;  %vm278_vm3 = vc.u32 %v276_v50, %v272_v33  ;;  %v360_v34 = vand.u32 31, %v358_v1  ;;  %v251_v56 = vshrl.u32 %v246_v22, 16 }
  0x3d   :  { %v138_v55 = vsub.s32 %v134_v53, %v137_v36  ;;  %v259_v57 = vadd.s32 %v257_v26, %v255_v52  ;;  %v279_v59 = vsel %vm278_vm3, 1, %v5435_v8  ;;  %v273_v61 = vshrl.u32 %v268_v9, 16 }
  0x3e   :  { %v281_v62 = vadd.s32 %v279_v59, %v277_v37  ;;  %v5616_v2 = vadd.s32 %v276_v50, %v272_v33  ;;  %v230_v3 = vsel %vm224_vm12, %v227_v28, %v229_v25  ;;  %v361_v35 = vsub.s32 32, %v360_v34 }
  0x3f   :  { %vm139_vm4 = vcmp.lt.s32.totalorder %v138_v55, 0  ;;  %v140_v63 = vsub.s32 0, %v138_v55  ;;  %v260_v0 = vadd.s32 %v259_v57, %v249_v44  ;;  %vm38_vm5 = vcmp.lt.s32.totalorder %v5464_v15, 0 }
  0x40   :  { %v282_v4 = vadd.s32 %v281_v62, %v271_v39  ;;  %v353_v53 = vand.u32 8388607, %v346_v24  ;;  %v130_v9 = vadd.s32 %v5565_v31, %v5579_v48  ;;  %v160_v21 = vsub.s32 4, %v136_v38 }
  0x41   :  { %v141_v5 = vsel %vm139_vm4, %v140_v63, %v138_v55  ;;  %v5621_v6 = vadd.s32 %v260_v0, %v251_v56  ;;  %v284_v22 = vmul.u32 %v5489_v41, %v230_v3  ;;  %v363_v7 = vshll.u32 %v5429_v43, %v360_v34 }
  0x42   :  { %v142_v19 = vclz %v141_v5  ;;  %v283_v58 = vadd.s32 %v282_v4, %v273_v61  ;;  %v366_v23 = vshll.u32 %v5430_v45, %v360_v34  ;;  %v364_v29 = vshrl.u32 %v5430_v45, %v361_v35 }
  0x43   :  { %vm286_vm6 = vc.u32 %v5621_v6, %v5616_v2  ;;  %v367_v30 = vshrl.u32 %v5431_v47, %v361_v35  ;;  %v369_v31 = vshll.u32 %v5431_v47, %v360_v34  ;;  %v370_v48 = vshrl.u32 %v5432_v49, %v361_v35 }
  0x44   :  { %v5296_v27 = vadd.s32 4294967294, %v142_v19  ;;  %v287_v28 = vadd.s32 1, %v283_v58  ;;  %v372_v25 = vshll.u32 %v5432_v49, %v360_v34  ;;  %v373_v41 = vshrl.u32 %v5433_v51, %v361_v35 }
  0x45   :  { %v161_v32 = vsel %vm38_vm5, %v160_v21, %v136_v38  ;;  %v5640_v33 = vshrl.u32 %v358_v1, 5  ;;  %v375_v54 = vshll.u32 %v5433_v51, %v360_v34  ;;  %v376_v46 = vshrl.u32 %v5434_v60, %v361_v35 }
  0x46   :  { %vm5297_vm7 = vcmp.lt.s32.totalorder %v5296_v27, 0  ;;  %v288_v40 = vsel %vm286_vm6, %v287_v28, %v283_v58  ;;  %v365_v39 = vor.u32 %v364_v29, %v363_v7  ;;  %v368_v37 = vor.u32 %v367_v30, %v366_v23 }
  0x47   :  { %v145_v42 = vsel %vm5297_vm7, 0, %v5296_v27  ;;  %v289_v44 = vadd.s32 %v288_v40, %v284_v22  ;;  %v371_v56 = vor.u32 %v370_v48, %v369_v31  ;;  %v374_v57 = vor.u32 %v373_v41, %v372_v25 }
  0x48   :  { %v146_v50 = vsub.s32 32, %v145_v42  ;;  %v147_v36 = vshll.u32 %v138_v55, %v145_v42  ;;  %v150_v52 = vsub.s32 4294967266, %v145_v42  ;;  %vm378_vm8 = vcmp.lt.s32.totalorder %v5640_v33, 1 }
  0x49   :  { %v290_v26 = vadd.s32 536870912, %v289_v44  ;;  %vm381_vm9 = vcmp.lt.s32.totalorder %v5640_v33, 4  ;;  %vm5648_vm10 = vcmp.le.f32.partialorder %v36_v18, 0.7853982  ;;  %v377_v34 = vor.u32 %v376_v46, %v375_v54 }
  0x4a   :  { %v148_v59 = vshrl.u32 %v130_v9, %v146_v50  ;;  %v151_v61 = vadd.s32 127, %v150_v52  ;;  %vm380_vm11 = vcmp.lt.s32.totalorder %v5640_v33, 3  ;;  %v163_v63 = vsel %vm5648_vm10, 0, %v161_v32 }
  0x4b   :  { %v5652_v38 = vshrl.u32 %v290_v26, 30  ;;  %v354_v0 = vor.u32 8388608, %v353_v53  ;;  %vm379_vm12 = vcmp.lt.s32.totalorder %v5640_v33, 2  ;;  %v386_v18 = vsel %vm378_vm8, %v365_v39, %v368_v37 }
  0x4c   :  { %v149_v55 = vor.u32 %v148_v59, %v147_v36  ;;  %v152_v62 = vshll.u32 %v151_v61, 23  ;;  %v387_v4 = vsel %vm381_vm9, %v374_v57, 920167782  ;;  %v390_v21 = vsel %vm378_vm8, %v368_v37, %v371_v56 }
  0x4d   :  { %v292_v3 = vshll.u32 %v5652_v38, 30  ;;  %v388_v19 = vsel %vm380_vm11, %v371_v56, %v387_v4  ;;  %v5668_v53 = vcvt.s32.f32 %v5449_v10  ;;  %v362_v22 = vshrl.u32 %v5429_v43, %v361_v35 }
  0x4e   :  { %v153_v5 = vor.u32 4788187, %v152_v62  ;;  %v156_v9 = vcvt.s32.f32 %v149_v55  ;;  %v391_v7 = vsel %vm381_vm9, %v377_v34, 1326507024  ;;  %v180_v27 = vadd.s32 3, %v163_v63 }
  0x4f   :  { %v5670_v58 = vsub.s32 %v289_v44, %v292_v3  ;;  %v392_v28 = vsel %vm380_vm11, %v374_v57, %v391_v7  ;;  %v5677_v29 = vshll.u32 %v354_v0, 8  ;;  %v389_v10 = vsel %vm379_vm12, %v386_v18, %v388_v19 }
  0x50   :  { %v154_v23 = vand.u32 2147483647, %v153_v5  ;;  %v393_v35 = vsel %vm379_vm12, %v390_v21, %v392_v28  ;;  %v5689_v32 = vmul.f32 %v5454_v11, %v5668_v53  ;;  %v285_v54 = vadd.s32 %v5616_v2, %v5621_v6 }
  0x51   :  { %vm294_vm13 = vcmp.lt.s32.totalorder %v5670_v58, 0  ;;  %v295_v30 = vsub.s32 0, %v5670_v58  ;;  %v395_v48 = vand.u32 65535, %v5677_v29  ;;  %v396_v25 = vshrl.u32 %v5677_v29, 16 }
  0x52   :  { %v157_v31 = vmul.f32 %v156_v9, %v154_v23  ;;  %v397_v41 = vand.u32 65535, %v393_v35  ;;  %v398_v42 = vshrl.u32 %v393_v35, 16  ;;  %v383_v36 = vsel %vm381_vm9, %v371_v56, 2102212464 }
  0x53   :  { %v296_v40 = vsel %vm294_vm13, %v295_v30, %v5670_v58  ;;  %v420_v57 = vshrl.u32 %v389_v10, 16  ;;  %v5700_v61 = vand.u32 3, %v180_v27  ;;  %v382_v55 = vsel %vm378_vm8, %v362_v22, %v365_v39 }
  0x54   :  { %v158_v44 = vxor.u32 2147483648, %v157_v31  ;;  %v297_v46 = vclz %v296_v40  ;;  %v5694_v50 = vmul.u32 %v397_v41, %v396_v25  ;;  %v399_v52 = vmul.u32 %v397_v41, %v395_v48 }
  0x55   :  { %v400_v26 = vmul.u32 %v398_v42, %v395_v48  ;;  %v419_v62 = vand.u32 65535, %v389_v10  ;;  %vm193_vm14 = vcmp.lt.s32.totalorder %v5468_v16, 0  ;;  %v384_v0 = vsel %vm380_vm11, %v368_v37, %v383_v36 }
  0x56   :  { %v159_v59 = vsel %vm38_vm5, %v158_v44, %v157_v31  ;;  %v5299_v34 = vadd.s32 4294967294, %v297_v46  ;;  %v405_v56 = vshll.u32 %v5694_v50, 16  ;;  %v402_v3 = vmul.u32 %v398_v42, %v396_v25 }
  0x57   :  { %v5707_v2 = vsel %vm5648_vm10, %v5464_v15, %v159_v59  ;;  %v403_v6 = vshll.u32 %v400_v26, 16  ;;  %v5715_v1 = vmul.u32 %v420_v57, %v395_v48  ;;  %v5719_v7 = vmul.u32 %v419_v62, %v396_v25 }
  0x58   :  { %v164_v63 = vmul.f32 %v5707_v2, %v5707_v2  ;;  %vm5300_vm15 = vcmp.lt.s32.totalorder %v5299_v34, 0  ;;  %vm5723_vm2 = vcmp.le.f32.partialorder %v191_v20, 0.7853982  ;;  %vm186_vm3 = vcmp.eq.s32.totalorder %v5700_v61, 2 }
  0x59   :  { %v300_v39 = vsel %vm5300_vm15, 0, %v5299_v34  ;;  %vm407_vm0 = vc.u32 %v399_v52, %v403_v6  ;;  %v409_v18 = vadd.s32 %v403_v6, %v399_v52  ;;  %v404_v35 = vshrl.u32 %v400_v26, 16 }
  0x5a   :  { %v165_v4 = vmul.f32 -0.001358992, %v164_v63  ;;  %v172_v5 = vmul.f32 -0.00019511016, %v164_v63  ;;  %v301_v9 = vsub.s32 32, %v300_v39  ;;  %v302_v19 = vshll.u32 %v5670_v58, %v300_v39 }
  0x5b   :  { %v305_v21 = vsub.s32 4294967266, %v300_v39  ;;  %v408_v22 = vsel %vm407_vm0, 1, %v5435_v8  ;;  %vm411_vm1 = vc.u32 %v409_v18, %v405_v56  ;;  %v315_v58 = vsub.s32 4, %v5652_v38 }
  0x5c   :  { %v166_v23 = vadd.f32 0.041655596, %v165_v4  ;;  %v173_v27 = vadd.f32 0.008332121, %v172_v5  ;;  %v303_v28 = vshrl.u32 %v285_v54, %v301_v9  ;;  %v410_v30 = vadd.s32 %v408_v22, %v402_v3 }
  0x5d   :  { %v306_v10 = vadd.s32 127, %v305_v21  ;;  %v421_v31 = vmul.u32 %v419_v62, %v395_v48  ;;  %v412_v44 = vsel %vm411_vm1, 1, %v5435_v8  ;;  %vm183_vm4 = vcmp.eq.s32.totalorder %v5700_v61, 0 }
  0x5e   :  { %v167_v41 = vmul.f32 %v166_v23, %v164_v63  ;;  %v174_v40 = vmul.f32 %v173_v27, %v164_v63  ;;  %v304_v42 = vor.u32 %v303_v28, %v302_v19  ;;  %v414_v46 = vadd.s32 %v412_v44, %v410_v30 }
  0x5f   :  { %v307_v20 = vshll.u32 %v306_v10, 23  ;;  %v424_v36 = vmul.u32 %v420_v57, %v396_v25  ;;  %v425_v54 = vshll.u32 %v5715_v1, 16  ;;  %vm182_vm5 = vcmp.lt.s32.totalorder %v5700_v61, 2 }
  0x60   :  { %v168_v52 = vadd.f32 -0.4999988, %v167_v41  ;;  %v175_v59 = vadd.f32 -0.16666654, %v174_v40  ;;  %v385_v26 = vsel %vm379_vm12, %v382_v55, %v384_v0  ;;  %v427_v48 = vshll.u32 %v5719_v7, 16 }
  0x61   :  { %v308_v34 = vor.u32 4788187, %v307_v20  ;;  %v311_v6 = vcvt.s32.f32 %v304_v42  ;;  %v316_v56 = vsel %vm193_vm14, %v315_v58, %v5652_v38  ;;  %vm429_vm6 = vc.u32 %v421_v31, %v425_v54 }
  0x62   :  { %v169_v62 = vmul.f32 %v168_v52, %v164_v63  ;;  %v176_v25 = vmul.f32 %v175_v59, %v164_v63  ;;  %v430_v57 = vsel %vm429_vm6, 1, %v5435_v8  ;;  %v431_v3 = vadd.s32 %v425_v54, %v421_v31 }
  0x63   :  { %v309_v39 = vand.u32 2147483647, %v308_v34  ;;  %v406_v18 = vshrl.u32 %v5694_v50, 16  ;;  %v415_v4 = vadd.s32 %v414_v46, %v404_v35  ;;  %v432_v33 = vadd.s32 %v430_v57, %v424_v36 }
  0x64   :  { %v170_v55 = vadd.f32 1.0, %v169_v62  ;;  %v177_v0 = vadd.f32 1.0, %v176_v25  ;;  %v426_v5 = vshrl.u32 %v5715_v1, 16  ;;  %vm433_vm7 = vc.u32 %v431_v3, %v427_v48 }
  0x65   :  { %v312_v9 = vmul.f32 %v311_v6, %v309_v39  ;;  %v318_v38 = vsel %vm5723_vm2, 0, %v316_v56  ;;  %v434_v19 = vsel %vm433_vm7, 1, %v5435_v8  ;;  %v504_v63 = vand.u32 2139095040, %v5689_v32 }
  0x66   :  { %v178_v21 = vmul.f32 %v177_v0, %v5707_v2  ;;  %v187_v22 = vxor.u32 2147483648, %v170_v55  ;;  %v428_v50 = vshrl.u32 %v5719_v7, 16  ;;  %v436_v23 = vadd.s32 %v434_v19, %v432_v33 }
  0x67   :  { %v313_v27 = vxor.u32 2147483648, %v312_v9  ;;  %v5748_v28 = vadd.s32 %v415_v4, %v406_v18  ;;  %v5750_v30 = vadd.s32 %v431_v3, %v427_v48  ;;  %v505_v1 = vshrl.u32 %v504_v63, 23 }
  0x68   :  { %v184_v10 = vxor.u32 2147483648, %v178_v21  ;;  %v188_v58 = vsel %vm186_vm3, %v187_v22, %v178_v21  ;;  %v437_v35 = vadd.s32 %v436_v23, %v426_v5  ;;  %v501_v31 = vand.u32 2147483647, %v5689_v32 }
  0x69   :  { %vm179_vm8 = vweird.f32 %v5464_v15  ;;  %v314_v2 = vsel %vm193_vm14, %v313_v27, %v312_v9  ;;  %v439_v7 = vmul.u32 %v5677_v29, %v385_v26  ;;  %v5304_v41 = vadd.s32 4294967169, %v505_v1 }
  0x6a   :  { %v185_v40 = vsel %vm183_vm4, %v170_v55, %v184_v10  ;;  %v317_v42 = vsel %vm5723_vm2, %v5468_v16, %v314_v2  ;;  %v335_v44 = vadd.s32 3, %v318_v38  ;;  %v438_v20 = vadd.s32 %v437_v35, %v428_v50 }
  0x6b   :  { %v189_v46 = vsel %vm182_vm5, %v185_v40, %v188_v58  ;;  %v319_v36 = vmul.f32 %v317_v42, %v317_v42  ;;  %vm441_vm9 = vc.u32 %v5748_v28, %v5750_v30  ;;  %v511_v15 = vadd.s32 1, %v5304_v41 }
  0x6c   :  { %v5768_v54 = vsel %vm179_vm8, nan, %v189_v46  ;;  %v442_v29 = vadd.s32 1, %v438_v20  ;;  %v508_v52 = vand.u32 8388607, %v501_v31  ;;  %v5773_v37 = vand.u32 3, %v335_v44 }
  0x6d   :  { %v320_v59 = vmul.f32 -0.001358992, %v319_v36  ;;  %v327_v26 = vmul.f32 -0.00019511016, %v319_v36  ;;  %vm512_vm10 = vcmp.gt.s32.totalorder %v511_v15, 0  ;;  %656 = vst [vmem:[#allocation3] sm:$0xff] %v5768_v54  ;;  %vm334_vm13 = vweird.f32 %v5468_v16 }
  0x6e   :  { %v443_v61 = vsel %vm441_vm9, %v442_v29, %v438_v20  ;;  %v513_v48 = vsel %vm512_vm10, %v511_v15, 0  ;;  %v509_v39 = vor.u32 8388608, %v508_v52  ;;  %vm338_vm11 = vcmp.eq.s32.totalorder %v5773_v37, 0 }
  0x6f   :  { %v321_v34 = vadd.f32 0.041655596, %v320_v59  ;;  %v328_v6 = vadd.f32 0.008332121, %v327_v26  ;;  %v444_v56 = vadd.s32 %v443_v61, %v439_v7  ;;  %v515_v62 = vand.u32 31, %v513_v48 }
  0x70   :  { %v5776_v18 = vshrl.u32 %v513_v48, 5  ;;  %vm337_vm12 = vcmp.lt.s32.totalorder %v5773_v37, 2  ;;  %vm341_vm14 = vcmp.eq.s32.totalorder %v5773_v37, 2  ;;  %v5793_v58 = vshll.u32 %v509_v39, 8 }
  0x71   :  { %v322_v25 = vmul.f32 %v321_v34, %v319_v36  ;;  %v329_v57 = vmul.f32 %v328_v6, %v319_v36  ;;  %v445_v3 = vadd.s32 536870912, %v444_v56  ;;  %v516_v4 = vsub.s32 32, %v515_v62 }
  0x72   :  { %v518_v33 = vshll.u32 %v5429_v43, %v515_v62  ;;  %v521_v55 = vshll.u32 %v5430_v45, %v515_v62  ;;  %v524_v38 = vshll.u32 %v5431_v47, %v515_v62  ;;  %v527_v22 = vshll.u32 %v5432_v49, %v515_v62 }
  0x73   :  { %v323_v0 = vadd.f32 -0.4999988, %v322_v25  ;;  %v330_v5 = vadd.f32 -0.16666654, %v329_v57  ;;  %v5781_v9 = vshrl.u32 %v445_v3, 30  ;;  %v519_v19 = vshrl.u32 %v5430_v45, %v516_v4 }
  0x74   :  { %v522_v63 = vshrl.u32 %v5431_v47, %v516_v4  ;;  %v525_v21 = vshrl.u32 %v5432_v49, %v516_v4  ;;  %v528_v10 = vshrl.u32 %v5433_v51, %v516_v4  ;;  %vm533_vm15 = vcmp.lt.s32.totalorder %v5776_v18, 1 }
  0x75   :  { %v324_v50 = vmul.f32 %v323_v0, %v319_v36  ;;  %v331_v23 = vmul.f32 %v330_v5, %v319_v36  ;;  %v447_v27 = vshll.u32 %v5781_v9, 30  ;;  %v520_v1 = vor.u32 %v519_v19, %v518_v33 }
  0x76   :  { %v523_v41 = vor.u32 %v522_v63, %v521_v55  ;;  %v526_v40 = vor.u32 %v525_v21, %v524_v38  ;;  %v529_v44 = vor.u32 %v528_v10, %v527_v22  ;;  %v530_v20 = vshll.u32 %v5433_v51, %v515_v62 }
  0x77   :  { %v325_v35 = vadd.f32 1.0, %v324_v50  ;;  %v332_v2 = vadd.f32 1.0, %v331_v23  ;;  %v448_v7 = vsub.s32 %v444_v56, %v447_v27  ;;  %v531_v46 = vshrl.u32 %v5434_v60, %v516_v4 }
  0x78   :  { %vm348_vm1 = vcmp.lt.s32.totalorder %v5472_v17, 0  ;;  %v440_v52 = vadd.s32 %v5750_v30, %v5748_v28  ;;  %vm535_vm2 = vcmp.lt.s32.totalorder %v5776_v18, 3  ;;  %vm536_vm3 = vcmp.lt.s32.totalorder %v5776_v18, 4 }
  0x79   :  { %v333_v36 = vmul.f32 %v332_v2, %v317_v42  ;;  %v342_v15 = vxor.u32 2147483648, %v325_v35  ;;  %vm449_vm0 = vcmp.lt.s32.totalorder %v448_v7, 0  ;;  %v450_v29 = vsub.s32 0, %v448_v7 }
  0x7a   :  { %v668_v59 = vadd.f32 4096.0, %v5456_v12  ;;  %v532_v42 = vor.u32 %v531_v46, %v530_v20  ;;  %vm534_vm4 = vcmp.lt.s32.totalorder %v5776_v18, 2  ;;  %v541_v6 = vsel %vm533_vm15, %v520_v1, %v523_v41 }
  0x7b   :  { %v339_v26 = vxor.u32 2147483648, %v333_v36  ;;  %v343_v61 = vsel %vm341_vm14, %v342_v15, %v333_v36  ;;  %v451_v48 = vsel %vm449_vm0, %v450_v29, %v448_v7  ;;  %v542_v28 = vsel %vm536_vm3, %v529_v44, 920167782 }
  0x7c   :  { %v452_v34 = vclz %v451_v48  ;;  %v543_v56 = vsel %vm535_vm2, %v526_v40, %v542_v28  ;;  %v550_v62 = vand.u32 65535, %v5793_v58  ;;  %v5816_v25 = vadd.f32 4096.0, %v5458_v13 }
  0x7d   :  { %v340_v30 = vsel %vm338_vm11, %v325_v35, %v339_v26  ;;  %v517_v39 = vshrl.u32 %v5429_v43, %v516_v4  ;;  %v551_v33 = vshrl.u32 %v5793_v58, 16  ;;  %v470_v0 = vsub.s32 4, %v5781_v9 }
  0x7e   :  { %v344_v57 = vsel %vm337_vm12, %v340_v30, %v343_v61  ;;  %v5302_v3 = vadd.s32 4294967294, %v452_v34  ;;  %v544_v5 = vsel %vm534_vm4, %v541_v6, %v543_v56  ;;  %v545_v38 = vsel %vm533_vm15, %v523_v41, %v526_v40 }
  0x7f   :  { %v5824_v55 = vsel %vm334_vm13, nan, %v344_v57  ;;  %vm5833_vm5 = vcmp.le.f32.partialorder %v346_v24, 0.7853982  ;;  %v538_v16 = vsel %vm536_vm3, %v526_v40, 2102212464  ;;  %v5843_v19 = vmul.f32 %v668_v59, %v5454_v11 }
  0x80   :  { %vm5303_vm6 = vcmp.lt.s32.totalorder %v5302_v3, 0  ;;  %v546_v4 = vsel %vm536_vm3, %v532_v42, 1326507024  ;;  %657 = vst [vmem:[#allocation3 + $0x8] sm:$0xff] %v5824_v55  ;;  %v574_v24 = vand.u32 65535, %v544_v5  ;;  %v575_v22 = vshrl.u32 %v544_v5, 16 }
  0x81   :  { %v455_v63 = vsel %vm5303_vm6, 0, %v5302_v3  ;;  %v547_v21 = vsel %vm535_vm2, %v529_v44, %v546_v4  ;;  %v471_v35 = vsel %vm348_vm1, %v470_v0, %v5781_v9  ;;  %v537_v2 = vsel %vm533_vm15, %v517_v39, %v520_v1 }
  0x82   :  { %v456_v50 = vsub.s32 32, %v455_v63  ;;  %v457_v23 = vshll.u32 %v448_v7, %v455_v63  ;;  %v460_v27 = vsub.s32 4294967266, %v455_v63  ;;  %v548_v10 = vsel %vm534_vm4, %v545_v38, %v547_v21 }
  0x83   :  { %v552_v40 = vand.u32 65535, %v548_v10  ;;  %v676_v20 = vand.u32 2147483647, %v5843_v19  ;;  %v539_v36 = vsel %vm535_vm2, %v523_v41, %v538_v16  ;;  %v553_v7 = vshrl.u32 %v548_v10, 16 }
  0x84   :  { %v458_v46 = vshrl.u32 %v440_v52, %v456_v50  ;;  %v461_v44 = vadd.s32 127, %v460_v27  ;;  %v576_v29 = vmul.u32 %v574_v24, %v550_v62  ;;  %v577_v59 = vmul.u32 %v575_v22, %v550_v62 }
  0x85   :  { %v556_v15 = vmul.u32 %v552_v40, %v551_v33  ;;  %v578_v26 = vmul.u32 %v574_v24, %v551_v33  ;;  %v554_v42 = vmul.u32 %v552_v40, %v550_v62  ;;  %v555_v9 = vmul.u32 %v553_v7, %v550_v62 }
  0x86   :  { %v459_v61 = vor.u32 %v458_v46, %v457_v23  ;;  %v462_v48 = vshll.u32 %v461_v44, 23  ;;  %v557_v34 = vmul.u32 %v553_v7, %v551_v33  ;;  %v579_v6 = vmul.u32 %v575_v22, %v551_v33 }
  0x87   :  { %v580_v1 = vshll.u32 %v577_v59, 16  ;;  %v679_v28 = vand.u32 2139095040, %v5843_v19  ;;  %v558_v56 = vshll.u32 %v555_v9, 16  ;;  %v560_v57 = vshll.u32 %v556_v15, 16 }
  0x88   :  { %v463_v30 = vor.u32 4788187, %v462_v48  ;;  %v466_v52 = vcvt.s32.f32 %v459_v61  ;;  %v473_v41 = vsel %vm5833_vm5, 0, %v471_v35  ;;  %v540_v3 = vsel %vm534_vm4, %v537_v2, %v539_v36 }
  0x89   :  { %v582_v39 = vshll.u32 %v578_v26, 16  ;;  %vm584_vm7 = vc.u32 %v576_v29, %v580_v1  ;;  %vm562_vm8 = vc.u32 %v554_v42, %v558_v56  ;;  %v564_v62 = vadd.s32 %v558_v56, %v554_v42 }
  0x8a   :  { %v464_v0 = vand.u32 2147483647, %v463_v30  ;;  %v585_v33 = vsel %vm584_vm7, 1, %v5435_v8  ;;  %v559_v5 = vshrl.u32 %v555_v9, 16  ;;  %v563_v38 = vsel %vm562_vm8, 1, %v5435_v8 }
  0x8b   :  { %v586_v16 = vadd.s32 %v580_v1, %v576_v29  ;;  %v587_v4 = vadd.s32 %v585_v33, %v579_v6  ;;  %v565_v21 = vadd.s32 %v563_v38, %v557_v34  ;;  %vm566_vm9 = vc.u32 %v564_v62, %v560_v57 }
  0x8c   :  { %v467_v63 = vmul.f32 %v466_v52, %v464_v0  ;;  %v680_v24 = vshrl.u32 %v679_v28, 23  ;;  %v561_v22 = vshrl.u32 %v556_v15, 16  ;;  %v567_v18 = vsel %vm566_vm9, 1, %v5435_v8 }
  0x8d   :  { %v581_v50 = vshrl.u32 %v577_v59, 16  ;;  %vm588_vm10 = vc.u32 %v586_v16, %v582_v39  ;;  %v569_v27 = vadd.s32 %v567_v18, %v565_v21  ;;  %v490_v2 = vadd.s32 3, %v473_v41 }
  0x8e   :  { %v468_v23 = vxor.u32 2147483648, %v467_v63  ;;  %v589_v10 = vsel %vm588_vm10, 1, %v5435_v8  ;;  %v5307_v35 = vadd.s32 4294967169, %v680_v24  ;;  %v583_v40 = vshrl.u32 %v578_v26, 16 }
  0x8f   :  { %v5866_v46 = vadd.s32 %v586_v16, %v582_v39  ;;  %v591_v44 = vadd.s32 %v589_v10, %v587_v4  ;;  %v570_v7 = vadd.s32 %v569_v27, %v559_v5  ;;  %v683_v15 = vand.u32 8388607, %v676_v20 }
  0x90   :  { %v469_v36 = vsel %vm348_vm1, %v468_v23, %v467_v63  ;;  %v686_v29 = vadd.s32 1, %v5307_v35  ;;  %v5879_v26 = vmul.f32 %v5816_v25, %v5454_v11  ;;  %v5881_v9 = vand.u32 3, %v490_v2 }
  0x91   :  { %v472_v59 = vsel %vm5833_vm5, %v5472_v17, %v469_v36  ;;  %v592_v61 = vadd.s32 %v591_v44, %v581_v50  ;;  %v5875_v42 = vadd.s32 %v570_v7, %v561_v22  ;;  %v594_v6 = vmul.u32 %v5793_v58, %v540_v3 }
  0x92   :  { %v474_v48 = vmul.f32 %v472_v59, %v472_v59  ;;  %vm687_vm11 = vcmp.gt.s32.totalorder %v686_v29, 0  ;;  %v684_v37 = vor.u32 8388608, %v683_v15  ;;  %vm496_vm13 = vcmp.eq.s32.totalorder %v5881_v9, 2 }
  0x93   :  { %v593_v34 = vadd.s32 %v592_v61, %v583_v40  ;;  %v688_v1 = vsel %vm687_vm11, %v686_v29, 0  ;;  %vm596_vm12 = vc.u32 %v5875_v42, %v5866_v46  ;;  %v831_v0 = vand.u32 2147483647, %v5879_v26 }
  0x94   :  { %v475_v28 = vmul.f32 -0.001358992, %v474_v48  ;;  %v482_v30 = vmul.f32 -0.00019511016, %v474_v48  ;;  %v690_v56 = vand.u32 31, %v688_v1  ;;  %v834_v62 = vand.u32 2139095040, %v5879_v26 }
  0x95   :  { %v597_v52 = vadd.s32 1, %v593_v34  ;;  %v5889_v5 = vshll.u32 %v684_v37, 8  ;;  %vm493_vm14 = vcmp.eq.s32.totalorder %v5881_v9, 0  ;;  %vm492_vm15 = vcmp.lt.s32.totalorder %v5881_v9, 2 }
  0x96   :  { %v476_v57 = vadd.f32 0.041655596, %v475_v28  ;;  %v483_v41 = vadd.f32 0.008332121, %v482_v30  ;;  %v691_v39 = vsub.s32 32, %v690_v56  ;;  %v693_v38 = vshll.u32 %v5429_v43, %v690_v56 }
  0x97   :  { %v598_v25 = vsel %vm596_vm12, %v597_v52, %v593_v34  ;;  %v696_v4 = vshll.u32 %v5430_v45, %v690_v56  ;;  %v5897_v18 = vshrl.u32 %v688_v1, 5  ;;  %v699_v50 = vshll.u32 %v5431_v47, %v690_v56 }
  0x98   :  { %v477_v58 = vmul.f32 %v476_v57, %v474_v48  ;;  %v484_v3 = vmul.f32 %v483_v41, %v474_v48  ;;  %v599_v33 = vadd.s32 %v598_v25, %v594_v6  ;;  %v694_v16 = vshrl.u32 %v5430_v45, %v691_v39 }
  0x99   :  { %v697_v63 = vshrl.u32 %v5431_v47, %v691_v39  ;;  %v700_v23 = vshrl.u32 %v5432_v49, %v691_v39  ;;  %v702_v27 = vshll.u32 %v5432_v49, %v690_v56  ;;  %v703_v10 = vshrl.u32 %v5433_v51, %v691_v39 }
  0x9a   :  { %v478_v21 = vadd.f32 -0.4999988, %v477_v58  ;;  %v485_v24 = vadd.f32 -0.16666654, %v484_v3  ;;  %v600_v22 = vadd.s32 536870912, %v599_v33  ;;  %v835_v44 = vshrl.u32 %v834_v62, 23 }
  0x9b   :  { %vm503_vm0 = vcmp.lt.s32.totalorder %v5689_v32, 0  ;;  %v695_v36 = vor.u32 %v694_v16, %v693_v38  ;;  %v698_v7 = vor.u32 %v697_v63, %v696_v4  ;;  %v705_v15 = vshll.u32 %v5433_v51, %v690_v56 }
  0x9c   :  { %v479_v35 = vmul.f32 %v478_v21, %v474_v48  ;;  %v486_v2 = vmul.f32 %v485_v24, %v474_v48  ;;  %v601_v40 = vshrl.u32 %v600_v22, 30  ;;  %v706_v29 = vshrl.u32 %v5434_v60, %v691_v39 }
  0x9d   :  { %v5908_v1 = vand.u32 8388607, %v831_v0  ;;  %v701_v28 = vor.u32 %v700_v23, %v699_v50  ;;  %v704_v30 = vor.u32 %v703_v10, %v702_v27  ;;  %vm708_vm1 = vcmp.lt.s32.totalorder %v5897_v18, 1 }
  0x9e   :  { %v480_v61 = vadd.f32 1.0, %v479_v35  ;;  %v487_v34 = vadd.f32 1.0, %v486_v2  ;;  %v602_v6 = vshll.u32 %v601_v40, 30  ;;  %v707_v48 = vor.u32 %v706_v29, %v705_v15 }
  0x9f   :  { %vm5913_vm2 = vcmp.le.f32.partialorder %v501_v31, 0.7853982  ;;  %v625_v41 = vsub.s32 4, %v601_v40  ;;  %vm709_vm3 = vcmp.lt.s32.totalorder %v5897_v18, 2  ;;  %vm710_vm4 = vcmp.lt.s32.totalorder %v5897_v18, 3 }
  0xa0   :  { %v488_v37 = vmul.f32 %v487_v34, %v472_v59  ;;  %v497_v52 = vxor.u32 2147483648, %v480_v61  ;;  %v603_v57 = vsub.s32 %v599_v33, %v602_v6  ;;  %vm711_vm5 = vcmp.lt.s32.totalorder %v5897_v18, 4 }
  0xa1   :  { %v716_v25 = vsel %vm708_vm1, %v695_v36, %v698_v7  ;;  %vm489_vm7 = vweird.f32 %v5472_v17  ;;  %v717_v58 = vsel %vm711_vm5, %v704_v30, 920167782  ;;  %v721_v3 = vsel %vm711_vm5, %v707_v48, 1326507024 }
  0xa2   :  { %v494_v62 = vxor.u32 2147483648, %v488_v37  ;;  %v498_v59 = vsel %vm496_vm13, %v497_v52, %v488_v37  ;;  %vm604_vm6 = vcmp.lt.s32.totalorder %v603_v57, 0  ;;  %v605_v31 = vsub.s32 0, %v603_v57 }
  0xa3   :  { %v725_v33 = vand.u32 65535, %v5889_v5  ;;  %v718_v4 = vsel %vm710_vm4, %v701_v28, %v717_v58  ;;  %v720_v63 = vsel %vm708_vm1, %v698_v7, %v701_v28  ;;  %v692_v24 = vshrl.u32 %v5429_v43, %v691_v39 }
  0xa4   :  { %v495_v38 = vsel %vm493_vm14, %v480_v61, %v494_v62  ;;  %v606_v16 = vsel %vm604_vm6, %v605_v31, %v603_v57  ;;  %v719_v22 = vsel %vm709_vm3, %v716_v25, %v718_v4  ;;  %v626_v23 = vsel %vm503_vm0, %v625_v41, %v601_v40 }
  0xa5   :  { %v499_v17 = vsel %vm492_vm15, %v495_v38, %v498_v59  ;;  %v607_v21 = vclz %v606_v16  ;;  %v722_v27 = vsel %vm710_vm4, %v704_v30, %v721_v3  ;;  %v5310_v10 = vadd.s32 4294967169, %v835_v44 }
  0xa6   :  { %v500_v50 = vsel %vm489_vm7, nan, %v499_v17  ;;  %v713_v9 = vsel %vm711_vm5, %v701_v28, 2102212464  ;;  %v723_v2 = vsel %vm709_vm3, %v720_v63, %v722_v27  ;;  %v726_v39 = vshrl.u32 %v5889_v5, 16 }
  0xa7   :  { %v5305_v35 = vadd.s32 4294967294, %v607_v21  ;;  %658 = vst [vmem:[#allocation3 + $0x10] sm:$0xff] %v500_v50  ;;  %v727_v15 = vand.u32 65535, %v723_v2  ;;  %v728_v29 = vshrl.u32 %v723_v2, 16  ;;  %v749_v61 = vand.u32 65535, %v719_v22 }
  0xa8   :  { %v750_v34 = vshrl.u32 %v719_v22, 16  ;;  %v595_v40 = vadd.s32 %v5866_v46, %v5875_v42  ;;  %v628_v44 = vsel %vm5913_vm2, 0, %v626_v23  ;;  %v712_v6 = vsel %vm708_vm1, %v692_v24, %v695_v36 }
  0xa9   :  { %vm5306_vm8 = vcmp.lt.s32.totalorder %v5305_v35, 0  ;;  %v714_v30 = vsel %vm710_vm4, %v698_v7, %v713_v9  ;;  %v730_v48 = vmul.u32 %v728_v29, %v725_v33  ;;  %v841_v37 = vadd.s32 1, %v5310_v10 }
  0xaa   :  { %v610_v28 = vsel %vm5306_vm8, 0, %v5305_v35  ;;  %v731_v62 = vmul.u32 %v727_v15, %v726_v39  ;;  %v660_v59 = vand.u32 2147483647, %v5768_v54  ;;  %v729_v46 = vmul.u32 %v727_v15, %v725_v33 }
  0xab   :  { %v611_v52 = vsub.s32 32, %v610_v28  ;;  %v612_v41 = vshll.u32 %v603_v57, %v610_v28  ;;  %v615_v25 = vsub.s32 4294967266, %v610_v28  ;;  %v751_v42 = vmul.u32 %v749_v61, %v725_v33 }
  0xac   :  { %v752_v31 = vmul.u32 %v750_v34, %v725_v33  ;;  %v661_v38 = vand.u32 2147483647, %v5824_v55  ;;  %v5960_v36 = vmul.u32 %v749_v61, %v726_v39  ;;  %v662_v16 = vand.u32 2147483647, %v500_v50 }
  0xad   :  { %v613_v58 = vshrl.u32 %v595_v40, %v611_v52  ;;  %v616_v3 = vadd.s32 127, %v615_v25  ;;  %v664_v4 = vmax.f32 %v660_v59, 0.0  ;;  %v732_v7 = vmul.u32 %v728_v29, %v726_v39 }
  0xae   :  { %v733_v63 = vshll.u32 %v730_v48, 16  ;;  %v665_v57 = vmax.f32 %v661_v38, 0.0  ;;  %v735_v24 = vshll.u32 %v731_v62, 16  ;;  %v666_v22 = vmax.f32 %v662_v16, 0.0 }
  0xaf   :  { %v614_v17 = vor.u32 %v613_v58, %v612_v41  ;;  %v617_v21 = vshll.u32 %v616_v3, 23  ;;  %v734_v23 = vshrl.u32 %v730_v48, 16  ;;  %v754_v9 = vmul.u32 %v750_v34, %v726_v39 }
  0xb0   :  { %vm737_vm9 = vc.u32 %v729_v46, %v733_v63  ;;  %v739_v54 = vadd.s32 %v733_v63, %v729_v46  ;;  %v1305_v10 = vmax.f32 %v664_v4, %v665_v57  ;;  %v755_v50 = vshll.u32 %v752_v31, 16 }
  0xb1   :  { %v618_v27 = vor.u32 4788187, %v617_v21  ;;  %v621_v33 = vcvt.s32.f32 %v614_v17  ;;  %v738_v35 = vsel %vm737_vm9, 1, %v5435_v8  ;;  %v715_v29 = vsel %vm709_vm3, %v712_v6, %v714_v30 }
  0xb2   :  { %v740_v55 = vadd.s32 %v738_v35, %v732_v7  ;;  %vm741_vm10 = vc.u32 %v739_v54, %v735_v24  ;;  %v5963_v15 = vmax.f32 %v666_v22, %v1305_v10  ;;  %v645_v40 = vadd.s32 3, %v628_v44 }
  0xb3   :  { %v619_v2 = vand.u32 2147483647, %v618_v27  ;;  %v742_v61 = vsel %vm741_vm10, 1, %v5435_v8  ;;  %v757_v48 = vshll.u32 %v5960_v36, 16  ;;  %vm759_vm11 = vc.u32 %v751_v42, %v755_v50 }
  0xb4   :  { %v744_v28 = vadd.s32 %v742_v61, %v740_v55  ;;  %v760_v41 = vsel %vm759_vm11, 1, %v5435_v8  ;;  %v761_v25 = vadd.s32 %v755_v50, %v751_v42  ;;  %vm842_vm12 = vcmp.gt.s32.totalorder %v841_v37, 0 }
  0xb5   :  { %v622_v52 = vmul.f32 %v621_v33, %v619_v2  ;;  %v736_v39 = vshrl.u32 %v731_v62, 16  ;;  %v762_v59 = vadd.s32 %v760_v41, %v754_v9  ;;  %v843_v46 = vsel %vm842_vm12, %v841_v37, 0 }
  0xb6   :  { %v745_v34 = vadd.s32 %v744_v28, %v734_v23  ;;  %v756_v3 = vshrl.u32 %v752_v31, 16  ;;  %vm763_vm13 = vc.u32 %v761_v25, %v757_v48  ;;  %v769_v44 = vmul.u32 %v5889_v5, %v715_v29 }
  0xb7   :  { %v623_v58 = vxor.u32 2147483648, %v622_v52  ;;  %v764_v18 = vsel %vm763_vm13, 1, %v5435_v8  ;;  %v839_v6 = vor.u32 8388608, %v5908_v1  ;;  %v845_v30 = vand.u32 31, %v843_v46 }
  0xb8   :  { %v5975_v16 = vand.u32 3, %v645_v40  ;;  %v758_v62 = vshrl.u32 %v5960_v36, 16  ;;  %v766_v42 = vadd.s32 %v764_v18, %v762_v59  ;;  %v5981_v31 = vadd.s32 %v745_v34, %v736_v39 }
  0xb9   :  { %v624_v38 = vsel %vm503_vm0, %v623_v58, %v622_v52  ;;  %v5983_v4 = vadd.s32 %v761_v25, %v757_v48  ;;  %v5985_v5 = vsub.s32 32, %v845_v30  ;;  %v848_v63 = vshll.u32 %v5429_v43, %v845_v30 }
  0xba   :  { %v627_v37 = vsel %vm5913_vm2, %v5689_v32, %v624_v38  ;;  %v767_v7 = vadd.s32 %v766_v42, %v756_v3  ;;  %v851_v17 = vshll.u32 %v5430_v45, %v845_v30  ;;  %v5989_v21 = vshrl.u32 %v843_v46, 5 }
  0xbb   :  { %v629_v1 = vmul.f32 %v627_v37, %v627_v37  ;;  %v849_v36 = vshrl.u32 %v5430_v45, %v5985_v5  ;;  %v852_v56 = vshrl.u32 %v5431_v47, %v5985_v5  ;;  %v854_v57 = vshll.u32 %v5431_v47, %v845_v30 }
  0xbc   :  { %v768_v23 = vadd.s32 %v767_v7, %v758_v62  ;;  %v855_v54 = vshrl.u32 %v5432_v49, %v5985_v5  ;;  %vm771_vm14 = vc.u32 %v5981_v31, %v5983_v4  ;;  %v857_v33 = vshll.u32 %v5432_v49, %v845_v30 }
  0xbd   :  { %v630_v24 = vmul.f32 -0.001358992, %v629_v1  ;;  %v637_v22 = vmul.f32 -0.00019511016, %v629_v1  ;;  %v6000_v27 = vor.u32 %v849_v36, %v848_v63  ;;  %v858_v10 = vshrl.u32 %v5433_v51, %v5985_v5 }
  0xbe   :  { %v772_v9 = vadd.s32 1, %v768_v23  ;;  %v6005_v50 = vor.u32 %v852_v56, %v851_v17  ;;  %v6007_v2 = vor.u32 %v855_v54, %v854_v57  ;;  %v860_v61 = vshll.u32 %v5433_v51, %v845_v30 }
  0xbf   :  { %v631_v35 = vadd.f32 0.041655596, %v630_v24  ;;  %v638_v55 = vadd.f32 0.008332121, %v637_v22  ;;  %v859_v29 = vor.u32 %v858_v10, %v857_v33  ;;  %v861_v40 = vshrl.u32 %v5434_v60, %v5985_v5 }
  0xc0   :  { %v773_v52 = vsel %vm771_vm14, %v772_v9, %v768_v23  ;;  %vm866_vm15 = vcmp.lt.s32.totalorder %v5989_v21, 4  ;;  %vm863_vm0 = vcmp.lt.s32.totalorder %v5989_v21, 1  ;;  %vm865_vm1 = vcmp.lt.s32.totalorder %v5989_v21, 3 }
  0xc1   :  { %v632_v28 = vmul.f32 %v631_v35, %v629_v1  ;;  %v639_v48 = vmul.f32 %v638_v55, %v629_v1  ;;  %v774_v41 = vadd.s32 %v773_v52, %v769_v44  ;;  %v862_v25 = vor.u32 %v861_v40, %v860_v61 }
  0xc2   :  { %v6015_v59 = vshll.u32 %v839_v6, 8  ;;  %v670_v46 = vadd.f32 4096.0, %v5460_v14  ;;  %vm864_vm2 = vcmp.lt.s32.totalorder %v5989_v21, 2  ;;  %v872_v3 = vsel %vm866_vm15, %v859_v29, 920167782 }
  0xc3   :  { %v633_v39 = vadd.f32 -0.4999988, %v632_v28  ;;  %v640_v34 = vadd.f32 -0.16666654, %v639_v48  ;;  %v775_v58 = vadd.s32 536870912, %v774_v41  ;;  %v871_v44 = vsel %vm863_vm0, %v6000_v27, %v6005_v50 }
  0xc4   :  { %v873_v6 = vsel %vm865_vm1, %v6007_v2, %v872_v3  ;;  %vm651_vm3 = vcmp.eq.s32.totalorder %v5975_v16, 2  ;;  %v875_v62 = vsel %vm863_vm0, %v6005_v50, %v6007_v2  ;;  %v876_v42 = vsel %vm866_vm15, %v862_v25, 1326507024 }
  0xc5   :  { %v634_v18 = vmul.f32 %v633_v39, %v629_v1  ;;  %v641_v30 = vmul.f32 %v640_v34, %v629_v1  ;;  %v6029_v38 = vshrl.u32 %v775_v58, 30  ;;  %v877_v63 = vsel %vm865_vm1, %v859_v29, %v876_v42 }
  0xc6   :  { %v880_v17 = vand.u32 65535, %v6015_v59  ;;  %v874_v56 = vsel %vm864_vm2, %v871_v44, %v873_v6  ;;  %v878_v57 = vsel %vm864_vm2, %v875_v62, %v877_v63  ;;  %v881_v24 = vshrl.u32 %v6015_v59, 16 }
  0xc7   :  { %v635_v1 = vadd.f32 1.0, %v634_v18  ;;  %v642_v7 = vadd.f32 1.0, %v641_v30  ;;  %v777_v36 = vshll.u32 %v6029_v38, 30  ;;  %v882_v54 = vand.u32 65535, %v878_v57 }
  0xc8   :  { %v883_v33 = vshrl.u32 %v878_v57, 16  ;;  %vm644_vm4 = vweird.f32 %v5689_v32  ;;  %vm647_vm5 = vcmp.lt.s32.totalorder %v5975_v16, 2  ;;  %vm648_vm6 = vcmp.eq.s32.totalorder %v5975_v16, 0 }
  0xc9   :  { %v643_v22 = vmul.f32 %v642_v7, %v627_v37  ;;  %v652_v23 = vxor.u32 2147483648, %v635_v1  ;;  %v778_v10 = vsub.s32 %v774_v41, %v777_v36  ;;  %v884_v9 = vmul.u32 %v882_v54, %v880_v17 }
  0xca   :  { %v905_v29 = vshrl.u32 %v874_v56, 16  ;;  %v885_v40 = vmul.u32 %v883_v33, %v880_v17  ;;  %v886_v37 = vmul.u32 %v882_v54, %v881_v24  ;;  %v6052_v48 = vmul.f32 %v670_v46, %v5454_v11 }
  0xcb   :  { %v649_v35 = vxor.u32 2147483648, %v643_v22  ;;  %v653_v55 = vsel %vm651_vm3, %v652_v23, %v643_v22  ;;  %vm779_vm7 = vcmp.lt.s32.totalorder %v778_v10, 0  ;;  %v780_v61 = vsub.s32 0, %v778_v10 }
  0xcc   :  { %v904_v52 = vand.u32 65535, %v874_v56  ;;  %v887_v34 = vmul.u32 %v883_v33, %v881_v24  ;;  %v888_v58 = vshll.u32 %v885_v40, 16  ;;  %v890_v3 = vshll.u32 %v886_v37, 16 }
  0xcd   :  { %v650_v28 = vsel %vm648_vm6, %v635_v1, %v649_v35  ;;  %v781_v39 = vsel %vm779_vm7, %v780_v61, %v778_v10  ;;  %v907_v18 = vmul.u32 %v905_v29, %v880_v17  ;;  %v770_v44 = vadd.s32 %v5983_v4, %v5981_v31 }
  0xce   :  { %v654_v25 = vsel %vm647_vm5, %v650_v28, %v653_v55  ;;  %v782_v16 = vclz %v781_v39  ;;  %vm892_vm8 = vc.u32 %v884_v9, %v888_v58  ;;  %v894_v6 = vadd.s32 %v888_v58, %v884_v9 }
  0xcf   :  { %v655_v41 = vsel %vm644_vm4, nan, %v654_v25  ;;  %v847_v62 = vshrl.u32 %v5429_v43, %v5985_v5  ;;  %v893_v42 = vsel %vm892_vm8, 1, %v5435_v8  ;;  %v908_v1 = vmul.u32 %v904_v52, %v881_v24 }
  0xd0   :  { %659 = vst [vmem:[#allocation3 + $0x18] sm:$0xff] %v655_v41  ;;  %v663_v30 = vand.u32 2147483647, %v655_v41  ;;  %v5308_v46 = vadd.s32 4294967294, %v782_v16  ;;  %v895_v32 = vadd.s32 %v893_v42, %v887_v34  ;;  %vm896_vm9 = vc.u32 %v894_v6, %v890_v3 }
  0xd1   :  { %v906_v63 = vmul.u32 %v904_v52, %v880_v17  ;;  %v889_v36 = vshrl.u32 %v885_v40, 16  ;;  %v897_v56 = vsel %vm896_vm9, 1, %v5435_v8  ;;  %v910_v57 = vshll.u32 %v907_v18, 16 }
  0xd2   :  { %v6061_v7 = vmax.f32 %v663_v30, 0.0  ;;  %vm5309_vm10 = vcmp.lt.s32.totalorder %v5308_v46, 0  ;;  %v899_v22 = vadd.s32 %v897_v56, %v895_v32  ;;  %v909_v23 = vmul.u32 %v905_v29, %v881_v24 }
  0xd3   :  { %v785_v4 = vsel %vm5309_vm10, 0, %v5308_v46  ;;  %v912_v35 = vshll.u32 %v908_v1, 16  ;;  %vm678_vm11 = vcmp.lt.s32.totalorder %v5843_v19, 0  ;;  %v800_v55 = vsub.s32 4, %v6029_v38 }
  0xd4   :  { %v1307_v31 = vmax.f32 %v6061_v7, %v5963_v15  ;;  %v786_v5 = vsub.s32 32, %v785_v4  ;;  %v787_v54 = vshll.u32 %v778_v10, %v785_v4  ;;  %v790_v33 = vsub.s32 4294967266, %v785_v4 }
  0xd5   :  { %v867_v17 = vsel %vm863_vm0, %v847_v62, %v6000_v27  ;;  %v868_v9 = vsel %vm866_vm15, %v6007_v2, 2102212464  ;;  %vm914_vm12 = vc.u32 %v906_v63, %v910_v57  ;;  %v916_v24 = vadd.s32 %v910_v57, %v906_v63 }
  0xd6   :  { %v788_v61 = vshrl.u32 %v770_v44, %v786_v5  ;;  %v791_v40 = vadd.s32 127, %v790_v33  ;;  %v891_v29 = vshrl.u32 %v886_v37, 16  ;;  %v900_v10 = vadd.s32 %v899_v22, %v889_v36 }
  0xd7   :  { %v911_v28 = vshrl.u32 %v907_v18, 16  ;;  %v915_v52 = vsel %vm914_vm12, 1, %v5435_v8  ;;  %vm918_vm13 = vc.u32 %v916_v24, %v912_v35  ;;  %v801_v27 = vsel %vm678_vm11, %v800_v55, %v6029_v38 }
  0xd8   :  { %v789_v25 = vor.u32 %v788_v61, %v787_v54  ;;  %v792_v39 = vshll.u32 %v791_v40, 23  ;;  %v917_v34 = vadd.s32 %v915_v52, %v909_v23  ;;  %v869_v2 = vsel %vm865_vm1, %v6005_v50, %v868_v9 }
  0xd9   :  { %v919_v58 = vsel %vm918_vm13, 1, %v5435_v8  ;;  %v989_v37 = vand.u32 2139095040, %v6052_v48  ;;  %v913_v3 = vshrl.u32 %v908_v1, 16  ;;  %v901_v30 = vadd.s32 %v900_v10, %v891_v29 }
  0xda   :  { %v793_v41 = vor.u32 4788187, %v792_v39  ;;  %v796_v16 = vcvt.s32.f32 %v789_v25  ;;  %v921_v18 = vadd.s32 %v919_v58, %v917_v34  ;;  %v920_v44 = vadd.s32 %v916_v24, %v912_v35 }
  0xdb   :  { %v990_v6 = vshrl.u32 %v989_v37, 23  ;;  %vm6085_vm14 = vcmp.le.f32.partialorder %v676_v20, 0.7853982  ;;  %v870_v50 = vsel %vm864_vm2, %v867_v17, %v869_v2  ;;  %v986_v1 = vand.u32 2147483647, %v6052_v48 }
  0xdc   :  { %v794_v38 = vand.u32 2147483647, %v793_v41  ;;  %v922_v62 = vadd.s32 %v921_v18, %v911_v28  ;;  %v803_v42 = vsel %vm6085_vm14, 0, %v801_v27  ;;  %v671_v63 = vadd.f32 4096.0, %v5668_v53 }
  0xdd   :  { %v5313_v32 = vadd.s32 4294967169, %v990_v6  ;;  %v924_v20 = vmul.u32 %v6015_v59, %v870_v50  ;;  %vm926_vm15 = vc.u32 %v901_v30, %v920_v44  ;;  %v820_v22 = vadd.s32 3, %v803_v42 }
  0xde   :  { %v797_v36 = vmul.f32 %v796_v16, %v794_v38  ;;  %v923_v56 = vadd.s32 %v922_v62, %v913_v3  ;;  %v993_v21 = vand.u32 8388607, %v986_v1  ;;  %v6099_v5 = vmul.f32 %v671_v63, %v5454_v11 }
  0xdf   :  { %v996_v57 = vadd.s32 1, %v5313_v32  ;;  %v6110_v61 = vand.u32 3, %v820_v22  ;;  %v6113_v24 = vadd.s32 %v920_v44, %v901_v30  ;;  %vm819_vm4 = vweird.f32 %v5843_v19 }
  0xe0   :  { %v798_v4 = vxor.u32 2147483648, %v797_v36  ;;  %v927_v23 = vadd.s32 1, %v923_v56  ;;  %v1141_v40 = vand.u32 2147483647, %v6099_v5  ;;  %v994_v10 = vor.u32 8388608, %v993_v21 }
  0xe1   :  { %vm997_vm0 = vcmp.gt.s32.totalorder %v996_v57, 0  ;;  %v1144_v34 = vand.u32 2139095040, %v6099_v5  ;;  %vm826_vm1 = vcmp.eq.s32.totalorder %v6110_v61, 2  ;;  %vm823_vm2 = vcmp.eq.s32.totalorder %v6110_v61, 0 }
  0xe2   :  { %v799_v54 = vsel %vm678_vm11, %v798_v4, %v797_v36  ;;  %v928_v33 = vsel %vm926_vm15, %v927_v23, %v923_v56  ;;  %v998_v35 = vsel %vm997_vm0, %v996_v57, 0  ;;  %v6128_v46 = vshll.u32 %v994_v10, 8 }
  0xe3   :  { %v6106_v59 = vsel %vm6085_vm14, %v5843_v19, %v799_v54  ;;  %v929_v55 = vadd.s32 %v928_v33, %v924_v20  ;;  %v1000_v17 = vand.u32 31, %v998_v35  ;;  %v6130_v62 = vshrl.u32 %v998_v35, 5 }
  0xe4   :  { %v804_v9 = vmul.f32 %v6106_v59, %v6106_v59  ;;  %v1145_v42 = vshrl.u32 %v1144_v34, 23  ;;  %vm822_vm3 = vcmp.lt.s32.totalorder %v6110_v61, 2  ;;  %vm833_vm6 = vcmp.lt.s32.totalorder %v5879_v26, 0 }
  0xe5   :  { %v930_v29 = vadd.s32 536870912, %v929_v55  ;;  %v1001_v28 = vsub.s32 32, %v1000_v17  ;;  %v1003_v39 = vshll.u32 %v5429_v43, %v1000_v17  ;;  %v1006_v58 = vshll.u32 %v5430_v45, %v1000_v17 }
  0xe6   :  { %v805_v52 = vmul.f32 -0.001358992, %v804_v9  ;;  %v812_v25 = vmul.f32 -0.00019511016, %v804_v9  ;;  %v1009_v37 = vshll.u32 %v5431_v47, %v1000_v17  ;;  %v1012_v44 = vshll.u32 %v5432_v49, %v1000_v17 }
  0xe7   :  { %v6117_v27 = vshrl.u32 %v930_v29, 30  ;;  %v1004_v2 = vshrl.u32 %v5430_v45, %v1001_v28  ;;  %v1007_v3 = vshrl.u32 %v5431_v47, %v1001_v28  ;;  %v1010_v18 = vshrl.u32 %v5432_v49, %v1001_v28 }
  0xe8   :  { %v806_v41 = vadd.f32 0.041655596, %v805_v52  ;;  %v813_v16 = vadd.f32 0.008332121, %v812_v25  ;;  %v1013_v6 = vshrl.u32 %v5433_v51, %v1001_v28  ;;  %v1015_v36 = vshll.u32 %v5433_v51, %v1000_v17 }
  0xe9   :  { %v932_v30 = vshll.u32 %v6117_v27, 30  ;;  %v1005_v63 = vor.u32 %v1004_v2, %v1003_v39  ;;  %v1016_v56 = vshrl.u32 %v5434_v60, %v1001_v28  ;;  %v1008_v4 = vor.u32 %v1007_v3, %v1006_v58 }
  0xea   :  { %v807_v38 = vmul.f32 %v806_v41, %v804_v9  ;;  %v814_v50 = vmul.f32 %v813_v16, %v804_v9  ;;  %v1011_v22 = vor.u32 %v1010_v18, %v1009_v37  ;;  %v1014_v21 = vor.u32 %v1013_v6, %v1012_v44 }
  0xeb   :  { %v6133_v32 = vsub.s32 %v929_v55, %v932_v30  ;;  %v1017_v54 = vor.u32 %v1016_v56, %v1015_v36  ;;  %vm1018_vm7 = vcmp.lt.s32.totalorder %v6130_v62, 1  ;;  %vm1021_vm8 = vcmp.lt.s32.totalorder %v6130_v62, 4 }
  0xec   :  { %v808_v20 = vadd.f32 -0.4999988, %v807_v38  ;;  %v815_v57 = vadd.f32 -0.16666654, %v814_v50  ;;  %v6146_v17 = vshrl.u32 %v6128_v46, 16  ;;  %v5316_v29 = vadd.s32 4294967169, %v1145_v42 }
  0xed   :  { %vm934_vm5 = vcmp.lt.s32.totalorder %v6133_v32, 0  ;;  %v935_v23 = vsub.s32 0, %v6133_v32  ;;  %v6150_v10 = vand.u32 8388607, %v1141_v40  ;;  %vm1020_vm9 = vcmp.lt.s32.totalorder %v6130_v62, 3 }
  0xee   :  { %v809_v33 = vmul.f32 %v808_v20, %v804_v9  ;;  %v816_v35 = vmul.f32 %v815_v57, %v804_v9  ;;  %vm1019_vm10 = vcmp.lt.s32.totalorder %v6130_v62, 2  ;;  %v1026_v9 = vsel %vm1018_vm7, %v1005_v63, %v1008_v4 }
  0xef   :  { %v936_v55 = vsel %vm934_vm5, %v935_v23, %v6133_v32  ;;  %v1027_v34 = vsel %vm1021_vm8, %v1014_v21, 920167782  ;;  %v1031_v2 = vsel %vm1021_vm8, %v1017_v54, 1326507024  ;;  %vm6163_vm11 = vcmp.le.f32.partialorder %v831_v0, 0.7853982 }
  0xf0   :  { %v810_v52 = vadd.f32 1.0, %v809_v33  ;;  %v817_v25 = vadd.f32 1.0, %v816_v35  ;;  %v937_v39 = vclz %v936_v55  ;;  %v1030_v3 = vsel %vm1018_vm7, %v1008_v4, %v1011_v22 }
  0xf1   :  { %v955_v18 = vsub.s32 4, %v6117_v27  ;;  %v1002_v30 = vshrl.u32 %v5429_v43, %v1001_v28  ;;  %v1028_v44 = vsel %vm1020_vm9, %v1011_v22, %v1027_v34  ;;  %v1151_v38 = vadd.s32 1, %v5316_v29 }
  0xf2   :  { %v818_v58 = vmul.f32 %v817_v25, %v6106_v59  ;;  %v827_v37 = vxor.u32 2147483648, %v810_v52  ;;  %v5311_v16 = vadd.s32 4294967294, %v937_v39  ;;  %v1032_v59 = vsel %vm1020_vm9, %v1014_v21, %v1031_v2 }
  0xf3   :  { %v1023_v42 = vsel %vm1021_vm8, %v1011_v22, 2102212464  ;;  %v1029_v36 = vsel %vm1019_vm10, %v1026_v9, %v1028_v44  ;;  %v1033_v28 = vsel %vm1019_vm10, %v1030_v3, %v1032_v59  ;;  %v956_v22 = vsel %vm833_vm6, %v955_v18, %v6117_v27 }
  0xf4   :  { %v824_v6 = vxor.u32 2147483648, %v818_v58  ;;  %v828_v0 = vsel %vm826_vm1, %v827_v37, %v818_v58  ;;  %vm5312_vm12 = vcmp.lt.s32.totalorder %v5311_v16, 0  ;;  %v1022_v54 = vsel %vm1018_vm7, %v1002_v30, %v1005_v63 }
  0xf5   :  { %v940_v50 = vsel %vm5312_vm12, 0, %v5311_v16  ;;  %v1035_v33 = vand.u32 65535, %v6128_v46  ;;  %v1037_v29 = vand.u32 65535, %v1033_v28  ;;  %v1024_v61 = vsel %vm1020_vm9, %v1008_v4, %v1023_v42 }
  0xf6   :  { %v825_v56 = vsel %vm823_vm2, %v810_v52, %v824_v6  ;;  %v941_v20 = vsub.s32 32, %v940_v50  ;;  %v942_v57 = vshll.u32 %v6133_v32, %v940_v50  ;;  %v945_v23 = vsub.s32 4294967266, %v940_v50 }
  0xf7   :  { %v829_v21 = vsel %vm822_vm3, %v825_v56, %v828_v0  ;;  %v1038_v52 = vshrl.u32 %v1033_v28, 16  ;;  %v1059_v25 = vand.u32 65535, %v1029_v36  ;;  %v1060_v39 = vshrl.u32 %v1029_v36, 16 }
  0xf8   :  { %v6196_v35 = vsel %vm819_vm4, nan, %v829_v21  ;;  %v943_v55 = vshrl.u32 %v6113_v24, %v941_v20  ;;  %v946_v32 = vadd.s32 127, %v945_v23  ;;  %v1041_v9 = vmul.u32 %v1037_v29, %v6146_v17 }
  0xf9   :  { %1297 = vst [vmem:[#allocation3 + $0x20] sm:$0xff] %v6196_v35  ;;  %vm1152_vm13 = vcmp.gt.s32.totalorder %v1151_v38, 0  ;;  %v958_v19 = vsel %vm6163_vm11, 0, %v956_v22  ;;  %v1039_v34 = vmul.u32 %v1037_v29, %v1035_v33  ;;  %v1040_v24 = vmul.u32 %v1038_v52, %v1035_v33 }
  0xfa   :  { %v944_v27 = vor.u32 %v943_v55, %v942_v57  ;;  %v947_v63 = vshll.u32 %v946_v32, 23  ;;  %v1062_v2 = vmul.u32 %v1060_v39, %v1035_v33  ;;  %v6207_v4 = vsel %vm1019_vm10, %v1022_v54, %v1024_v61 }
  0xfb   :  { %v1061_v16 = vmul.u32 %v1059_v25, %v1035_v33  ;;  %v1042_v3 = vmul.u32 %v1038_v52, %v6146_v17  ;;  %v1043_v18 = vshll.u32 %v1040_v24, 16  ;;  %v1045_v30 = vshll.u32 %v1041_v9, 16 }
  0xfc   :  { %v948_v58 = vor.u32 4788187, %v947_v63  ;;  %v951_v37 = vcvt.s32.f32 %v944_v27  ;;  %v1063_v44 = vmul.u32 %v1059_v25, %v6146_v17  ;;  %v1044_v6 = vshrl.u32 %v1040_v24, 16 }
  0xfd   :  { %v1064_v0 = vmul.u32 %v1060_v39, %v6146_v17  ;;  %v1065_v50 = vshll.u32 %v1062_v2, 16  ;;  %vm1047_vm14 = vc.u32 %v1039_v34, %v1043_v18  ;;  %v1049_v42 = vadd.s32 %v1043_v18, %v1039_v34 }
  0xfe   :  { %v949_v59 = vand.u32 2147483647, %v948_v58  ;;  %v1067_v36 = vshll.u32 %v1063_v44, 16  ;;  %v1153_v28 = vsel %vm1152_vm13, %v1151_v38, 0  ;;  %v1048_v56 = vsel %vm1047_vm14, 1, %v5435_v8 }
  0xff   :  { %vm1069_vm15 = vc.u32 %v1061_v16, %v1065_v50  ;;  %v1071_v20 = vadd.s32 %v1065_v50, %v1061_v16  ;;  %v1050_v57 = vadd.s32 %v1048_v56, %v1042_v3  ;;  %vm1051_vm0 = vc.u32 %v1049_v42, %v1045_v30 }
 0x100   :  { %v952_v62 = vmul.f32 %v951_v37, %v949_v59  ;;  %v1066_v23 = vshrl.u32 %v1062_v2, 16  ;;  %v1070_v21 = vsel %vm1069_vm15, 1, %v5435_v8  ;;  %v1052_v54 = vsel %vm1051_vm0, 1, %v5435_v8 }
 0x101   :  { %v1072_v17 = vadd.s32 %v1070_v21, %v1064_v0  ;;  %vm1073_vm1 = vc.u32 %v1071_v20, %v1067_v36  ;;  %v1046_v33 = vshrl.u32 %v1041_v9, 16  ;;  %v1054_v55 = vadd.s32 %v1052_v54, %v1050_v57 }
 0x102   :  { %v953_v22 = vxor.u32 2147483648, %v952_v62  ;;  %v1074_v32 = vsel %vm1073_vm1, 1, %v5435_v8  ;;  %v1155_v38 = vand.u32 31, %v1153_v28  ;;  %v1068_v61 = vshrl.u32 %v1063_v44, 16 }
 0x103   :  { %v1076_v52 = vadd.s32 %v1074_v32, %v1072_v17  ;;  %v6219_v25 = vshrl.u32 %v1153_v28, 5  ;;  %v1055_v27 = vadd.s32 %v1054_v55, %v1044_v6  ;;  %v6224_v63 = vadd.s32 %v1071_v20, %v1067_v36 }
 0x104   :  { %v954_v29 = vsel %vm833_vm6, %v953_v22, %v952_v62  ;;  %v6226_v34 = vsub.s32 32, %v1155_v38  ;;  %v975_v24 = vadd.s32 3, %v958_v19  ;;  %v1158_v58 = vshll.u32 %v5429_v43, %v1155_v38 }
 0x105   :  { %v957_v39 = vsel %vm6163_vm11, %v5879_v26, %v954_v29  ;;  %v1077_v2 = vadd.s32 %v1076_v52, %v1066_v23  ;;  %v6229_v37 = vadd.s32 %v1055_v27, %v1046_v33  ;;  %v1079_v16 = vmul.u32 %v6128_v46, %v6207_v4 }
 0x106   :  { %v959_v9 = vmul.f32 %v957_v39, %v957_v39  ;;  %v1159_v3 = vshrl.u32 %v5430_v45, %v6226_v34  ;;  %v1161_v41 = vshll.u32 %v5430_v45, %v1155_v38  ;;  %v1162_v59 = vshrl.u32 %v5431_v47, %v6226_v34 }
 0x107   :  { %v1078_v44 = vadd.s32 %v1077_v2, %v1068_v61  ;;  %vm1081_vm2 = vc.u32 %v6229_v37, %v6224_v63  ;;  %v1164_v19 = vshll.u32 %v5431_v47, %v1155_v38  ;;  %v1165_v6 = vshrl.u32 %v5432_v49, %v6226_v34 }
 0x108   :  { %v960_v18 = vmul.f32 -0.001358992, %v959_v9  ;;  %v967_v30 = vmul.f32 -0.00019511016, %v959_v9  ;;  %vm1173_vm3 = vcmp.lt.s32.totalorder %v6219_v25, 1  ;;  %v6244_v50 = vor.u32 %v1159_v3, %v1158_v58 }
 0x109   :  { %v1082_v0 = vadd.s32 1, %v1078_v44  ;;  %v1167_v42 = vshll.u32 %v5432_v49, %v1155_v38  ;;  %v1168_v36 = vshrl.u32 %v5433_v51, %v6226_v34  ;;  %v1170_v28 = vshll.u32 %v5433_v51, %v1155_v38 }
 0x10a   :  { %v961_v46 = vadd.f32 0.041655596, %v960_v18  ;;  %v968_v4 = vadd.f32 0.008332121, %v967_v30  ;;  %v1171_v62 = vshrl.u32 %v5434_v60, %v6226_v34  ;;  %v6252_v23 = vor.u32 %v1162_v59, %v1161_v41 }
 0x10b   :  { %v1083_v57 = vsel %vm1081_vm2, %v1082_v0, %v1078_v44  ;;  %v6254_v22 = vor.u32 %v1165_v6, %v1164_v19  ;;  %v1169_v54 = vor.u32 %v1168_v36, %v1167_v42  ;;  %vm1176_vm4 = vcmp.lt.s32.totalorder %v6219_v25, 4 }
 0x10c   :  { %v962_v56 = vmul.f32 %v961_v46, %v959_v9  ;;  %v969_v20 = vmul.f32 %v968_v4, %v959_v9  ;;  %v1084_v21 = vadd.s32 %v1083_v57, %v1079_v16  ;;  %v1172_v17 = vor.u32 %v1171_v62, %v1170_v28 }
 0x10d   :  { %v976_v32 = vand.u32 3, %v975_v24  ;;  %v1149_v38 = vor.u32 8388608, %v6150_v10  ;;  %vm1175_vm5 = vcmp.lt.s32.totalorder %v6219_v25, 3  ;;  %vm1174_vm6 = vcmp.lt.s32.totalorder %v6219_v25, 2 }
 0x10e   :  { %v963_v33 = vadd.f32 -0.4999988, %v962_v56  ;;  %v970_v55 = vadd.f32 -0.16666654, %v969_v20  ;;  %v1085_v29 = vadd.s32 536870912, %v1084_v21  ;;  %v1181_v27 = vsel %vm1173_vm3, %v6244_v50, %v6252_v23 }
 0x10f   :  { %v1182_v58 = vsel %vm1176_vm4, %v1169_v54, 920167782  ;;  %v1185_v10 = vsel %vm1173_vm3, %v6252_v23, %v6254_v22  ;;  %vm981_vm7 = vcmp.eq.s32.totalorder %v976_v32, 2  ;;  %v6284_v6 = vshll.u32 %v1149_v38, 8 }
 0x110   :  { %v964_v61 = vmul.f32 %v963_v33, %v959_v9  ;;  %v971_v52 = vmul.f32 %v970_v55, %v959_v9  ;;  %v6264_v2 = vshrl.u32 %v1085_v29, 30  ;;  %v1186_v9 = vsel %vm1176_vm4, %v1172_v17, 1326507024 }
 0x111   :  { %v1183_v3 = vsel %vm1175_vm5, %v6254_v22, %v1182_v58  ;;  %v1187_v41 = vsel %vm1175_vm5, %v1169_v54, %v1186_v9  ;;  %vm974_vm8 = vweird.f32 %v5879_v26  ;;  %vm978_vm9 = vcmp.eq.s32.totalorder %v976_v32, 0 }
 0x112   :  { %v965_v24 = vadd.f32 1.0, %v964_v61  ;;  %v972_v16 = vadd.f32 1.0, %v971_v52  ;;  %v1087_v18 = vshll.u32 %v6264_v2, 30  ;;  %v1184_v30 = vsel %vm1174_vm6, %v1181_v27, %v1183_v3 }
 0x113   :  { %v1188_v44 = vsel %vm1174_vm6, %v1185_v10, %v1187_v41  ;;  %vm977_vm10 = vcmp.lt.s32.totalorder %v976_v32, 2  ;;  %v1190_v28 = vand.u32 65535, %v6284_v6  ;;  %v1191_v56 = vshrl.u32 %v6284_v6, 16 }
 0x114   :  { %v973_v59 = vmul.f32 %v972_v16, %v957_v39  ;;  %v982_v19 = vxor.u32 2147483648, %v965_v24  ;;  %v1192_v46 = vand.u32 65535, %v1188_v44  ;;  %v1088_v4 = vsub.s32 %v1084_v21, %v1087_v18 }
 0x115   :  { %v1193_v0 = vshrl.u32 %v1188_v44, 16  ;;  %v1215_v20 = vshrl.u32 %v1184_v30, 16  ;;  %v1214_v29 = vand.u32 65535, %v1184_v30  ;;  %v1080_v9 = vadd.s32 %v6224_v63, %v6229_v37 }
 0x116   :  { %v979_v42 = vxor.u32 2147483648, %v973_v59  ;;  %v983_v36 = vsel %vm981_vm7, %v982_v19, %v973_v59  ;;  %vm1089_vm11 = vcmp.lt.s32.totalorder %v1088_v4, 0  ;;  %v1090_v62 = vsub.s32 0, %v1088_v4 }
 0x117   :  { %v1194_v57 = vmul.u32 %v1192_v46, %v1190_v28  ;;  %v1195_v54 = vmul.u32 %v1193_v0, %v1190_v28  ;;  %v1196_v55 = vmul.u32 %v1192_v46, %v1191_v56  ;;  %v1197_v38 = vmul.u32 %v1193_v0, %v1191_v56 }
 0x118   :  { %v980_v39 = vsel %vm978_vm9, %v965_v24, %v979_v42  ;;  %v1091_v33 = vsel %vm1089_vm11, %v1090_v62, %v1088_v4  ;;  %v1217_v27 = vmul.u32 %v1215_v20, %v1190_v28  ;;  %v1216_v16 = vmul.u32 %v1214_v29, %v1190_v28 }
 0x119   :  { %v984_v17 = vsel %vm977_vm10, %v980_v39, %v983_v36  ;;  %v1092_v32 = vclz %v1091_v33  ;;  %v1198_v61 = vshll.u32 %v1195_v54, 16  ;;  %v1200_v52 = vshll.u32 %v1196_v55, 16 }
 0x11a   :  { %v6291_v21 = vsel %vm974_vm8, nan, %v984_v17  ;;  %v1218_v3 = vmul.u32 %v1214_v29, %v1191_v56  ;;  %vm988_vm13 = vcmp.lt.s32.totalorder %v6052_v48, 0  ;;  %v1220_v41 = vshll.u32 %v1217_v27, 16 }
 0x11b   :  { %1298 = vst [vmem:[#allocation3 + $0x28] sm:$0xff] %v6291_v21  ;;  %v5314_v58 = vadd.s32 4294967294, %v1092_v32  ;;  %vm1202_vm12 = vc.u32 %v1194_v57, %v1198_v61  ;;  %v1204_v10 = vadd.s32 %v1198_v61, %v1194_v57  ;;  %v1199_v30 = vshrl.u32 %v1195_v54, 16 }
 0x11c   :  { %v1203_v24 = vsel %vm1202_vm12, 1, %v5435_v8  ;;  %v1219_v59 = vmul.u32 %v1215_v20, %v1191_v56  ;;  %vm6301_vm0 = vcmp.le.f32.partialorder %v986_v1, 0.7853982  ;;  %v1157_v37 = vshrl.u32 %v5429_v43, %v6226_v34 }
 0x11d   :  { %vm5315_vm14 = vcmp.lt.s32.totalorder %v5314_v58, 0  ;;  %v1205_v26 = vadd.s32 %v1203_v24, %v1197_v38  ;;  %vm1206_vm15 = vc.u32 %v1204_v10, %v1200_v52  ;;  %v1178_v36 = vsel %vm1176_vm4, %v6254_v22, 2102212464 }
 0x11e   :  { %v1095_v18 = vsel %vm5315_vm14, 0, %v5314_v58  ;;  %v1207_v44 = vsel %vm1206_vm15, 1, %v5435_v8  ;;  %v1222_v28 = vshll.u32 %v1218_v3, 16  ;;  %vm1224_vm1 = vc.u32 %v1216_v16, %v1220_v41 }
 0x11f   :  { %v1096_v19 = vsub.s32 32, %v1095_v18  ;;  %v1097_v46 = vshll.u32 %v1088_v4, %v1095_v18  ;;  %v1100_v0 = vsub.s32 4294967266, %v1095_v18  ;;  %v1209_v42 = vadd.s32 %v1207_v44, %v1205_v26 }
 0x120   :  { %v1110_v4 = vsub.s32 4, %v6264_v2  ;;  %v1201_v20 = vshrl.u32 %v1196_v55, 16  ;;  %v1225_v39 = vsel %vm1224_vm1, 1, %v5435_v8  ;;  %v1226_v1 = vadd.s32 %v1220_v41, %v1216_v16 }
 0x121   :  { %v1098_v62 = vshrl.u32 %v1080_v9, %v1096_v19  ;;  %v1101_v56 = vadd.s32 127, %v1100_v0  ;;  %v1309_v57 = vadd.f32 8192.0, %v5456_v12  ;;  %v1210_v33 = vadd.s32 %v1209_v42, %v1199_v30 }
 0x122   :  { %v1227_v34 = vadd.s32 %v1225_v39, %v1219_v59  ;;  %v1177_v22 = vsel %vm1173_vm3, %v1157_v37, %v6244_v50  ;;  %v1221_v29 = vshrl.u32 %v1217_v27, 16  ;;  %vm1228_vm2 = vc.u32 %v1226_v1, %v1222_v28 }
 0x123   :  { %v1099_v54 = vor.u32 %v1098_v62, %v1097_v46  ;;  %v1102_v17 = vshll.u32 %v1101_v56, 23  ;;  %v1310_v32 = vadd.f32 8192.0, %v5458_v13  ;;  %v1179_v55 = vsel %vm1175_vm5, %v6252_v23, %v1178_v36 }
 0x124   :  { %v1229_v52 = vsel %vm1228_vm2, 1, %v5435_v8  ;;  %v1111_v58 = vsel %vm988_vm13, %v1110_v4, %v6264_v2  ;;  %v1223_v10 = vshrl.u32 %v1218_v3, 16  ;;  %v6325_v50 = vmul.f32 %v1309_v57, %v5454_v11 }
 0x125   :  { %v1103_v38 = vor.u32 4788187, %v1102_v17  ;;  %v1106_v61 = vcvt.s32.f32 %v1099_v54  ;;  %v1231_v9 = vadd.s32 %v1229_v52, %v1227_v34  ;;  %v1211_v24 = vadd.s32 %v1210_v33, %v1201_v20 }
 0x126   :  { %v1230_v16 = vadd.s32 %v1226_v1, %v1222_v28  ;;  %v6328_v26 = vmul.f32 %v1310_v32, %v5454_v11  ;;  %v1180_v23 = vsel %vm1174_vm6, %v1177_v22, %v1179_v55  ;;  %v1317_v18 = vand.u32 2147483647, %v6325_v50 }
 0x127   :  { %v1104_v27 = vand.u32 2147483647, %v1103_v38  ;;  %v1232_v41 = vadd.s32 %v1231_v9, %v1221_v29  ;;  %v1320_v30 = vand.u32 2139095040, %v6325_v50  ;;  %v1113_v3 = vsel %vm6301_vm0, 0, %v1111_v58 }
 0x128   :  { %v1475_v44 = vand.u32 2139095040, %v6328_v26  ;;  %v1324_v46 = vand.u32 8388607, %v1317_v18  ;;  %v1234_v25 = vmul.u32 %v6284_v6, %v1180_v23  ;;  %vm1236_vm3 = vc.u32 %v1211_v24, %v1230_v16 }
 0x129   :  { %v1107_v2 = vmul.f32 %v1106_v61, %v1104_v27  ;;  %v1233_v59 = vadd.s32 %v1232_v41, %v1223_v10  ;;  %v1321_v19 = vshrl.u32 %v1320_v30, 23  ;;  %v1130_v42 = vadd.s32 3, %v1113_v3 }
 0x12a   :  { %v1476_v28 = vshrl.u32 %v1475_v44, 23  ;;  %v1472_v56 = vand.u32 2147483647, %v6328_v26  ;;  %v1325_v39 = vor.u32 8388608, %v1324_v46  ;;  %v1235_v23 = vadd.s32 %v1230_v16, %v1211_v24 }
 0x12b   :  { %v1108_v0 = vxor.u32 2147483648, %v1107_v2  ;;  %v1237_v37 = vadd.s32 1, %v1233_v59  ;;  %v5319_v36 = vadd.s32 4294967169, %v1321_v19  ;;  %v6346_v6 = vand.u32 3, %v1130_v42 }
 0x12c   :  { %v5322_v17 = vadd.s32 4294967169, %v1476_v28  ;;  %v6348_v38 = vshll.u32 %v1325_v39, 8  ;;  %v6352_v63 = vand.u32 8388607, %v1472_v56  ;;  %vm1129_vm8 = vweird.f32 %v6052_v48 }
 0x12d   :  { %v1109_v62 = vsel %vm988_vm13, %v1108_v0, %v1107_v2  ;;  %v1238_v20 = vsel %vm1236_vm3, %v1237_v37, %v1233_v59  ;;  %v1327_v1 = vadd.s32 1, %v5319_v36  ;;  %vm1136_vm5 = vcmp.eq.s32.totalorder %v6346_v6, 2 }
 0x12e   :  { %v1112_v4 = vsel %vm6301_vm0, %v6052_v48, %v1109_v62  ;;  %v1239_v54 = vadd.s32 %v1238_v20, %v1234_v25  ;;  %v1482_v58 = vadd.s32 1, %v5322_v17  ;;  %vm1133_vm6 = vcmp.eq.s32.totalorder %v6346_v6, 0 }
 0x12f   :  { %v1114_v57 = vmul.f32 %v1112_v4, %v1112_v4  ;;  %vm1328_vm4 = vcmp.gt.s32.totalorder %v1327_v1, 0  ;;  %v6362_v30 = vand.u32 65535, %v6348_v38  ;;  %v1480_v2 = vor.u32 8388608, %v6352_v63 }
 0x130   :  { %v1240_v22 = vadd.s32 536870912, %v1239_v54  ;;  %v1329_v29 = vsel %vm1328_vm4, %v1327_v1, 0  ;;  %vm1132_vm7 = vcmp.lt.s32.totalorder %v6346_v6, 2  ;;  %vm1483_vm9 = vcmp.gt.s32.totalorder %v1482_v58, 0 }
 0x131   :  { %v1115_v33 = vmul.f32 -0.001358992, %v1114_v57  ;;  %v1122_v34 = vmul.f32 -0.00019511016, %v1114_v57  ;;  %v1331_v32 = vand.u32 31, %v1329_v29  ;;  %v6368_v19 = vshrl.u32 %v1329_v29, 5 }
 0x132   :  { %v6354_v52 = vshrl.u32 %v1240_v22, 30  ;;  %vm1143_vm11 = vcmp.lt.s32.totalorder %v6099_v5, 0  ;;  %vm6402_vm13 = vcmp.le.f32.partialorder %v1141_v40, 0.7853982 }
 0x133   :  { %v1116_v61 = vadd.f32 0.041655596, %v1115_v33  ;;  %v1123_v55 = vadd.f32 0.008332121, %v1122_v34  ;;  %v6359_v41 = vsub.s32 32, %v1331_v32  ;;  %v1334_v46 = vshll.u32 %v5429_v43, %v1331_v32 }
 0x134   :  { %v1242_v27 = vshll.u32 %v6354_v52, 30  ;;  %v1337_v24 = vshll.u32 %v5430_v45, %v1331_v32  ;;  %v1340_v16 = vshll.u32 %v5431_v47, %v1331_v32  ;;  %v1343_v28 = vshll.u32 %v5432_v49, %v1331_v32 }
 0x135   :  { %v1117_v10 = vmul.f32 %v1116_v61, %v1114_v57  ;;  %v1124_v9 = vmul.f32 %v1123_v55, %v1114_v57  ;;  %v1335_v37 = vshrl.u32 %v5430_v45, %v6359_v41  ;;  %v1338_v36 = vshrl.u32 %v5431_v47, %v6359_v41 }
 0x136   :  { %v6366_v59 = vsub.s32 %v1239_v54, %v1242_v27  ;;  %v1344_v62 = vshrl.u32 %v5433_v51, %v6359_v41  ;;  %v1346_v17 = vshll.u32 %v5433_v51, %v1331_v32  ;;  %v1347_v33 = vshrl.u32 %v5434_v60, %v6359_v41 }
 0x137   :  { %v1118_v3 = vadd.f32 -0.4999988, %v1117_v10  ;;  %v1125_v44 = vadd.f32 -0.16666654, %v1124_v9  ;;  %v6391_v34 = vshrl.u32 %v6348_v38, 16  ;;  %v6394_v55 = vsel %vm1483_vm9, %v1482_v58, 0 }
 0x138   :  { %vm1244_vm10 = vcmp.lt.s32.totalorder %v6366_v59, 0  ;;  %v1245_v42 = vsub.s32 0, %v6366_v59  ;;  %v1345_v61 = vor.u32 %v1344_v62, %v1343_v28  ;;  %v1265_v9 = vsub.s32 4, %v6354_v52 }
 0x139   :  { %v1119_v0 = vmul.f32 %v1118_v3, %v1114_v57  ;;  %v1126_v25 = vmul.f32 %v1125_v44, %v1114_v57  ;;  %v1341_v57 = vshrl.u32 %v5432_v49, %v6359_v41  ;;  %v1336_v27 = vor.u32 %v1335_v37, %v1334_v46 }
 0x13a   :  { %v1246_v1 = vsel %vm1244_vm10, %v1245_v42, %v6366_v59  ;;  %vm1352_vm12 = vcmp.lt.s32.totalorder %v6368_v19, 4  ;;  %v1339_v44 = vor.u32 %v1338_v36, %v1337_v24  ;;  %v1348_v58 = vor.u32 %v1347_v33, %v1346_v17 }
 0x13b   :  { %v1120_v20 = vadd.f32 1.0, %v1119_v0  ;;  %v1127_v39 = vadd.f32 1.0, %v1126_v25  ;;  %v1247_v54 = vclz %v1246_v1  ;;  %v1342_v0 = vor.u32 %v1341_v57, %v1340_v16 }
 0x13c   :  { %vm1349_vm15 = vcmp.lt.s32.totalorder %v6368_v19, 1  ;;  %vm1351_vm0 = vcmp.lt.s32.totalorder %v6368_v19, 3  ;;  %v1301_v42 = vand.u32 2147483647, %v6196_v35  ;;  %v1358_v24 = vsel %vm1352_vm12, %v1345_v61, 920167782 }
 0x13d   :  { %v1128_v22 = vmul.f32 %v1127_v39, %v1112_v4  ;;  %v1137_v29 = vxor.u32 2147483648, %v1120_v20  ;;  %v5317_v10 = vadd.s32 4294967294, %v1247_v54  ;;  %v1266_v62 = vsel %vm1143_vm11, %v1265_v9, %v6354_v52 }
 0x13e   :  { %vm1350_vm1 = vcmp.lt.s32.totalorder %v6368_v19, 2  ;;  %v1357_v35 = vsel %vm1349_vm15, %v1336_v27, %v1339_v44  ;;  %v1308_v6 = vmax.f32 %v1301_v42, %v1307_v31  ;;  %v1359_v1 = vsel %vm1351_vm0, %v1342_v0, %v1358_v24 }
 0x13f   :  { %v1134_v3 = vxor.u32 2147483648, %v1128_v22  ;;  %v1138_v32 = vsel %vm1136_vm5, %v1137_v29, %v1128_v22  ;;  %vm5318_vm14 = vcmp.lt.s32.totalorder %v5317_v10, 0  ;;  %v1361_v52 = vsel %vm1349_vm15, %v1339_v44, %v1342_v0 }
 0x140   :  { %v1250_v25 = vsel %vm5318_vm14, 0, %v5317_v10  ;;  %v1362_v57 = vsel %vm1352_vm12, %v1348_v58, 1326507024  ;;  %v1360_v33 = vsel %vm1350_vm1, %v1357_v35, %v1359_v1  ;;  %v1333_v15 = vshrl.u32 %v5429_v43, %v6359_v41 }
 0x141   :  { %v1135_v46 = vsel %vm1133_vm6, %v1120_v20, %v1134_v3  ;;  %v1251_v16 = vsub.s32 32, %v1250_v25  ;;  %v1252_v37 = vshll.u32 %v6366_v59, %v1250_v25  ;;  %v1255_v36 = vsub.s32 4294967266, %v1250_v25 }
 0x142   :  { %v1139_v40 = vsel %vm1132_vm7, %v1135_v46, %v1138_v32  ;;  %v1302_v59 = vand.u32 2147483647, %v6291_v21  ;;  %v1363_v7 = vsel %vm1351_vm0, %v1345_v61, %v1362_v57  ;;  %v1390_v31 = vand.u32 65535, %v1360_v33 }
 0x143   :  { %v1140_v28 = vsel %vm1129_vm8, nan, %v1139_v40  ;;  %v1253_v20 = vshrl.u32 %v1235_v23, %v1251_v16  ;;  %v1256_v39 = vadd.s32 127, %v1255_v36  ;;  %v1391_v21 = vshrl.u32 %v1360_v33, 16 }
 0x144   :  { %1299 = vst [vmem:[#allocation3 + $0x30] sm:$0xff] %v1140_v28  ;;  %v1303_v48 = vand.u32 2147483647, %v1140_v28  ;;  %v1946_v17 = vmax.f32 %v1302_v59, %v1308_v6  ;;  %v1364_v9 = vsel %vm1350_vm1, %v1361_v52, %v1363_v7  ;;  %v1268_v3 = vsel %vm6402_vm13, 0, %v1266_v62 }
 0x145   :  { %v1254_v54 = vor.u32 %v1253_v20, %v1252_v37  ;;  %v1257_v23 = vshll.u32 %v1256_v39, 23  ;;  %v1354_v32 = vsel %vm1352_vm12, %v1342_v0, 2102212464  ;;  %v1368_v58 = vand.u32 65535, %v1364_v9 }
 0x146   :  { %v6440_v10 = vmax.f32 %v1303_v48, %v1946_v17  ;;  %v1369_v41 = vshrl.u32 %v1364_v9, 16  ;;  %v1392_v61 = vmul.u32 %v1390_v31, %v6362_v30  ;;  %v1393_v25 = vmul.u32 %v1391_v21, %v6362_v30 }
 0x147   :  { %v1258_v22 = vor.u32 4788187, %v1257_v23  ;;  %v1261_v29 = vcvt.s32.f32 %v1254_v54  ;;  %v1394_v42 = vmul.u32 %v1390_v31, %v6391_v34  ;;  %v1353_v24 = vsel %vm1349_vm15, %v1333_v15, %v1336_v27 }
 0x148   :  { %v1370_v40 = vmul.u32 %v1368_v58, %v6362_v30  ;;  %v1371_v16 = vmul.u32 %v1369_v41, %v6362_v30  ;;  %v1372_v37 = vmul.u32 %v1368_v58, %v6391_v34  ;;  %v1285_v0 = vadd.s32 3, %v1268_v3 }
 0x149   :  { %v1259_v46 = vand.u32 2147483647, %v1258_v22  ;;  %v1395_v28 = vmul.u32 %v1391_v21, %v6391_v34  ;;  %v1396_v62 = vshll.u32 %v1393_v25, 16  ;;  %v1355_v35 = vsel %vm1351_vm0, %v1339_v44, %v1354_v32 }
 0x14a   :  { %v1373_v20 = vmul.u32 %v1369_v41, %v6391_v34  ;;  %v1374_v39 = vshll.u32 %v1371_v16, 16  ;;  %v1376_v6 = vshll.u32 %v1372_v37, 16  ;;  %v1397_v27 = vshrl.u32 %v1393_v25, 16 }
 0x14b   :  { %v1262_v36 = vmul.f32 %v1261_v29, %v1259_v46  ;;  %v1398_v48 = vshll.u32 %v1394_v42, 16  ;;  %vm1400_vm2 = vc.u32 %v1392_v61, %v1396_v62  ;;  %v1402_v52 = vadd.s32 %v1396_v62, %v1392_v61 }
 0x14c   :  { %vm1378_vm3 = vc.u32 %v1370_v40, %v1374_v39  ;;  %v1380_v30 = vadd.s32 %v1374_v39, %v1370_v40  ;;  %v1401_v1 = vsel %vm1400_vm2, 1, %v5435_v8  ;;  %v1375_v54 = vshrl.u32 %v1371_v16, 16 }
 0x14d   :  { %v1263_v59 = vxor.u32 2147483648, %v1262_v36  ;;  %v1379_v23 = vsel %vm1378_vm3, 1, %v5435_v8  ;;  %v1403_v44 = vadd.s32 %v1401_v1, %v1395_v28  ;;  %vm1404_vm5 = vc.u32 %v1402_v52, %v1398_v48 }
 0x14e   :  { %v1381_v17 = vadd.s32 %v1379_v23, %v1373_v20  ;;  %vm1382_vm4 = vc.u32 %v1380_v30, %v1376_v6  ;;  %v1377_v15 = vshrl.u32 %v1372_v37, 16  ;;  %v1405_v31 = vsel %vm1404_vm5, 1, %v5435_v8 }
 0x14f   :  { %v1264_v57 = vsel %vm1143_vm11, %v1263_v59, %v1262_v36  ;;  %v1383_v7 = vsel %vm1382_vm4, 1, %v5435_v8  ;;  %v1399_v22 = vshrl.u32 %v1394_v42, 16  ;;  %v1407_v29 = vadd.s32 %v1405_v31, %v1403_v44 }
 0x150   :  { %v1267_v34 = vsel %vm6402_vm13, %v6099_v5, %v1264_v57  ;;  %v1385_v21 = vadd.s32 %v1383_v7, %v1381_v17  ;;  %v1486_v9 = vand.u32 31, %v6394_v55  ;;  %v6470_v58 = vand.u32 3, %v1285_v0 }
 0x151   :  { %v1269_v33 = vmul.f32 %v1267_v34, %v1267_v34  ;;  %v1356_v4 = vsel %vm1350_vm1, %v1353_v24, %v1355_v35  ;;  %v6474_v46 = vadd.s32 %v1402_v52, %v1398_v48  ;;  %v1408_v61 = vadd.s32 %v1407_v29, %v1397_v27 }
 0x152   :  { %v1386_v41 = vadd.s32 %v1385_v21, %v1375_v54  ;;  %v6476_v25 = vsub.s32 32, %v1486_v9  ;;  %v6479_v42 = vshrl.u32 %v6394_v55, 5  ;;  %v1489_v37 = vshll.u32 %v5429_v43, %v1486_v9 }
 0x153   :  { %v1270_v3 = vmul.f32 -0.001358992, %v1269_v33  ;;  %v1277_v32 = vmul.f32 -0.00019511016, %v1269_v33  ;;  %v1409_v0 = vadd.s32 %v1408_v61, %v1399_v22  ;;  %v1410_v28 = vmul.u32 %v6348_v38, %v1356_v4 }
 0x154   :  { %v6482_v36 = vadd.s32 %v1386_v41, %v1377_v15  ;;  %v1490_v19 = vshrl.u32 %v5430_v45, %v6476_v25  ;;  %v1492_v35 = vshll.u32 %v5430_v45, %v1486_v9  ;;  %v1495_v20 = vshll.u32 %v5431_v47, %v1486_v9 }
 0x155   :  { %v1271_v40 = vadd.f32 0.041655596, %v1270_v3  ;;  %v1278_v16 = vadd.f32 0.008332121, %v1277_v32  ;;  %v1413_v55 = vadd.s32 1, %v1409_v0  ;;  %v1493_v39 = vshrl.u32 %v5431_v47, %v6476_v25 }
 0x156   :  { %vm1412_vm6 = vc.u32 %v6482_v36, %v6474_v46  ;;  %v1496_v6 = vshrl.u32 %v5432_v49, %v6476_v25  ;;  %v6495_v27 = vor.u32 %v1490_v19, %v1489_v37  ;;  %vm1504_vm7 = vcmp.lt.s32.totalorder %v6479_v42, 1 }
 0x157   :  { %v1272_v24 = vmul.f32 %v1271_v40, %v1269_v33  ;;  %v1279_v62 = vmul.f32 %v1278_v16, %v1269_v33  ;;  %v1414_v48 = vsel %vm1412_vm6, %v1413_v55, %v1409_v0  ;;  %v1498_v30 = vshll.u32 %v5432_v49, %v1486_v9 }
 0x158   :  { %v1499_v1 = vshrl.u32 %v5433_v51, %v6476_v25  ;;  %v1501_v52 = vshll.u32 %v5433_v51, %v1486_v9  ;;  %v1415_v23 = vadd.s32 %v1414_v48, %v1410_v28  ;;  %v1502_v44 = vshrl.u32 %v5434_v60, %v6476_v25 }
 0x159   :  { %v1273_v38 = vadd.f32 -0.4999988, %v1272_v24  ;;  %v1280_v59 = vadd.f32 -0.16666654, %v1279_v62  ;;  %v6504_v17 = vor.u32 %v1493_v39, %v1492_v35  ;;  %v1497_v15 = vor.u32 %v1496_v6, %v1495_v20 }
 0x15a   :  { %v1500_v7 = vor.u32 %v1499_v1, %v1498_v30  ;;  %vm1507_vm8 = vcmp.lt.s32.totalorder %v6479_v42, 4  ;;  %v1416_v22 = vadd.s32 536870912, %v1415_v23  ;;  %vm1506_vm9 = vcmp.lt.s32.totalorder %v6479_v42, 3 }
 0x15b   :  { %v1274_v57 = vmul.f32 %v1273_v38, %v1269_v33  ;;  %v1281_v54 = vmul.f32 %v1280_v59, %v1269_v33  ;;  %vm1288_vm10 = vcmp.eq.s32.totalorder %v6470_v58, 0  ;;  %vm1291_vm11 = vcmp.eq.s32.totalorder %v6470_v58, 2 }
 0x15c   :  { %v1503_v33 = vor.u32 %v1502_v44, %v1501_v52  ;;  %v1513_v29 = vsel %vm1507_vm8, %v1500_v7, 920167782  ;;  %v6512_v32 = vshrl.u32 %v1416_v22, 30  ;;  %vm1505_vm12 = vcmp.lt.s32.totalorder %v6479_v42, 2 }
 0x15d   :  { %v1275_v31 = vadd.f32 1.0, %v1274_v57  ;;  %v1282_v21 = vadd.f32 1.0, %v1281_v54  ;;  %v1512_v4 = vsel %vm1504_vm7, %v6495_v27, %v6504_v17  ;;  %v1514_v41 = vsel %vm1506_vm9, %v1497_v15, %v1513_v29 }
 0x15e   :  { %v1516_v61 = vsel %vm1504_vm7, %v6504_v17, %v1497_v15  ;;  %vm1287_vm13 = vcmp.lt.s32.totalorder %v6470_v58, 2  ;;  %v1418_v37 = vshll.u32 %v6512_v32, 30  ;;  %vm1284_vm14 = vweird.f32 %v6099_v5 }
 0x15f   :  { %v1283_v9 = vmul.f32 %v1282_v21, %v1267_v34  ;;  %v1292_v3 = vxor.u32 2147483648, %v1275_v31  ;;  %v1517_v34 = vsel %vm1507_vm8, %v1503_v33, 1326507024  ;;  %v6533_v28 = vshll.u32 %v1480_v2, 8 }
 0x160   :  { %v1518_v0 = vsel %vm1506_vm9, %v1500_v7, %v1517_v34  ;;  %v1419_v24 = vsub.s32 %v1415_v23, %v1418_v37  ;;  %v1515_v62 = vsel %vm1505_vm12, %v1512_v4, %v1514_v41  ;;  %v1311_v58 = vadd.f32 8192.0, %v5460_v14 }
 0x161   :  { %v1289_v40 = vxor.u32 2147483648, %v1283_v9  ;;  %v1293_v16 = vsel %vm1291_vm11, %v1292_v3, %v1283_v9  ;;  %v1519_v35 = vsel %vm1505_vm12, %v1516_v61, %v1518_v0  ;;  %v1521_v5 = vand.u32 65535, %v6533_v28 }
 0x162   :  { %v1522_v55 = vshrl.u32 %v6533_v28, 16  ;;  %vm1420_vm15 = vcmp.lt.s32.totalorder %v1419_v24, 0  ;;  %v1421_v63 = vsub.s32 0, %v1419_v24  ;;  %v1523_v2 = vand.u32 65535, %v1519_v35 }
 0x163   :  { %v1290_v19 = vsel %vm1288_vm10, %v1275_v31, %v1289_v40  ;;  %v1524_v38 = vshrl.u32 %v1519_v35, 16  ;;  %v1546_v59 = vshrl.u32 %v1515_v62, 16  ;;  %v1488_v30 = vshrl.u32 %v5429_v43, %v6476_v25 }
 0x164   :  { %v1294_v20 = vsel %vm1287_vm13, %v1290_v19, %v1293_v16  ;;  %v1422_v48 = vsel %vm1420_vm15, %v1421_v63, %v1419_v24  ;;  %v1527_v1 = vmul.u32 %v1523_v2, %v1522_v55  ;;  %v1545_v52 = vand.u32 65535, %v1515_v62 }
 0x165   :  { %v1295_v39 = vsel %vm1284_vm14, nan, %v1294_v20  ;;  %v1423_v54 = vclz %v1422_v48  ;;  %v1525_v23 = vmul.u32 %v1523_v2, %v1521_v5  ;;  %v1526_v44 = vmul.u32 %v1524_v38, %v1521_v5 }
 0x166   :  { %1300 = vst [vmem:[#allocation3 + $0x38] sm:$0xff] %v1295_v39  ;;  %v1304_v6 = vand.u32 2147483647, %v1295_v39  ;;  %v1509_v7 = vsel %vm1507_vm8, %v1497_v15, 2102212464  ;;  %v1548_v31 = vmul.u32 %v1546_v59, %v1521_v5  ;;  %v6552_v21 = vmul.f32 %v1311_v58, %v5454_v11 }
 0x167   :  { %v5320_v22 = vadd.s32 4294967294, %v1423_v54  ;;  %v1528_v33 = vmul.u32 %v1524_v38, %v1522_v55  ;;  %v1529_v29 = vshll.u32 %v1526_v44, 16  ;;  %v1411_v25 = vadd.s32 %v6474_v46, %v6482_v36 }
 0x168   :  { %v6547_v57 = vmax.f32 %v1304_v6, %v6440_v10  ;;  %v1508_v10 = vsel %vm1504_vm7, %v1488_v30, %v6495_v27  ;;  %v1531_v9 = vshll.u32 %v1527_v1, 16  ;;  %v1549_v3 = vmul.u32 %v1545_v52, %v1522_v55 }
 0x169   :  { %vm1319_vm0 = vcmp.lt.s32.totalorder %v6325_v50, 0  ;;  %vm5321_vm1 = vcmp.lt.s32.totalorder %v5320_v22, 0  ;;  %v1510_v15 = vsel %vm1506_vm9, %v6504_v17, %v1509_v7  ;;  %vm1533_vm2 = vc.u32 %v1525_v23, %v1529_v29 }
 0x16a   :  { %v1535_v4 = vadd.s32 %v1529_v29, %v1525_v23  ;;  %v1426_v41 = vsel %vm5321_vm1, 0, %v5320_v22  ;;  %v1534_v61 = vsel %vm1533_vm2, 1, %v5435_v8  ;;  %v1547_v34 = vmul.u32 %v1545_v52, %v1521_v5 }
 0x16b   :  { %v1551_v46 = vshll.u32 %v1548_v31, 16  ;;  %v1427_v36 = vsub.s32 32, %v1426_v41  ;;  %v1428_v40 = vshll.u32 %v1419_v24, %v1426_v41  ;;  %v1431_v16 = vsub.s32 4294967266, %v1426_v41 }
 0x16c   :  { %v1536_v27 = vadd.s32 %v1534_v61, %v1528_v33  ;;  %v1530_v37 = vshrl.u32 %v1526_v44, 16  ;;  %vm1537_vm3 = vc.u32 %v1535_v4, %v1531_v9  ;;  %v1550_v0 = vmul.u32 %v1546_v59, %v1522_v55 }
 0x16d   :  { %v1553_v19 = vshll.u32 %v1549_v3, 16  ;;  %v1429_v62 = vshrl.u32 %v1411_v25, %v1427_v36  ;;  %v1432_v35 = vadd.s32 127, %v1431_v16  ;;  %v1441_v20 = vsub.s32 4, %v6512_v32 }
 0x16e   :  { %v1538_v17 = vsel %vm1537_vm3, 1, %v5435_v8  ;;  %vm1555_vm4 = vc.u32 %v1547_v34, %v1551_v46  ;;  %v1557_v63 = vadd.s32 %v1551_v46, %v1547_v34  ;;  %v1630_v5 = vand.u32 2139095040, %v6552_v21 }
 0x16f   :  { %v1540_v39 = vadd.s32 %v1538_v17, %v1536_v27  ;;  %v1430_v2 = vor.u32 %v1429_v62, %v1428_v40  ;;  %v1433_v6 = vshll.u32 %v1432_v35, 23  ;;  %v1532_v24 = vshrl.u32 %v1527_v1, 16 }
 0x170   :  { %v1556_v58 = vsel %vm1555_vm4, 1, %v5435_v8  ;;  %v1552_v48 = vshrl.u32 %v1548_v31, 16  ;;  %vm1559_vm5 = vc.u32 %v1557_v63, %v1553_v19  ;;  %v1631_v54 = vshrl.u32 %v1630_v5, 23 }
 0x171   :  { %v1541_v38 = vadd.s32 %v1540_v39, %v1530_v37  ;;  %v1558_v55 = vadd.s32 %v1556_v58, %v1550_v0  ;;  %v1434_v59 = vor.u32 4788187, %v1433_v6  ;;  %v1437_v30 = vcvt.s32.f32 %v1430_v2 }
 0x172   :  { %v1560_v52 = vsel %vm1559_vm5, 1, %v5435_v8  ;;  %v1312_v23 = vadd.f32 8192.0, %v5668_v53  ;;  %v1442_v44 = vsel %vm1319_vm0, %v1441_v20, %v6512_v32  ;;  %v1554_v7 = vshrl.u32 %v1549_v3, 16 }
 0x173   :  { %v1562_v22 = vadd.s32 %v1560_v52, %v1558_v55  ;;  %v1435_v1 = vand.u32 2147483647, %v1434_v59  ;;  %v6573_v33 = vadd.s32 %v1541_v38, %v1532_v24  ;;  %v6575_v29 = vadd.s32 %v1557_v63, %v1553_v19 }
 0x174   :  { %v5325_v31 = vadd.s32 4294967169, %v1631_v54  ;;  %vm6579_vm6 = vcmp.le.f32.partialorder %v1317_v18, 0.7853982  ;;  %v1511_v9 = vsel %vm1505_vm12, %v1508_v10, %v1510_v15  ;;  %v1627_v32 = vand.u32 2147483647, %v6552_v21 }
 0x175   :  { %v1563_v4 = vadd.s32 %v1562_v22, %v1552_v48  ;;  %v1438_v3 = vmul.f32 %v1437_v30, %v1435_v1  ;;  %v1444_v41 = vsel %vm6579_vm6, 0, %v1442_v44  ;;  %v6589_v34 = vmul.f32 %v1312_v23, %v5454_v11 }
 0x176   :  { %v1637_v61 = vadd.s32 1, %v5325_v31  ;;  %v1565_v18 = vmul.u32 %v6533_v28, %v1511_v9  ;;  %vm1567_vm7 = vc.u32 %v6573_v33, %v6575_v29  ;;  %v1461_v42 = vadd.s32 3, %v1444_v41 }
 0x177   :  { %v1564_v46 = vadd.s32 %v1563_v4, %v1554_v7  ;;  %v1439_v36 = vxor.u32 2147483648, %v1438_v3  ;;  %v1634_v15 = vand.u32 8388607, %v1627_v32  ;;  %v1785_v39 = vand.u32 2139095040, %v6589_v34 }
 0x178   :  { %vm1638_vm8 = vcmp.gt.s32.totalorder %v1637_v61, 0  ;;  %v6603_v35 = vand.u32 3, %v1461_v42  ;;  %vm1460_vm12 = vweird.f32 %v6325_v50  ;;  %vm1474_vm1 = vcmp.lt.s32.totalorder %v6328_v26, 0 }
 0x179   :  { %v1568_v10 = vadd.s32 1, %v1564_v46  ;;  %v1639_v40 = vsel %vm1638_vm8, %v1637_v61, 0  ;;  %v1440_v16 = vsel %vm1319_vm0, %v1439_v36, %v1438_v3  ;;  %v1635_v20 = vor.u32 8388608, %v1634_v15 }
 0x17a   :  { %v1641_v27 = vand.u32 31, %v1639_v40  ;;  %v1443_v37 = vsel %vm6579_vm6, %v6325_v50, %v1440_v16  ;;  %vm1467_vm9 = vcmp.eq.s32.totalorder %v6603_v35, 2  ;;  %v6619_v54 = vshrl.u32 %v1639_v40, 5 }
 0x17b   :  { %v1569_v0 = vsel %vm1567_vm7, %v1568_v10, %v1564_v46  ;;  %v1445_v28 = vmul.f32 %v1443_v37, %v1443_v37  ;;  %v6627_v25 = vshll.u32 %v1635_v20, 8  ;;  %vm1464_vm10 = vcmp.eq.s32.totalorder %v6603_v35, 0 }
 0x17c   :  { %v1570_v19 = vadd.s32 %v1569_v0, %v1565_v18  ;;  %v6601_v62 = vsub.s32 32, %v1641_v27  ;;  %v1644_v17 = vshll.u32 %v5429_v43, %v1641_v27  ;;  %v1647_v6 = vshll.u32 %v5430_v45, %v1641_v27 }
 0x17d   :  { %v1446_v63 = vmul.f32 -0.001358992, %v1445_v28  ;;  %v1453_v5 = vmul.f32 -0.00019511016, %v1445_v28  ;;  %v1650_v38 = vshll.u32 %v5431_v47, %v1641_v27  ;;  %v1653_v48 = vshll.u32 %v5432_v49, %v1641_v27 }
 0x17e   :  { %v1571_v2 = vadd.s32 536870912, %v1570_v19  ;;  %v1645_v24 = vshrl.u32 %v5430_v45, %v6601_v62  ;;  %v1648_v58 = vshrl.u32 %v5431_v47, %v6601_v62  ;;  %v1651_v52 = vshrl.u32 %v5432_v49, %v6601_v62 }
 0x17f   :  { %v1447_v55 = vadd.f32 0.041655596, %v1446_v63  ;;  %v1454_v59 = vadd.f32 0.008332121, %v1453_v5  ;;  %v1654_v23 = vshrl.u32 %v5433_v51, %v6601_v62  ;;  %v1656_v44 = vshll.u32 %v5433_v51, %v1641_v27 }
 0x180   :  { %v6614_v30 = vshrl.u32 %v1571_v2, 30  ;;  %v1657_v7 = vshrl.u32 %v5434_v60, %v6601_v62  ;;  %v6630_v9 = vor.u32 %v1645_v24, %v1644_v17  ;;  %v6632_v4 = vor.u32 %v1648_v58, %v1647_v6 }
 0x181   :  { %v1448_v22 = vmul.f32 %v1447_v55, %v1445_v28  ;;  %v1455_v1 = vmul.f32 %v1454_v59, %v1445_v28  ;;  %v1655_v3 = vor.u32 %v1654_v23, %v1653_v48  ;;  %v1786_v41 = vshrl.u32 %v1785_v39, 23 }
 0x182   :  { %v1573_v31 = vshll.u32 %v6614_v30, 30  ;;  %vm1463_vm11 = vcmp.lt.s32.totalorder %v6603_v35, 2  ;;  %v1652_v18 = vor.u32 %v1651_v52, %v1650_v38  ;;  %v1658_v42 = vor.u32 %v1657_v7, %v1656_v44 }
 0x183   :  { %v1449_v61 = vadd.f32 -0.4999988, %v1448_v22  ;;  %v1456_v46 = vadd.f32 -0.16666654, %v1455_v1  ;;  %vm1659_vm13 = vcmp.lt.s32.totalorder %v6619_v54, 1  ;;  %vm1661_vm14 = vcmp.lt.s32.totalorder %v6619_v54, 3 }
 0x184   :  { %v6635_v36 = vsub.s32 %v1570_v19, %v1573_v31  ;;  %vm1662_vm15 = vcmp.lt.s32.totalorder %v6619_v54, 4  ;;  %v1566_v16 = vadd.s32 %v6575_v29, %v6573_v33  ;;  %vm1660_vm2 = vcmp.lt.s32.totalorder %v6619_v54, 2 }
 0x185   :  { %v1450_v10 = vmul.f32 %v1449_v61, %v1445_v28  ;;  %v1457_v15 = vmul.f32 %v1456_v46, %v1445_v28  ;;  %v1668_v27 = vsel %vm1662_vm15, %v1655_v3, 920167782  ;;  %v1782_v0 = vand.u32 2147483647, %v6589_v34 }
 0x186   :  { %vm1575_vm0 = vcmp.lt.s32.totalorder %v6635_v36, 0  ;;  %v1576_v40 = vsub.s32 0, %v6635_v36  ;;  %v1667_v17 = vsel %vm1659_vm13, %v6630_v9, %v6632_v4  ;;  %v1669_v33 = vsel %vm1661_vm14, %v1652_v18, %v1668_v27 }
 0x187   :  { %v1451_v19 = vadd.f32 1.0, %v1450_v10  ;;  %v1458_v20 = vadd.f32 1.0, %v1457_v15  ;;  %v1671_v29 = vsel %vm1659_vm13, %v6632_v4, %v1652_v18  ;;  %v5328_v63 = vadd.s32 4294967169, %v1786_v41 }
 0x188   :  { %v1577_v28 = vsel %vm1575_vm0, %v1576_v40, %v6635_v36  ;;  %v1672_v6 = vsel %vm1662_vm15, %v1658_v42, 1326507024  ;;  %v1676_v24 = vand.u32 65535, %v6627_v25  ;;  %v1670_v38 = vsel %vm1660_vm2, %v1667_v17, %v1669_v33 }
 0x189   :  { %v1578_v39 = vclz %v1577_v28  ;;  %v1459_v5 = vmul.f32 %v1458_v20, %v1443_v37  ;;  %v1468_v2 = vxor.u32 2147483648, %v1451_v19  ;;  %v1673_v48 = vsel %vm1661_vm14, %v1655_v3, %v1672_v6 }
 0x18a   :  { %v1677_v55 = vshrl.u32 %v6627_v25, 16  ;;  %v1596_v37 = vsub.s32 4, %v6614_v30  ;;  %v1674_v23 = vsel %vm1660_vm2, %v1671_v29, %v1673_v48  ;;  %v1792_v22 = vadd.s32 1, %v5328_v63 }
 0x18b   :  { %v5323_v58 = vadd.s32 4294967294, %v1578_v39  ;;  %v1465_v59 = vxor.u32 2147483648, %v1459_v5  ;;  %v1469_v52 = vsel %vm1467_vm9, %v1468_v2, %v1459_v5  ;;  %v1678_v44 = vand.u32 65535, %v1674_v23 }
 0x18c   :  { %v1679_v7 = vshrl.u32 %v1674_v23, 16  ;;  %v1700_v3 = vand.u32 65535, %v1670_v38  ;;  %v1701_v41 = vshrl.u32 %v1670_v38, 16  ;;  %v1597_v40 = vsel %vm1474_vm1, %v1596_v37, %v6614_v30 }
 0x18d   :  { %vm5324_vm3 = vcmp.lt.s32.totalorder %v5323_v58, 0  ;;  %v1466_v1 = vsel %vm1464_vm10, %v1451_v19, %v1465_v59  ;;  %v1643_v27 = vshrl.u32 %v5429_v43, %v6601_v62  ;;  %v1664_v19 = vsel %vm1662_vm15, %v1652_v18, 2102212464 }
 0x18e   :  { %v1581_v31 = vsel %vm5324_vm3, 0, %v5323_v58  ;;  %v1470_v61 = vsel %vm1463_vm11, %v1466_v1, %v1469_v52  ;;  %v1680_v28 = vmul.u32 %v1678_v44, %v1676_v24  ;;  %v1681_v17 = vmul.u32 %v1679_v7, %v1676_v24 }
 0x18f   :  { %v1582_v46 = vsub.s32 32, %v1581_v31  ;;  %v1583_v42 = vshll.u32 %v6635_v36, %v1581_v31  ;;  %v1586_v10 = vsub.s32 4294967266, %v1581_v31  ;;  %v6680_v15 = vsel %vm1460_vm12, nan, %v1470_v61 }
 0x190   :  { %1938 = vst [vmem:[#allocation3 + $0x40] sm:$0xff] %v6680_v15  ;;  %vm6692_vm4 = vcmp.le.f32.partialorder %v1472_v56, 0.7853982  ;;  %v1682_v36 = vmul.u32 %v1678_v44, %v1677_v55  ;;  %v1702_v30 = vmul.u32 %v1700_v3, %v1676_v24  ;;  %v1703_v39 = vmul.u32 %v1701_v41, %v1676_v24 }
 0x191   :  { %v1584_v35 = vshrl.u32 %v1566_v16, %v1582_v46  ;;  %v1587_v20 = vadd.s32 127, %v1586_v10  ;;  %v1704_v33 = vmul.u32 %v1700_v3, %v1677_v55  ;;  %v1683_v63 = vmul.u32 %v1679_v7, %v1677_v55 }
 0x192   :  { %v1684_v18 = vshll.u32 %v1681_v17, 16  ;;  %v1663_v16 = vsel %vm1659_vm13, %v1643_v27, %v6630_v9  ;;  %v1686_v5 = vshll.u32 %v1682_v36, 16  ;;  %v1705_v2 = vmul.u32 %v1701_v41, %v1677_v55 }
 0x193   :  { %v1585_v62 = vor.u32 %v1584_v35, %v1583_v42  ;;  %v1588_v29 = vshll.u32 %v1587_v20, 23  ;;  %v1706_v6 = vshll.u32 %v1703_v39, 16  ;;  %v1665_v24 = vsel %vm1661_vm14, %v6632_v4, %v1664_v19 }
 0x194   :  { %vm1688_vm5 = vc.u32 %v1680_v28, %v1684_v18  ;;  %v1690_v38 = vadd.s32 %v1684_v18, %v1680_v28  ;;  %v1685_v48 = vshrl.u32 %v1681_v17, 16  ;;  %v1708_v52 = vshll.u32 %v1704_v33, 16 }
 0x195   :  { %v1589_v58 = vor.u32 4788187, %v1588_v29  ;;  %v1592_v56 = vcvt.s32.f32 %v1585_v62  ;;  %v1689_v59 = vsel %vm1688_vm5, 1, %v5435_v8  ;;  %vm1710_vm7 = vc.u32 %v1702_v30, %v1706_v6 }
 0x196   :  { %v1691_v23 = vadd.s32 %v1689_v59, %v1683_v63  ;;  %vm1692_vm6 = vc.u32 %v1690_v38, %v1686_v5  ;;  %v1687_v9 = vshrl.u32 %v1682_v36, 16  ;;  %v1711_v44 = vsel %vm1710_vm7, 1, %v5435_v8 }
 0x197   :  { %v1590_v37 = vand.u32 2147483647, %v1589_v58  ;;  %v1693_v55 = vsel %vm1692_vm6, 1, %v5435_v8  ;;  %v1712_v7 = vadd.s32 %v1706_v6, %v1702_v30  ;;  %v1713_v3 = vadd.s32 %v1711_v44, %v1705_v2 }
 0x198   :  { %v1695_v31 = vadd.s32 %v1693_v55, %v1691_v23  ;;  %vm1793_vm8 = vcmp.gt.s32.totalorder %v1792_v22, 0  ;;  %v1707_v41 = vshrl.u32 %v1703_v39, 16  ;;  %v1789_v4 = vand.u32 8388607, %v1782_v0 }
 0x199   :  { %v1593_v1 = vmul.f32 %v1592_v56, %v1590_v37  ;;  %vm1714_vm9 = vc.u32 %v1712_v7, %v1708_v52  ;;  %v1794_v61 = vsel %vm1793_vm8, %v1792_v22, 0  ;;  %v1599_v42 = vsel %vm6692_vm4, 0, %v1597_v40 }
 0x19a   :  { %v1696_v10 = vadd.s32 %v1695_v31, %v1685_v48  ;;  %v1715_v27 = vsel %vm1714_vm9, 1, %v5435_v8  ;;  %v1666_v19 = vsel %vm1660_vm2, %v1663_v16, %v1665_v24  ;;  %v1709_v35 = vshrl.u32 %v1704_v33, 16 }
 0x19b   :  { %v1594_v46 = vxor.u32 2147483648, %v1593_v1  ;;  %v1717_v20 = vadd.s32 %v1715_v27, %v1713_v3  ;;  %v1796_v28 = vand.u32 31, %v1794_v61  ;;  %v6716_v30 = vadd.s32 %v1712_v7, %v1708_v52 }
 0x19c   :  { %v6714_v36 = vadd.s32 %v1696_v10, %v1687_v9  ;;  %v1790_v39 = vor.u32 8388608, %v1789_v4  ;;  %v1616_v29 = vadd.s32 3, %v1599_v42  ;;  %v1720_v33 = vmul.u32 %v6627_v25, %v1666_v19 }
 0x19d   :  { %v1595_v17 = vsel %vm1474_vm1, %v1594_v46, %v1593_v1  ;;  %v1718_v40 = vadd.s32 %v1717_v20, %v1707_v41  ;;  %v6721_v62 = vsub.s32 32, %v1796_v28  ;;  %v1799_v63 = vshll.u32 %v5429_v43, %v1796_v28 }
 0x19e   :  { %v1598_v22 = vsel %vm6692_vm4, %v6328_v26, %v1595_v17  ;;  %v1802_v5 = vshll.u32 %v5430_v45, %v1796_v28  ;;  %vm1722_vm10 = vc.u32 %v6714_v36, %v6716_v30  ;;  %v6732_v58 = vshrl.u32 %v1794_v61, 5 }
 0x19f   :  { %v1600_v54 = vmul.f32 %v1598_v22, %v1598_v22  ;;  %v1719_v18 = vadd.s32 %v1718_v40, %v1709_v35  ;;  %v1800_v16 = vshrl.u32 %v5430_v45, %v6721_v62  ;;  %v1803_v50 = vshrl.u32 %v5431_v47, %v6721_v62 }
 0x1a0   :  { %v1805_v25 = vshll.u32 %v5431_v47, %v1796_v28  ;;  %v1806_v38 = vshrl.u32 %v5432_v49, %v6721_v62  ;;  %v1808_v24 = vshll.u32 %v5432_v49, %v1796_v28  ;;  %v1809_v37 = vshrl.u32 %v5433_v51, %v6721_v62 }
 0x1a1   :  { %v1601_v2 = vmul.f32 -0.001358992, %v1600_v54  ;;  %v1608_v6 = vmul.f32 -0.00019511016, %v1600_v54  ;;  %v1723_v56 = vadd.s32 1, %v1719_v18  ;;  %v6738_v52 = vor.u32 %v1800_v16, %v1799_v63 }
 0x1a2   :  { %v6742_v9 = vor.u32 %v1803_v50, %v1802_v5  ;;  %v1811_v55 = vshll.u32 %v5433_v51, %v1796_v28  ;;  %v1812_v44 = vshrl.u32 %v5434_v60, %v6721_v62  ;;  %v1810_v3 = vor.u32 %v1809_v37, %v1808_v24 }
 0x1a3   :  { %v1602_v48 = vadd.f32 0.041655596, %v1601_v2  ;;  %v1609_v59 = vadd.f32 0.008332121, %v1608_v6  ;;  %v1724_v23 = vsel %vm1722_vm10, %v1723_v56, %v1719_v18  ;;  %v1807_v41 = vor.u32 %v1806_v38, %v1805_v25 }
 0x1a4   :  { %v1725_v31 = vadd.s32 %v1724_v23, %v1720_v33  ;;  %v1813_v4 = vor.u32 %v1812_v44, %v1811_v55  ;;  %vm1814_vm11 = vcmp.lt.s32.totalorder %v6732_v58, 1  ;;  %vm1817_vm12 = vcmp.lt.s32.totalorder %v6732_v58, 4 }
 0x1a5   :  { %v1603_v7 = vmul.f32 %v1602_v48, %v1600_v54  ;;  %v1610_v1 = vmul.f32 %v1609_v59, %v1600_v54  ;;  %vm1816_vm13 = vcmp.lt.s32.totalorder %v6732_v58, 3  ;;  %v1617_v10 = vand.u32 3, %v1616_v29 }
 0x1a6   :  { %v1726_v42 = vadd.s32 536870912, %v1725_v31  ;;  %vm1815_vm14 = vcmp.lt.s32.totalorder %v6732_v58, 2  ;;  %v1823_v27 = vsel %vm1817_vm12, %v1810_v3, 920167782  ;;  %v6753_v19 = vshll.u32 %v1790_v39, 8 }
 0x1a7   :  { %v1604_v61 = vadd.f32 -0.4999988, %v1603_v7  ;;  %v1611_v46 = vadd.f32 -0.16666654, %v1610_v1  ;;  %v1822_v17 = vsel %vm1814_vm11, %v6738_v52, %v6742_v9  ;;  %vm1615_vm15 = vweird.f32 %v6328_v26 }
 0x1a8   :  { %v6755_v28 = vshrl.u32 %v1726_v42, 30  ;;  %v1824_v40 = vsel %vm1816_vm13, %v1807_v41, %v1823_v27  ;;  %v1827_v29 = vsel %vm1817_vm12, %v1813_v4, 1326507024  ;;  %vm1618_vm0 = vcmp.lt.s32.totalorder %v1617_v10, 2 }
 0x1a9   :  { %v1605_v35 = vmul.f32 %v1604_v61, %v1600_v54  ;;  %v1612_v20 = vmul.f32 %v1611_v46, %v1600_v54  ;;  %v1826_v54 = vsel %vm1814_vm11, %v6742_v9, %v1807_v41  ;;  %vm1622_vm1 = vcmp.eq.s32.totalorder %v1617_v10, 2 }
 0x1aa   :  { %v1728_v63 = vshll.u32 %v6755_v28, 30  ;;  %v1825_v18 = vsel %vm1815_vm14, %v1822_v17, %v1824_v40  ;;  %v1828_v16 = vsel %vm1816_vm13, %v1810_v3, %v1827_v29  ;;  %v1831_v6 = vand.u32 65535, %v6753_v19 }
 0x1ab   :  { %v1606_v33 = vadd.f32 1.0, %v1605_v35  ;;  %v1613_v39 = vadd.f32 1.0, %v1612_v20  ;;  %vm1619_vm2 = vcmp.eq.s32.totalorder %v1617_v10, 0  ;;  %v1829_v56 = vsel %vm1815_vm14, %v1826_v54, %v1828_v16 }
 0x1ac   :  { %v1729_v2 = vsub.s32 %v1725_v31, %v1728_v63  ;;  %v1832_v25 = vshrl.u32 %v6753_v19, 16  ;;  %v1856_v38 = vshrl.u32 %v1825_v18, 16  ;;  %v1798_v37 = vshrl.u32 %v5429_v43, %v6721_v62 }
 0x1ad   :  { %v1614_v5 = vmul.f32 %v1613_v39, %v1598_v22  ;;  %v1623_v50 = vxor.u32 2147483648, %v1606_v33  ;;  %v1819_v22 = vsel %vm1817_vm12, %v1807_v41, 2102212464  ;;  %v1833_v23 = vand.u32 65535, %v1829_v56 }
 0x1ae   :  { %vm1730_vm3 = vcmp.lt.s32.totalorder %v1729_v2, 0  ;;  %v1731_v59 = vsub.s32 0, %v1729_v2  ;;  %v1834_v55 = vshrl.u32 %v1829_v56, 16  ;;  %v1855_v1 = vand.u32 65535, %v1825_v18 }
 0x1af   :  { %v1620_v24 = vxor.u32 2147483648, %v1614_v5  ;;  %v1624_v48 = vsel %vm1622_vm1, %v1623_v50, %v1614_v5  ;;  %v6782_v31 = vmul.u32 %v1856_v38, %v1831_v6  ;;  %v1835_v61 = vmul.u32 %v1833_v23, %v1831_v6 }
 0x1b0   :  { %v1732_v7 = vsel %vm1730_vm3, %v1731_v59, %v1729_v2  ;;  %v1836_v46 = vmul.u32 %v1834_v55, %v1831_v6  ;;  %v1721_v62 = vadd.s32 %v6716_v30, %v6714_v36  ;;  %v1837_v41 = vmul.u32 %v1833_v23, %v1832_v25 }
 0x1b1   :  { %v1621_v44 = vsel %vm1619_vm2, %v1606_v33, %v1620_v24  ;;  %v1733_v4 = vclz %v1732_v7  ;;  %v1818_v35 = vsel %vm1814_vm11, %v1798_v37, %v6738_v52  ;;  %v1838_v20 = vmul.u32 %v1834_v55, %v1832_v25 }
 0x1b2   :  { %v1625_v3 = vsel %vm1618_vm0, %v1621_v44, %v1624_v48  ;;  %v1839_v17 = vshll.u32 %v1836_v46, 16  ;;  %vm1629_vm4 = vcmp.lt.s32.totalorder %v6552_v21, 0  ;;  %v1820_v26 = vsel %vm1816_vm13, %v6742_v9, %v1819_v22 }
 0x1b3   :  { %v6787_v42 = vsel %vm1615_vm15, nan, %v1625_v3  ;;  %v5326_v27 = vadd.s32 4294967294, %v1733_v4  ;;  %v1841_v10 = vshll.u32 %v1837_v41, 16  ;;  %v1857_v40 = vmul.u32 %v1855_v1, %v1831_v6 }
 0x1b4   :  { %1939 = vst [vmem:[#allocation3 + $0x48] sm:$0xff] %v6787_v42  ;;  %v1859_v29 = vmul.u32 %v1855_v1, %v1832_v25  ;;  %vm1843_vm6 = vc.u32 %v1835_v61, %v1839_v17  ;;  %v1845_v36 = vadd.s32 %v1839_v17, %v1835_v61  ;;  %v1861_v30 = vshll.u32 %v6782_v31, 16 }
 0x1b5   :  { %vm5327_vm5 = vcmp.lt.s32.totalorder %v5326_v27, 0  ;;  %v1844_v52 = vsel %vm1843_vm6, 1, %v5435_v8  ;;  %v1860_v39 = vmul.u32 %v1856_v38, %v1832_v25  ;;  %v1950_v63 = vadd.f32 12288.0, %v5456_v12 }
 0x1b6   :  { %v1736_v33 = vsel %vm5327_vm5, 0, %v5326_v27  ;;  %v1846_v5 = vadd.s32 %v1844_v52, %v1838_v20  ;;  %v1751_v9 = vsub.s32 4, %v6755_v28  ;;  %v1840_v50 = vshrl.u32 %v1836_v46, 16 }
 0x1b7   :  { %v1737_v54 = vsub.s32 32, %v1736_v33  ;;  %v1738_v18 = vshll.u32 %v1729_v2, %v1736_v33  ;;  %v1741_v16 = vsub.s32 4294967266, %v1736_v33  ;;  %vm1847_vm7 = vc.u32 %v1845_v36, %v1841_v10 }
 0x1b8   :  { %v1863_v6 = vshll.u32 %v1859_v29, 16  ;;  %v1848_v48 = vsel %vm1847_vm7, 1, %v5435_v8  ;;  %vm1865_vm8 = vc.u32 %v1857_v40, %v1861_v30  ;;  %v1867_v25 = vadd.s32 %v1861_v30, %v1857_v40 }
 0x1b9   :  { %v1739_v56 = vshrl.u32 %v1721_v62, %v1737_v54  ;;  %v1742_v24 = vadd.s32 127, %v1741_v16  ;;  %v1850_v59 = vadd.s32 %v1848_v48, %v1846_v5  ;;  %v1866_v37 = vsel %vm1865_vm8, 1, %v5435_v8 }
 0x1ba   :  { %v1951_v38 = vadd.f32 12288.0, %v5458_v13  ;;  %v1842_v23 = vshrl.u32 %v1837_v41, 16  ;;  %v1868_v55 = vadd.s32 %v1866_v37, %v1860_v39  ;;  %v1862_v7 = vshrl.u32 %v6782_v31, 16 }
 0x1bb   :  { %v1740_v22 = vor.u32 %v1739_v56, %v1738_v18  ;;  %v1743_v2 = vshll.u32 %v1742_v24, 23  ;;  %v1851_v44 = vadd.s32 %v1850_v59, %v1840_v50  ;;  %vm1869_vm9 = vc.u32 %v1867_v25, %v1863_v6 }
 0x1bc   :  { %v6808_v1 = vmul.f32 %v1950_v63, %v5454_v11  ;;  %v1752_v61 = vsel %vm1629_vm4, %v1751_v9, %v6755_v28  ;;  %v1870_v46 = vsel %vm1869_vm9, 1, %v5435_v8  ;;  %vm6816_vm10 = vcmp.le.f32.partialorder %v1627_v32, 0.7853982 }
 0x1bd   :  { %v1744_v3 = vor.u32 4788187, %v1743_v2  ;;  %v1747_v4 = vcvt.s32.f32 %v1740_v22  ;;  %v1821_v31 = vsel %vm1815_vm14, %v1818_v35, %v1820_v26  ;;  %v1864_v41 = vshrl.u32 %v1859_v29, 16 }
 0x1be   :  { %v1872_v27 = vadd.s32 %v1870_v46, %v1868_v55  ;;  %v1852_v17 = vadd.s32 %v1851_v44, %v1842_v23  ;;  %v1871_v10 = vadd.s32 %v1867_v25, %v1863_v6  ;;  %v1961_v40 = vand.u32 2139095040, %v6808_v1 }
 0x1bf   :  { %v1745_v20 = vand.u32 2147483647, %v1744_v3  ;;  %v1754_v28 = vsel %vm6816_vm10, 0, %v1752_v61  ;;  %v6826_v30 = vmul.f32 %v1951_v38, %v5454_v11  ;;  %v1875_v58 = vmul.u32 %v6753_v19, %v1821_v31 }
 0x1c0   :  { %v1873_v36 = vadd.s32 %v1872_v27, %v1862_v7  ;;  %v1962_v33 = vshrl.u32 %v1961_v40, 23  ;;  %v1771_v26 = vadd.s32 3, %v1754_v28  ;;  %vm1877_vm11 = vc.u32 %v1852_v17, %v1871_v10 }
 0x1c1   :  { %v1748_v32 = vmul.f32 %v1747_v4, %v1745_v20  ;;  %v1958_v63 = vand.u32 2147483647, %v6808_v1  ;;  %v2116_v54 = vand.u32 2139095040, %v6826_v30  ;;  %v2113_v48 = vand.u32 2147483647, %v6826_v30 }
 0x1c2   :  { %v1874_v52 = vadd.s32 %v1873_v36, %v1864_v41  ;;  %v5331_v29 = vadd.s32 4294967169, %v1962_v33  ;;  %v6836_v19 = vand.u32 3, %v1771_v26  ;;  %v6844_v44 = vadd.f32 12288.0, %v5460_v14 }
 0x1c3   :  { %v1749_v35 = vxor.u32 2147483648, %v1748_v32  ;;  %v1965_v56 = vand.u32 8388607, %v1958_v63  ;;  %v2117_v59 = vshrl.u32 %v2116_v54, 23  ;;  %v6847_v7 = vadd.s32 %v1871_v10, %v1852_v17 }
 0x1c4   :  { %v1878_v39 = vadd.s32 1, %v1874_v52  ;;  %v1968_v16 = vadd.s32 1, %v5331_v29  ;;  %vm1777_vm13 = vcmp.eq.s32.totalorder %v6836_v19, 2  ;;  %v6854_v41 = vand.u32 8388607, %v2113_v48 }
 0x1c5   :  { %v1750_v18 = vsel %vm1629_vm4, %v1749_v35, %v1748_v32  ;;  %v1966_v3 = vor.u32 8388608, %v1965_v56  ;;  %v5334_v61 = vadd.s32 4294967169, %v2117_v59  ;;  %vm1774_vm14 = vcmp.eq.s32.totalorder %v6836_v19, 0 }
 0x1c6   :  { %v1753_v5 = vsel %vm6816_vm10, %v6552_v21, %v1750_v18  ;;  %v1879_v9 = vsel %vm1877_vm11, %v1878_v39, %v1874_v52  ;;  %vm1969_vm12 = vcmp.gt.s32.totalorder %v1968_v16, 0  ;;  %vm1773_vm15 = vcmp.lt.s32.totalorder %v6836_v19, 2 }
 0x1c7   :  { %v1755_v50 = vmul.f32 %v1753_v5, %v1753_v5  ;;  %v1880_v6 = vadd.s32 %v1879_v9, %v1875_v58  ;;  %v1970_v24 = vsel %vm1969_vm12, %v1968_v16, 0  ;;  %vm1770_vm0 = vweird.f32 %v6552_v21 }
 0x1c8   :  { %v1972_v22 = vand.u32 31, %v1970_v24  ;;  %v6857_v27 = vshrl.u32 %v1970_v24, 5  ;;  %v6872_v58 = vshll.u32 %v1966_v3, 8  ;;  %v6874_v35 = vadd.s32 1, %v5334_v61 }
 0x1c9   :  { %v1756_v37 = vmul.f32 -0.001358992, %v1755_v50  ;;  %v1763_v25 = vmul.f32 -0.00019511016, %v1755_v50  ;;  %v1881_v38 = vadd.s32 536870912, %v1880_v6  ;;  %vm1784_vm2 = vcmp.lt.s32.totalorder %v6589_v34, 0 }
 0x1ca   :  { %v6849_v4 = vsub.s32 32, %v1972_v22  ;;  %v1975_v20 = vshll.u32 %v5429_v43, %v1972_v22  ;;  %v1978_v10 = vshll.u32 %v5430_v45, %v1972_v22  ;;  %v1981_v33 = vshll.u32 %v5431_v47, %v1972_v22 }
 0x1cb   :  { %v1757_v2 = vadd.f32 0.041655596, %v1756_v37  ;;  %v1764_v23 = vadd.f32 0.008332121, %v1763_v25  ;;  %v6841_v55 = vshrl.u32 %v1881_v38, 30  ;;  %v1984_v18 = vshll.u32 %v5432_v49, %v1972_v22 }
 0x1cc   :  { %v1976_v17 = vshrl.u32 %v5430_v45, %v6849_v4  ;;  %v1979_v32 = vshrl.u32 %v5431_v47, %v6849_v4  ;;  %v1982_v52 = vshrl.u32 %v5432_v49, %v6849_v4  ;;  %v1985_v16 = vshrl.u32 %v5433_v51, %v6849_v4 }
 0x1cd   :  { %v1758_v46 = vmul.f32 %v1757_v2, %v1755_v50  ;;  %v1765_v62 = vmul.f32 %v1764_v23, %v1755_v50  ;;  %v1883_v31 = vshll.u32 %v6841_v55, 30  ;;  %vm1990_vm3 = vcmp.lt.s32.totalorder %v6857_v27, 1 }
 0x1ce   :  { %v6879_v54 = vor.u32 %v1976_v17, %v1975_v20  ;;  %v1986_v59 = vor.u32 %v1985_v16, %v1984_v18  ;;  %v1987_v37 = vshll.u32 %v5433_v51, %v1972_v22  ;;  %v1988_v25 = vshrl.u32 %v5434_v60, %v6849_v4 }
 0x1cf   :  { %v1759_v40 = vadd.f32 -0.4999988, %v1758_v46  ;;  %v1766_v28 = vadd.f32 -0.16666654, %v1765_v62  ;;  %v6864_v36 = vsub.s32 %v1880_v6, %v1883_v31  ;;  %v1983_v23 = vor.u32 %v1982_v52, %v1981_v33 }
 0x1d0   :  { %vm1993_vm4 = vcmp.lt.s32.totalorder %v6857_v27, 4  ;;  %vm6894_vm5 = vcmp.le.f32.partialorder %v1782_v0, 0.7853982  ;;  %vm1992_vm6 = vcmp.lt.s32.totalorder %v6857_v27, 3  ;;  %v2007_v46 = vand.u32 65535, %v6872_v58 }
 0x1d1   :  { %v1760_v26 = vmul.f32 %v1759_v40, %v1755_v50  ;;  %v1767_v29 = vmul.f32 %v1766_v28, %v1755_v50  ;;  %vm1885_vm1 = vcmp.lt.s32.totalorder %v6864_v36, 0  ;;  %v1886_v39 = vsub.s32 0, %v6864_v36 }
 0x1d2   :  { %v6886_v50 = vor.u32 %v1979_v32, %v1978_v10  ;;  %v1999_v22 = vsel %vm1993_vm4, %v1986_v59, 920167782  ;;  %v1906_v31 = vsub.s32 4, %v6841_v55  ;;  %v2008_v20 = vshrl.u32 %v6872_v58, 16 }
 0x1d3   :  { %v1761_v9 = vadd.f32 1.0, %v1760_v26  ;;  %v1768_v6 = vadd.f32 1.0, %v1767_v29  ;;  %v1887_v56 = vsel %vm1885_vm1, %v1886_v39, %v6864_v36  ;;  %v1989_v0 = vor.u32 %v1988_v25, %v1987_v37 }
 0x1d4   :  { %v1888_v24 = vclz %v1887_v56  ;;  %vm1991_vm8 = vcmp.lt.s32.totalorder %v6857_v27, 2  ;;  %v1998_v17 = vsel %vm1990_vm3, %v6879_v54, %v6886_v50  ;;  %v1942_v28 = vand.u32 2147483647, %v6680_v15 }
 0x1d5   :  { %v1769_v38 = vmul.f32 %v1768_v6, %v1753_v5  ;;  %v1778_v2 = vxor.u32 2147483648, %v1761_v9  ;;  %v2000_v32 = vsel %vm1992_vm6, %v1983_v23, %v1999_v22  ;;  %v1907_v18 = vsel %vm1784_vm2, %v1906_v31, %v6841_v55 }
 0x1d6   :  { %v5329_v61 = vadd.s32 4294967294, %v1888_v24  ;;  %v1974_v15 = vshrl.u32 %v5429_v43, %v6849_v4  ;;  %vm2124_vm9 = vcmp.gt.s32.totalorder %v6874_v35, 0  ;;  %v2001_v21 = vsel %vm1991_vm8, %v1998_v17, %v2000_v32 }
 0x1d7   :  { %v1775_v62 = vxor.u32 2147483648, %v1769_v38  ;;  %v1779_v5 = vsel %vm1777_vm13, %v1778_v2, %v1769_v38  ;;  %v2002_v55 = vsel %vm1990_vm3, %v6886_v50, %v1983_v23  ;;  %v2003_v4 = vsel %vm1993_vm4, %v1989_v0, 1326507024 }
 0x1d8   :  { %vm5330_vm7 = vcmp.lt.s32.totalorder %v5329_v61, 0  ;;  %v2004_v37 = vsel %vm1992_vm6, %v1986_v59, %v2003_v4  ;;  %v2031_v25 = vand.u32 65535, %v2001_v21  ;;  %v2032_v38 = vshrl.u32 %v2001_v21, 16 }
 0x1d9   :  { %v1776_v10 = vsel %vm1774_vm14, %v1761_v9, %v1775_v62  ;;  %v1891_v40 = vsel %vm5330_vm7, 0, %v5329_v61  ;;  %v1949_v9 = vmax.f32 %v1942_v28, %v6547_v57  ;;  %v1909_v57 = vsel %vm6894_vm5, 0, %v1907_v18 }
 0x1da   :  { %v1780_v33 = vsel %vm1773_vm15, %v1776_v10, %v1779_v5  ;;  %v1892_v52 = vsub.s32 32, %v1891_v40  ;;  %v1893_v26 = vshll.u32 %v6864_v36, %v1891_v40  ;;  %v1896_v29 = vsub.s32 4294967266, %v1891_v40 }
 0x1db   :  { %v1781_v39 = vsel %vm1770_vm0, nan, %v1780_v33  ;;  %v1943_v36 = vand.u32 2147483647, %v6787_v42  ;;  %v2005_v42 = vsel %vm1991_vm8, %v2002_v55, %v2004_v37  ;;  %v1994_v5 = vsel %vm1990_vm3, %v1974_v15, %v6879_v54 }
 0x1dc   :  { %v1894_v16 = vshrl.u32 %v6847_v7, %v1892_v52  ;;  %v1897_v19 = vadd.s32 127, %v1896_v29  ;;  %1940 = vst [vmem:[#allocation3 + $0x50] sm:$0xff] %v1781_v39  ;;  %v1944_v6 = vand.u32 2147483647, %v1781_v39  ;;  %v2009_v62 = vand.u32 65535, %v2005_v42 }
 0x1dd   :  { %v2587_v7 = vmax.f32 %v1943_v36, %v1949_v9  ;;  %v1995_v59 = vsel %vm1993_vm4, %v1983_v23, 2102212464  ;;  %v2010_v31 = vshrl.u32 %v2005_v42, 16  ;;  %v2125_v0 = vsel %vm2124_vm9, %v6874_v35, 0 }
 0x1de   :  { %v1895_v56 = vor.u32 %v1894_v16, %v1893_v26  ;;  %v1898_v24 = vshll.u32 %v1897_v19, 23  ;;  %v2013_v10 = vmul.u32 %v2009_v62, %v2008_v20  ;;  %v2033_v40 = vmul.u32 %v2031_v25, %v2007_v46 }
 0x1df   :  { %v6943_v22 = vmax.f32 %v1944_v6, %v2587_v7  ;;  %v2034_v28 = vmul.u32 %v2032_v38, %v2007_v46  ;;  %v1926_v32 = vadd.s32 3, %v1909_v57  ;;  %v2011_v33 = vmul.u32 %v2009_v62, %v2007_v46 }
 0x1e0   :  { %v1899_v2 = vor.u32 4788187, %v1898_v24  ;;  %v1902_v61 = vcvt.s32.f32 %v1895_v56  ;;  %v2012_v52 = vmul.u32 %v2010_v31, %v2007_v46  ;;  %v2035_v26 = vmul.u32 %v2031_v25, %v2008_v20 }
 0x1e1   :  { %v1996_v54 = vsel %vm1992_vm6, %v6886_v50, %v1995_v59  ;;  %v2036_v39 = vmul.u32 %v2032_v38, %v2008_v20  ;;  %v2037_v23 = vshll.u32 %v2034_v28, 16  ;;  %v2014_v18 = vmul.u32 %v2010_v31, %v2008_v20 }
 0x1e2   :  { %v1900_v17 = vand.u32 2147483647, %v1899_v2  ;;  %v2015_v15 = vshll.u32 %v2012_v52, 16  ;;  %v2017_v16 = vshll.u32 %v2013_v10, 16  ;;  %v2039_v19 = vshll.u32 %v2035_v26, 16 }
 0x1e3   :  { %v2016_v9 = vshrl.u32 %v2012_v52, 16  ;;  %vm2041_vm10 = vc.u32 %v2033_v40, %v2037_v23  ;;  %v2043_v36 = vadd.s32 %v2037_v23, %v2033_v40  ;;  %v2038_v21 = vshrl.u32 %v2034_v28, 16 }
 0x1e4   :  { %v1903_v29 = vmul.f32 %v1902_v61, %v1900_v17  ;;  %vm2019_vm11 = vc.u32 %v2011_v33, %v2015_v15  ;;  %v2021_v6 = vadd.s32 %v2015_v15, %v2011_v33  ;;  %v2042_v46 = vsel %vm2041_vm10, 1, %v5435_v8 }
 0x1e5   :  { %v2020_v50 = vsel %vm2019_vm11, 1, %v5435_v8  ;;  %v2044_v4 = vadd.s32 %v2042_v46, %v2036_v39  ;;  %vm2045_vm12 = vc.u32 %v2043_v36, %v2039_v19  ;;  %v2040_v57 = vshrl.u32 %v2035_v26, 16 }
 0x1e6   :  { %v1904_v35 = vxor.u32 2147483648, %v1903_v29  ;;  %v2022_v56 = vadd.s32 %v2020_v50, %v2014_v18  ;;  %vm2023_vm13 = vc.u32 %v2021_v6, %v2017_v16  ;;  %v2046_v24 = vsel %vm2045_vm12, 1, %v5435_v8 }
 0x1e7   :  { %v2024_v37 = vsel %vm2023_vm13, 1, %v5435_v8  ;;  %v2048_v42 = vadd.s32 %v2046_v24, %v2044_v4  ;;  %v2018_v25 = vshrl.u32 %v2013_v10, 16  ;;  %v6965_v2 = vshrl.u32 %v2125_v0, 5 }
 0x1e8   :  { %v1905_v55 = vsel %vm1784_vm2, %v1904_v35, %v1903_v29  ;;  %v2026_v38 = vadd.s32 %v2024_v37, %v2022_v56  ;;  %v2127_v61 = vand.u32 31, %v2125_v0  ;;  %v1997_v3 = vsel %vm1991_vm8, %v1994_v5, %v1996_v54 }
 0x1e9   :  { %v1908_v20 = vsel %vm6894_vm5, %v6589_v34, %v1905_v55  ;;  %v2049_v31 = vadd.s32 %v2048_v42, %v2038_v21  ;;  %v6969_v17 = vand.u32 3, %v1926_v32  ;;  %v6971_v28 = vadd.s32 %v2043_v36, %v2039_v19 }
 0x1ea   :  { %v1910_v7 = vmul.f32 %v1908_v20, %v1908_v20  ;;  %v2027_v40 = vadd.s32 %v2026_v38, %v2016_v9  ;;  %v2128_v33 = vsub.s32 32, %v2127_v61  ;;  %v2130_v10 = vshll.u32 %v5429_v43, %v2127_v61 }
 0x1eb   :  { %v2050_v29 = vadd.s32 %v2049_v31, %v2040_v57  ;;  %v2051_v0 = vmul.u32 %v6872_v58, %v1997_v3  ;;  %vm2145_vm14 = vcmp.lt.s32.totalorder %v6965_v2, 1  ;;  %v2133_v54 = vshll.u32 %v5430_v45, %v2127_v61 }
 0x1ec   :  { %v1911_v62 = vmul.f32 -0.001358992, %v1910_v7  ;;  %v1918_v59 = vmul.f32 -0.00019511016, %v1910_v7  ;;  %v6974_v39 = vadd.s32 %v2027_v40, %v2018_v25  ;;  %v2131_v23 = vshrl.u32 %v5430_v45, %v2128_v33 }
 0x1ed   :  { %v2054_v32 = vadd.s32 1, %v2050_v29  ;;  %v2134_v18 = vshrl.u32 %v5431_v47, %v2128_v33  ;;  %v2136_v15 = vshll.u32 %v5431_v47, %v2127_v61  ;;  %v2137_v16 = vshrl.u32 %v5432_v49, %v2128_v33 }
 0x1ee   :  { %v1912_v52 = vadd.f32 0.041655596, %v1911_v62  ;;  %v1919_v26 = vadd.f32 0.008332121, %v1918_v59  ;;  %vm2053_vm15 = vc.u32 %v6974_v39, %v6971_v28  ;;  %v6985_v9 = vor.u32 %v2131_v23, %v2130_v10 }
 0x1ef   :  { %v2055_v35 = vsel %vm2053_vm15, %v2054_v32, %v2050_v29  ;;  %v2139_v6 = vshll.u32 %v5432_v49, %v2127_v61  ;;  %v2140_v21 = vshrl.u32 %v5433_v51, %v2128_v33  ;;  %v2142_v46 = vshll.u32 %v5433_v51, %v2127_v61 }
 0x1f0   :  { %v1913_v27 = vmul.f32 %v1912_v52, %v1910_v7  ;;  %v1920_v5 = vmul.f32 %v1919_v26, %v1910_v7  ;;  %v2056_v36 = vadd.s32 %v2055_v35, %v2051_v0  ;;  %v2143_v4 = vshrl.u32 %v5434_v60, %v2128_v33 }
 0x1f1   :  { %vm2148_vm0 = vcmp.lt.s32.totalorder %v6965_v2, 4  ;;  %v6992_v24 = vor.u32 %v2134_v18, %v2133_v54  ;;  %v2138_v37 = vor.u32 %v2137_v16, %v2136_v15  ;;  %v2141_v57 = vor.u32 %v2140_v21, %v2139_v6 }
 0x1f2   :  { %v1914_v19 = vadd.f32 -0.4999988, %v1913_v27  ;;  %v1921_v58 = vadd.f32 -0.16666654, %v1920_v5  ;;  %v2057_v56 = vadd.s32 536870912, %v2056_v36  ;;  %v2144_v38 = vor.u32 %v2143_v4, %v2142_v46 }
 0x1f3   :  { %vm2147_vm1 = vcmp.lt.s32.totalorder %v6965_v2, 3  ;;  %vm1932_vm2 = vcmp.eq.s32.totalorder %v6969_v17, 2  ;;  %v2154_v61 = vsel %vm2148_vm0, %v2141_v57, 920167782  ;;  %vm1928_vm3 = vcmp.lt.s32.totalorder %v6969_v17, 2 }
 0x1f4   :  { %v1915_v55 = vmul.f32 %v1914_v19, %v1910_v7  ;;  %v1922_v50 = vmul.f32 %v1921_v58, %v1910_v7  ;;  %v6996_v62 = vshrl.u32 %v2057_v56, 30  ;;  %v2121_v7 = vor.u32 8388608, %v6854_v41 }
 0x1f5   :  { %vm1929_vm4 = vcmp.eq.s32.totalorder %v6969_v17, 0  ;;  %vm2146_vm5 = vcmp.lt.s32.totalorder %v6965_v2, 2  ;;  %v2153_v40 = vsel %vm2145_vm14, %v6985_v9, %v6992_v24  ;;  %v2155_v41 = vsel %vm2147_vm1, %v2138_v37, %v2154_v61 }
 0x1f6   :  { %v1916_v42 = vadd.f32 1.0, %v1915_v55  ;;  %v1923_v25 = vadd.f32 1.0, %v1922_v50  ;;  %v2059_v31 = vshll.u32 %v6996_v62, 30  ;;  %v2158_v29 = vsel %vm2148_vm0, %v2144_v38, 1326507024 }
 0x1f7   :  { %vm1925_vm6 = vweird.f32 %v6589_v34  ;;  %v2159_v0 = vsel %vm2147_vm1, %v2141_v57, %v2158_v29  ;;  %v7019_v23 = vshll.u32 %v2121_v7, 8  ;;  %v2129_v5 = vshrl.u32 %v5429_v43, %v2128_v33 }
 0x1f8   :  { %v1924_v59 = vmul.f32 %v1923_v25, %v1908_v20  ;;  %v1933_v3 = vxor.u32 2147483648, %v1916_v42  ;;  %v2157_v20 = vsel %vm2145_vm14, %v6992_v24, %v2138_v37  ;;  %v2060_v10 = vsub.s32 %v2056_v36, %v2059_v31 }
 0x1f9   :  { %v2156_v32 = vsel %vm2146_vm5, %v2153_v40, %v2155_v41  ;;  %v2160_v54 = vsel %vm2146_vm5, %v2157_v20, %v2159_v0  ;;  %v2162_v15 = vand.u32 65535, %v7019_v23  ;;  %v2163_v19 = vshrl.u32 %v7019_v23, 16 }
 0x1fa   :  { %v1930_v52 = vxor.u32 2147483648, %v1924_v59  ;;  %v1934_v26 = vsel %vm1932_vm2, %v1933_v3, %v1924_v59  ;;  %vm2061_vm7 = vcmp.lt.s32.totalorder %v2060_v10, 0  ;;  %v2062_v34 = vsub.s32 0, %v2060_v10 }
 0x1fb   :  { %v2164_v58 = vand.u32 65535, %v2160_v54  ;;  %v2165_v35 = vshrl.u32 %v2160_v54, 16  ;;  %v2186_v6 = vand.u32 65535, %v2156_v32  ;;  %v2187_v21 = vshrl.u32 %v2156_v32, 16 }
 0x1fc   :  { %v1931_v27 = vsel %vm1929_vm4, %v1916_v42, %v1930_v52  ;;  %v2063_v36 = vsel %vm2061_vm7, %v2062_v34, %v2060_v10  ;;  %v1953_v56 = vadd.f32 12288.0, %v5668_v53  ;;  %v7036_v42 = vmul.f32 %v6844_v44, %v5454_v11 }
 0x1fd   :  { %v1935_v18 = vsel %vm1928_vm3, %v1931_v27, %v1934_v26  ;;  %v2064_v46 = vclz %v2063_v36  ;;  %v2166_v55 = vmul.u32 %v2164_v58, %v2162_v15  ;;  %v2167_v50 = vmul.u32 %v2165_v35, %v2162_v15 }
 0x1fe   :  { %v1936_v16 = vsel %vm1925_vm6, nan, %v1935_v18  ;;  %v2168_v4 = vmul.u32 %v2164_v58, %v2163_v19  ;;  %v2189_v57 = vmul.u32 %v2187_v21, %v2162_v15  ;;  %v2169_v38 = vmul.u32 %v2165_v35, %v2163_v19 }
 0x1ff   :  { %1941 = vst [vmem:[#allocation3 + $0x58] sm:$0xff] %v1936_v16  ;;  %v1945_v33 = vand.u32 2147483647, %v1936_v16  ;;  %v5332_v25 = vadd.s32 4294967294, %v2064_v46  ;;  %v2170_v7 = vshll.u32 %v2167_v50, 16  ;;  %vm1960_vm8 = vcmp.lt.s32.totalorder %v6808_v1, 0 }
 0x200   :  { %v2052_v61 = vadd.s32 %v6971_v28, %v6974_v39  ;;  %v2150_v59 = vsel %vm2148_vm0, %v2138_v37, 2102212464  ;;  %v2172_v3 = vshll.u32 %v2168_v4, 16  ;;  %v2190_v31 = vmul.u32 %v2186_v6, %v2163_v19 }
 0x201   :  { %v7031_v17 = vmax.f32 %v1945_v33, %v6943_v22  ;;  %v2149_v22 = vsel %vm2145_vm14, %v2129_v5, %v6985_v9  ;;  %vm5333_vm9 = vcmp.lt.s32.totalorder %v5332_v25, 0  ;;  %vm2174_vm10 = vc.u32 %v2166_v55, %v2170_v7 }
 0x202   :  { %v2176_v44 = vadd.s32 %v2170_v7, %v2166_v55  ;;  %v2067_v40 = vsel %vm5333_vm9, 0, %v5332_v25  ;;  %v2175_v41 = vsel %vm2174_vm10, 1, %v5435_v8  ;;  %v2188_v52 = vmul.u32 %v2186_v6, %v2162_v15 }
 0x203   :  { %v2192_v26 = vshll.u32 %v2189_v57, 16  ;;  %v2068_v20 = vsub.s32 32, %v2067_v40  ;;  %v2069_v29 = vshll.u32 %v2060_v10, %v2067_v40  ;;  %v2072_v28 = vsub.s32 4294967266, %v2067_v40 }
 0x204   :  { %v2177_v39 = vadd.s32 %v2175_v41, %v2169_v38  ;;  %v2082_v0 = vsub.s32 4, %v6996_v62  ;;  %v2171_v9 = vshrl.u32 %v2167_v50, 16  ;;  %vm2178_vm11 = vc.u32 %v2176_v44, %v2172_v3 }
 0x205   :  { %v2191_v27 = vmul.u32 %v2187_v21, %v2163_v19  ;;  %v2070_v37 = vshrl.u32 %v2052_v61, %v2068_v20  ;;  %v2073_v5 = vadd.s32 127, %v2072_v28  ;;  %v2179_v32 = vsel %vm2178_vm11, 1, %v5435_v8 }
 0x206   :  { %v2194_v54 = vshll.u32 %v2190_v31, 16  ;;  %v2151_v18 = vsel %vm2147_vm1, %v6992_v24, %v2150_v59  ;;  %v2181_v34 = vadd.s32 %v2179_v32, %v2177_v39  ;;  %vm2196_vm12 = vc.u32 %v2188_v52, %v2192_v26 }
 0x207   :  { %v2198_v15 = vadd.s32 %v2192_v26, %v2188_v52  ;;  %v2071_v10 = vor.u32 %v2070_v37, %v2069_v29  ;;  %v2074_v16 = vshll.u32 %v2073_v5, 23  ;;  %v2173_v58 = vshrl.u32 %v2168_v4, 16 }
 0x208   :  { %v2197_v35 = vsel %vm2196_vm12, 1, %v5435_v8  ;;  %v2182_v33 = vadd.s32 %v2181_v34, %v2171_v9  ;;  %v2193_v36 = vshrl.u32 %v2189_v57, 16  ;;  %v2083_v46 = vsel %vm1960_vm8, %v2082_v0, %v6996_v62 }
 0x209   :  { %v2199_v19 = vadd.s32 %v2197_v35, %v2191_v27  ;;  %vm2200_vm13 = vc.u32 %v2198_v15, %v2194_v54  ;;  %v2075_v6 = vor.u32 4788187, %v2074_v16  ;;  %v2078_v21 = vcvt.s32.f32 %v2071_v10 }
 0x20a   :  { %v2201_v24 = vsel %vm2200_vm13, 1, %v5435_v8  ;;  %v2195_v55 = vshrl.u32 %v2190_v31, 16  ;;  %v2268_v25 = vand.u32 2147483647, %v7036_v42  ;;  %v2271_v4 = vand.u32 2139095040, %v7036_v42 }
 0x20b   :  { %v2203_v50 = vadd.s32 %v2201_v24, %v2199_v19  ;;  %v7060_v38 = vmul.f32 %v1953_v56, %v5454_v11  ;;  %v2076_v57 = vand.u32 2147483647, %v2075_v6  ;;  %v7062_v7 = vadd.s32 %v2182_v33, %v2173_v58 }
 0x20c   :  { %v7064_v61 = vadd.s32 %v2198_v15, %v2194_v54  ;;  %vm7068_vm14 = vcmp.le.f32.partialorder %v1958_v63, 0.7853982  ;;  %v2152_v59 = vsel %vm2146_vm5, %v2149_v22, %v2151_v18  ;;  %v2272_v44 = vshrl.u32 %v2271_v4, 23 }
 0x20d   :  { %v2204_v3 = vadd.s32 %v2203_v50, %v2193_v36  ;;  %v2079_v31 = vmul.f32 %v2078_v21, %v2076_v57  ;;  %v2085_v56 = vsel %vm7068_vm14, 0, %v2083_v46  ;;  %v2275_v52 = vand.u32 8388607, %v2268_v25 }
 0x20e   :  { %v5337_v41 = vadd.s32 4294967169, %v2272_v44  ;;  %v2206_v63 = vmul.u32 %v7019_v23, %v2152_v59  ;;  %vm2208_vm15 = vc.u32 %v7062_v7, %v7064_v61  ;;  %v2426_v2 = vand.u32 2139095040, %v7060_v38 }
 0x20f   :  { %v2205_v40 = vadd.s32 %v2204_v3, %v2195_v55  ;;  %v2080_v26 = vxor.u32 2147483648, %v2079_v31  ;;  %v2102_v22 = vadd.s32 3, %v2085_v56  ;;  %v2423_v39 = vand.u32 2147483647, %v7060_v38 }
 0x210   :  { %v2278_v29 = vadd.s32 1, %v5337_v41  ;;  %v2276_v27 = vor.u32 8388608, %v2275_v52  ;;  %v2427_v32 = vshrl.u32 %v2426_v2, 23  ;;  %vm2101_vm4 = vweird.f32 %v6808_v1 }
 0x211   :  { %v2209_v20 = vadd.s32 1, %v2205_v40  ;;  %v2081_v28 = vsel %vm1960_vm8, %v2080_v26, %v2079_v31  ;;  %v7088_v54 = vand.u32 3, %v2102_v22  ;;  %v7096_v35 = vand.u32 8388607, %v2423_v39 }
 0x212   :  { %v2084_v0 = vsel %vm7068_vm14, %v6808_v1, %v2081_v28  ;;  %vm2279_vm0 = vcmp.gt.s32.totalorder %v2278_v29, 0  ;;  %v7092_v58 = vshll.u32 %v2276_v27, 8  ;;  %v5340_v6 = vadd.s32 4294967169, %v2427_v32 }
 0x213   :  { %v2210_v9 = vsel %vm2208_vm15, %v2209_v20, %v2205_v40  ;;  %v2086_v23 = vmul.f32 %v2084_v0, %v2084_v0  ;;  %v2280_v5 = vsel %vm2279_vm0, %v2278_v29, 0  ;;  %vm2108_vm1 = vcmp.eq.s32.totalorder %v7088_v54, 2 }
 0x214   :  { %v2211_v37 = vadd.s32 %v2210_v9, %v2206_v63  ;;  %v2282_v18 = vand.u32 31, %v2280_v5  ;;  %v7101_v21 = vshrl.u32 %v2280_v5, 5  ;;  %vm2105_vm2 = vcmp.eq.s32.totalorder %v7088_v54, 0 }
 0x215   :  { %v2087_v34 = vmul.f32 -0.001358992, %v2086_v23  ;;  %v2094_v15 = vmul.f32 -0.00019511016, %v2086_v23  ;;  %vm2104_vm3 = vcmp.lt.s32.totalorder %v7088_v54, 2  ;;  %v2433_v52 = vadd.s32 1, %v5340_v6 }
 0x216   :  { %v2212_v10 = vadd.s32 536870912, %v2211_v37  ;;  %v7090_v16 = vsub.s32 32, %v2282_v18  ;;  %v2285_v46 = vshll.u32 %v5429_v43, %v2282_v18  ;;  %v2294_v55 = vshll.u32 %v5432_v49, %v2282_v18 }
 0x217   :  { %v2088_v33 = vadd.f32 0.041655596, %v2087_v34  ;;  %v2095_v36 = vadd.f32 0.008332121, %v2094_v15  ;;  %v2288_v62 = vshll.u32 %v5430_v45, %v2282_v18  ;;  %v2291_v3 = vshll.u32 %v5431_v47, %v2282_v18 }
 0x218   :  { %v7098_v19 = vshrl.u32 %v2212_v10, 30  ;;  %v2286_v24 = vshrl.u32 %v5430_v45, %v7090_v16  ;;  %v2289_v59 = vshrl.u32 %v5431_v47, %v7090_v16  ;;  %v2292_v44 = vshrl.u32 %v5432_v49, %v7090_v16 }
 0x219   :  { %v2089_v50 = vmul.f32 %v2088_v33, %v2086_v23  ;;  %v2096_v4 = vmul.f32 %v2095_v36, %v2086_v23  ;;  %v2295_v31 = vshrl.u32 %v5433_v51, %v7090_v16  ;;  %v2297_v2 = vshll.u32 %v5433_v51, %v2282_v18 }
 0x21a   :  { %v2214_v57 = vshll.u32 %v7098_v19, 30  ;;  %v2287_v26 = vor.u32 %v2286_v24, %v2285_v46  ;;  %v2298_v22 = vshrl.u32 %v5434_v60, %v7090_v16  ;;  %v2290_v9 = vor.u32 %v2289_v59, %v2288_v62 }
 0x21b   :  { %v2090_v56 = vadd.f32 -0.4999988, %v2089_v50  ;;  %v2097_v40 = vadd.f32 -0.16666654, %v2096_v4  ;;  %v2296_v63 = vor.u32 %v2295_v31, %v2294_v55  ;;  %v2293_v27 = vor.u32 %v2292_v44, %v2291_v3 }
 0x21c   :  { %v7118_v41 = vsub.s32 %v2211_v37, %v2214_v57  ;;  %vm2300_vm6 = vcmp.lt.s32.totalorder %v7101_v21, 1  ;;  %vm2302_vm7 = vcmp.lt.s32.totalorder %v7101_v21, 3  ;;  %vm2303_vm8 = vcmp.lt.s32.totalorder %v7101_v21, 4 }
 0x21d   :  { %v2091_v20 = vmul.f32 %v2090_v56, %v2086_v23  ;;  %v2098_v29 = vmul.f32 %v2097_v40, %v2086_v23  ;;  %vm2115_vm9 = vcmp.lt.s32.totalorder %v6826_v30, 0  ;;  %v2207_v23 = vadd.s32 %v7064_v61, %v7062_v7 }
 0x21e   :  { %vm2216_vm5 = vcmp.lt.s32.totalorder %v7118_v41, 0  ;;  %v2217_v28 = vsub.s32 0, %v7118_v41  ;;  %v2431_v34 = vor.u32 8388608, %v7096_v35  ;;  %vm2434_vm10 = vcmp.gt.s32.totalorder %v2433_v52, 0 }
 0x21f   :  { %v2092_v37 = vadd.f32 1.0, %v2091_v20  ;;  %v2099_v5 = vadd.f32 1.0, %v2098_v29  ;;  %v2299_v33 = vor.u32 %v2298_v22, %v2297_v2  ;;  %v2309_v36 = vsel %vm2303_vm8, %v2296_v63, 920167782 }
 0x220   :  { %v2218_v32 = vsel %vm2216_vm5, %v2217_v28, %v7118_v41  ;;  %vm2301_vm11 = vcmp.lt.s32.totalorder %v7101_v21, 2  ;;  %v2308_v46 = vsel %vm2300_vm6, %v2287_v26, %v2290_v9  ;;  %v2310_v24 = vsel %vm2302_vm7, %v2293_v27, %v2309_v36 }
 0x221   :  { %v2219_v18 = vclz %v2218_v32  ;;  %v2100_v15 = vmul.f32 %v2099_v5, %v2084_v0  ;;  %v2109_v10 = vxor.u32 2147483648, %v2092_v37  ;;  %v2317_v0 = vand.u32 65535, %v7092_v58 }
 0x222   :  { %v2435_v55 = vsel %vm2434_vm10, %v2433_v52, 0  ;;  %vm7146_vm12 = vcmp.le.f32.partialorder %v2113_v48, 0.7853982  ;;  %v2237_v4 = vsub.s32 4, %v7098_v19  ;;  %v2284_v57 = vshrl.u32 %v5429_v43, %v7090_v16 }
 0x223   :  { %v5335_v6 = vadd.s32 4294967294, %v2219_v18  ;;  %v2106_v7 = vxor.u32 2147483648, %v2100_v15  ;;  %v2110_v61 = vsel %vm2108_vm1, %v2109_v10, %v2100_v15  ;;  %v2312_v62 = vsel %vm2300_vm6, %v2290_v9, %v2293_v27 }
 0x224   :  { %v2311_v44 = vsel %vm2301_vm11, %v2308_v46, %v2310_v24  ;;  %v2313_v48 = vsel %vm2303_vm8, %v2299_v33, 1326507024  ;;  %v2305_v2 = vsel %vm2303_vm8, %v2293_v27, 2102212464  ;;  %v2318_v22 = vshrl.u32 %v7092_v58, 16 }
 0x225   :  { %vm5336_vm13 = vcmp.lt.s32.totalorder %v5335_v6, 0  ;;  %v2107_v59 = vsel %vm2105_vm2, %v2092_v37, %v2106_v7  ;;  %v7171_v20 = vshrl.u32 %v2435_v55, 5  ;;  %v2314_v54 = vsel %vm2302_vm7, %v2296_v63, %v2313_v48 }
 0x226   :  { %v2222_v3 = vsel %vm5336_vm13, 0, %v5335_v6  ;;  %v2111_v31 = vsel %vm2104_vm3, %v2107_v59, %v2110_v61  ;;  %v2341_v37 = vand.u32 65535, %v2311_v44  ;;  %v7179_v1 = vsel %vm2115_vm9, %v2237_v4, %v7098_v19 }
 0x227   :  { %v2223_v56 = vsub.s32 32, %v2222_v3  ;;  %v2224_v40 = vshll.u32 %v7118_v41, %v2222_v3  ;;  %v2227_v16 = vsub.s32 4294967266, %v2222_v3  ;;  %v7166_v52 = vsel %vm2101_vm4, nan, %v2111_v31 }
 0x228   :  { %2579 = vst [vmem:[#allocation3 + $0x60] sm:$0xff] %v7166_v52  ;;  %v2304_v41 = vsel %vm2300_vm6, %v2284_v57, %v2287_v26  ;;  %v2315_v27 = vsel %vm2301_vm11, %v2312_v62, %v2314_v54  ;;  %v2342_v5 = vshrl.u32 %v2311_v44, 16  ;;  %v2306_v63 = vsel %vm2302_vm7, %v2290_v9, %v2305_v2 }
 0x229   :  { %v2225_v29 = vshrl.u32 %v2207_v23, %v2223_v56  ;;  %v2228_v28 = vadd.s32 127, %v2227_v16  ;;  %v2319_v18 = vand.u32 65535, %v2315_v27  ;;  %v2320_v15 = vshrl.u32 %v2315_v27, 16 }
 0x22a   :  { %v2343_v10 = vmul.u32 %v2341_v37, %v2317_v0  ;;  %v2344_v33 = vmul.u32 %v2342_v5, %v2317_v0  ;;  %v2345_v36 = vmul.u32 %v2341_v37, %v2318_v22  ;;  %v2240_v26 = vsel %vm7146_vm12, 0, %v7179_v1 }
 0x22b   :  { %v2226_v32 = vor.u32 %v2225_v29, %v2224_v40  ;;  %v2229_v23 = vshll.u32 %v2228_v28, 23  ;;  %v2321_v46 = vmul.u32 %v2319_v18, %v2317_v0  ;;  %v2322_v24 = vmul.u32 %v2320_v15, %v2317_v0 }
 0x22c   :  { %v2323_v7 = vmul.u32 %v2319_v18, %v2318_v22  ;;  %v2346_v61 = vmul.u32 %v2342_v5, %v2318_v22  ;;  %v2347_v4 = vshll.u32 %v2344_v33, 16  ;;  %v2324_v62 = vmul.u32 %v2320_v15, %v2318_v22 }
 0x22d   :  { %v2230_v6 = vor.u32 4788187, %v2229_v23  ;;  %v2233_v19 = vcvt.s32.f32 %v2226_v32  ;;  %v2325_v59 = vshll.u32 %v2322_v24, 16  ;;  %v2437_v3 = vand.u32 31, %v2435_v55 }
 0x22e   :  { %v7192_v9 = vsel %vm2301_vm11, %v2304_v41, %v2306_v63  ;;  %v2327_v44 = vshll.u32 %v2323_v7, 16  ;;  %v2349_v48 = vshll.u32 %v2345_v36, 16  ;;  %vm2351_vm14 = vc.u32 %v2343_v10, %v2347_v4 }
 0x22f   :  { %v2231_v57 = vand.u32 2147483647, %v2230_v6  ;;  %vm2329_vm15 = vc.u32 %v2321_v46, %v2325_v59  ;;  %v2331_v0 = vadd.s32 %v2325_v59, %v2321_v46  ;;  %v2352_v56 = vsel %vm2351_vm14, 1, %v5435_v8 }
 0x230   :  { %v2326_v40 = vshrl.u32 %v2322_v24, 16  ;;  %v2330_v16 = vsel %vm2329_vm15, 1, %v5435_v8  ;;  %v2353_v2 = vadd.s32 %v2347_v4, %v2343_v10  ;;  %v2354_v29 = vadd.s32 %v2352_v56, %v2346_v61 }
 0x231   :  { %v2234_v31 = vmul.f32 %v2233_v19, %v2231_v57  ;;  %v2332_v28 = vadd.s32 %v2330_v16, %v2324_v62  ;;  %vm2333_vm0 = vc.u32 %v2331_v0, %v2327_v44  ;;  %v7196_v55 = vsub.s32 32, %v2437_v3 }
 0x232   :  { %v2328_v21 = vshrl.u32 %v2323_v7, 16  ;;  %v2334_v54 = vsel %vm2333_vm0, 1, %v5435_v8  ;;  %v2348_v37 = vshrl.u32 %v2344_v33, 16  ;;  %vm2355_vm1 = vc.u32 %v2353_v2, %v2349_v48 }
 0x233   :  { %v2235_v22 = vxor.u32 2147483648, %v2234_v31  ;;  %v2336_v41 = vadd.s32 %v2334_v54, %v2332_v28  ;;  %v2350_v27 = vshrl.u32 %v2345_v36, 16  ;;  %v2356_v5 = vsel %vm2355_vm1, 1, %v5435_v8 }
 0x234   :  { %v7205_v23 = vadd.s32 %v2353_v2, %v2349_v48  ;;  %v2358_v18 = vadd.s32 %v2356_v5, %v2354_v29  ;;  %v2440_v15 = vshll.u32 %v5429_v43, %v2437_v3  ;;  %v2443_v33 = vshll.u32 %v5430_v45, %v2437_v3 }
 0x235   :  { %v2236_v1 = vsel %vm2115_vm9, %v2235_v22, %v2234_v31  ;;  %v2337_v10 = vadd.s32 %v2336_v41, %v2326_v40  ;;  %v2444_v6 = vshrl.u32 %v5431_v47, %v7196_v55  ;;  %v2446_v36 = vshll.u32 %v5431_v47, %v2437_v3 }
 0x236   :  { %v2239_v32 = vsel %vm7146_vm12, %v6826_v30, %v2236_v1  ;;  %v2359_v19 = vadd.s32 %v2358_v18, %v2348_v37  ;;  %v2447_v46 = vshrl.u32 %v5432_v49, %v7196_v55  ;;  %v2449_v50 = vshll.u32 %v5432_v49, %v2437_v3 }
 0x237   :  { %v2241_v63 = vmul.f32 %v2239_v32, %v2239_v32  ;;  %v7215_v61 = vadd.s32 %v2337_v10, %v2328_v21  ;;  %v2450_v4 = vshrl.u32 %v5433_v51, %v7196_v55  ;;  %v2441_v62 = vshrl.u32 %v5430_v45, %v7196_v55 }
 0x238   :  { %v2360_v57 = vadd.s32 %v2359_v19, %v2350_v27  ;;  %v2452_v59 = vshll.u32 %v5433_v51, %v2437_v3  ;;  %v2453_v44 = vshrl.u32 %v5434_v60, %v7196_v55  ;;  %v2361_v0 = vmul.u32 %v7092_v58, %v7192_v9 }
 0x239   :  { %v2242_v24 = vmul.f32 -0.001358992, %v2241_v63  ;;  %v2249_v7 = vmul.f32 -0.00019511016, %v2241_v63  ;;  %vm2363_vm2 = vc.u32 %v7215_v61, %v7205_v23  ;;  %v2257_v56 = vadd.s32 3, %v2240_v26 }
 0x23a   :  { %v2364_v40 = vadd.s32 1, %v2360_v57  ;;  %v2451_v16 = vor.u32 %v2450_v4, %v2449_v50  ;;  %v2454_v2 = vor.u32 %v2453_v44, %v2452_v59  ;;  %v7228_v28 = vor.u32 %v2444_v6, %v2443_v33 }
 0x23b   :  { %v2243_v48 = vadd.f32 0.041655596, %v2242_v24  ;;  %v2250_v31 = vadd.f32 0.008332121, %v2249_v7  ;;  %v7230_v3 = vor.u32 %v2447_v46, %v2446_v36  ;;  %v7232_v54 = vor.u32 %v2441_v62, %v2440_v15 }
 0x23c   :  { %v2365_v21 = vsel %vm2363_vm2, %v2364_v40, %v2360_v57  ;;  %vm2455_vm3 = vcmp.lt.s32.totalorder %v7171_v20, 1  ;;  %vm2458_vm4 = vcmp.lt.s32.totalorder %v7171_v20, 4  ;;  %vm2457_vm5 = vcmp.lt.s32.totalorder %v7171_v20, 3 }
 0x23d   :  { %v2244_v29 = vmul.f32 %v2243_v48, %v2241_v63  ;;  %v2251_v22 = vmul.f32 %v2250_v31, %v2241_v63  ;;  %v2366_v37 = vadd.s32 %v2365_v21, %v2361_v0  ;;  %v2258_v26 = vand.u32 3, %v2257_v56 }
 0x23e   :  { %vm2456_vm6 = vcmp.lt.s32.totalorder %v7171_v20, 2  ;;  %v2464_v1 = vsel %vm2458_vm4, %v2451_v16, 920167782  ;;  %v2468_v41 = vsel %vm2458_vm4, %v2454_v2, 1326507024  ;;  %v2467_v15 = vsel %vm2455_vm3, %v7228_v28, %v7230_v3 }
 0x23f   :  { %v2245_v58 = vadd.f32 -0.4999988, %v2244_v29  ;;  %v2252_v9 = vadd.f32 -0.16666654, %v2251_v22  ;;  %v2367_v18 = vadd.s32 536870912, %v2366_v37  ;;  %v2463_v10 = vsel %vm2455_vm3, %v7232_v54, %v7228_v28 }
 0x240   :  { %v2465_v33 = vsel %vm2457_vm5, %v7230_v3, %v2464_v1  ;;  %v2469_v6 = vsel %vm2457_vm5, %v2451_v16, %v2468_v41  ;;  %vm2256_vm7 = vweird.f32 %v6826_v30  ;;  %vm2260_vm8 = vcmp.eq.s32.totalorder %v2258_v26, 0 }
 0x241   :  { %v2246_v27 = vmul.f32 %v2245_v58, %v2241_v63  ;;  %v2253_v5 = vmul.f32 %v2252_v9, %v2241_v63  ;;  %v7256_v36 = vshrl.u32 %v2367_v18, 30  ;;  %vm2263_vm9 = vcmp.eq.s32.totalorder %v2258_v26, 2 }
 0x242   :  { %v2470_v46 = vsel %vm2456_vm6, %v2467_v15, %v2469_v6  ;;  %v7262_v50 = vshll.u32 %v2431_v34, 8  ;;  %v2466_v57 = vsel %vm2456_vm6, %v2463_v10, %v2465_v33  ;;  %vm2259_vm10 = vcmp.lt.s32.totalorder %v2258_v26, 2 }
 0x243   :  { %v2247_v19 = vadd.f32 1.0, %v2246_v27  ;;  %v2254_v63 = vadd.f32 1.0, %v2253_v5  ;;  %v2369_v4 = vshll.u32 %v7256_v36, 30  ;;  %v2474_v44 = vand.u32 65535, %v2470_v46 }
 0x244   :  { %v2472_v62 = vand.u32 65535, %v7262_v50  ;;  %v2473_v59 = vshrl.u32 %v7262_v50, 16  ;;  %v2475_v48 = vshrl.u32 %v2470_v46, 16  ;;  %v2496_v29 = vand.u32 65535, %v2466_v57 }
 0x245   :  { %v2255_v24 = vmul.f32 %v2254_v63, %v2239_v32  ;;  %v2264_v7 = vxor.u32 2147483648, %v2247_v19  ;;  %v2370_v56 = vsub.s32 %v2366_v37, %v2369_v4  ;;  %v2497_v32 = vshrl.u32 %v2466_v57, 16 }
 0x246   :  { %v2476_v35 = vmul.u32 %v2474_v44, %v2472_v62  ;;  %v2477_v34 = vmul.u32 %v2475_v48, %v2472_v62  ;;  %v2478_v40 = vmul.u32 %v2474_v44, %v2473_v59  ;;  %v2479_v21 = vmul.u32 %v2475_v48, %v2473_v59 }
 0x247   :  { %v2261_v31 = vxor.u32 2147483648, %v2255_v24  ;;  %v2265_v0 = vsel %vm2263_vm9, %v2264_v7, %v2255_v24  ;;  %vm2371_vm11 = vcmp.lt.s32.totalorder %v2370_v56, 0  ;;  %v2372_v2 = vsub.s32 0, %v2370_v56 }
 0x248   :  { %v2480_v58 = vshll.u32 %v2477_v34, 16  ;;  %v2482_v9 = vshll.u32 %v2478_v40, 16  ;;  %v2499_v5 = vmul.u32 %v2497_v32, %v2472_v62  ;;  %v2498_v18 = vmul.u32 %v2496_v29, %v2472_v62 }
 0x249   :  { %v2262_v16 = vsel %vm2260_vm8, %v2247_v19, %v2261_v31  ;;  %v2373_v41 = vsel %vm2371_vm11, %v2372_v2, %v2370_v56  ;;  %v2500_v15 = vmul.u32 %v2496_v29, %v2473_v59  ;;  %vm2270_vm14 = vcmp.lt.s32.totalorder %v7036_v42, 0 }
 0x24a   :  { %v2266_v22 = vsel %vm2259_vm10, %v2262_v16, %v2265_v0  ;;  %v2374_v27 = vclz %v2373_v41  ;;  %vm2484_vm12 = vc.u32 %v2476_v35, %v2480_v58  ;;  %v2486_v37 = vadd.s32 %v2480_v58, %v2476_v35 }
 0x24b   :  { %v7272_v1 = vsel %vm2256_vm7, nan, %v2266_v22  ;;  %v2485_v26 = vsel %vm2484_vm12, 1, %v5435_v8  ;;  %v2502_v6 = vshll.u32 %v2499_v5, 16  ;;  %v2439_v30 = vshrl.u32 %v5429_v43, %v7196_v55 }
 0x24c   :  { %2580 = vst [vmem:[#allocation3 + $0x68] sm:$0xff] %v7272_v1  ;;  %v5338_v10 = vadd.s32 4294967294, %v2374_v27  ;;  %v2487_v33 = vadd.s32 %v2485_v26, %v2479_v21  ;;  %vm2488_vm13 = vc.u32 %v2486_v37, %v2482_v9  ;;  %v2481_v19 = vshrl.u32 %v2477_v34, 16 }
 0x24d   :  { %v2489_v63 = vsel %vm2488_vm13, 1, %v5435_v8  ;;  %v2362_v46 = vadd.s32 %v7205_v23, %v7215_v61  ;;  %v2501_v7 = vmul.u32 %v2497_v32, %v2473_v59  ;;  %v2504_v57 = vshll.u32 %v2500_v15, 16 }
 0x24e   :  { %vm5339_vm15 = vcmp.lt.s32.totalorder %v5338_v10, 0  ;;  %v2491_v24 = vadd.s32 %v2489_v63, %v2487_v33  ;;  %vm2506_vm0 = vc.u32 %v2498_v18, %v2502_v6  ;;  %v2508_v62 = vadd.s32 %v2502_v6, %v2498_v18 }
 0x24f   :  { %v2377_v4 = vsel %vm5339_vm15, 0, %v5338_v10  ;;  %v2460_v55 = vsel %vm2458_vm4, %v7230_v3, 2102212464  ;;  %v2392_v0 = vsub.s32 4, %v7256_v36  ;;  %v2483_v35 = vshrl.u32 %v2478_v40, 16 }
 0x250   :  { %v2378_v44 = vsub.s32 32, %v2377_v4  ;;  %v2379_v48 = vshll.u32 %v2370_v56, %v2377_v4  ;;  %v2382_v31 = vsub.s32 4294967266, %v2377_v4  ;;  %v2492_v34 = vadd.s32 %v2491_v24, %v2481_v19 }
 0x251   :  { %v2507_v23 = vsel %vm2506_vm0, 1, %v5435_v8  ;;  %v2459_v59 = vsel %vm2455_vm3, %v2439_v30, %v7232_v54  ;;  %v2503_v2 = vshrl.u32 %v2499_v5, 16  ;;  %vm2510_vm1 = vc.u32 %v2508_v62, %v2504_v57 }
 0x252   :  { %v2380_v61 = vshrl.u32 %v2362_v46, %v2378_v44  ;;  %v2383_v16 = vadd.s32 127, %v2382_v31  ;;  %v2509_v32 = vadd.s32 %v2507_v23, %v2501_v7  ;;  %v2591_v56 = vadd.f32 16384.0, %v5456_v12 }
 0x253   :  { %v2592_v29 = vadd.f32 16384.0, %v5458_v13  ;;  %v2461_v40 = vsel %vm2457_vm5, %v7228_v28, %v2460_v55  ;;  %v2511_v21 = vsel %vm2510_vm1, 1, %v5435_v8  ;;  %v2393_v58 = vsel %vm2270_vm14, %v2392_v0, %v7256_v36 }
 0x254   :  { %v2381_v3 = vor.u32 %v2380_v61, %v2379_v48  ;;  %v2384_v22 = vshll.u32 %v2383_v16, 23  ;;  %v2493_v54 = vadd.s32 %v2492_v34, %v2483_v35  ;;  %v2505_v9 = vshrl.u32 %v2500_v15, 16 }
 0x255   :  { %v2513_v41 = vadd.s32 %v2511_v21, %v2509_v32  ;;  %v2512_v5 = vadd.s32 %v2508_v62, %v2504_v57  ;;  %v7300_v26 = vmul.f32 %v2591_v56, %v5454_v11  ;;  %vm7304_vm2 = vcmp.le.f32.partialorder %v2268_v25, 0.7853982 }
 0x256   :  { %v2385_v27 = vor.u32 4788187, %v2384_v22  ;;  %v2388_v37 = vcvt.s32.f32 %v2381_v3  ;;  %v2462_v28 = vsel %vm2456_vm6, %v2459_v59, %v2461_v40  ;;  %v7311_v36 = vmul.f32 %v2592_v29, %v5454_v11 }
 0x257   :  { %v2514_v10 = vadd.s32 %v2513_v41, %v2503_v2  ;;  %v2599_v33 = vand.u32 2147483647, %v7300_v26  ;;  %v2602_v6 = vand.u32 2139095040, %v7300_v26  ;;  %v2395_v30 = vsel %vm7304_vm2, 0, %v2393_v58 }
 0x258   :  { %v2386_v15 = vand.u32 2147483647, %v2385_v27  ;;  %v2516_v63 = vmul.u32 %v7262_v50, %v2462_v28  ;;  %vm2518_vm3 = vc.u32 %v2493_v54, %v2512_v5  ;;  %v2757_v7 = vand.u32 2139095040, %v7311_v36 }
 0x259   :  { %v2515_v19 = vadd.s32 %v2514_v10, %v2505_v9  ;;  %v2603_v46 = vshrl.u32 %v2602_v6, 23  ;;  %v2606_v24 = vand.u32 8388607, %v2599_v33  ;;  %v2412_v62 = vadd.s32 3, %v2395_v30 }
 0x25a   :  { %v2389_v25 = vmul.f32 %v2388_v37, %v2386_v15  ;;  %v2754_v35 = vand.u32 2147483647, %v7311_v36  ;;  %v2758_v34 = vshrl.u32 %v2757_v7, 23  ;;  %vm2425_vm5 = vcmp.lt.s32.totalorder %v7060_v38, 0 }
 0x25b   :  { %v2519_v20 = vadd.s32 1, %v2515_v19  ;;  %v5343_v57 = vadd.s32 4294967169, %v2603_v46  ;;  %v2607_v0 = vor.u32 8388608, %v2606_v24  ;;  %v7327_v16 = vand.u32 3, %v2412_v62 }
 0x25c   :  { %v2390_v4 = vxor.u32 2147483648, %v2389_v25  ;;  %v5346_v22 = vadd.s32 4294967169, %v2758_v34  ;;  %v7333_v40 = vand.u32 8388607, %v2754_v35  ;;  %vm7339_vm7 = vcmp.le.f32.partialorder %v2423_v39, 0.7853982 }
 0x25d   :  { %v2520_v44 = vsel %vm2518_vm3, %v2519_v20, %v2515_v19  ;;  %v2609_v55 = vadd.s32 1, %v5343_v57  ;;  %v7329_v3 = vshll.u32 %v2607_v0, 8  ;;  %vm2418_vm6 = vcmp.eq.s32.totalorder %v7327_v16, 2 }
 0x25e   :  { %v2391_v48 = vsel %vm2270_vm14, %v2390_v4, %v2389_v25  ;;  %v2521_v31 = vadd.s32 %v2520_v44, %v2516_v63  ;;  %v2517_v10 = vadd.s32 %v2512_v5, %v2493_v54  ;;  %vm2415_vm8 = vcmp.eq.s32.totalorder %v7327_v16, 0 }
 0x25f   :  { %v2394_v50 = vsel %vm7304_vm2, %v7036_v42, %v2391_v48  ;;  %vm2610_vm4 = vcmp.gt.s32.totalorder %v2609_v55, 0  ;;  %v7346_v30 = vand.u32 65535, %v7329_v3  ;;  %v2762_v19 = vor.u32 8388608, %v7333_v40 }
 0x260   :  { %v2396_v23 = vmul.f32 %v2394_v50, %v2394_v50  ;;  %v2522_v61 = vadd.s32 536870912, %v2521_v31  ;;  %v2611_v59 = vsel %vm2610_vm4, %v2609_v55, 0  ;;  %v7349_v25 = vadd.s32 1, %v5346_v22 }
 0x261   :  { %v2613_v29 = vand.u32 31, %v2611_v59  ;;  %vm2414_vm9 = vcmp.lt.s32.totalorder %v7327_v16, 2  ;;  %vm2411_vm11 = vweird.f32 %v7036_v42 }
 0x262   :  { %v2397_v32 = vmul.f32 -0.001358992, %v2396_v23  ;;  %v2404_v2 = vmul.f32 -0.00019511016, %v2396_v23  ;;  %v2523_v56 = vshrl.u32 %v2522_v61, 30  ;;  %v7362_v61 = vshrl.u32 %v2611_v59, 5 }
 0x263   :  { %v2614_v37 = vsub.s32 32, %v2613_v29  ;;  %v2616_v6 = vshll.u32 %v5429_v43, %v2613_v29  ;;  %v2619_v20 = vshll.u32 %v5430_v45, %v2613_v29  ;;  %v2622_v24 = vshll.u32 %v5431_v47, %v2613_v29 }
 0x264   :  { %v2398_v21 = vadd.f32 0.041655596, %v2397_v32  ;;  %v2405_v58 = vadd.f32 0.008332121, %v2404_v2  ;;  %v2524_v9 = vshll.u32 %v2523_v56, 30  ;;  %v2547_v27 = vsub.s32 4, %v2523_v56 }
 0x265   :  { %v2617_v5 = vshrl.u32 %v5430_v45, %v2614_v37  ;;  %v2620_v62 = vshrl.u32 %v5431_v47, %v2614_v37  ;;  %v2623_v48 = vshrl.u32 %v5432_v49, %v2614_v37  ;;  %v2626_v55 = vshrl.u32 %v5433_v51, %v2614_v37 }
 0x266   :  { %v2399_v18 = vmul.f32 %v2398_v21, %v2396_v23  ;;  %v2406_v28 = vmul.f32 %v2405_v58, %v2396_v23  ;;  %v2525_v15 = vsub.s32 %v2521_v31, %v2524_v9  ;;  %v2548_v54 = vsel %vm2425_vm5, %v2547_v27, %v2523_v56 }
 0x267   :  { %v2625_v31 = vshll.u32 %v5432_v49, %v2613_v29  ;;  %v7365_v32 = vshrl.u32 %v7329_v3, 16  ;;  %v2615_v56 = vshrl.u32 %v5429_v43, %v2614_v37  ;;  %v2618_v22 = vor.u32 %v2617_v5, %v2616_v6 }
 0x268   :  { %v2400_v39 = vadd.f32 -0.4999988, %v2399_v18  ;;  %v2407_v63 = vadd.f32 -0.16666654, %v2406_v28  ;;  %vm2526_vm10 = vcmp.lt.s32.totalorder %v2525_v15, 0  ;;  %v2527_v46 = vsub.s32 0, %v2525_v15 }
 0x269   :  { %v2628_v9 = vshll.u32 %v5433_v51, %v2613_v29  ;;  %v2629_v27 = vshrl.u32 %v5434_v60, %v2614_v37  ;;  %v2621_v18 = vor.u32 %v2620_v62, %v2619_v20  ;;  %v2624_v59 = vor.u32 %v2623_v48, %v2622_v24 }
 0x26a   :  { %v2401_v7 = vmul.f32 %v2400_v39, %v2396_v23  ;;  %v2408_v4 = vmul.f32 %v2407_v63, %v2396_v23  ;;  %v2528_v57 = vsel %vm2526_vm10, %v2527_v46, %v2525_v15  ;;  %v2550_v23 = vsel %vm7339_vm7, 0, %v2548_v54 }
 0x26b   :  { %v2529_v44 = vclz %v2528_v57  ;;  %v2627_v28 = vor.u32 %v2626_v55, %v2625_v31  ;;  %vm2631_vm13 = vcmp.lt.s32.totalorder %v7362_v61, 1  ;;  %v2630_v37 = vor.u32 %v2629_v27, %v2628_v9 }
 0x26c   :  { %v2402_v0 = vadd.f32 1.0, %v2401_v7  ;;  %v2409_v34 = vadd.f32 1.0, %v2408_v4  ;;  %vm2632_vm14 = vcmp.lt.s32.totalorder %v7362_v61, 2  ;;  %vm2634_vm15 = vcmp.lt.s32.totalorder %v7362_v61, 4 }
 0x26d   :  { %v5341_v2 = vadd.s32 4294967294, %v2529_v44  ;;  %vm2633_vm0 = vcmp.lt.s32.totalorder %v7362_v61, 3  ;;  %v2636_v57 = vsel %vm2634_vm15, %v2624_v59, 2102212464  ;;  %v2639_v16 = vsel %vm2631_vm13, %v2618_v22, %v2621_v18 }
 0x26e   :  { %v2410_v21 = vmul.f32 %v2409_v34, %v2394_v50  ;;  %v2419_v58 = vxor.u32 2147483648, %v2402_v0  ;;  %v2583_v50 = vand.u32 2147483647, %v7166_v52  ;;  %v2584_v52 = vand.u32 2147483647, %v7272_v1 }
 0x26f   :  { %vm5342_vm12 = vcmp.lt.s32.totalorder %v5341_v2, 0  ;;  %v2643_v42 = vsel %vm2631_vm13, %v2621_v18, %v2624_v59  ;;  %v2644_v1 = vsel %vm2634_vm15, %v2630_v37, 1326507024  ;;  %vm2765_vm1 = vcmp.gt.s32.totalorder %v7349_v25, 0 }
 0x270   :  { %v2416_v39 = vxor.u32 2147483648, %v2410_v21  ;;  %v2420_v63 = vsel %vm2418_vm6, %v2419_v58, %v2410_v21  ;;  %v2532_v46 = vsel %vm5342_vm12, 0, %v5341_v2  ;;  %v2590_v4 = vmax.f32 %v2583_v50, %v7031_v17 }
 0x271   :  { %v2533_v54 = vsub.s32 32, %v2532_v46  ;;  %v2534_v7 = vshll.u32 %v2525_v15, %v2532_v46  ;;  %v2537_v6 = vsub.s32 4294967266, %v2532_v46  ;;  %v2640_v17 = vsel %vm2634_vm15, %v2627_v28, 920167782 }
 0x272   :  { %v2417_v29 = vsel %vm2415_vm8, %v2402_v0, %v2416_v39  ;;  %v2641_v0 = vsel %vm2633_vm0, %v2624_v59, %v2640_v17  ;;  %v2645_v34 = vsel %vm2633_vm0, %v2627_v28, %v2644_v1  ;;  %v2567_v2 = vadd.s32 3, %v2550_v23 }
 0x273   :  { %v2421_v5 = vsel %vm2414_vm9, %v2417_v29, %v2420_v63  ;;  %v2535_v20 = vshrl.u32 %v2517_v10, %v2533_v54  ;;  %v2538_v24 = vadd.s32 127, %v2537_v6  ;;  %v3228_v10 = vmax.f32 %v2584_v52, %v2590_v4 }
 0x274   :  { %v2422_v15 = vsel %vm2411_vm11, nan, %v2421_v5  ;;  %v2642_v58 = vsel %vm2632_vm14, %v2639_v16, %v2641_v0  ;;  %v2646_v27 = vsel %vm2632_vm14, %v2643_v42, %v2645_v34  ;;  %v2635_v59 = vsel %vm2631_vm13, %v2615_v56, %v2618_v22 }
 0x275   :  { %v2536_v62 = vor.u32 %v2535_v20, %v2534_v7  ;;  %v2539_v44 = vshll.u32 %v2538_v24, 23  ;;  %2581 = vst [vmem:[#allocation3 + $0x70] sm:$0xff] %v2422_v15  ;;  %v2585_v48 = vand.u32 2147483647, %v2422_v15  ;;  %v2672_v39 = vand.u32 65535, %v2642_v58 }
 0x276   :  { %v2673_v63 = vshrl.u32 %v2642_v58, 16  ;;  %v2637_v28 = vsel %vm2633_vm0, %v2621_v18, %v2636_v57  ;;  %v2650_v23 = vand.u32 65535, %v2646_v27  ;;  %v2651_v46 = vshrl.u32 %v2646_v27, 16 }
 0x277   :  { %v2540_v31 = vor.u32 4788187, %v2539_v44  ;;  %v2543_v55 = vcvt.s32.f32 %v2536_v62  ;;  %v7401_v21 = vmax.f32 %v2585_v48, %v3228_v10  ;;  %v2674_v7 = vmul.u32 %v2672_v39, %v7346_v30 }
 0x278   :  { %v2675_v6 = vmul.u32 %v2673_v63, %v7346_v30  ;;  %v2676_v50 = vmul.u32 %v2672_v39, %v7365_v32  ;;  %v2652_v29 = vmul.u32 %v2650_v23, %v7346_v30  ;;  %v2653_v37 = vmul.u32 %v2651_v46, %v7346_v30 }
 0x279   :  { %v2541_v9 = vand.u32 2147483647, %v2540_v31  ;;  %v2654_v5 = vmul.u32 %v2650_v23, %v7365_v32  ;;  %v2766_v56 = vsel %vm2765_vm1, %v7349_v25, 0  ;;  %v7421_v18 = vand.u32 3, %v2567_v2 }
 0x27a   :  { %v2677_v20 = vmul.u32 %v2673_v63, %v7365_v32  ;;  %v2678_v24 = vshll.u32 %v2675_v6, 16  ;;  %v7426_v4 = vsel %vm2632_vm14, %v2635_v59, %v2637_v28  ;;  %v2655_v15 = vmul.u32 %v2651_v46, %v7365_v32 }
 0x27b   :  { %v2544_v54 = vmul.f32 %v2543_v55, %v2541_v9  ;;  %v2656_v52 = vshll.u32 %v2653_v37, 16  ;;  %v2658_v30 = vshll.u32 %v2654_v5, 16  ;;  %v2679_v62 = vshrl.u32 %v2675_v6, 16 }
 0x27c   :  { %v2680_v44 = vshll.u32 %v2676_v50, 16  ;;  %vm2682_vm2 = vc.u32 %v2674_v7, %v2678_v24  ;;  %v2684_v32 = vadd.s32 %v2678_v24, %v2674_v7  ;;  %v2657_v42 = vshrl.u32 %v2653_v37, 16 }
 0x27d   :  { %v2545_v22 = vxor.u32 2147483648, %v2544_v54  ;;  %vm2660_vm3 = vc.u32 %v2652_v29, %v2656_v52  ;;  %v2662_v48 = vadd.s32 %v2656_v52, %v2652_v29  ;;  %v2683_v61 = vsel %vm2682_vm2, 1, %v5435_v8 }
 0x27e   :  { %v2661_v10 = vsel %vm2660_vm3, 1, %v5435_v8  ;;  %v2685_v17 = vadd.s32 %v2683_v61, %v2677_v20  ;;  %v2768_v31 = vand.u32 31, %v2766_v56  ;;  %v2659_v41 = vshrl.u32 %v2654_v5, 16 }
 0x27f   :  { %v2546_v57 = vsel %vm2425_vm5, %v2545_v22, %v2544_v54  ;;  %v2663_v1 = vadd.s32 %v2661_v10, %v2655_v15  ;;  %vm2664_vm4 = vc.u32 %v2662_v48, %v2658_v30  ;;  %vm2686_vm5 = vc.u32 %v2684_v32, %v2680_v44 }
 0x280   :  { %v2549_v25 = vsel %vm7339_vm7, %v7060_v38, %v2546_v57  ;;  %v2665_v34 = vsel %vm2664_vm4, 1, %v5435_v8  ;;  %v2687_v58 = vsel %vm2686_vm5, 1, %v5435_v8  ;;  %v7438_v9 = vsub.s32 32, %v2768_v31 }
 0x281   :  { %v2551_v16 = vmul.f32 %v2549_v25, %v2549_v25  ;;  %v2667_v2 = vadd.s32 %v2665_v34, %v2663_v1  ;;  %v2681_v63 = vshrl.u32 %v2676_v50, 16  ;;  %v2689_v59 = vadd.s32 %v2687_v58, %v2685_v17 }
 0x282   :  { %vm2573_vm6 = vcmp.eq.s32.totalorder %v7421_v18, 2  ;;  %v7441_v23 = vadd.s32 %v2684_v32, %v2680_v44  ;;  %v2692_v46 = vmul.u32 %v7329_v3, %v7426_v4  ;;  %v2771_v29 = vshll.u32 %v5429_v43, %v2768_v31 }
 0x283   :  { %v2552_v55 = vmul.f32 -0.001358992, %v2551_v16  ;;  %v2559_v0 = vmul.f32 -0.00019511016, %v2551_v16  ;;  %v2668_v28 = vadd.s32 %v2667_v2, %v2657_v42  ;;  %v2690_v6 = vadd.s32 %v2689_v59, %v2679_v62 }
 0x284   :  { %v2772_v5 = vshrl.u32 %v5430_v45, %v7438_v9  ;;  %v2774_v50 = vshll.u32 %v5430_v45, %v2768_v31  ;;  %v2775_v22 = vshrl.u32 %v5431_v47, %v7438_v9  ;;  %v7453_v52 = vshrl.u32 %v2766_v56, 5 }
 0x285   :  { %v2553_v27 = vadd.f32 0.041655596, %v2552_v55  ;;  %v2560_v39 = vadd.f32 0.008332121, %v2559_v0  ;;  %v7446_v37 = vadd.s32 %v2668_v28, %v2659_v41  ;;  %v2691_v15 = vadd.s32 %v2690_v6, %v2681_v63 }
 0x286   :  { %v2777_v3 = vshll.u32 %v5431_v47, %v2768_v31  ;;  %v2778_v4 = vshrl.u32 %v5432_v49, %v7438_v9  ;;  %v2780_v30 = vshll.u32 %v5432_v49, %v2768_v31  ;;  %v2781_v48 = vshrl.u32 %v5433_v51, %v7438_v9 }
 0x287   :  { %v2554_v54 = vmul.f32 %v2553_v27, %v2551_v16  ;;  %v2561_v7 = vmul.f32 %v2560_v39, %v2551_v16  ;;  %vm2694_vm7 = vc.u32 %v7446_v37, %v7441_v23  ;;  %v2695_v44 = vadd.s32 1, %v2691_v15 }
 0x288   :  { %v7463_v61 = vor.u32 %v2772_v5, %v2771_v29  ;;  %v7465_v56 = vor.u32 %v2775_v22, %v2774_v50  ;;  %v2783_v10 = vshll.u32 %v5433_v51, %v2768_v31  ;;  %v2784_v32 = vshrl.u32 %v5434_v60, %v7438_v9 }
 0x289   :  { %v2555_v20 = vadd.f32 -0.4999988, %v2554_v54  ;;  %v2562_v24 = vadd.f32 -0.16666654, %v2561_v7  ;;  %v2696_v1 = vsel %vm2694_vm7, %v2695_v44, %v2691_v15  ;;  %v2782_v55 = vor.u32 %v2781_v48, %v2780_v30 }
 0x28a   :  { %v2697_v0 = vadd.s32 %v2696_v1, %v2692_v46  ;;  %v2779_v34 = vor.u32 %v2778_v4, %v2777_v3  ;;  %vm2789_vm8 = vcmp.lt.s32.totalorder %v7453_v52, 4  ;;  %vm2566_vm9 = vweird.f32 %v7060_v38 }
 0x28b   :  { %v2556_v57 = vmul.f32 %v2555_v20, %v2551_v16  ;;  %v2563_v62 = vmul.f32 %v2562_v24, %v2551_v16  ;;  %v2785_v16 = vor.u32 %v2784_v32, %v2783_v10  ;;  %vm2786_vm10 = vcmp.lt.s32.totalorder %v7453_v52, 1 }
 0x28c   :  { %vm2570_vm11 = vcmp.eq.s32.totalorder %v7421_v18, 0  ;;  %v2698_v31 = vadd.s32 536870912, %v2697_v0  ;;  %vm2788_vm12 = vcmp.lt.s32.totalorder %v7453_v52, 3  ;;  %v2795_v58 = vsel %vm2789_vm8, %v2782_v55, 920167782 }
 0x28d   :  { %v2557_v17 = vadd.f32 1.0, %v2556_v57  ;;  %v2564_v42 = vadd.f32 1.0, %v2563_v62  ;;  %vm2569_vm13 = vcmp.lt.s32.totalorder %v7421_v18, 2  ;;  %vm2787_vm14 = vcmp.lt.s32.totalorder %v7453_v52, 2 }
 0x28e   :  { %v2794_v63 = vsel %vm2786_vm10, %v7463_v61, %v7465_v56  ;;  %v2798_v59 = vsel %vm2786_vm10, %v7465_v56, %v2779_v34  ;;  %v2799_v28 = vsel %vm2789_vm8, %v2785_v16, 1326507024  ;;  %v2796_v18 = vsel %vm2788_vm12, %v2779_v34, %v2795_v58 }
 0x28f   :  { %v2565_v41 = vmul.f32 %v2564_v42, %v2549_v25  ;;  %v2574_v2 = vxor.u32 2147483648, %v2557_v17  ;;  %v7481_v25 = vshrl.u32 %v2698_v31, 30  ;;  %v2800_v54 = vsel %vm2788_vm12, %v2782_v55, %v2799_v28 }
 0x290   :  { %v7498_v7 = vshll.u32 %v2762_v19, 8  ;;  %v2593_v29 = vadd.f32 16384.0, %v5460_v14  ;;  %v2801_v50 = vsel %vm2787_vm14, %v2798_v59, %v2800_v54  ;;  %v2797_v3 = vsel %vm2787_vm14, %v2794_v63, %v2796_v18 }
 0x291   :  { %v2571_v27 = vxor.u32 2147483648, %v2565_v41  ;;  %v2575_v39 = vsel %vm2573_vm6, %v2574_v2, %v2565_v41  ;;  %v2700_v5 = vshll.u32 %v7481_v25, 30  ;;  %v2805_v15 = vand.u32 65535, %v2801_v50 }
 0x292   :  { %v2803_v20 = vand.u32 65535, %v7498_v7  ;;  %v2804_v24 = vshrl.u32 %v7498_v7, 16  ;;  %v2806_v4 = vshrl.u32 %v2801_v50, 16  ;;  %v2594_v30 = vadd.f32 16384.0, %v5668_v53 }
 0x293   :  { %v2572_v46 = vsel %vm2570_vm11, %v2557_v17, %v2571_v27  ;;  %v2701_v19 = vsub.s32 %v2697_v0, %v2700_v5  ;;  %v2827_v44 = vand.u32 65535, %v2797_v3  ;;  %v2828_v32 = vshrl.u32 %v2797_v3, 16 }
 0x294   :  { %v2576_v6 = vsel %vm2569_vm13, %v2572_v46, %v2575_v39  ;;  %v2807_v57 = vmul.u32 %v2805_v15, %v2803_v20  ;;  %v7511_v62 = vmul.u32 %v2805_v15, %v2804_v24  ;;  %v2808_v10 = vmul.u32 %v2806_v4, %v2803_v20 }
 0x295   :  { %v2577_v22 = vsel %vm2566_vm9, nan, %v2576_v6  ;;  %vm2702_vm15 = vcmp.lt.s32.totalorder %v2701_v19, 0  ;;  %v2703_v48 = vsub.s32 0, %v2701_v19  ;;  %v2810_v42 = vmul.u32 %v2806_v4, %v2804_v24 }
 0x296   :  { %2582 = vst [vmem:[#allocation3 + $0x78] sm:$0xff] %v2577_v22  ;;  %v2586_v40 = vand.u32 2147483647, %v2577_v22  ;;  %v2811_v1 = vshll.u32 %v2808_v10, 16  ;;  %v2813_v55 = vshll.u32 %v7511_v62, 16  ;;  %v7518_v0 = vmul.f32 %v2593_v29, %v5454_v11 }
 0x297   :  { %v2704_v17 = vsel %vm2702_vm15, %v2703_v48, %v2701_v19  ;;  %v7521_v16 = vmul.f32 %v2594_v30, %v5454_v11  ;;  %v2830_v2 = vmul.u32 %v2828_v32, %v2803_v20  ;;  %v2829_v31 = vmul.u32 %v2827_v44, %v2803_v20 }
 0x298   :  { %v7514_v38 = vmax.f32 %v2586_v40, %v7401_v21  ;;  %v2705_v41 = vclz %v2704_v17  ;;  %vm2815_vm0 = vc.u32 %v2807_v57, %v2811_v1  ;;  %v2817_v21 = vadd.s32 %v2811_v1, %v2807_v57 }
 0x299   :  { %v2831_v58 = vmul.u32 %v2827_v44, %v2804_v24  ;;  %v2770_v39 = vshrl.u32 %v5429_v43, %v7438_v9  ;;  %v2816_v63 = vsel %vm2815_vm0, 1, %v5435_v8  ;;  %v2833_v59 = vshll.u32 %v2830_v2, 16 }
 0x29a   :  { %v5344_v27 = vadd.s32 4294967294, %v2705_v41  ;;  %v2693_v28 = vadd.s32 %v7441_v23, %v7446_v37  ;;  %v2791_v46 = vsel %vm2789_vm8, %v2779_v34, 2102212464  ;;  %v2818_v18 = vadd.s32 %v2816_v63, %v2810_v42 }
 0x29b   :  { %vm2819_vm1 = vc.u32 %v2817_v21, %v2813_v55  ;;  %v2812_v54 = vshrl.u32 %v2808_v10, 16  ;;  %v2832_v29 = vmul.u32 %v2828_v32, %v2804_v24  ;;  %v2835_v22 = vshll.u32 %v2831_v58, 16 }
 0x29c   :  { %vm5345_vm2 = vcmp.lt.s32.totalorder %v5344_v27, 0  ;;  %v2820_v6 = vsel %vm2819_vm1, 1, %v5435_v8  ;;  %vm2837_vm3 = vc.u32 %v2829_v31, %v2833_v59  ;;  %vm2601_vm4 = vcmp.lt.s32.totalorder %v7300_v26, 0 }
 0x29d   :  { %v2708_v5 = vsel %vm5345_vm2, 0, %v5344_v27  ;;  %v2822_v50 = vadd.s32 %v2820_v6, %v2818_v18  ;;  %v2838_v40 = vsel %vm2837_vm3, 1, %v5435_v8  ;;  %v2723_v23 = vsub.s32 4, %v7481_v25 }
 0x29e   :  { %v2709_v9 = vsub.s32 32, %v2708_v5  ;;  %v2710_v20 = vshll.u32 %v2701_v19, %v2708_v5  ;;  %v2713_v15 = vsub.s32 4294967266, %v2708_v5  ;;  %v2790_v37 = vsel %vm2786_vm10, %v2770_v39, %v7463_v61 }
 0x29f   :  { %v2792_v34 = vsel %vm2788_vm12, %v7465_v56, %v2791_v46  ;;  %v2839_v4 = vadd.s32 %v2833_v59, %v2829_v31  ;;  %v2840_v30 = vadd.s32 %v2838_v40, %v2832_v29  ;;  %v2814_v19 = vshrl.u32 %v7511_v62, 16 }
 0x2a0   :  { %v2711_v24 = vshrl.u32 %v2693_v28, %v2709_v9  ;;  %v2714_v3 = vadd.s32 127, %v2713_v15  ;;  %v2823_v57 = vadd.s32 %v2822_v50, %v2812_v54  ;;  %v2909_v44 = vand.u32 2147483647, %v7518_v0 }
 0x2a1   :  { %v2912_v48 = vand.u32 2139095040, %v7518_v0  ;;  %v2834_v17 = vshrl.u32 %v2830_v2, 16  ;;  %vm2841_vm5 = vc.u32 %v2839_v4, %v2835_v22  ;;  %vm7545_vm6 = vcmp.le.f32.partialorder %v2599_v33, 0.7853982 }
 0x2a2   :  { %v2712_v10 = vor.u32 %v2711_v24, %v2710_v20  ;;  %v2715_v32 = vshll.u32 %v2714_v3, 23  ;;  %v2724_v56 = vsel %vm2601_vm4, %v2723_v23, %v7481_v25  ;;  %v2842_v62 = vsel %vm2841_vm5, 1, %v5435_v8 }
 0x2a3   :  { %v2913_v42 = vshrl.u32 %v2912_v48, 23  ;;  %v2836_v41 = vshrl.u32 %v2831_v58, 16  ;;  %v2844_v21 = vadd.s32 %v2842_v62, %v2840_v30  ;;  %v2793_v2 = vsel %vm2787_vm14, %v2790_v37, %v2792_v34 }
 0x2a4   :  { %v2716_v1 = vor.u32 4788187, %v2715_v32  ;;  %v2719_v55 = vcvt.s32.f32 %v2712_v10  ;;  %v2824_v31 = vadd.s32 %v2823_v57, %v2814_v19  ;;  %v2843_v27 = vadd.s32 %v2839_v4, %v2835_v22 }
 0x2a5   :  { %v5349_v33 = vadd.s32 4294967169, %v2913_v42  ;;  %v2726_v63 = vsel %vm7545_vm6, 0, %v2724_v56  ;;  %v2845_v59 = vadd.s32 %v2844_v21, %v2834_v17  ;;  %v2916_v25 = vand.u32 8388607, %v2909_v44 }
 0x2a6   :  { %v2717_v39 = vand.u32 2147483647, %v2716_v1  ;;  %v3067_v46 = vand.u32 2139095040, %v7521_v16  ;;  %v2743_v54 = vadd.s32 3, %v2726_v63  ;;  %v2847_v52 = vmul.u32 %v7498_v7, %v2793_v2 }
 0x2a7   :  { %v2919_v28 = vadd.s32 1, %v5349_v33  ;;  %v2846_v58 = vadd.s32 %v2845_v59, %v2836_v41  ;;  %vm2849_vm7 = vc.u32 %v2824_v31, %v2843_v27  ;;  %v2917_v5 = vor.u32 8388608, %v2916_v25 }
 0x2a8   :  { %v2720_v18 = vmul.f32 %v2719_v55, %v2717_v39  ;;  %v3068_v9 = vshrl.u32 %v3067_v46, 23  ;;  %v7568_v23 = vand.u32 3, %v2743_v54  ;;  %v7572_v24 = vadd.s32 %v2843_v27, %v2824_v31 }
 0x2a9   :  { %vm2920_vm8 = vcmp.gt.s32.totalorder %v2919_v28, 0  ;;  %v2850_v29 = vadd.s32 1, %v2846_v58  ;;  %v7574_v3 = vshll.u32 %v2917_v5, 8  ;;  %v3064_v4 = vand.u32 2147483647, %v7521_v16 }
 0x2aa   :  { %v2721_v6 = vxor.u32 2147483648, %v2720_v18  ;;  %v2921_v50 = vsel %vm2920_vm8, %v2919_v28, 0  ;;  %v5352_v48 = vadd.s32 4294967169, %v3068_v9  ;;  %vm2749_vm9 = vcmp.eq.s32.totalorder %v7568_v23, 2 }
 0x2ab   :  { %v2923_v22 = vand.u32 31, %v2921_v50  ;;  %v2851_v15 = vsel %vm2849_vm7, %v2850_v29, %v2846_v58  ;;  %v7577_v19 = vshrl.u32 %v2921_v50, 5  ;;  %v7591_v39 = vand.u32 65535, %v7574_v3 }
 0x2ac   :  { %v2722_v20 = vsel %vm2601_vm4, %v2721_v6, %v2720_v18  ;;  %v2852_v7 = vadd.s32 %v2851_v15, %v2847_v52  ;;  %vm2756_vm10 = vcmp.lt.s32.totalorder %v7311_v36, 0  ;;  %v3074_v28 = vadd.s32 1, %v5352_v48 }
 0x2ad   :  { %v7566_v40 = vsel %vm7545_vm6, %v7300_v26, %v2722_v20  ;;  %v2924_v37 = vsub.s32 32, %v2923_v22  ;;  %v2926_v57 = vshll.u32 %v5429_v43, %v2923_v22  ;;  %v2929_v17 = vshll.u32 %v5430_v45, %v2923_v22 }
 0x2ae   :  { %v2727_v34 = vmul.f32 %v7566_v40, %v7566_v40  ;;  %v2853_v30 = vadd.s32 536870912, %v2852_v7  ;;  %v2935_v61 = vshll.u32 %v5432_v49, %v2923_v22  ;;  %v2932_v21 = vshll.u32 %v5431_v47, %v2923_v22 }
 0x2af   :  { %v2927_v62 = vshrl.u32 %v5430_v45, %v2924_v37  ;;  %v2930_v42 = vshrl.u32 %v5431_v47, %v2924_v37  ;;  %v2936_v1 = vshrl.u32 %v5433_v51, %v2924_v37  ;;  %v2933_v2 = vshrl.u32 %v5432_v49, %v2924_v37 }
 0x2b0   :  { %v2728_v10 = vmul.f32 -0.001358992, %v2727_v34  ;;  %v2735_v32 = vmul.f32 -0.00019511016, %v2727_v34  ;;  %v2854_v56 = vshrl.u32 %v2853_v30, 30  ;;  %v2938_v27 = vshll.u32 %v5433_v51, %v2923_v22 }
 0x2b1   :  { %v2939_v33 = vshrl.u32 %v5434_v60, %v2924_v37  ;;  %v2925_v25 = vshrl.u32 %v5429_v43, %v2924_v37  ;;  %vm2746_vm11 = vcmp.eq.s32.totalorder %v7568_v23, 0  ;;  %v2928_v18 = vor.u32 %v2927_v62, %v2926_v57 }
 0x2b2   :  { %v2729_v55 = vadd.f32 0.041655596, %v2728_v10  ;;  %v2736_v41 = vadd.f32 0.008332121, %v2735_v32  ;;  %v2855_v31 = vshll.u32 %v2854_v56, 30  ;;  %v2931_v58 = vor.u32 %v2930_v42, %v2929_v17 }
 0x2b3   :  { %v2937_v54 = vor.u32 %v2936_v1, %v2935_v61  ;;  %vm2745_vm12 = vcmp.lt.s32.totalorder %v7568_v23, 2  ;;  %v2934_v29 = vor.u32 %v2933_v2, %v2932_v21  ;;  %vm2941_vm13 = vcmp.lt.s32.totalorder %v7577_v19, 1 }
 0x2b4   :  { %v2730_v63 = vmul.f32 %v2729_v55, %v2727_v34  ;;  %v2737_v59 = vmul.f32 %v2736_v41, %v2727_v34  ;;  %v7596_v46 = vsub.s32 %v2852_v7, %v2855_v31  ;;  %vm2742_vm14 = vweird.f32 %v7300_v26 }
 0x2b5   :  { %v2940_v50 = vor.u32 %v2939_v33, %v2938_v27  ;;  %vm2944_vm0 = vcmp.lt.s32.totalorder %v7577_v19, 4  ;;  %v2878_v20 = vsub.s32 4, %v2854_v56  ;;  %vm2943_vm1 = vcmp.lt.s32.totalorder %v7577_v19, 3 }
 0x2b6   :  { %v2731_v52 = vadd.f32 -0.4999988, %v2730_v63  ;;  %v2738_v6 = vadd.f32 -0.16666654, %v2737_v59  ;;  %vm2857_vm15 = vcmp.lt.s32.totalorder %v7596_v46, 0  ;;  %v2858_v5 = vsub.s32 0, %v7596_v46 }
 0x2b7   :  { %vm2942_vm2 = vcmp.lt.s32.totalorder %v7577_v19, 2  ;;  %v2949_v7 = vsel %vm2941_vm13, %v2928_v18, %v2931_v58  ;;  %v2950_v37 = vsel %vm2944_vm0, %v2937_v54, 920167782  ;;  %vm7613_vm3 = vcmp.le.f32.partialorder %v2754_v35, 0.7853982 }
 0x2b8   :  { %v2732_v22 = vmul.f32 %v2731_v52, %v2727_v34  ;;  %v2739_v9 = vmul.f32 %v2738_v6, %v2727_v34  ;;  %v2859_v15 = vsel %vm2857_vm15, %v2858_v5, %v7596_v46  ;;  %v2959_v10 = vshrl.u32 %v7574_v3, 16 }
 0x2b9   :  { %v2860_v34 = vclz %v2859_v15  ;;  %v2946_v32 = vsel %vm2944_vm0, %v2934_v29, 2102212464  ;;  %v2951_v17 = vsel %vm2943_vm1, %v2934_v29, %v2950_v37  ;;  %v2953_v61 = vsel %vm2941_vm13, %v2931_v58, %v2934_v29 }
 0x2ba   :  { %v2733_v30 = vadd.f32 1.0, %v2732_v22  ;;  %v2740_v57 = vadd.f32 1.0, %v2739_v9  ;;  %v2954_v62 = vsel %vm2944_vm0, %v2940_v50, 1326507024  ;;  %v2952_v55 = vsel %vm2942_vm2, %v2949_v7, %v2951_v17 }
 0x2bb   :  { %v5347_v1 = vadd.s32 4294967294, %v2860_v34  ;;  %v7631_v41 = vsel %vm2756_vm10, %v2878_v20, %v2854_v56  ;;  %v2945_v21 = vsel %vm2941_vm13, %v2925_v25, %v2928_v18  ;;  %v2955_v2 = vsel %vm2943_vm1, %v2937_v54, %v2954_v62 }
 0x2bc   :  { %v2741_v35 = vmul.f32 %v2740_v57, %v7566_v40  ;;  %v2750_v42 = vxor.u32 2147483648, %v2733_v30  ;;  %vm3075_vm4 = vcmp.gt.s32.totalorder %v3074_v28, 0  ;;  %v2947_v27 = vsel %vm2943_vm1, %v2931_v58, %v2946_v32 }
 0x2bd   :  { %vm5348_vm5 = vcmp.lt.s32.totalorder %v5347_v1, 0  ;;  %v2956_v56 = vsel %vm2942_vm2, %v2953_v61, %v2955_v2  ;;  %v2982_v63 = vand.u32 65535, %v2952_v55  ;;  %v2983_v59 = vshrl.u32 %v2952_v55, 16 }
 0x2be   :  { %v2747_v31 = vxor.u32 2147483648, %v2741_v35  ;;  %v2751_v40 = vsel %vm2749_vm9, %v2750_v42, %v2741_v35  ;;  %v2863_v33 = vsel %vm5348_vm5, 0, %v5347_v1  ;;  %v7650_v29 = vsel %vm2942_vm2, %v2945_v21, %v2947_v27 }
 0x2bf   :  { %v2864_v18 = vsub.s32 32, %v2863_v33  ;;  %v2865_v54 = vshll.u32 %v7596_v46, %v2863_v33  ;;  %v2868_v52 = vsub.s32 4294967266, %v2863_v33  ;;  %v7654_v58 = vand.u32 8388607, %v3064_v4 }
 0x2c0   :  { %v2748_v25 = vsel %vm2746_vm11, %v2733_v30, %v2747_v31  ;;  %v3076_v5 = vsel %vm3075_vm4, %v3074_v28, 0  ;;  %v2960_v9 = vand.u32 65535, %v2956_v56  ;;  %v2881_v23 = vsel %vm7613_vm3, 0, %v7631_v41 }
 0x2c1   :  { %v2752_v6 = vsel %vm2745_vm12, %v2748_v25, %v2751_v40  ;;  %v2866_v46 = vshrl.u32 %v7572_v24, %v2864_v18  ;;  %v2869_v22 = vadd.s32 127, %v2868_v52  ;;  %v2961_v19 = vshrl.u32 %v2956_v56, 16 }
 0x2c2   :  { %v7659_v50 = vsel %vm2742_vm14, nan, %v2752_v6  ;;  %v2985_v20 = vmul.u32 %v2983_v59, %v7591_v39  ;;  %v2986_v15 = vmul.u32 %v2982_v63, %v2959_v10  ;;  %v2964_v37 = vmul.u32 %v2960_v9, %v2959_v10 }
 0x2c3   :  { %3220 = vst [vmem:[#allocation3 + $0x80] sm:$0xff] %v7659_v50  ;;  %v2867_v7 = vor.u32 %v2866_v46, %v2865_v54  ;;  %v2870_v28 = vshll.u32 %v2869_v22, 23  ;;  %v2984_v26 = vmul.u32 %v2982_v63, %v7591_v39  ;;  %v2962_v30 = vmul.u32 %v2960_v9, %v7591_v39 }
 0x2c4   :  { %v2963_v24 = vmul.u32 %v2961_v19, %v7591_v39  ;;  %v2988_v57 = vshll.u32 %v2985_v20, 16  ;;  %v3002_v34 = vmul.u32 %v7574_v3, %v7650_v29  ;;  %v2965_v61 = vmul.u32 %v2961_v19, %v2959_v10 }
 0x2c5   :  { %v2871_v32 = vor.u32 4788187, %v2870_v28  ;;  %v2874_v17 = vcvt.s32.f32 %v2867_v7  ;;  %v2987_v62 = vmul.u32 %v2983_v59, %v2959_v10  ;;  %v2968_v42 = vshll.u32 %v2964_v37, 16 }
 0x2c6   :  { %v2966_v35 = vshll.u32 %v2963_v24, 16  ;;  %v2989_v1 = vshrl.u32 %v2985_v20, 16  ;;  %v2990_v55 = vshll.u32 %v2986_v15, 16  ;;  %vm2992_vm6 = vc.u32 %v2984_v26, %v2988_v57 }
 0x2c7   :  { %v2872_v41 = vand.u32 2147483647, %v2871_v32  ;;  %v2994_v21 = vadd.s32 %v2988_v57, %v2984_v26  ;;  %v3078_v2 = vand.u32 31, %v3076_v5  ;;  %v2967_v31 = vshrl.u32 %v2963_v24, 16 }
 0x2c8   :  { %vm2970_vm7 = vc.u32 %v2962_v30, %v2966_v35  ;;  %v2972_v40 = vadd.s32 %v2966_v35, %v2962_v30  ;;  %v2993_v39 = vsel %vm2992_vm6, 1, %v5435_v8  ;;  %v2991_v10 = vshrl.u32 %v2986_v15, 16 }
 0x2c9   :  { %v2875_v27 = vmul.f32 %v2874_v17, %v2872_v41  ;;  %v2971_v3 = vsel %vm2970_vm7, 1, %v5435_v8  ;;  %v2995_v33 = vadd.s32 %v2993_v39, %v2987_v62  ;;  %vm2996_vm8 = vc.u32 %v2994_v21, %v2990_v55 }
 0x2ca   :  { %v2973_v56 = vadd.s32 %v2971_v3, %v2965_v61  ;;  %vm2974_vm9 = vc.u32 %v2972_v40, %v2968_v42  ;;  %v2997_v63 = vsel %vm2996_vm8, 1, %v5435_v8  ;;  %v7676_v54 = vsub.s32 32, %v3078_v2 }
 0x2cb   :  { %v2876_v59 = vxor.u32 2147483648, %v2875_v27  ;;  %v2975_v25 = vsel %vm2974_vm9, 1, %v5435_v8  ;;  %v2999_v18 = vadd.s32 %v2997_v63, %v2995_v33  ;;  %v2898_v52 = vadd.s32 3, %v2881_v23 }
 0x2cc   :  { %v2969_v6 = vshrl.u32 %v2964_v37, 16  ;;  %v2977_v29 = vadd.s32 %v2975_v25, %v2973_v56  ;;  %v7678_v46 = vshrl.u32 %v3076_v5, 5  ;;  %v7682_v9 = vadd.s32 %v2994_v21, %v2990_v55 }
 0x2cd   :  { %v2877_v22 = vsel %vm2756_vm10, %v2876_v59, %v2875_v27  ;;  %v3000_v19 = vadd.s32 %v2999_v18, %v2989_v1  ;;  %v3081_v20 = vshll.u32 %v5429_v43, %v3078_v2  ;;  %v3082_v23 = vshrl.u32 %v5430_v45, %v7676_v54 }
 0x2ce   :  { %v2880_v15 = vsel %vm7613_vm3, %v7311_v36, %v2877_v22  ;;  %v2978_v7 = vadd.s32 %v2977_v29, %v2967_v31  ;;  %v3084_v28 = vshll.u32 %v5430_v45, %v3078_v2  ;;  %v3085_v26 = vshrl.u32 %v5431_v47, %v7676_v54 }
 0x2cf   :  { %v2882_v5 = vmul.f32 %v2880_v15, %v2880_v15  ;;  %v3001_v37 = vadd.s32 %v3000_v19, %v2991_v10  ;;  %v3087_v30 = vshll.u32 %v5431_v47, %v3078_v2  ;;  %v3088_v57 = vshrl.u32 %v5432_v49, %v7676_v54 }
 0x2d0   :  { %v7694_v24 = vadd.s32 %v2978_v7, %v2969_v6  ;;  %v3090_v48 = vshll.u32 %v5432_v49, %v3078_v2  ;;  %v3091_v32 = vshrl.u32 %v5433_v51, %v7676_v54  ;;  %v3093_v35 = vshll.u32 %v5433_v51, %v3078_v2 }
 0x2d1   :  { %v2883_v17 = vmul.f32 -0.001358992, %v2882_v5  ;;  %v2890_v61 = vmul.f32 -0.00019511016, %v2882_v5  ;;  %v3005_v62 = vadd.s32 1, %v3001_v37  ;;  %v7704_v42 = vor.u32 %v3082_v23, %v3081_v20 }
 0x2d2   :  { %vm3004_vm10 = vc.u32 %v7694_v24, %v7682_v9  ;;  %v3094_v1 = vshrl.u32 %v5434_v60, %v7676_v54  ;;  %vm3096_vm11 = vcmp.lt.s32.totalorder %v7678_v46, 1  ;;  %v7709_v31 = vor.u32 %v3085_v26, %v3084_v28 }
 0x2d3   :  { %v2884_v55 = vadd.f32 0.041655596, %v2883_v17  ;;  %v2891_v41 = vadd.f32 0.008332121, %v2890_v61  ;;  %v3006_v21 = vsel %vm3004_vm10, %v3005_v62, %v3001_v37  ;;  %v3089_v39 = vor.u32 %v3088_v57, %v3087_v30 }
 0x2d4   :  { %v3007_v40 = vadd.s32 %v3006_v21, %v3002_v34  ;;  %v3092_v27 = vor.u32 %v3091_v32, %v3090_v48  ;;  %v3095_v3 = vor.u32 %v3094_v1, %v3093_v35  ;;  %vm3099_vm12 = vcmp.lt.s32.totalorder %v7678_v46, 4 }
 0x2d5   :  { %v2885_v2 = vmul.f32 %v2884_v55, %v2882_v5  ;;  %v2892_v33 = vmul.f32 %v2891_v41, %v2882_v5  ;;  %v2899_v56 = vand.u32 3, %v2898_v52  ;;  %v3072_v63 = vor.u32 8388608, %v7654_v58 }
 0x2d6   :  { %v3008_v10 = vadd.s32 536870912, %v3007_v40  ;;  %vm3098_vm13 = vcmp.lt.s32.totalorder %v7678_v46, 3  ;;  %vm3097_vm14 = vcmp.lt.s32.totalorder %v7678_v46, 2  ;;  %v3104_v34 = vsel %vm3096_vm11, %v7704_v42, %v7709_v31 }
 0x2d7   :  { %v2886_v59 = vadd.f32 -0.4999988, %v2885_v2  ;;  %v2893_v25 = vadd.f32 -0.16666654, %v2892_v33  ;;  %v3105_v6 = vsel %vm3099_vm12, %v3092_v27, 920167782  ;;  %v3108_v58 = vsel %vm3096_vm11, %v7709_v31, %v3089_v39 }
 0x2d8   :  { %v7719_v18 = vshrl.u32 %v3008_v10, 30  ;;  %v3109_v52 = vsel %vm3099_vm12, %v3095_v3, 1326507024  ;;  %v3106_v19 = vsel %vm3098_vm13, %v3089_v39, %v3105_v6  ;;  %v7737_v30 = vshll.u32 %v3072_v63, 8 }
 0x2d9   :  { %v2887_v29 = vmul.f32 %v2886_v59, %v2882_v5  ;;  %v2894_v22 = vmul.f32 %v2893_v25, %v2882_v5  ;;  %v3110_v20 = vsel %vm3098_vm13, %v3092_v27, %v3109_v52  ;;  %v3107_v23 = vsel %vm3097_vm14, %v3104_v34, %v3106_v19 }
 0x2da   :  { %v3010_v7 = vshll.u32 %v7719_v18, 30  ;;  %v3111_v28 = vsel %vm3097_vm14, %v3108_v58, %v3110_v20  ;;  %vm2900_vm15 = vcmp.lt.s32.totalorder %v2899_v56, 2  ;;  %vm2904_vm0 = vcmp.eq.s32.totalorder %v2899_v56, 2 }
 0x2db   :  { %v2888_v37 = vadd.f32 1.0, %v2887_v29  ;;  %v2895_v26 = vadd.f32 1.0, %v2894_v22  ;;  %v3115_v57 = vand.u32 65535, %v3111_v28  ;;  %v3116_v48 = vshrl.u32 %v3111_v28, 16 }
 0x2dc   :  { %v3011_v5 = vsub.s32 %v3007_v40, %v3010_v7  ;;  %vm2901_vm1 = vcmp.eq.s32.totalorder %v2899_v56, 0  ;;  %v3113_v61 = vand.u32 65535, %v7737_v30  ;;  %v3114_v35 = vshrl.u32 %v7737_v30, 16 }
 0x2dd   :  { %v2896_v32 = vmul.f32 %v2895_v26, %v2880_v15  ;;  %v2905_v17 = vxor.u32 2147483648, %v2888_v37  ;;  %v3138_v1 = vshrl.u32 %v3107_v23, 16  ;;  %vm2897_vm3 = vweird.f32 %v7311_v36 }
 0x2de   :  { %vm3012_vm2 = vcmp.lt.s32.totalorder %v3011_v5, 0  ;;  %v3013_v62 = vsub.s32 0, %v3011_v5  ;;  %v3117_v21 = vmul.u32 %v3115_v57, %v3113_v61  ;;  %v3118_v27 = vmul.u32 %v3116_v48, %v3113_v61 }
 0x2df   :  { %v2902_v55 = vxor.u32 2147483648, %v2896_v32  ;;  %v2906_v41 = vsel %vm2904_vm0, %v2905_v17, %v2896_v32  ;;  %v3119_v2 = vmul.u32 %v3115_v57, %v3114_v35  ;;  %v3137_v40 = vand.u32 65535, %v3107_v23 }
 0x2e0   :  { %v3014_v3 = vsel %vm3012_vm2, %v3013_v62, %v3011_v5  ;;  %v3120_v10 = vmul.u32 %v3116_v48, %v3114_v35  ;;  %v3121_v63 = vshll.u32 %v3118_v27, 16  ;;  %v3080_v25 = vshrl.u32 %v5429_v43, %v7676_v54 }
 0x2e1   :  { %v2903_v33 = vsel %vm2901_vm1, %v2888_v37, %v2902_v55  ;;  %v3015_v15 = vclz %v3014_v3  ;;  %v3123_v34 = vshll.u32 %v3119_v2, 16  ;;  %v3140_v6 = vmul.u32 %v3138_v1, %v3113_v61 }
 0x2e2   :  { %v2907_v59 = vsel %vm2900_vm15, %v2903_v33, %v2906_v41  ;;  %vm3125_vm4 = vc.u32 %v3117_v21, %v3121_v63  ;;  %v3127_v29 = vadd.s32 %v3121_v63, %v3117_v21  ;;  %v3003_v36 = vadd.s32 %v7682_v9, %v7694_v24 }
 0x2e3   :  { %v7745_v58 = vsel %vm2897_vm3, nan, %v2907_v59  ;;  %v5350_v52 = vadd.s32 4294967294, %v3015_v15  ;;  %v3101_v22 = vsel %vm3099_vm12, %v3089_v39, 2102212464  ;;  %v3126_v19 = vsel %vm3125_vm4, 1, %v5435_v8 }
 0x2e4   :  { %v3139_v56 = vmul.u32 %v3137_v40, %v3113_v61  ;;  %3221 = vst [vmem:[#allocation3 + $0x88] sm:$0xff] %v7745_v58  ;;  %v3128_v54 = vadd.s32 %v3126_v19, %v3120_v10  ;;  %vm3129_vm6 = vc.u32 %v3127_v29, %v3123_v34  ;;  %v3141_v20 = vmul.u32 %v3137_v40, %v3114_v35 }
 0x2e5   :  { %vm5351_vm5 = vcmp.lt.s32.totalorder %v5350_v52, 0  ;;  %v3122_v23 = vshrl.u32 %v3118_v27, 16  ;;  %v3130_v28 = vsel %vm3129_vm6, 1, %v5435_v8  ;;  %v3143_v37 = vshll.u32 %v3140_v6, 16 }
 0x2e6   :  { %v3018_v7 = vsel %vm5351_vm5, 0, %v5350_v52  ;;  %v3132_v24 = vadd.s32 %v3130_v28, %v3128_v54  ;;  %vm2911_vm7 = vcmp.lt.s32.totalorder %v7518_v0, 0  ;;  %v3100_v39 = vsel %vm3096_vm11, %v3080_v25, %v7704_v42 }
 0x2e7   :  { %v3019_v26 = vsub.s32 32, %v3018_v7  ;;  %v3020_v57 = vshll.u32 %v3011_v5, %v3018_v7  ;;  %v3023_v9 = vsub.s32 4294967266, %v3018_v7  ;;  %v3142_v48 = vmul.u32 %v3138_v1, %v3114_v35 }
 0x2e8   :  { %v3102_v61 = vsel %vm3098_vm13, %v7709_v31, %v3101_v22  ;;  %v3145_v62 = vshll.u32 %v3141_v20, 16  ;;  %v3033_v55 = vsub.s32 4, %v7719_v18  ;;  %v3124_v41 = vshrl.u32 %v3119_v2, 16 }
 0x2e9   :  { %v3021_v32 = vshrl.u32 %v3003_v36, %v3019_v26  ;;  %v3024_v17 = vadd.s32 127, %v3023_v9  ;;  %vm3147_vm8 = vc.u32 %v3139_v56, %v3143_v37  ;;  %v3149_v5 = vadd.s32 %v3143_v37, %v3139_v56 }
 0x2ea   :  { %v3133_v3 = vadd.s32 %v3132_v24, %v3122_v23  ;;  %v3148_v40 = vsel %vm3147_vm8, 1, %v5435_v8  ;;  %v3144_v33 = vshrl.u32 %v3140_v6, 16  ;;  %v3232_v35 = vadd.f32 20480.0, %v5456_v12 }
 0x2eb   :  { %v3022_v21 = vor.u32 %v3021_v32, %v3020_v57  ;;  %v3025_v27 = vshll.u32 %v3024_v17, 23  ;;  %v3150_v42 = vadd.s32 %v3148_v40, %v3142_v48  ;;  %vm3151_vm9 = vc.u32 %v3149_v5, %v3145_v62 }
 0x2ec   :  { %v3152_v31 = vsel %vm3151_vm9, 1, %v5435_v8  ;;  %v3233_v10 = vadd.f32 20480.0, %v5458_v13  ;;  %v3034_v2 = vsel %vm2911_vm7, %v3033_v55, %v7719_v18  ;;  %v3146_v63 = vshrl.u32 %v3141_v20, 16 }
 0x2ed   :  { %v3026_v1 = vor.u32 4788187, %v3025_v27  ;;  %v3029_v15 = vcvt.s32.f32 %v3022_v21  ;;  %v3154_v59 = vadd.s32 %v3152_v31, %v3150_v42  ;;  %v3134_v34 = vadd.s32 %v3133_v3, %v3124_v41 }
 0x2ee   :  { %v3153_v52 = vadd.s32 %v3149_v5, %v3145_v62  ;;  %v7770_v6 = vmul.f32 %v3232_v35, %v5454_v11  ;;  %v3103_v29 = vsel %vm3097_vm14, %v3100_v39, %v3102_v61  ;;  %v7775_v22 = vmul.f32 %v3233_v10, %v5454_v11 }
 0x2ef   :  { %v3027_v25 = vand.u32 2147483647, %v3026_v1  ;;  %v3155_v36 = vadd.s32 %v3154_v59, %v3144_v33  ;;  %vm7779_vm10 = vcmp.le.f32.partialorder %v2909_v44, 0.7853982  ;;  %v3157_v23 = vmul.u32 %v7737_v30, %v3103_v29 }
 0x2f0   :  { %v3240_v56 = vand.u32 2147483647, %v7770_v6  ;;  %v3243_v54 = vand.u32 2139095040, %v7770_v6  ;;  %v3036_v20 = vsel %vm7779_vm10, 0, %v3034_v2  ;;  %vm3159_vm11 = vc.u32 %v3134_v34, %v3153_v52 }
 0x2f1   :  { %v3030_v18 = vmul.f32 %v3029_v15, %v3027_v25  ;;  %v3156_v46 = vadd.s32 %v3155_v36, %v3146_v63  ;;  %v3398_v26 = vand.u32 2139095040, %v7775_v22  ;;  %v3053_v39 = vadd.s32 3, %v3036_v20 }
 0x2f2   :  { %v3244_v28 = vshrl.u32 %v3243_v54, 23  ;;  %v3247_v44 = vand.u32 8388607, %v3240_v56  ;;  %v3395_v62 = vand.u32 2147483647, %v7775_v22  ;;  %vm3066_vm15 = vcmp.lt.s32.totalorder %v7521_v16, 0 }
 0x2f3   :  { %v3031_v7 = vxor.u32 2147483648, %v3030_v18  ;;  %v3160_v37 = vadd.s32 1, %v3156_v46  ;;  %v3399_v55 = vshrl.u32 %v3398_v26, 23  ;;  %v7797_v27 = vand.u32 3, %v3053_v39 }
 0x2f4   :  { %v5355_v9 = vadd.s32 4294967169, %v3244_v28  ;;  %v3248_v61 = vor.u32 8388608, %v3247_v44  ;;  %v7803_v31 = vand.u32 8388607, %v3395_v62  ;;  %v3158_v36 = vadd.s32 %v3153_v52, %v3134_v34 }
 0x2f5   :  { %v3032_v57 = vsel %vm2911_vm7, %v3031_v7, %v3030_v18  ;;  %v3161_v48 = vsel %vm3159_vm11, %v3160_v37, %v3156_v46  ;;  %v5358_v15 = vadd.s32 4294967169, %v3399_v55  ;;  %vm3056_vm13 = vcmp.eq.s32.totalorder %v7797_v27, 0 }
 0x2f6   :  { %v3035_v24 = vsel %vm7779_vm10, %v7518_v0, %v3032_v57  ;;  %v3162_v30 = vadd.s32 %v3161_v48, %v3157_v23  ;;  %v3250_v17 = vadd.s32 1, %v5355_v9  ;;  %v7799_v1 = vshll.u32 %v3248_v61, 8 }
 0x2f7   :  { %v3037_v32 = vmul.f32 %v3035_v24, %v3035_v24  ;;  %vm3059_vm14 = vcmp.eq.s32.totalorder %v7797_v27, 2  ;;  %vm3055_vm0 = vcmp.lt.s32.totalorder %v7797_v27, 2  ;;  %vm3052_vm1 = vweird.f32 %v7518_v0 }
 0x2f8   :  { %v3163_v21 = vadd.s32 536870912, %v3162_v30  ;;  %vm3251_vm12 = vcmp.gt.s32.totalorder %v3250_v17, 0  ;;  %v7811_v54 = vand.u32 65535, %v7799_v1  ;;  %v3403_v20 = vor.u32 8388608, %v7803_v31 }
 0x2f9   :  { %v3038_v41 = vmul.f32 -0.001358992, %v3037_v32  ;;  %v3045_v5 = vmul.f32 -0.00019511016, %v3037_v32  ;;  %v3252_v3 = vsel %vm3251_vm12, %v3250_v17, 0  ;;  %v7814_v46 = vadd.s32 1, %v5358_v15 }
 0x2fa   :  { %v3164_v42 = vshrl.u32 %v3163_v21, 30  ;;  %v3254_v35 = vand.u32 31, %v3252_v3  ;;  %v7816_v37 = vshrl.u32 %v3252_v3, 5  ;;  %v7821_v52 = vshrl.u32 %v7799_v1, 16 }
 0x2fb   :  { %v3039_v40 = vadd.f32 0.041655596, %v3038_v41  ;;  %v3046_v33 = vadd.f32 0.008332121, %v3045_v5  ;;  %vm7832_vm3 = vcmp.le.f32.partialorder %v3064_v4, 0.7853982 }
 0x2fc   :  { %v3165_v63 = vshll.u32 %v3164_v42, 30  ;;  %v3255_v59 = vsub.s32 32, %v3254_v35  ;;  %v3188_v18 = vsub.s32 4, %v3164_v42  ;;  %v3257_v44 = vshll.u32 %v5429_v43, %v3254_v35 }
 0x2fd   :  { %v3040_v10 = vmul.f32 %v3039_v40, %v3037_v32  ;;  %v3047_v2 = vmul.f32 %v3046_v33, %v3037_v32  ;;  %v3260_v39 = vshll.u32 %v5430_v45, %v3254_v35  ;;  %v3263_v5 = vshll.u32 %v5431_v47, %v3254_v35 }
 0x2fe   :  { %v3166_v19 = vsub.s32 %v3162_v30, %v3165_v63  ;;  %v3258_v34 = vshrl.u32 %v5430_v45, %v3255_v59  ;;  %v3261_v30 = vshrl.u32 %v5431_v47, %v3255_v59  ;;  %v3267_v17 = vshrl.u32 %v5433_v51, %v3255_v59 }
 0x2ff   :  { %v3041_v25 = vadd.f32 -0.4999988, %v3040_v10  ;;  %v3048_v29 = vadd.f32 -0.16666654, %v3047_v2  ;;  %v3189_v41 = vsel %vm3066_vm15, %v3188_v18, %v3164_v42  ;;  %v3256_v40 = vshrl.u32 %v5429_v43, %v3255_v59 }
 0x300   :  { %vm3167_vm2 = vcmp.lt.s32.totalorder %v3166_v19, 0  ;;  %v3168_v28 = vsub.s32 0, %v3166_v19  ;;  %v3259_v33 = vor.u32 %v3258_v34, %v3257_v44  ;;  %v3264_v15 = vshrl.u32 %v5432_v49, %v3255_v59 }
 0x301   :  { %v3042_v7 = vmul.f32 %v3041_v25, %v3037_v32  ;;  %v3049_v23 = vmul.f32 %v3048_v29, %v3037_v32  ;;  %v3266_v32 = vshll.u32 %v5432_v49, %v3254_v35  ;;  %v3269_v42 = vshll.u32 %v5433_v51, %v3254_v35 }
 0x302   :  { %v3169_v9 = vsel %vm3167_vm2, %v3168_v28, %v3166_v19  ;;  %v3270_v2 = vshrl.u32 %v5434_v60, %v3255_v59  ;;  %vm3406_vm4 = vcmp.gt.s32.totalorder %v7814_v46, 0  ;;  %v3262_v4 = vor.u32 %v3261_v30, %v3260_v39 }
 0x303   :  { %v3043_v26 = vadd.f32 1.0, %v3042_v7  ;;  %v3050_v57 = vadd.f32 1.0, %v3049_v23  ;;  %v3170_v48 = vclz %v3169_v9  ;;  %v3268_v63 = vor.u32 %v3267_v17, %v3266_v32 }
 0x304   :  { %vm3272_vm6 = vcmp.lt.s32.totalorder %v7816_v37, 1  ;;  %v3224_v18 = vand.u32 2147483647, %v7659_v50  ;;  %vm3275_vm7 = vcmp.lt.s32.totalorder %v7816_v37, 4  ;;  %v3265_v44 = vor.u32 %v3264_v15, %v3263_v5 }
 0x305   :  { %v3051_v61 = vmul.f32 %v3050_v57, %v3035_v24  ;;  %v3060_v55 = vxor.u32 2147483648, %v3043_v26  ;;  %v5353_v3 = vadd.s32 4294967294, %v3170_v48  ;;  %v3271_v34 = vor.u32 %v3270_v2, %v3269_v42 }
 0x306   :  { %vm3274_vm8 = vcmp.lt.s32.totalorder %v7816_v37, 3  ;;  %v3231_v50 = vmax.f32 %v3224_v18, %v7514_v38  ;;  %v3225_v9 = vand.u32 2147483647, %v7745_v58  ;;  %vm3273_vm9 = vcmp.lt.s32.totalorder %v7816_v37, 2 }
 0x307   :  { %v3057_v10 = vxor.u32 2147483648, %v3051_v61  ;;  %v3061_v24 = vsel %vm3059_vm14, %v3060_v55, %v3051_v61  ;;  %vm5354_vm5 = vcmp.lt.s32.totalorder %v5353_v3, 0  ;;  %v3280_v27 = vsel %vm3272_vm6, %v3259_v33, %v3262_v4 }
 0x308   :  { %v3173_v29 = vsel %vm5354_vm5, 0, %v5353_v3  ;;  %v3281_v0 = vsel %vm3275_vm7, %v3268_v63, 920167782  ;;  %v3869_v30 = vmax.f32 %v3225_v9, %v3231_v50  ;;  %v3191_v38 = vsel %vm7832_vm3, 0, %v3189_v41 }
 0x309   :  { %v3058_v25 = vsel %vm3056_vm13, %v3043_v26, %v3057_v10  ;;  %v3174_v7 = vsub.s32 32, %v3173_v29  ;;  %v3175_v59 = vshll.u32 %v3166_v19, %v3173_v29  ;;  %v3178_v23 = vsub.s32 4294967266, %v3173_v29 }
 0x30a   :  { %v3062_v35 = vsel %vm3055_vm0, %v3058_v25, %v3061_v24  ;;  %v3282_v58 = vsel %vm3274_vm8, %v3265_v44, %v3281_v0  ;;  %v3284_v32 = vsel %vm3272_vm6, %v3262_v4, %v3265_v44  ;;  %v3285_v17 = vsel %vm3275_vm7, %v3271_v34, 1326507024 }
 0x30b   :  { %v3063_v28 = vsel %vm3052_vm1, nan, %v3062_v35  ;;  %v3176_v57 = vshrl.u32 %v3158_v36, %v3174_v7  ;;  %v3179_v26 = vadd.s32 127, %v3178_v23  ;;  %v3277_v36 = vsel %vm3275_vm7, %v3265_v44, 2102212464 }
 0x30c   :  { %3222 = vst [vmem:[#allocation3 + $0x90] sm:$0xff] %v3063_v28  ;;  %v3226_v39 = vand.u32 2147483647, %v3063_v28  ;;  %v3283_v3 = vsel %vm3273_vm9, %v3280_v27, %v3282_v58  ;;  %v3276_v15 = vsel %vm3272_vm6, %v3256_v40, %v3259_v33  ;;  %v3278_v41 = vsel %vm3274_vm8, %v3262_v4, %v3277_v36 }
 0x30d   :  { %v3177_v19 = vor.u32 %v3176_v57, %v3175_v59  ;;  %v3180_v48 = vshll.u32 %v3179_v26, 23  ;;  %v3286_v10 = vsel %vm3274_vm8, %v3268_v63, %v3285_v17  ;;  %v3313_v24 = vand.u32 65535, %v3283_v3 }
 0x30e   :  { %v7870_v5 = vmax.f32 %v3226_v39, %v3869_v30  ;;  %v3287_v2 = vsel %vm3273_vm9, %v3284_v32, %v3286_v10  ;;  %v3314_v25 = vshrl.u32 %v3283_v3, 16  ;;  %v7885_v29 = vsel %vm3406_vm4, %v7814_v46, 0 }
 0x30f   :  { %v3181_v61 = vor.u32 4788187, %v3180_v48  ;;  %v3184_v55 = vcvt.s32.f32 %v3177_v19  ;;  %v3208_v18 = vadd.s32 3, %v3191_v38  ;;  %v3291_v35 = vand.u32 65535, %v3287_v2 }
 0x310   :  { %v3292_v40 = vshrl.u32 %v3287_v2, 16  ;;  %v3317_v33 = vmul.u32 %v3313_v24, %v7821_v52  ;;  %v7890_v63 = vsel %vm3273_vm9, %v3276_v15, %v3278_v41  ;;  %v3315_v7 = vmul.u32 %v3313_v24, %v7811_v54 }
 0x311   :  { %v3182_v42 = vand.u32 2147483647, %v3181_v61  ;;  %v3316_v59 = vmul.u32 %v3314_v25, %v7811_v54  ;;  %v3293_v23 = vmul.u32 %v3291_v35, %v7811_v54  ;;  %v3295_v46 = vmul.u32 %v3291_v35, %v7821_v52 }
 0x312   :  { %v3294_v28 = vmul.u32 %v3292_v40, %v7811_v54  ;;  %v3318_v44 = vmul.u32 %v3314_v25, %v7821_v52  ;;  %v3321_v26 = vshll.u32 %v3317_v33, 16  ;;  %v3409_v50 = vand.u32 31, %v7885_v29 }
 0x313   :  { %v3185_v4 = vmul.f32 %v3184_v55, %v3182_v42  ;;  %v3319_v57 = vshll.u32 %v3316_v59, 16  ;;  %v3296_v37 = vmul.u32 %v3292_v40, %v7821_v52  ;;  %v3299_v39 = vshll.u32 %v3295_v46, 16 }
 0x314   :  { %v3297_v9 = vshll.u32 %v3294_v28, 16  ;;  %v3320_v27 = vshrl.u32 %v3316_v59, 16  ;;  %v3298_v19 = vshrl.u32 %v3294_v28, 16  ;;  %v3322_v17 = vshrl.u32 %v3317_v33, 16 }
 0x315   :  { %v3186_v34 = vxor.u32 2147483648, %v3185_v4  ;;  %vm3323_vm10 = vc.u32 %v3315_v7, %v3319_v57  ;;  %v3325_v54 = vadd.s32 %v3319_v57, %v3315_v7  ;;  %v7909_v41 = vand.u32 3, %v3208_v18 }
 0x316   :  { %vm3301_vm11 = vc.u32 %v3293_v23, %v3297_v9  ;;  %v3303_v30 = vadd.s32 %v3297_v9, %v3293_v23  ;;  %v3324_v36 = vsel %vm3323_vm10, 1, %v5435_v8  ;;  %v3300_v10 = vshrl.u32 %v3295_v46, 16 }
 0x317   :  { %v3187_v0 = vsel %vm3066_vm15, %v3186_v34, %v3185_v4  ;;  %v3302_v52 = vsel %vm3301_vm11, 1, %v5435_v8  ;;  %v3326_v58 = vadd.s32 %v3324_v36, %v3318_v44  ;;  %vm3327_vm12 = vc.u32 %v3325_v54, %v3321_v26 }
 0x318   :  { %v3190_v48 = vsel %vm7832_vm3, %v7521_v16, %v3187_v0  ;;  %v3304_v32 = vadd.s32 %v3302_v52, %v3296_v37  ;;  %vm3305_vm13 = vc.u32 %v3303_v30, %v3299_v39  ;;  %v3328_v61 = vsel %vm3327_vm12, 1, %v5435_v8 }
 0x319   :  { %v3192_v38 = vmul.f32 %v3190_v48, %v3190_v48  ;;  %v3306_v15 = vsel %vm3305_vm13, 1, %v5435_v8  ;;  %v3330_v21 = vadd.s32 %v3328_v61, %v3326_v58  ;;  %v7911_v42 = vsub.s32 32, %v3409_v50 }
 0x31a   :  { %v3308_v24 = vadd.s32 %v3306_v15, %v3304_v32  ;;  %v3333_v40 = vmul.u32 %v7799_v1, %v7890_v63  ;;  %v7915_v4 = vadd.s32 %v3325_v54, %v3321_v26  ;;  %v3412_v7 = vshll.u32 %v5429_v43, %v3409_v50 }
 0x31b   :  { %v3193_v55 = vmul.f32 -0.001358992, %v3192_v38  ;;  %v3200_v3 = vmul.f32 -0.00019511016, %v3192_v38  ;;  %v3331_v35 = vadd.s32 %v3330_v21, %v3320_v27  ;;  %v3415_v59 = vshll.u32 %v5430_v45, %v3409_v50 }
 0x31c   :  { %v3309_v33 = vadd.s32 %v3308_v24, %v3298_v19  ;;  %v3418_v46 = vshll.u32 %v5431_v47, %v3409_v50  ;;  %v3413_v34 = vshrl.u32 %v5430_v45, %v7911_v42  ;;  %v3416_v1 = vshrl.u32 %v5431_v47, %v7911_v42 }
 0x31d   :  { %v3194_v2 = vadd.f32 0.041655596, %v3193_v55  ;;  %v3201_v25 = vadd.f32 0.008332121, %v3200_v3  ;;  %v3332_v28 = vadd.s32 %v3331_v35, %v3322_v17  ;;  %v3421_v63 = vshll.u32 %v5432_v49, %v3409_v50 }
 0x31e   :  { %v7920_v44 = vadd.s32 %v3309_v33, %v3300_v10  ;;  %v3419_v9 = vshrl.u32 %v5432_v49, %v7911_v42  ;;  %v7932_v39 = vshrl.u32 %v7885_v29, 5  ;;  %v3422_v27 = vshrl.u32 %v5433_v51, %v7911_v42 }
 0x31f   :  { %v3195_v23 = vmul.f32 %v3194_v2, %v3192_v38  ;;  %v3202_v18 = vmul.f32 %v3201_v25, %v3192_v38  ;;  %v3336_v37 = vadd.s32 1, %v3332_v28  ;;  %v3424_v0 = vshll.u32 %v5433_v51, %v3409_v50 }
 0x320   :  { %vm3335_vm14 = vc.u32 %v7920_v44, %v7915_v4  ;;  %v3425_v36 = vshrl.u32 %v5434_v60, %v7911_v42  ;;  %vm3214_vm15 = vcmp.eq.s32.totalorder %v7909_v41, 2  ;;  %v3414_v58 = vor.u32 %v3413_v34, %v3412_v7 }
 0x321   :  { %v3196_v57 = vadd.f32 -0.4999988, %v3195_v23  ;;  %v3203_v26 = vadd.f32 -0.16666654, %v3202_v18  ;;  %v3337_v30 = vsel %vm3335_vm14, %v3336_v37, %v3332_v28  ;;  %v3423_v32 = vor.u32 %v3422_v27, %v3421_v63 }
 0x322   :  { %v3338_v52 = vadd.s32 %v3337_v30, %v3333_v40  ;;  %v7940_v29 = vor.u32 %v3416_v1, %v3415_v59  ;;  %v7942_v55 = vor.u32 %v3419_v9, %v3418_v46  ;;  %vm3427_vm0 = vcmp.lt.s32.totalorder %v7932_v39, 1 }
 0x323   :  { %v3197_v19 = vmul.f32 %v3196_v57, %v3192_v38  ;;  %v3204_v54 = vmul.f32 %v3203_v26, %v3192_v38  ;;  %vm3429_vm1 = vcmp.lt.s32.totalorder %v7932_v39, 3  ;;  %vm3430_vm2 = vcmp.lt.s32.totalorder %v7932_v39, 4 }
 0x324   :  { %v3339_v3 = vadd.s32 536870912, %v3338_v52  ;;  %vm3210_vm3 = vcmp.lt.s32.totalorder %v7909_v41, 2  ;;  %v3426_v15 = vor.u32 %v3425_v36, %v3424_v0  ;;  %vm3211_vm4 = vcmp.eq.s32.totalorder %v7909_v41, 0 }
 0x325   :  { %v3198_v17 = vadd.f32 1.0, %v3197_v19  ;;  %v3205_v61 = vadd.f32 1.0, %v3204_v54  ;;  %vm3428_vm5 = vcmp.lt.s32.totalorder %v7932_v39, 2  ;;  %v3436_v10 = vsel %vm3430_vm2, %v3423_v32, 920167782 }
 0x326   :  { %v7949_v21 = vshrl.u32 %v3339_v3, 30  ;;  %v3437_v25 = vsel %vm3429_vm1, %v7942_v55, %v3436_v10  ;;  %vm3207_vm6 = vweird.f32 %v7521_v16  ;;  %v3439_v40 = vsel %vm3427_vm0, %v7940_v29, %v7942_v55 }
 0x327   :  { %v3206_v50 = vmul.f32 %v3205_v61, %v3190_v48  ;;  %v3215_v38 = vxor.u32 2147483648, %v3198_v17  ;;  %v3435_v48 = vsel %vm3427_vm0, %v3414_v58, %v7940_v29  ;;  %v3440_v7 = vsel %vm3430_vm2, %v3426_v15, 1326507024 }
 0x328   :  { %v3341_v35 = vshll.u32 %v7949_v21, 30  ;;  %v7972_v59 = vshll.u32 %v3403_v20, 8  ;;  %v3438_v16 = vsel %vm3428_vm5, %v3435_v48, %v3437_v25  ;;  %v3441_v28 = vsel %vm3429_vm1, %v3423_v32, %v3440_v7 }
 0x329   :  { %v3212_v24 = vxor.u32 2147483648, %v3206_v50  ;;  %v3216_v2 = vsel %vm3214_vm15, %v3215_v38, %v3206_v50  ;;  %v3234_v34 = vadd.f32 20480.0, %v5460_v14  ;;  %v3442_v1 = vsel %vm3428_vm5, %v3439_v40, %v3441_v28 }
 0x32a   :  { %v3342_v18 = vsub.s32 %v3338_v52, %v3341_v35  ;;  %v3444_v31 = vand.u32 65535, %v7972_v59  ;;  %v3445_v63 = vshrl.u32 %v7972_v59, 16  ;;  %v3411_v57 = vshrl.u32 %v5429_v43, %v7911_v42 }
 0x32b   :  { %v3213_v33 = vsel %vm3211_vm4, %v3198_v17, %v3212_v24  ;;  %v3446_v26 = vand.u32 65535, %v3442_v1  ;;  %v3447_v37 = vshrl.u32 %v3442_v1, 16  ;;  %v3469_v9 = vshrl.u32 %v3438_v16, 16 }
 0x32c   :  { %v3217_v23 = vsel %vm3210_vm3, %v3213_v33, %v3216_v2  ;;  %vm3343_vm7 = vcmp.lt.s32.totalorder %v3342_v18, 0  ;;  %v3344_v41 = vsub.s32 0, %v3342_v18  ;;  %v3468_v19 = vand.u32 65535, %v3438_v16 }
 0x32d   :  { %v3218_v46 = vsel %vm3207_vm6, nan, %v3217_v23  ;;  %v3448_v30 = vmul.u32 %v3446_v26, %v3444_v31  ;;  %v3449_v36 = vmul.u32 %v3447_v37, %v3444_v31  ;;  %v3450_v52 = vmul.u32 %v3446_v26, %v3445_v63 }
 0x32e   :  { %3223 = vst [vmem:[#allocation3 + $0x98] sm:$0xff] %v3218_v46  ;;  %v3227_v20 = vand.u32 2147483647, %v3218_v46  ;;  %v3345_v0 = vsel %vm3343_vm7, %v3344_v41, %v3342_v18  ;;  %v7991_v32 = vmul.f32 %v3234_v34, %v5454_v11  ;;  %vm3242_vm8 = vcmp.lt.s32.totalorder %v7770_v6, 0 }
 0x32f   :  { %v3346_v54 = vclz %v3345_v0  ;;  %v3334_v42 = vadd.s32 %v7915_v4, %v7920_v44  ;;  %v3471_v17 = vmul.u32 %v3469_v9, %v3444_v31  ;;  %v3451_v3 = vmul.u32 %v3447_v37, %v3445_v63 }
 0x330   :  { %v7988_v27 = vmax.f32 %v3227_v20, %v7870_v5  ;;  %v3431_v5 = vsel %vm3427_vm0, %v3411_v57, %v3414_v58  ;;  %v3452_v50 = vshll.u32 %v3449_v36, 16  ;;  %v3364_v38 = vsub.s32 4, %v7949_v21 }
 0x331   :  { %v5356_v61 = vadd.s32 4294967294, %v3346_v54  ;;  %v3454_v15 = vshll.u32 %v3450_v52, 16  ;;  %v3470_v10 = vmul.u32 %v3468_v19, %v3444_v31  ;;  %v3472_v24 = vmul.u32 %v3468_v19, %v3445_v63 }
 0x332   :  { %vm8001_vm9 = vcmp.le.f32.partialorder %v3240_v56, 0.7853982  ;;  %vm3456_vm11 = vc.u32 %v3448_v30, %v3452_v50  ;;  %v3458_v4 = vadd.s32 %v3452_v50, %v3448_v30  ;;  %v3474_v44 = vshll.u32 %v3471_v17, 16 }
 0x333   :  { %vm5357_vm10 = vcmp.lt.s32.totalorder %v5356_v61, 0  ;;  %v3432_v58 = vsel %vm3430_vm2, %v7942_v55, 2102212464  ;;  %v3457_v25 = vsel %vm3456_vm11, 1, %v5435_v8  ;;  %v3473_v35 = vmul.u32 %v3469_v9, %v3445_v63 }
 0x334   :  { %v3349_v48 = vsel %vm5357_vm10, 0, %v5356_v61  ;;  %v3459_v23 = vadd.s32 %v3457_v25, %v3451_v3  ;;  %v3365_v56 = vsel %vm3242_vm8, %v3364_v38, %v7949_v21  ;;  %v3453_v16 = vshrl.u32 %v3449_v36, 16 }
 0x335   :  { %v3350_v40 = vsub.s32 32, %v3349_v48  ;;  %v3351_v33 = vshll.u32 %v3342_v18, %v3349_v48  ;;  %v3354_v7 = vsub.s32 4294967266, %v3349_v48  ;;  %vm3460_vm12 = vc.u32 %v3458_v4, %v3454_v15 }
 0x336   :  { %v3476_v28 = vshll.u32 %v3472_v24, 16  ;;  %v3461_v1 = vsel %vm3460_vm12, 1, %v5435_v8  ;;  %vm3478_vm13 = vc.u32 %v3470_v10, %v3474_v44  ;;  %v3455_v55 = vshrl.u32 %v3450_v52, 16 }
 0x337   :  { %v3352_v46 = vshrl.u32 %v3334_v42, %v3350_v40  ;;  %v3355_v34 = vadd.s32 127, %v3354_v7  ;;  %v3463_v31 = vadd.s32 %v3461_v1, %v3459_v23  ;;  %v3479_v20 = vsel %vm3478_vm13, 1, %v5435_v8 }
 0x338   :  { %v3480_v41 = vadd.s32 %v3474_v44, %v3470_v10  ;;  %v3481_v57 = vadd.s32 %v3479_v20, %v3473_v35  ;;  %v3553_v26 = vand.u32 2139095040, %v7991_v32  ;;  %v3433_v21 = vsel %vm3429_vm1, %v7940_v29, %v3432_v58 }
 0x339   :  { %v3353_v18 = vor.u32 %v3352_v46, %v3351_v33  ;;  %v3356_v63 = vshll.u32 %v3355_v34, 23  ;;  %v3464_v37 = vadd.s32 %v3463_v31, %v3453_v16  ;;  %v3475_v9 = vshrl.u32 %v3471_v17, 16 }
 0x33a   :  { %vm3482_vm14 = vc.u32 %v3480_v41, %v3476_v28  ;;  %v3554_v30 = vshrl.u32 %v3553_v26, 23  ;;  %v3367_v36 = vsel %vm8001_vm9, 0, %v3365_v56  ;;  %v3477_v52 = vshrl.u32 %v3472_v24, 16 }
 0x33b   :  { %v3357_v0 = vor.u32 4788187, %v3356_v63  ;;  %v3360_v19 = vcvt.s32.f32 %v3353_v18  ;;  %v3483_v54 = vsel %vm3482_vm14, 1, %v5435_v8  ;;  %v8021_v3 = vadd.s32 %v3464_v37, %v3455_v55 }
 0x33c   :  { %v3485_v42 = vadd.s32 %v3483_v54, %v3481_v57  ;;  %v8023_v50 = vadd.s32 %v3480_v41, %v3476_v28  ;;  %v5361_v38 = vadd.s32 4294967169, %v3554_v30  ;;  %v3434_v29 = vsel %vm3428_vm5, %v3431_v5, %v3433_v21 }
 0x33d   :  { %v3358_v61 = vand.u32 2147483647, %v3357_v0  ;;  %v3235_v15 = vadd.f32 20480.0, %v5668_v53  ;;  %v3384_v44 = vadd.s32 3, %v3367_v36  ;;  %v3550_v58 = vand.u32 2147483647, %v7991_v32 }
 0x33e   :  { %v3486_v17 = vadd.s32 %v3485_v42, %v3475_v9  ;;  %v3560_v4 = vadd.s32 1, %v5361_v38  ;;  %v3488_v25 = vmul.u32 %v7972_v59, %v3434_v29  ;;  %vm3490_vm15 = vc.u32 %v8021_v3, %v8023_v50 }
 0x33f   :  { %v3361_v10 = vmul.f32 %v3360_v19, %v3358_v61  ;;  %v8033_v39 = vmul.f32 %v3235_v15, %v5454_v11  ;;  %v8042_v23 = vand.u32 3, %v3384_v44  ;;  %v3557_v56 = vand.u32 8388607, %v3550_v58 }
 0x340   :  { %v3487_v48 = vadd.s32 %v3486_v17, %v3477_v52  ;;  %vm3561_vm0 = vcmp.gt.s32.totalorder %v3560_v4, 0  ;;  %vm3383_vm5 = vweird.f32 %v7770_v6  ;;  %vm8140_vm12 = vcmp.le.f32.partialorder %v3395_v62, 0.7853982 }
 0x341   :  { %v3362_v24 = vxor.u32 2147483648, %v3361_v10  ;;  %v3562_v40 = vsel %vm3561_vm0, %v3560_v4, 0  ;;  %vm3390_vm1 = vcmp.eq.s32.totalorder %v8042_v23, 2  ;;  %v3558_v30 = vor.u32 8388608, %v3557_v56 }
 0x342   :  { %v3491_v35 = vadd.s32 1, %v3487_v48  ;;  %v3564_v33 = vand.u32 31, %v3562_v40  ;;  %v8048_v46 = vshrl.u32 %v3562_v40, 5  ;;  %v3708_v36 = vand.u32 2139095040, %v8033_v39 }
 0x343   :  { %v3363_v5 = vsel %vm3242_vm8, %v3362_v24, %v3361_v10  ;;  %vm3387_vm2 = vcmp.eq.s32.totalorder %v8042_v23, 0  ;;  %vm3386_vm3 = vcmp.lt.s32.totalorder %v8042_v23, 2  ;;  %v8086_v24 = vshll.u32 %v3558_v30, 8 }
 0x344   :  { %v8040_v7 = vsel %vm8001_vm9, %v7770_v6, %v3363_v5  ;;  %v3492_v59 = vsel %vm3490_vm15, %v3491_v35, %v3487_v48  ;;  %v8050_v34 = vsub.s32 32, %v3564_v33  ;;  %v3567_v1 = vshll.u32 %v5429_v43, %v3564_v33 }
 0x345   :  { %v3368_v16 = vmul.f32 %v8040_v7, %v8040_v7  ;;  %v3493_v28 = vadd.s32 %v3492_v59, %v3488_v25  ;;  %v3570_v2 = vshll.u32 %v5430_v45, %v3564_v33  ;;  %v3573_v55 = vshll.u32 %v5431_v47, %v3564_v33 }
 0x346   :  { %v3576_v31 = vshll.u32 %v5432_v49, %v3564_v33  ;;  %v3579_v63 = vshll.u32 %v5433_v51, %v3564_v33  ;;  %v3568_v57 = vshrl.u32 %v5430_v45, %v8050_v34  ;;  %v3571_v26 = vshrl.u32 %v5431_v47, %v8050_v34 }
 0x347   :  { %v3369_v20 = vmul.f32 -0.001358992, %v3368_v16  ;;  %v3376_v41 = vmul.f32 -0.00019511016, %v3368_v16  ;;  %v3494_v18 = vadd.s32 536870912, %v3493_v28  ;;  %v3574_v21 = vshrl.u32 %v5432_v49, %v8050_v34 }
 0x348   :  { %v3577_v37 = vshrl.u32 %v5433_v51, %v8050_v34  ;;  %v3580_v54 = vshrl.u32 %v5434_v60, %v8050_v34  ;;  %v8072_v38 = vor.u32 %v3568_v57, %v3567_v1  ;;  %v8075_v29 = vor.u32 %v3571_v26, %v3570_v2 }
 0x349   :  { %v3370_v9 = vadd.f32 0.041655596, %v3369_v20  ;;  %v3377_v0 = vadd.f32 0.008332121, %v3376_v41  ;;  %v8065_v19 = vshrl.u32 %v3494_v18, 30  ;;  %v8077_v17 = vor.u32 %v3574_v21, %v3573_v55 }
 0x34a   :  { %v3578_v15 = vor.u32 %v3577_v37, %v3576_v31  ;;  %v3581_v10 = vor.u32 %v3580_v54, %v3579_v63  ;;  %vm3582_vm4 = vcmp.lt.s32.totalorder %v8048_v46, 1  ;;  %vm3584_vm6 = vcmp.lt.s32.totalorder %v8048_v46, 3 }
 0x34b   :  { %v3371_v52 = vmul.f32 %v3370_v9, %v3368_v16  ;;  %v3378_v42 = vmul.f32 %v3377_v0, %v3368_v16  ;;  %v3496_v61 = vshll.u32 %v8065_v19, 30  ;;  %vm3585_vm7 = vcmp.lt.s32.totalorder %v8048_v46, 4 }
 0x34c   :  { %v3709_v25 = vshrl.u32 %v3708_v36, 23  ;;  %vm3397_vm9 = vcmp.lt.s32.totalorder %v7775_v22, 0  ;;  %vm3583_vm10 = vcmp.lt.s32.totalorder %v8048_v46, 2  ;;  %v3590_v33 = vsel %vm3582_vm4, %v8072_v38, %v8075_v29 }
 0x34d   :  { %v3372_v4 = vadd.f32 -0.4999988, %v3371_v52  ;;  %v3379_v44 = vadd.f32 -0.16666654, %v3378_v42  ;;  %v8080_v48 = vsub.s32 %v3493_v28, %v3496_v61  ;;  %v3591_v59 = vsel %vm3585_vm7, %v3578_v15, 920167782 }
 0x34e   :  { %v3595_v56 = vsel %vm3585_vm7, %v3581_v10, 1326507024  ;;  %v3594_v2 = vsel %vm3582_vm4, %v8075_v29, %v8077_v17  ;;  %v3592_v31 = vsel %vm3584_vm6, %v8077_v17, %v3591_v59  ;;  %v5364_v41 = vadd.s32 4294967169, %v3709_v25 }
 0x34f   :  { %v3373_v35 = vmul.f32 %v3372_v4, %v3368_v16  ;;  %v3380_v40 = vmul.f32 %v3379_v44, %v3368_v16  ;;  %vm3498_vm8 = vcmp.lt.s32.totalorder %v8080_v48, 0  ;;  %v3499_v5 = vsub.s32 0, %v8080_v48 }
 0x350   :  { %v3596_v20 = vsel %vm3584_vm6, %v3578_v15, %v3595_v56  ;;  %v3489_v57 = vadd.s32 %v8023_v50, %v8021_v3  ;;  %v3705_v26 = vand.u32 2147483647, %v8033_v39  ;;  %v3593_v37 = vsel %vm3583_vm10, %v3590_v33, %v3592_v31 }
 0x351   :  { %v3374_v16 = vadd.f32 1.0, %v3373_v35  ;;  %v3381_v28 = vadd.f32 1.0, %v3380_v40  ;;  %v3500_v1 = vsel %vm3498_vm8, %v3499_v5, %v8080_v48  ;;  %v3597_v9 = vsel %vm3583_vm10, %v3594_v2, %v3596_v20 }
 0x352   :  { %v3501_v55 = vclz %v3500_v1  ;;  %v3599_v0 = vand.u32 65535, %v8086_v24  ;;  %v3601_v36 = vand.u32 65535, %v3597_v9  ;;  %v3600_v3 = vshrl.u32 %v8086_v24, 16 }
 0x353   :  { %v3382_v18 = vmul.f32 %v3381_v28, %v8040_v7  ;;  %v3391_v63 = vxor.u32 2147483648, %v3374_v16  ;;  %v3519_v7 = vsub.s32 4, %v8065_v19  ;;  %v3602_v50 = vshrl.u32 %v3597_v9, 16 }
 0x354   :  { %v5359_v21 = vadd.s32 4294967294, %v3501_v55  ;;  %v3715_v52 = vadd.s32 1, %v5364_v41  ;;  %v3623_v15 = vand.u32 65535, %v3593_v37  ;;  %v3624_v10 = vshrl.u32 %v3593_v37, 16 }
 0x355   :  { %v3388_v54 = vxor.u32 2147483648, %v3382_v18  ;;  %v3392_v30 = vsel %vm3390_vm1, %v3391_v63, %v3382_v18  ;;  %v3520_v5 = vsel %vm3397_vm9, %v3519_v7, %v8065_v19  ;;  %v3566_v33 = vshrl.u32 %v5429_v43, %v8050_v34 }
 0x356   :  { %vm5360_vm11 = vcmp.lt.s32.totalorder %v5359_v21, 0  ;;  %v3603_v59 = vmul.u32 %v3601_v36, %v3599_v0  ;;  %v3604_v23 = vmul.u32 %v3602_v50, %v3599_v0  ;;  %v3605_v28 = vmul.u32 %v3601_v36, %v3600_v3 }
 0x357   :  { %v3389_v42 = vsel %vm3387_vm2, %v3374_v16, %v3388_v54  ;;  %v3504_v61 = vsel %vm5360_vm11, 0, %v5359_v21  ;;  %v3587_v19 = vsel %vm3585_vm7, %v8077_v17, 2102212464  ;;  %v3626_v1 = vmul.u32 %v3624_v10, %v3599_v0 }
 0x358   :  { %v3393_v4 = vsel %vm3386_vm3, %v3389_v42, %v3392_v30  ;;  %v3505_v44 = vsub.s32 32, %v3504_v61  ;;  %v3506_v25 = vshll.u32 %v8080_v48, %v3504_v61  ;;  %v3509_v35 = vsub.s32 4294967266, %v3504_v61 }
 0x359   :  { %v8130_v40 = vsel %vm3383_vm5, nan, %v3393_v4  ;;  %v3606_v48 = vmul.u32 %v3602_v50, %v3600_v3  ;;  %v3627_v34 = vmul.u32 %v3623_v15, %v3600_v3  ;;  %v3607_v31 = vshll.u32 %v3604_v23, 16 }
 0x35a   :  { %v3507_v56 = vshrl.u32 %v3489_v57, %v3505_v44  ;;  %v3510_v16 = vadd.s32 127, %v3509_v35  ;;  %3861 = vst [vmem:[#allocation3 + $0xa0] sm:$0xff] %v8130_v40  ;;  %v3625_v20 = vmul.u32 %v3623_v15, %v3599_v0  ;;  %v3586_v41 = vsel %vm3582_vm4, %v3566_v33, %v8072_v38 }
 0x35b   :  { %v3609_v18 = vshll.u32 %v3605_v28, 16  ;;  %v3628_v62 = vmul.u32 %v3624_v10, %v3600_v3  ;;  %v3629_v63 = vshll.u32 %v3626_v1, 16  ;;  %vm3611_vm13 = vc.u32 %v3603_v59, %v3607_v31 }
 0x35c   :  { %v3508_v2 = vor.u32 %v3507_v56, %v3506_v25  ;;  %v3511_v55 = vshll.u32 %v3510_v16, 23  ;;  %v3613_v37 = vadd.s32 %v3607_v31, %v3603_v59  ;;  %v3588_v17 = vsel %vm3584_vm6, %v8075_v29, %v3587_v19 }
 0x35d   :  { %v3608_v9 = vshrl.u32 %v3604_v23, 16  ;;  %v3612_v54 = vsel %vm3611_vm13, 1, %v5435_v8  ;;  %v3631_v30 = vshll.u32 %v3627_v34, 16  ;;  %vm3633_vm15 = vc.u32 %v3625_v20, %v3629_v63 }
 0x35e   :  { %v3512_v57 = vor.u32 4788187, %v3511_v55  ;;  %v3515_v21 = vcvt.s32.f32 %v3508_v2  ;;  %v3614_v7 = vadd.s32 %v3612_v54, %v3606_v48  ;;  %vm3615_vm14 = vc.u32 %v3613_v37, %v3609_v18 }
 0x35f   :  { %v3610_v38 = vshrl.u32 %v3605_v28, 16  ;;  %v3616_v36 = vsel %vm3615_vm14, 1, %v5435_v8  ;;  %v3634_v3 = vsel %vm3633_vm15, 1, %v5435_v8  ;;  %v3635_v50 = vadd.s32 %v3629_v63, %v3625_v20 }
 0x360   :  { %v3513_v0 = vand.u32 2147483647, %v3512_v57  ;;  %v3618_v61 = vadd.s32 %v3616_v36, %v3614_v7  ;;  %v3636_v15 = vadd.s32 %v3634_v3, %v3628_v62  ;;  %vm3716_vm0 = vcmp.gt.s32.totalorder %v3715_v52, 0 }
 0x361   :  { %v3630_v10 = vshrl.u32 %v3626_v1, 16  ;;  %vm3637_vm1 = vc.u32 %v3635_v50, %v3631_v30  ;;  %v3712_v29 = vand.u32 8388607, %v3705_v26  ;;  %v3717_v4 = vsel %vm3716_vm0, %v3715_v52, 0 }
 0x362   :  { %v3516_v42 = vmul.f32 %v3515_v21, %v3513_v0  ;;  %v3522_v25 = vsel %vm8140_vm12, 0, %v3520_v5  ;;  %v3619_v35 = vadd.s32 %v3618_v61, %v3608_v9  ;;  %v3638_v33 = vsel %vm3637_vm1, 1, %v5435_v8 }
 0x363   :  { %v3589_v59 = vsel %vm3583_vm10, %v3586_v41, %v3588_v17  ;;  %v3632_v56 = vshrl.u32 %v3627_v34, 16  ;;  %v3640_v16 = vadd.s32 %v3638_v33, %v3636_v15  ;;  %v3719_v23 = vand.u32 31, %v3717_v4 }
 0x364   :  { %v3517_v44 = vxor.u32 2147483648, %v3516_v42  ;;  %v8165_v19 = vadd.s32 %v3619_v35, %v3610_v38  ;;  %v8167_v48 = vadd.s32 %v3635_v50, %v3631_v30  ;;  %v3713_v1 = vor.u32 8388608, %v3712_v29 }
 0x365   :  { %v3641_v5 = vadd.s32 %v3640_v16, %v3630_v10  ;;  %v8172_v2 = vsub.s32 32, %v3719_v23  ;;  %v3539_v55 = vadd.s32 3, %v3522_v25  ;;  %v3643_v34 = vmul.u32 %v8086_v24, %v3589_v59 }
 0x366   :  { %v3518_v28 = vsel %vm3397_vm9, %v3517_v44, %v3516_v42  ;;  %v3722_v31 = vshll.u32 %v5429_v43, %v3719_v23  ;;  %v3725_v18 = vshll.u32 %v5430_v45, %v3719_v23  ;;  %vm3645_vm2 = vc.u32 %v8165_v19, %v8167_v48 }
 0x367   :  { %v3521_v52 = vsel %vm8140_vm12, %v7775_v22, %v3518_v28  ;;  %v3642_v20 = vadd.s32 %v3641_v5, %v3632_v56  ;;  %v3723_v41 = vshrl.u32 %v5430_v45, %v8172_v2  ;;  %v3726_v6 = vshrl.u32 %v5431_v47, %v8172_v2 }
 0x368   :  { %v3523_v46 = vmul.f32 %v3521_v52, %v3521_v52  ;;  %v8183_v57 = vshrl.u32 %v3717_v4, 5  ;;  %v3728_v24 = vshll.u32 %v5431_v47, %v3719_v23  ;;  %v3729_v37 = vshrl.u32 %v5432_v49, %v8172_v2 }
 0x369   :  { %v3646_v21 = vadd.s32 1, %v3642_v20  ;;  %v3731_v17 = vshll.u32 %v5432_v49, %v3719_v23  ;;  %v8189_v30 = vor.u32 %v3723_v41, %v3722_v31  ;;  %v3732_v0 = vshrl.u32 %v5433_v51, %v8172_v2 }
 0x36a   :  { %v3524_v62 = vmul.f32 -0.001358992, %v3523_v46  ;;  %v3531_v63 = vmul.f32 -0.00019511016, %v3523_v46  ;;  %v8193_v38 = vor.u32 %v3726_v6, %v3725_v18  ;;  %v3734_v36 = vshll.u32 %v5433_v51, %v3719_v23 }
 0x36b   :  { %v3647_v7 = vsel %vm3645_vm2, %v3646_v21, %v3642_v20  ;;  %v3735_v3 = vshrl.u32 %v5434_v60, %v8172_v2  ;;  %v3733_v15 = vor.u32 %v3732_v0, %v3731_v17  ;;  %v3730_v10 = vor.u32 %v3729_v37, %v3728_v24 }
 0x36c   :  { %v3525_v9 = vadd.f32 0.041655596, %v3524_v62  ;;  %v3532_v54 = vadd.f32 0.008332121, %v3531_v63  ;;  %v3648_v61 = vadd.s32 %v3647_v7, %v3643_v34  ;;  %vm3737_vm3 = vcmp.lt.s32.totalorder %v8183_v57, 1 }
 0x36d   :  { %v3736_v29 = vor.u32 %v3735_v3, %v3734_v36  ;;  %vm3740_vm4 = vcmp.lt.s32.totalorder %v8183_v57, 4  ;;  %vm3739_vm5 = vcmp.lt.s32.totalorder %v8183_v57, 3  ;;  %v3540_v35 = vand.u32 3, %v3539_v55 }
 0x36e   :  { %v3526_v50 = vmul.f32 %v3525_v9, %v3523_v46  ;;  %v3533_v42 = vmul.f32 %v3532_v54, %v3523_v46  ;;  %v3649_v25 = vadd.s32 536870912, %v3648_v61  ;;  %vm3738_vm6 = vcmp.lt.s32.totalorder %v8183_v57, 2 }
 0x36f   :  { %v3746_v33 = vsel %vm3740_vm4, %v3733_v15, 920167782  ;;  %v8204_v59 = vshll.u32 %v3713_v1, 8  ;;  %v3745_v28 = vsel %vm3737_vm3, %v8189_v30, %v8193_v38  ;;  %vm3538_vm7 = vweird.f32 %v7775_v22 }
 0x370   :  { %v3527_v4 = vadd.f32 -0.4999988, %v3526_v50  ;;  %v3534_v44 = vadd.f32 -0.16666654, %v3533_v42  ;;  %v8206_v23 = vshrl.u32 %v3649_v25, 30  ;;  %v3747_v5 = vsel %vm3739_vm5, %v3730_v10, %v3746_v33 }
 0x371   :  { %v3750_v55 = vsel %vm3740_vm4, %v3736_v29, 1326507024  ;;  %vm3541_vm8 = vcmp.lt.s32.totalorder %v3540_v35, 2  ;;  %vm3545_vm9 = vcmp.eq.s32.totalorder %v3540_v35, 2  ;;  %v3748_v20 = vsel %vm3738_vm6, %v3745_v28, %v3747_v5 }
 0x372   :  { %v3528_v56 = vmul.f32 %v3527_v4, %v3523_v46  ;;  %v3535_v16 = vmul.f32 %v3534_v44, %v3523_v46  ;;  %v3651_v31 = vshll.u32 %v8206_v23, 30  ;;  %v3749_v46 = vsel %vm3737_vm3, %v8193_v38, %v3730_v10 }
 0x373   :  { %v3751_v41 = vsel %vm3739_vm5, %v3733_v15, %v3750_v55  ;;  %v3754_v63 = vand.u32 65535, %v8204_v59  ;;  %vm3542_vm10 = vcmp.eq.s32.totalorder %v3540_v35, 0  ;;  %v3755_v24 = vshrl.u32 %v8204_v59, 16 }
 0x374   :  { %v3529_v34 = vadd.f32 1.0, %v3528_v56  ;;  %v3536_v1 = vadd.f32 1.0, %v3535_v16  ;;  %v3652_v62 = vsub.s32 %v3648_v61, %v3651_v31  ;;  %v3752_v21 = vsel %vm3738_vm6, %v3749_v46, %v3751_v41 }
 0x375   :  { %v3779_v37 = vshrl.u32 %v3748_v20, 16  ;;  %v3721_v0 = vshrl.u32 %v5429_v43, %v8172_v2  ;;  %v3756_v7 = vand.u32 65535, %v3752_v21  ;;  %v3757_v36 = vshrl.u32 %v3752_v21, 16 }
 0x376   :  { %v3537_v18 = vmul.f32 %v3536_v1, %v3521_v52  ;;  %v3546_v6 = vxor.u32 2147483648, %v3529_v34  ;;  %vm3653_vm11 = vcmp.lt.s32.totalorder %v3652_v62, 0  ;;  %v3654_v54 = vsub.s32 0, %v3652_v62 }
 0x377   :  { %v3742_v52 = vsel %vm3740_vm4, %v3730_v10, 2102212464  ;;  %v3778_v42 = vand.u32 65535, %v3748_v20  ;;  %v8233_v61 = vmul.u32 %v3779_v37, %v3754_v63  ;;  %v3758_v4 = vmul.u32 %v3756_v7, %v3754_v63 }
 0x378   :  { %v3543_v17 = vxor.u32 2147483648, %v3537_v18  ;;  %v3547_v9 = vsel %vm3545_vm9, %v3546_v6, %v3537_v18  ;;  %v3655_v50 = vsel %vm3653_vm11, %v3654_v54, %v3652_v62  ;;  %v3759_v44 = vmul.u32 %v3757_v36, %v3754_v63 }
 0x379   :  { %v3656_v29 = vclz %v3655_v50  ;;  %v3644_v2 = vadd.s32 %v8167_v48, %v8165_v19  ;;  %v3760_v10 = vmul.u32 %v3756_v7, %v3755_v24  ;;  %v3741_v56 = vsel %vm3737_vm3, %v3721_v0, %v8189_v30 }
 0x37a   :  { %v3544_v3 = vsel %vm3542_vm10, %v3529_v34, %v3543_v17  ;;  %v3761_v16 = vmul.u32 %v3757_v36, %v3755_v24  ;;  %v3762_v28 = vshll.u32 %v3759_v44, 16  ;;  %vm3552_vm12 = vcmp.lt.s32.totalorder %v7991_v32, 0 }
 0x37b   :  { %v3548_v15 = vsel %vm3541_vm8, %v3544_v3, %v3547_v9  ;;  %v5362_v33 = vadd.s32 4294967294, %v3656_v29  ;;  %v3743_v22 = vsel %vm3739_vm5, %v8193_v38, %v3742_v52  ;;  %v3764_v35 = vshll.u32 %v3760_v10, 16 }
 0x37c   :  { %v8238_v25 = vsel %vm3538_vm7, nan, %v3548_v15  ;;  %v3780_v5 = vmul.u32 %v3778_v42, %v3754_v63  ;;  %v3782_v55 = vmul.u32 %v3778_v42, %v3755_v24  ;;  %vm3766_vm14 = vc.u32 %v3758_v4, %v3762_v28 }
 0x37d   :  { %3862 = vst [vmem:[#allocation3 + $0xa8] sm:$0xff] %v8238_v25  ;;  %vm5363_vm13 = vcmp.lt.s32.totalorder %v5362_v33, 0  ;;  %v3768_v19 = vadd.s32 %v3762_v28, %v3758_v4  ;;  %v3784_v48 = vshll.u32 %v8233_v61, 16  ;;  %v3767_v30 = vsel %vm3766_vm14, 1, %v5435_v8 }
 0x37e   :  { %v3659_v34 = vsel %vm5363_vm13, 0, %v5362_v33  ;;  %v3783_v1 = vmul.u32 %v3779_v37, %v3755_v24  ;;  %v3873_v31 = vadd.f32 24576.0, %v5456_v12  ;;  %v3769_v18 = vadd.s32 %v3767_v30, %v3761_v16 }
 0x37f   :  { %v3660_v46 = vsub.s32 32, %v3659_v34  ;;  %v3661_v20 = vshll.u32 %v3652_v62, %v3659_v34  ;;  %v3664_v41 = vsub.s32 4294967266, %v3659_v34  ;;  %v3674_v38 = vsub.s32 4, %v8206_v23 }
 0x380   :  { %v3763_v6 = vshrl.u32 %v3759_v44, 16  ;;  %vm3770_vm15 = vc.u32 %v3768_v19, %v3764_v35  ;;  %v3786_v63 = vshll.u32 %v3782_v55, 16  ;;  %vm3788_vm0 = vc.u32 %v3780_v5, %v3784_v48 }
 0x381   :  { %v3662_v21 = vshrl.u32 %v3644_v2, %v3660_v46  ;;  %v3665_v17 = vadd.s32 127, %v3664_v41  ;;  %v3771_v9 = vsel %vm3770_vm15, 1, %v5435_v8  ;;  %v3789_v0 = vsel %vm3788_vm0, 1, %v5435_v8 }
 0x382   :  { %v3773_v54 = vadd.s32 %v3771_v9, %v3769_v18  ;;  %v3790_v24 = vadd.s32 %v3784_v48, %v3780_v5  ;;  %v3874_v37 = vadd.f32 24576.0, %v5458_v13  ;;  %v3765_v7 = vshrl.u32 %v3760_v10, 16 }
 0x383   :  { %v3663_v52 = vor.u32 %v3662_v21, %v3661_v20  ;;  %v3666_v62 = vshll.u32 %v3665_v17, 23  ;;  %v3791_v36 = vadd.s32 %v3789_v0, %v3783_v1  ;;  %v3785_v50 = vshrl.u32 %v8233_v61, 16 }
 0x384   :  { %v3774_v3 = vadd.s32 %v3773_v54, %v3763_v6  ;;  %vm3792_vm1 = vc.u32 %v3790_v24, %v3786_v63  ;;  %v8259_v42 = vmul.f32 %v3873_v31, %v5454_v11  ;;  %v3675_v4 = vsel %vm3552_vm12, %v3674_v38, %v8206_v23 }
 0x385   :  { %v3667_v15 = vor.u32 4788187, %v3666_v62  ;;  %v3670_v29 = vcvt.s32.f32 %v3663_v52  ;;  %v3793_v44 = vsel %vm3792_vm1, 1, %v5435_v8  ;;  %vm8267_vm2 = vcmp.le.f32.partialorder %v3550_v58, 0.7853982 }
 0x386   :  { %v3744_v61 = vsel %vm3738_vm6, %v3741_v56, %v3743_v22  ;;  %v3787_v10 = vshrl.u32 %v3782_v55, 16  ;;  %v3795_v33 = vadd.s32 %v3793_v44, %v3791_v36  ;;  %v3775_v28 = vadd.s32 %v3774_v3, %v3765_v7 }
 0x387   :  { %v3668_v16 = vand.u32 2147483647, %v3667_v15  ;;  %v3794_v35 = vadd.s32 %v3790_v24, %v3786_v63  ;;  %v3884_v5 = vand.u32 2139095040, %v8259_v42  ;;  %v3677_v23 = vsel %vm8267_vm2, 0, %v3675_v4 }
 0x388   :  { %v3796_v19 = vadd.s32 %v3795_v33, %v3785_v50  ;;  %v8277_v48 = vmul.f32 %v3874_v37, %v5454_v11  ;;  %v3798_v57 = vmul.u32 %v8204_v59, %v3744_v61  ;;  %v3694_v22 = vadd.s32 3, %v3677_v23 }
 0x389   :  { %v3671_v58 = vmul.f32 %v3670_v29, %v3668_v16  ;;  %v3885_v34 = vshrl.u32 %v3884_v5, 23  ;;  %vm3800_vm3 = vc.u32 %v3775_v28, %v3794_v35  ;;  %v3881_v31 = vand.u32 2147483647, %v8259_v42 }
 0x38a   :  { %v3797_v30 = vadd.s32 %v3796_v19, %v3787_v10  ;;  %v4039_v46 = vand.u32 2139095040, %v8277_v48  ;;  %v8287_v59 = vand.u32 3, %v3694_v22  ;;  %v4036_v9 = vand.u32 2147483647, %v8277_v48 }
 0x38b   :  { %v3672_v56 = vxor.u32 2147483648, %v3671_v58  ;;  %v5367_v55 = vadd.s32 4294967169, %v3885_v34  ;;  %v3888_v21 = vand.u32 8388607, %v3881_v31  ;;  %v8295_v3 = vadd.f32 24576.0, %v5460_v14 }
 0x38c   :  { %v3801_v1 = vadd.s32 1, %v3797_v30  ;;  %v4040_v54 = vshrl.u32 %v4039_v46, 23  ;;  %vm3700_vm5 = vcmp.eq.s32.totalorder %v8287_v59, 2  ;;  %v8298_v50 = vadd.s32 %v3794_v35, %v3775_v28 }
 0x38d   :  { %v3673_v20 = vsel %vm3552_vm12, %v3672_v56, %v3671_v58  ;;  %v3891_v41 = vadd.s32 1, %v5367_v55  ;;  %v3889_v15 = vor.u32 8388608, %v3888_v21  ;;  %v8305_v10 = vand.u32 8388607, %v4036_v9 }
 0x38e   :  { %v3676_v18 = vsel %vm8267_vm2, %v7991_v32, %v3673_v20  ;;  %v3802_v38 = vsel %vm3800_vm3, %v3801_v1, %v3797_v30  ;;  %v5370_v4 = vadd.s32 4294967169, %v4040_v54  ;;  %vm3697_vm6 = vcmp.eq.s32.totalorder %v8287_v59, 0 }
 0x38f   :  { %v3678_v6 = vmul.f32 %v3676_v18, %v3676_v18  ;;  %v3803_v63 = vadd.s32 %v3802_v38, %v3798_v57  ;;  %vm3892_vm4 = vcmp.gt.s32.totalorder %v3891_v41, 0  ;;  %vm3696_vm7 = vcmp.lt.s32.totalorder %v8287_v59, 2 }
 0x390   :  { %v3893_v17 = vsel %vm3892_vm4, %v3891_v41, 0  ;;  %vm3693_vm8 = vweird.f32 %v7991_v32  ;;  %v8323_v57 = vshll.u32 %v3889_v15, 8  ;;  %v8325_v56 = vadd.s32 1, %v5370_v4 }
 0x391   :  { %v3679_v0 = vmul.f32 -0.001358992, %v3678_v6  ;;  %v3686_v24 = vmul.f32 -0.00019511016, %v3678_v6  ;;  %v3804_v37 = vadd.s32 536870912, %v3803_v63  ;;  %v3895_v52 = vand.u32 31, %v3893_v17 }
 0x392   :  { %v8308_v33 = vshrl.u32 %v3893_v17, 5  ;;  %vm3707_vm10 = vcmp.lt.s32.totalorder %v8033_v39, 0  ;;  %vm8345_vm13 = vcmp.le.f32.partialorder %v3705_v26, 0.7853982  ;;  %vm4047_vm1 = vcmp.gt.s32.totalorder %v8325_v56, 0 }
 0x393   :  { %v3680_v62 = vadd.f32 0.041655596, %v3679_v0  ;;  %v3687_v7 = vadd.f32 0.008332121, %v3686_v24  ;;  %v8292_v36 = vshrl.u32 %v3804_v37, 30  ;;  %v8300_v29 = vsub.s32 32, %v3895_v52 }
 0x394   :  { %v3898_v16 = vshll.u32 %v5429_v43, %v3895_v52  ;;  %v3901_v35 = vshll.u32 %v5430_v45, %v3895_v52  ;;  %v3904_v34 = vshll.u32 %v5431_v47, %v3895_v52  ;;  %v3907_v20 = vshll.u32 %v5432_v49, %v3895_v52 }
 0x395   :  { %v3681_v44 = vmul.f32 %v3680_v62, %v3678_v6  ;;  %v3688_v2 = vmul.f32 %v3687_v7, %v3678_v6  ;;  %v3806_v61 = vshll.u32 %v8292_v36, 30  ;;  %v3899_v28 = vshrl.u32 %v5430_v45, %v8300_v29 }
 0x396   :  { %v3902_v58 = vshrl.u32 %v5431_v47, %v8300_v29  ;;  %v3905_v30 = vshrl.u32 %v5432_v49, %v8300_v29  ;;  %v3908_v41 = vshrl.u32 %v5433_v51, %v8300_v29  ;;  %vm3913_vm11 = vcmp.lt.s32.totalorder %v8308_v33, 1 }
 0x397   :  { %v3682_v5 = vadd.f32 -0.4999988, %v3681_v44  ;;  %v3689_v23 = vadd.f32 -0.16666654, %v3688_v2  ;;  %v8315_v19 = vsub.s32 %v3803_v63, %v3806_v61  ;;  %v8330_v46 = vor.u32 %v3899_v28, %v3898_v16 }
 0x398   :  { %v3909_v54 = vor.u32 %v3908_v41, %v3907_v20  ;;  %v3910_v0 = vshll.u32 %v5433_v51, %v3895_v52  ;;  %v3911_v24 = vshrl.u32 %v5434_v60, %v8300_v29  ;;  %v3906_v7 = vor.u32 %v3905_v30, %v3904_v34 }
 0x399   :  { %v3683_v22 = vmul.f32 %v3682_v5, %v3678_v6  ;;  %v3690_v55 = vmul.f32 %v3689_v23, %v3678_v6  ;;  %vm3808_vm9 = vcmp.lt.s32.totalorder %v8315_v19, 0  ;;  %v3809_v1 = vsub.s32 0, %v8315_v19 }
 0x39a   :  { %v8337_v6 = vor.u32 %v3902_v58, %v3901_v35  ;;  %vm3916_vm12 = vcmp.lt.s32.totalorder %v8308_v33, 4  ;;  %vm3915_vm14 = vcmp.lt.s32.totalorder %v8308_v33, 3  ;;  %v3930_v44 = vand.u32 65535, %v8323_v57 }
 0x39b   :  { %v3684_v38 = vadd.f32 1.0, %v3683_v22  ;;  %v3691_v63 = vadd.f32 1.0, %v3690_v55  ;;  %v3810_v21 = vsel %vm3808_vm9, %v3809_v1, %v8315_v19  ;;  %v3922_v52 = vsel %vm3916_vm12, %v3909_v54, 920167782 }
 0x39c   :  { %v3811_v17 = vclz %v3810_v21  ;;  %v3829_v61 = vsub.s32 4, %v8292_v36  ;;  %v3931_v16 = vshrl.u32 %v8323_v57, 16  ;;  %v3912_v26 = vor.u32 %v3911_v24, %v3910_v0 }
 0x39d   :  { %v3692_v37 = vmul.f32 %v3691_v63, %v3676_v18  ;;  %v3701_v62 = vxor.u32 2147483648, %v3684_v38  ;;  %vm3914_vm0 = vcmp.lt.s32.totalorder %v8308_v33, 2  ;;  %v3921_v28 = vsel %vm3913_vm11, %v8330_v46, %v8337_v6 }
 0x39e   :  { %v5365_v4 = vadd.s32 4294967294, %v3811_v17  ;;  %v3865_v23 = vand.u32 2147483647, %v8130_v40  ;;  %v3923_v58 = vsel %vm3915_vm14, %v3906_v7, %v3922_v52  ;;  %v3830_v20 = vsel %vm3707_vm10, %v3829_v61, %v8292_v36 }
 0x39f   :  { %v3698_v2 = vxor.u32 2147483648, %v3692_v37  ;;  %v3702_v18 = vsel %vm3700_vm5, %v3701_v62, %v3692_v37  ;;  %v3897_v40 = vshrl.u32 %v5429_v43, %v8300_v29  ;;  %v3924_v32 = vsel %vm3914_vm0, %v3921_v28, %v3923_v58 }
 0x3a0   :  { %vm5366_vm15 = vcmp.lt.s32.totalorder %v5365_v4, 0  ;;  %v3925_v36 = vsel %vm3913_vm11, %v8337_v6, %v3906_v7  ;;  %v3926_v29 = vsel %vm3916_vm12, %v3912_v26, 1326507024  ;;  %v3954_v24 = vand.u32 65535, %v3924_v32 }
 0x3a1   :  { %v3699_v35 = vsel %vm3697_vm6, %v3684_v38, %v3698_v2  ;;  %v3814_v5 = vsel %vm5366_vm15, 0, %v5365_v4  ;;  %v3872_v38 = vmax.f32 %v3865_v23, %v7988_v27  ;;  %v3927_v0 = vsel %vm3915_vm14, %v3909_v54, %v3926_v29 }
 0x3a2   :  { %v3703_v34 = vsel %vm3696_vm7, %v3699_v35, %v3702_v18  ;;  %v3815_v30 = vsub.s32 32, %v3814_v5  ;;  %v3816_v22 = vshll.u32 %v8315_v19, %v3814_v5  ;;  %v3819_v55 = vsub.s32 4294967266, %v3814_v5 }
 0x3a3   :  { %v3704_v1 = vsel %vm3693_vm8, nan, %v3703_v34  ;;  %v3866_v19 = vand.u32 2147483647, %v8238_v25  ;;  %v3832_v27 = vsel %vm8345_vm13, 0, %v3830_v20  ;;  %v3928_v25 = vsel %vm3914_vm0, %v3925_v36, %v3927_v0 }
 0x3a4   :  { %v3817_v41 = vshrl.u32 %v8298_v50, %v3815_v30  ;;  %v3820_v59 = vadd.s32 127, %v3819_v55  ;;  %3863 = vst [vmem:[#allocation3 + $0xb0] sm:$0xff] %v3704_v1  ;;  %v3867_v63 = vand.u32 2147483647, %v3704_v1  ;;  %v3955_v37 = vshrl.u32 %v3924_v32, 16 }
 0x3a5   :  { %v4510_v50 = vmax.f32 %v3866_v19, %v3872_v38  ;;  %v3932_v2 = vand.u32 65535, %v3928_v25  ;;  %v3917_v18 = vsel %vm3913_vm11, %v3897_v40, %v8330_v46  ;;  %v3918_v54 = vsel %vm3916_vm12, %v3906_v7, 2102212464 }
 0x3a6   :  { %v3818_v21 = vor.u32 %v3817_v41, %v3816_v22  ;;  %v3821_v17 = vshll.u32 %v3820_v59, 23  ;;  %v3933_v61 = vshrl.u32 %v3928_v25, 16  ;;  %v4048_v26 = vsel %vm4047_vm1, %v8325_v56, 0 }
 0x3a7   :  { %v8394_v52 = vmax.f32 %v3867_v63, %v4510_v50  ;;  %v3936_v35 = vmul.u32 %v3932_v2, %v3931_v16  ;;  %v3956_v5 = vmul.u32 %v3954_v24, %v3930_v44  ;;  %v3957_v23 = vmul.u32 %v3955_v37, %v3930_v44 }
 0x3a8   :  { %v3822_v62 = vor.u32 4788187, %v3821_v17  ;;  %v3825_v4 = vcvt.s32.f32 %v3818_v21  ;;  %v3849_v58 = vadd.s32 3, %v3832_v27  ;;  %v3934_v34 = vmul.u32 %v3932_v2, %v3930_v44 }
 0x3a9   :  { %v3935_v30 = vmul.u32 %v3933_v61, %v3930_v44  ;;  %v3958_v22 = vmul.u32 %v3954_v24, %v3931_v16  ;;  %v3919_v46 = vsel %vm3915_vm14, %v8337_v6, %v3918_v54  ;;  %v3959_v1 = vmul.u32 %v3955_v37, %v3931_v16 }
 0x3aa   :  { %v3823_v28 = vand.u32 2147483647, %v3822_v62  ;;  %v3960_v7 = vshll.u32 %v3957_v23, 16  ;;  %v3937_v20 = vmul.u32 %v3933_v61, %v3931_v16  ;;  %v3940_v41 = vshll.u32 %v3936_v35, 16 }
 0x3ab   :  { %v3938_v40 = vshll.u32 %v3935_v30, 16  ;;  %v3962_v59 = vshll.u32 %v3958_v22, 16  ;;  %v3939_v38 = vshrl.u32 %v3935_v30, 16  ;;  %v3961_v32 = vshrl.u32 %v3957_v23, 16 }
 0x3ac   :  { %v3826_v55 = vmul.f32 %v3825_v4, %v3823_v28  ;;  %vm3964_vm2 = vc.u32 %v3956_v5, %v3960_v7  ;;  %v3966_v19 = vadd.s32 %v3960_v7, %v3956_v5  ;;  %v3963_v27 = vshrl.u32 %v3958_v22, 16 }
 0x3ad   :  { %vm3942_vm3 = vc.u32 %v3934_v34, %v3938_v40  ;;  %v3944_v63 = vadd.s32 %v3938_v40, %v3934_v34  ;;  %v3965_v44 = vsel %vm3964_vm2, 1, %v5435_v8  ;;  %v3941_v24 = vshrl.u32 %v3936_v35, 16 }
 0x3ae   :  { %v3827_v56 = vxor.u32 2147483648, %v3826_v55  ;;  %v3943_v6 = vsel %vm3942_vm3, 1, %v5435_v8  ;;  %v3967_v29 = vadd.s32 %v3965_v44, %v3959_v1  ;;  %vm3968_vm4 = vc.u32 %v3966_v19, %v3962_v59 }
 0x3af   :  { %v3945_v21 = vadd.s32 %v3943_v6, %v3937_v20  ;;  %vm3946_vm5 = vc.u32 %v3944_v63, %v3940_v41  ;;  %v3969_v17 = vsel %vm3968_vm4, 1, %v5435_v8  ;;  %v8416_v62 = vshrl.u32 %v4048_v26, 5 }
 0x3b0   :  { %v3828_v36 = vsel %vm3707_vm10, %v3827_v56, %v3826_v55  ;;  %v3947_v0 = vsel %vm3946_vm5, 1, %v5435_v8  ;;  %v3971_v25 = vadd.s32 %v3969_v17, %v3967_v29  ;;  %v4050_v4 = vand.u32 31, %v4048_v26 }
 0x3b1   :  { %v3831_v16 = vsel %vm8345_vm13, %v8033_v39, %v3828_v36  ;;  %v3949_v37 = vadd.s32 %v3947_v0, %v3945_v21  ;;  %v3920_v15 = vsel %vm3914_vm0, %v3917_v18, %v3919_v46  ;;  %v8420_v28 = vand.u32 3, %v3849_v58 }
 0x3b2   :  { %v3833_v50 = vmul.f32 %v3831_v16, %v3831_v16  ;;  %v3972_v61 = vadd.s32 %v3971_v25, %v3961_v32  ;;  %v8422_v23 = vadd.s32 %v3966_v19, %v3962_v59  ;;  %v4051_v34 = vsub.s32 32, %v4050_v4 }
 0x3b3   :  { %v3950_v5 = vadd.s32 %v3949_v37, %v3939_v38  ;;  %v4053_v35 = vshll.u32 %v5429_v43, %v4050_v4  ;;  %v3974_v26 = vmul.u32 %v8323_v57, %v3920_v15  ;;  %vm4068_vm6 = vcmp.lt.s32.totalorder %v8416_v62, 1 }
 0x3b4   :  { %v3834_v2 = vmul.f32 -0.001358992, %v3833_v50  ;;  %v3841_v54 = vmul.f32 -0.00019511016, %v3833_v50  ;;  %v3973_v55 = vadd.s32 %v3972_v61, %v3963_v27  ;;  %v4054_v7 = vshrl.u32 %v5430_v45, %v4051_v34 }
 0x3b5   :  { %v8425_v1 = vadd.s32 %v3950_v5, %v3941_v24  ;;  %v4056_v46 = vshll.u32 %v5430_v45, %v4050_v4  ;;  %v4057_v20 = vshrl.u32 %v5431_v47, %v4051_v34  ;;  %v4059_v40 = vshll.u32 %v5431_v47, %v4050_v4 }
 0x3b6   :  { %v3835_v30 = vadd.f32 0.041655596, %v3834_v2  ;;  %v3842_v22 = vadd.f32 0.008332121, %v3841_v54  ;;  %v3977_v58 = vadd.s32 1, %v3973_v55  ;;  %v4060_v41 = vshrl.u32 %v5432_v49, %v4051_v34 }
 0x3b7   :  { %vm3976_vm7 = vc.u32 %v8425_v1, %v8422_v23  ;;  %v8436_v38 = vor.u32 %v4054_v7, %v4053_v35  ;;  %v4062_v63 = vshll.u32 %v5432_v49, %v4050_v4  ;;  %v4063_v32 = vshrl.u32 %v5433_v51, %v4051_v34 }
 0x3b8   :  { %v3836_v33 = vmul.f32 %v3835_v30, %v3833_v50  ;;  %v3843_v18 = vmul.f32 %v3842_v22, %v3833_v50  ;;  %v3978_v56 = vsel %vm3976_vm7, %v3977_v58, %v3973_v55  ;;  %v4065_v44 = vshll.u32 %v5433_v51, %v4050_v4 }
 0x3b9   :  { %v3979_v19 = vadd.s32 %v3978_v56, %v3974_v26  ;;  %v4066_v29 = vshrl.u32 %v5434_v60, %v4051_v34  ;;  %vm4071_vm8 = vcmp.lt.s32.totalorder %v8416_v62, 4  ;;  %v8443_v17 = vor.u32 %v4057_v20, %v4056_v46 }
 0x3ba   :  { %v3837_v59 = vadd.f32 -0.4999988, %v3836_v33  ;;  %v3844_v57 = vadd.f32 -0.16666654, %v3843_v18  ;;  %v4061_v0 = vor.u32 %v4060_v41, %v4059_v40  ;;  %v4064_v27 = vor.u32 %v4063_v32, %v4062_v63 }
 0x3bb   :  { %v3980_v21 = vadd.s32 536870912, %v3979_v19  ;;  %v4067_v37 = vor.u32 %v4066_v29, %v4065_v44  ;;  %vm4070_vm9 = vcmp.lt.s32.totalorder %v8416_v62, 3  ;;  %vm3855_vm10 = vcmp.eq.s32.totalorder %v8420_v28, 2 }
 0x3bc   :  { %v3838_v36 = vmul.f32 %v3837_v59, %v3833_v50  ;;  %v3845_v6 = vmul.f32 %v3844_v57, %v3833_v50  ;;  %v4044_v50 = vor.u32 8388608, %v8305_v10  ;;  %v4077_v4 = vsel %vm4071_vm8, %v4064_v27, 920167782 }
 0x3bd   :  { %v8447_v2 = vshrl.u32 %v3980_v21, 30  ;;  %vm3851_vm11 = vcmp.lt.s32.totalorder %v8420_v28, 2  ;;  %vm3852_vm12 = vcmp.eq.s32.totalorder %v8420_v28, 0  ;;  %vm4069_vm13 = vcmp.lt.s32.totalorder %v8416_v62, 2 }
 0x3be   :  { %v3839_v25 = vadd.f32 1.0, %v3838_v36  ;;  %v3846_v24 = vadd.f32 1.0, %v3845_v6  ;;  %v4076_v5 = vsel %vm4068_vm6, %v8436_v38, %v8443_v17  ;;  %v4078_v10 = vsel %vm4070_vm9, %v4061_v0, %v4077_v4 }
 0x3bf   :  { %v3982_v61 = vshll.u32 %v8447_v2, 30  ;;  %v4081_v55 = vsel %vm4071_vm8, %v4067_v37, 1326507024  ;;  %vm3848_vm14 = vweird.f32 %v8033_v39  ;;  %v8470_v7 = vshll.u32 %v4044_v50, 8 }
 0x3c0   :  { %v3847_v54 = vmul.f32 %v3846_v24, %v3831_v16  ;;  %v3856_v15 = vxor.u32 2147483648, %v3839_v25  ;;  %v4080_v16 = vsel %vm4068_vm6, %v8443_v17, %v4061_v0  ;;  %v4082_v26 = vsel %vm4070_vm9, %v4064_v27, %v4081_v55 }
 0x3c1   :  { %v3983_v35 = vsub.s32 %v3979_v19, %v3982_v61  ;;  %v4052_v18 = vshrl.u32 %v5429_v43, %v4051_v34  ;;  %v4079_v58 = vsel %vm4069_vm13, %v4076_v5, %v4078_v10  ;;  %v4083_v46 = vsel %vm4069_vm13, %v4080_v16, %v4082_v26 }
 0x3c2   :  { %v3853_v30 = vxor.u32 2147483648, %v3847_v54  ;;  %v3857_v22 = vsel %vm3855_vm10, %v3856_v15, %v3847_v54  ;;  %v4085_v40 = vand.u32 65535, %v8470_v7  ;;  %v4086_v59 = vshrl.u32 %v8470_v7, 16 }
 0x3c3   :  { %vm3984_vm15 = vcmp.lt.s32.totalorder %v3983_v35, 0  ;;  %v3985_v39 = vsub.s32 0, %v3983_v35  ;;  %v4087_v57 = vand.u32 65535, %v4083_v46  ;;  %v4088_v56 = vshrl.u32 %v4083_v46, 16 }
 0x3c4   :  { %v3854_v33 = vsel %vm3852_vm12, %v3839_v25, %v3853_v30  ;;  %v4109_v63 = vand.u32 65535, %v4079_v58  ;;  %v4110_v32 = vshrl.u32 %v4079_v58, 16  ;;  %v3876_v21 = vadd.f32 24576.0, %v5668_v53 }
 0x3c5   :  { %v3858_v20 = vsel %vm3851_vm11, %v3854_v33, %v3857_v22  ;;  %v3986_v19 = vsel %vm3984_vm15, %v3985_v39, %v3983_v35  ;;  %v4089_v36 = vmul.u32 %v4087_v57, %v4085_v40  ;;  %v4090_v6 = vmul.u32 %v4088_v56, %v4085_v40 }
 0x3c6   :  { %v3859_v41 = vsel %vm3848_vm14, nan, %v3858_v20  ;;  %v3987_v44 = vclz %v3986_v19  ;;  %v4091_v29 = vmul.u32 %v4087_v57, %v4086_v59  ;;  %v4112_v27 = vmul.u32 %v4110_v32, %v4085_v40 }
 0x3c7   :  { %3864 = vst [vmem:[#allocation3 + $0xb8] sm:$0xff] %v3859_v41  ;;  %v3868_v34 = vand.u32 2147483647, %v3859_v41  ;;  %v8487_v25 = vmul.f32 %v8295_v3, %v5454_v11  ;;  %v4092_v37 = vmul.u32 %v4088_v56, %v4086_v59  ;;  %v4093_v50 = vshll.u32 %v4090_v6, 16 }
 0x3c8   :  { %v5368_v24 = vadd.s32 4294967294, %v3987_v44  ;;  %vm3883_vm0 = vcmp.lt.s32.totalorder %v8259_v42, 0  ;;  %v3975_v4 = vadd.s32 %v8422_v23, %v8425_v1  ;;  %v4073_v54 = vsel %vm4071_vm8, %v4061_v0, 2102212464 }
 0x3c9   :  { %v8482_v28 = vmax.f32 %v3868_v34, %v8394_v52  ;;  %v4072_v52 = vsel %vm4068_vm6, %v4052_v18, %v8436_v38  ;;  %v4095_v15 = vshll.u32 %v4091_v29, 16  ;;  %vm4097_vm2 = vc.u32 %v4089_v36, %v4093_v50 }
 0x3ca   :  { %vm5369_vm1 = vcmp.lt.s32.totalorder %v5368_v24, 0  ;;  %v4099_v3 = vadd.s32 %v4093_v50, %v4089_v36  ;;  %v4113_v61 = vmul.u32 %v4109_v63, %v4086_v59  ;;  %v4098_v10 = vsel %vm4097_vm2, 1, %v5435_v8 }
 0x3cb   :  { %v3990_v5 = vsel %vm5369_vm1, 0, %v5368_v24  ;;  %v4111_v30 = vmul.u32 %v4109_v63, %v4085_v40  ;;  %v4115_v22 = vshll.u32 %v4112_v27, 16  ;;  %v4100_v1 = vadd.s32 %v4098_v10, %v4092_v37 }
 0x3cc   :  { %v3991_v16 = vsub.s32 32, %v3990_v5  ;;  %v3992_v55 = vshll.u32 %v3983_v35, %v3990_v5  ;;  %v3995_v23 = vsub.s32 4294967266, %v3990_v5  ;;  %v4005_v26 = vsub.s32 4, %v8447_v2 }
 0x3cd   :  { %v4094_v38 = vshrl.u32 %v4090_v6, 16  ;;  %vm4101_vm3 = vc.u32 %v4099_v3, %v4095_v15  ;;  %v4114_v33 = vmul.u32 %v4110_v32, %v4086_v59  ;;  %v4117_v46 = vshll.u32 %v4113_v61, 16 }
 0x3ce   :  { %v3993_v0 = vshrl.u32 %v3975_v4, %v3991_v16  ;;  %v3996_v18 = vadd.s32 127, %v3995_v23  ;;  %v4102_v58 = vsel %vm4101_vm3, 1, %v5435_v8  ;;  %v4074_v20 = vsel %vm4070_vm9, %v8443_v17, %v4073_v54 }
 0x3cf   :  { %v4104_v39 = vadd.s32 %v4102_v58, %v4100_v1  ;;  %vm4119_vm4 = vc.u32 %v4111_v30, %v4115_v22  ;;  %v4121_v40 = vadd.s32 %v4115_v22, %v4111_v30  ;;  %v4096_v57 = vshrl.u32 %v4091_v29, 16 }
 0x3d0   :  { %v3994_v35 = vor.u32 %v3993_v0, %v3992_v55  ;;  %v3997_v41 = vshll.u32 %v3996_v18, 23  ;;  %v4120_v56 = vsel %vm4119_vm4, 1, %v5435_v8  ;;  %v4116_v19 = vshrl.u32 %v4112_v27, 16 }
 0x3d1   :  { %v4105_v34 = vadd.s32 %v4104_v39, %v4094_v38  ;;  %v4122_v59 = vadd.s32 %v4120_v56, %v4114_v33  ;;  %vm4123_vm5 = vc.u32 %v4121_v40, %v4117_v46  ;;  %v4006_v44 = vsel %vm3883_vm0, %v4005_v26, %v8447_v2 }
 0x3d2   :  { %v3998_v63 = vor.u32 4788187, %v3997_v41  ;;  %v4001_v32 = vcvt.s32.f32 %v3994_v35  ;;  %v4124_v17 = vsel %vm4123_vm5, 1, %v5435_v8  ;;  %v4118_v36 = vshrl.u32 %v4113_v61, 16 }
 0x3d3   :  { %v4126_v6 = vadd.s32 %v4124_v17, %v4122_v59  ;;  %v4191_v24 = vand.u32 2147483647, %v8487_v25  ;;  %v4194_v29 = vand.u32 2139095040, %v8487_v25  ;;  %v8511_v37 = vmul.f32 %v3876_v21, %v5454_v11 }
 0x3d4   :  { %v3999_v27 = vand.u32 2147483647, %v3998_v63  ;;  %v8513_v50 = vadd.s32 %v4105_v34, %v4096_v57  ;;  %v8515_v4 = vadd.s32 %v4121_v40, %v4117_v46  ;;  %vm8519_vm6 = vcmp.le.f32.partialorder %v3881_v31, 0.7853982 }
 0x3d5   :  { %v4075_v54 = vsel %vm4069_vm13, %v4072_v52, %v4074_v20  ;;  %v4127_v15 = vadd.s32 %v4126_v6, %v4116_v19  ;;  %v4195_v3 = vshrl.u32 %v4194_v29, 23  ;;  %v4008_v21 = vsel %vm8519_vm6, 0, %v4006_v44 }
 0x3d6   :  { %v4002_v61 = vmul.f32 %v4001_v32, %v3999_v27  ;;  %v4198_v30 = vand.u32 8388607, %v4191_v24  ;;  %v4129_v31 = vmul.u32 %v8470_v7, %v4075_v54  ;;  %vm4131_vm7 = vc.u32 %v8513_v50, %v8515_v4 }
 0x3d7   :  { %v4128_v5 = vadd.s32 %v4127_v15, %v4118_v36  ;;  %v5373_v10 = vadd.s32 4294967169, %v4195_v3  ;;  %v4349_v62 = vand.u32 2139095040, %v8511_v37  ;;  %v4025_v52 = vadd.s32 3, %v4008_v21 }
 0x3d8   :  { %v4003_v22 = vxor.u32 2147483648, %v4002_v61  ;;  %v4346_v1 = vand.u32 2147483647, %v8511_v37  ;;  %v4199_v33 = vor.u32 8388608, %v4198_v30  ;;  %vm4024_vm12 = vweird.f32 %v8259_v42 }
 0x3d9   :  { %v4132_v16 = vadd.s32 1, %v4128_v5  ;;  %v4201_v55 = vadd.s32 1, %v5373_v10  ;;  %v4350_v58 = vshrl.u32 %v4349_v62, 23  ;;  %v8539_v46 = vand.u32 3, %v4025_v52 }
 0x3da   :  { %v4004_v23 = vsel %vm3883_vm0, %v4003_v22, %v4002_v61  ;;  %v8543_v57 = vshll.u32 %v4199_v33, 8  ;;  %v8547_v56 = vand.u32 8388607, %v4346_v1  ;;  %vm4038_vm1 = vcmp.lt.s32.totalorder %v8277_v48, 0 }
 0x3db   :  { %v4007_v26 = vsel %vm8519_vm6, %v8259_v42, %v4004_v23  ;;  %v4133_v38 = vsel %vm4131_vm7, %v4132_v16, %v4128_v5  ;;  %vm4202_vm8 = vcmp.gt.s32.totalorder %v4201_v55, 0  ;;  %v5376_v63 = vadd.s32 4294967169, %v4350_v58 }
 0x3dc   :  { %v4009_v7 = vmul.f32 %v4007_v26, %v4007_v26  ;;  %v4134_v0 = vadd.s32 %v4133_v38, %v4129_v31  ;;  %v4203_v18 = vsel %vm4202_vm8, %v4201_v55, 0  ;;  %vm4031_vm9 = vcmp.eq.s32.totalorder %v8539_v46, 2 }
 0x3dd   :  { %v4205_v20 = vand.u32 31, %v4203_v18  ;;  %v8552_v32 = vshrl.u32 %v4203_v18, 5  ;;  %vm4028_vm10 = vcmp.eq.s32.totalorder %v8539_v46, 0  ;;  %vm4027_vm11 = vcmp.lt.s32.totalorder %v8539_v46, 2 }
 0x3de   :  { %v4010_v39 = vmul.f32 -0.001358992, %v4009_v7  ;;  %v4017_v40 = vmul.f32 -0.00019511016, %v4009_v7  ;;  %v4135_v35 = vadd.s32 536870912, %v4134_v0  ;;  %v4356_v30 = vadd.s32 1, %v5376_v63 }
 0x3df   :  { %v8541_v41 = vsub.s32 32, %v4205_v20  ;;  %v4208_v44 = vshll.u32 %v5429_v43, %v4205_v20  ;;  %v4217_v36 = vshll.u32 %v5432_v49, %v4205_v20  ;;  %v4211_v2 = vshll.u32 %v5430_v45, %v4205_v20 }
 0x3e0   :  { %v4011_v34 = vadd.f32 0.041655596, %v4010_v39  ;;  %v4018_v19 = vadd.f32 0.008332121, %v4017_v40  ;;  %v8549_v59 = vshrl.u32 %v4135_v35, 30  ;;  %v4214_v15 = vshll.u32 %v5431_v47, %v4205_v20 }
 0x3e1   :  { %v4209_v17 = vshrl.u32 %v5430_v45, %v8541_v41  ;;  %v4212_v54 = vshrl.u32 %v5431_v47, %v8541_v41  ;;  %v4215_v3 = vshrl.u32 %v5432_v49, %v8541_v41  ;;  %v4218_v61 = vshrl.u32 %v5433_v51, %v8541_v41 }
 0x3e2   :  { %v4012_v6 = vmul.f32 %v4011_v34, %v4009_v7  ;;  %v4019_v29 = vmul.f32 %v4018_v19, %v4009_v7  ;;  %v4137_v27 = vshll.u32 %v8549_v59, 30  ;;  %v4220_v62 = vshll.u32 %v5433_v51, %v4205_v20 }
 0x3e3   :  { %v4210_v22 = vor.u32 %v4209_v17, %v4208_v44  ;;  %v4219_v31 = vor.u32 %v4218_v61, %v4217_v36  ;;  %v4221_v52 = vshrl.u32 %v5434_v60, %v8541_v41  ;;  %v4213_v38 = vor.u32 %v4212_v54, %v4211_v2 }
 0x3e4   :  { %v4013_v21 = vadd.f32 -0.4999988, %v4012_v6  ;;  %v4020_v5 = vadd.f32 -0.16666654, %v4019_v29  ;;  %v8569_v10 = vsub.s32 %v4134_v0, %v4137_v27  ;;  %v4216_v33 = vor.u32 %v4215_v3, %v4214_v15 }
 0x3e5   :  { %vm4223_vm14 = vcmp.lt.s32.totalorder %v8552_v32, 1  ;;  %vm4225_vm15 = vcmp.lt.s32.totalorder %v8552_v32, 3  ;;  %vm4226_vm0 = vcmp.lt.s32.totalorder %v8552_v32, 4  ;;  %v4354_v39 = vor.u32 8388608, %v8547_v56 }
 0x3e6   :  { %v4014_v16 = vmul.f32 %v4013_v21, %v4009_v7  ;;  %v4021_v55 = vmul.f32 %v4020_v5, %v4009_v7  ;;  %vm4139_vm13 = vcmp.lt.s32.totalorder %v8569_v10, 0  ;;  %v4140_v23 = vsub.s32 0, %v8569_v10 }
 0x3e7   :  { %v4130_v7 = vadd.s32 %v8515_v4, %v8513_v50  ;;  %vm4357_vm2 = vcmp.gt.s32.totalorder %v4356_v30, 0  ;;  %v4222_v34 = vor.u32 %v4221_v52, %v4220_v62  ;;  %v4232_v19 = vsel %vm4226_vm0, %v4219_v31, 920167782 }
 0x3e8   :  { %v4015_v0 = vadd.f32 1.0, %v4014_v16  ;;  %v4022_v18 = vadd.f32 1.0, %v4021_v55  ;;  %v4141_v58 = vsel %vm4139_vm13, %v4140_v23, %v8569_v10  ;;  %vm4224_vm3 = vcmp.lt.s32.totalorder %v8552_v32, 2 }
 0x3e9   :  { %v4142_v20 = vclz %v4141_v58  ;;  %v4231_v44 = vsel %vm4223_vm14, %v4210_v22, %v4213_v38  ;;  %v4233_v17 = vsel %vm4225_vm15, %v4216_v33, %v4232_v19  ;;  %v4358_v36 = vsel %vm4357_vm2, %v4356_v30, 0 }
 0x3ea   :  { %v4023_v40 = vmul.f32 %v4022_v18, %v4007_v26  ;;  %v4032_v35 = vxor.u32 2147483648, %v4015_v0  ;;  %v4240_v26 = vand.u32 65535, %v8543_v57  ;;  %vm8597_vm4 = vcmp.le.f32.partialorder %v4036_v9, 0.7853982 }
 0x3eb   :  { %v5371_v63 = vadd.s32 4294967294, %v4142_v20  ;;  %v4160_v29 = vsub.s32 4, %v8549_v59  ;;  %v4207_v27 = vshrl.u32 %v5429_v43, %v8541_v41  ;;  %v4235_v2 = vsel %vm4223_vm14, %v4213_v38, %v4216_v33 }
 0x3ec   :  { %v4029_v50 = vxor.u32 2147483648, %v4023_v40  ;;  %v4033_v4 = vsel %vm4031_vm9, %v4032_v35, %v4023_v40  ;;  %v4234_v3 = vsel %vm4224_vm3, %v4231_v44, %v4233_v17  ;;  %v4236_v9 = vsel %vm4226_vm0, %v4222_v34, 1326507024 }
 0x3ed   :  { %vm5372_vm5 = vcmp.lt.s32.totalorder %v5371_v63, 0  ;;  %v4228_v62 = vsel %vm4226_vm0, %v4216_v33, 2102212464  ;;  %v4241_v52 = vshrl.u32 %v8543_v57, 16  ;;  %v8622_v16 = vshrl.u32 %v4358_v36, 5 }
 0x3ee   :  { %v4030_v54 = vsel %vm4028_vm10, %v4015_v0, %v4029_v50  ;;  %v4145_v15 = vsel %vm5372_vm5, 0, %v5371_v63  ;;  %v4237_v46 = vsel %vm4225_vm15, %v4219_v31, %v4236_v9  ;;  %v4264_v0 = vand.u32 65535, %v4234_v3 }
 0x3ef   :  { %v4034_v61 = vsel %vm4027_vm11, %v4030_v54, %v4033_v4  ;;  %v4146_v21 = vsub.s32 32, %v4145_v15  ;;  %v4147_v5 = vshll.u32 %v8569_v10, %v4145_v15  ;;  %v4150_v41 = vsub.s32 4294967266, %v4145_v15 }
 0x3f0   :  { %v8617_v30 = vsel %vm4024_vm12, nan, %v4034_v61  ;;  %v8630_v42 = vsel %vm4038_vm1, %v4160_v29, %v8549_v59  ;;  %v4227_v10 = vsel %vm4223_vm14, %v4207_v27, %v4210_v22  ;;  %v4238_v33 = vsel %vm4224_vm3, %v4235_v2, %v4237_v46 }
 0x3f1   :  { %v4148_v55 = vshrl.u32 %v4130_v7, %v4146_v21  ;;  %v4151_v23 = vadd.s32 127, %v4150_v41  ;;  %4502 = vst [vmem:[#allocation3 + $0xc0] sm:$0xff] %v8617_v30  ;;  %v4265_v18 = vshrl.u32 %v4234_v3, 16  ;;  %v4242_v20 = vand.u32 65535, %v4238_v33 }
 0x3f2   :  { %v4243_v40 = vshrl.u32 %v4238_v33, 16  ;;  %v4229_v31 = vsel %vm4225_vm15, %v4213_v38, %v4228_v62  ;;  %v4266_v35 = vmul.u32 %v4264_v0, %v4240_v26  ;;  %v4268_v19 = vmul.u32 %v4264_v0, %v4241_v52 }
 0x3f3   :  { %v4149_v58 = vor.u32 %v4148_v55, %v4147_v5  ;;  %v4152_v7 = vshll.u32 %v4151_v23, 23  ;;  %v4267_v34 = vmul.u32 %v4265_v18, %v4240_v26  ;;  %v4244_v44 = vmul.u32 %v4242_v20, %v4240_v26 }
 0x3f4   :  { %v4245_v17 = vmul.u32 %v4243_v40, %v4240_v26  ;;  %v4163_v22 = vsel %vm8597_vm4, 0, %v8630_v42  ;;  %v4246_v50 = vmul.u32 %v4242_v20, %v4241_v52  ;;  %v4269_v4 = vmul.u32 %v4265_v18, %v4241_v52 }
 0x3f5   :  { %v4153_v63 = vor.u32 4788187, %v4152_v7  ;;  %v4156_v59 = vcvt.s32.f32 %v4149_v58  ;;  %v4270_v29 = vshll.u32 %v4267_v34, 16  ;;  %v4247_v2 = vmul.u32 %v4243_v40, %v4241_v52 }
 0x3f6   :  { %v4248_v54 = vshll.u32 %v4245_v17, 16  ;;  %v4360_v15 = vand.u32 31, %v4358_v36  ;;  %v8643_v38 = vsel %vm4224_vm3, %v4227_v10, %v4229_v31  ;;  %v4250_v3 = vshll.u32 %v4246_v50, 16 }
 0x3f7   :  { %v4154_v27 = vand.u32 2147483647, %v4153_v63  ;;  %v4272_v9 = vshll.u32 %v4268_v19, 16  ;;  %vm4274_vm6 = vc.u32 %v4266_v35, %v4270_v29  ;;  %v4249_v5 = vshrl.u32 %v4245_v17, 16 }
 0x3f8   :  { %vm4252_vm7 = vc.u32 %v4244_v44, %v4248_v54  ;;  %v4254_v26 = vadd.s32 %v4248_v54, %v4244_v44  ;;  %v4275_v21 = vsel %vm4274_vm6, 1, %v5435_v8  ;;  %v4276_v62 = vadd.s32 %v4270_v29, %v4266_v35 }
 0x3f9   :  { %v4157_v61 = vmul.f32 %v4156_v59, %v4154_v27  ;;  %v4253_v41 = vsel %vm4252_vm7, 1, %v5435_v8  ;;  %v4277_v55 = vadd.s32 %v4275_v21, %v4269_v4  ;;  %v8647_v36 = vsub.s32 32, %v4360_v15 }
 0x3fa   :  { %v4255_v23 = vadd.s32 %v4253_v41, %v4247_v2  ;;  %vm4256_vm8 = vc.u32 %v4254_v26, %v4250_v3  ;;  %v4251_v32 = vshrl.u32 %v4246_v50, 16  ;;  %v4271_v0 = vshrl.u32 %v4267_v34, 16 }
 0x3fb   :  { %v4158_v52 = vxor.u32 2147483648, %v4157_v61  ;;  %v4257_v46 = vsel %vm4256_vm8, 1, %v5435_v8  ;;  %vm4278_vm9 = vc.u32 %v4276_v62, %v4272_v9  ;;  %v4273_v33 = vshrl.u32 %v4268_v19, 16 }
 0x3fc   :  { %v4259_v10 = vadd.s32 %v4257_v46, %v4255_v23  ;;  %v4279_v18 = vsel %vm4278_vm9, 1, %v5435_v8  ;;  %v8656_v7 = vadd.s32 %v4276_v62, %v4272_v9  ;;  %v4363_v40 = vshll.u32 %v5429_v43, %v4360_v15 }
 0x3fd   :  { %v4159_v42 = vsel %vm4038_vm1, %v4158_v52, %v4157_v61  ;;  %v4281_v20 = vadd.s32 %v4279_v18, %v4277_v55  ;;  %v4366_v34 = vshll.u32 %v5430_v45, %v4360_v15  ;;  %v4367_v63 = vshrl.u32 %v5431_v47, %v8647_v36 }
 0x3fe   :  { %v4162_v58 = vsel %vm8597_vm4, %v8277_v48, %v4159_v42  ;;  %v4260_v35 = vadd.s32 %v4259_v10, %v4249_v5  ;;  %v4369_v19 = vshll.u32 %v5431_v47, %v4360_v15  ;;  %v4370_v44 = vshrl.u32 %v5432_v49, %v8647_v36 }
 0x3ff   :  { %v4164_v31 = vmul.f32 %v4162_v58, %v4162_v58  ;;  %v4282_v59 = vadd.s32 %v4281_v20, %v4271_v0  ;;  %v4372_v6 = vshll.u32 %v5432_v49, %v4360_v15  ;;  %v4373_v29 = vshrl.u32 %v5433_v51, %v8647_v36 }
 0x400   :  { %v8666_v4 = vadd.s32 %v4260_v35, %v4251_v32  ;;  %v4364_v2 = vshrl.u32 %v5430_v45, %v8647_v36  ;;  %v4375_v54 = vshll.u32 %v5433_v51, %v4360_v15  ;;  %v4376_v3 = vshrl.u32 %v5434_v60, %v8647_v36 }
 0x401   :  { %v4165_v17 = vmul.f32 -0.001358992, %v4164_v31  ;;  %v4172_v50 = vmul.f32 -0.00019511016, %v4164_v31  ;;  %v4283_v27 = vadd.s32 %v4282_v59, %v4273_v33  ;;  %v4284_v26 = vmul.u32 %v8543_v57, %v8643_v38 }
 0x402   :  { %vm4286_vm10 = vc.u32 %v8666_v4, %v8656_v7  ;;  %v4180_v21 = vadd.s32 3, %v4163_v22  ;;  %v4374_v41 = vor.u32 %v4373_v29, %v4372_v6  ;;  %v4377_v62 = vor.u32 %v4376_v3, %v4375_v54 }
 0x403   :  { %v4166_v9 = vadd.f32 0.041655596, %v4165_v17  ;;  %v4173_v61 = vadd.f32 0.008332121, %v4172_v50  ;;  %v4287_v5 = vadd.s32 1, %v4283_v27  ;;  %v8679_v23 = vor.u32 %v4367_v63, %v4366_v34 }
 0x404   :  { %v8681_v15 = vor.u32 %v4370_v44, %v4369_v19  ;;  %v8683_v46 = vor.u32 %v4364_v2, %v4363_v40  ;;  %vm4378_vm11 = vcmp.lt.s32.totalorder %v8622_v16, 1  ;;  %vm4381_vm12 = vcmp.lt.s32.totalorder %v8622_v16, 4 }
 0x405   :  { %v4167_v55 = vmul.f32 %v4166_v9, %v4164_v31  ;;  %v4174_v52 = vmul.f32 %v4173_v61, %v4164_v31  ;;  %v4288_v32 = vsel %vm4286_vm10, %v4287_v5, %v4283_v27  ;;  %vm4380_vm13 = vcmp.lt.s32.totalorder %v8622_v16, 3 }
 0x406   :  { %v4289_v0 = vadd.s32 %v4288_v32, %v4284_v26  ;;  %v4181_v22 = vand.u32 3, %v4180_v21  ;;  %vm4379_vm14 = vcmp.lt.s32.totalorder %v8622_v16, 2  ;;  %v4387_v42 = vsel %vm4381_vm12, %v4374_v41, 920167782 }
 0x407   :  { %v4168_v57 = vadd.f32 -0.4999988, %v4167_v55  ;;  %v4175_v38 = vadd.f32 -0.16666654, %v4174_v52  ;;  %v4391_v10 = vsel %vm4381_vm12, %v4377_v62, 1326507024  ;;  %v4390_v40 = vsel %vm4378_vm11, %v8679_v23, %v8681_v15 }
 0x408   :  { %v4290_v20 = vadd.s32 536870912, %v4289_v0  ;;  %v4386_v35 = vsel %vm4378_vm11, %v8683_v46, %v8679_v23  ;;  %v4388_v34 = vsel %vm4380_vm13, %v8681_v15, %v4387_v42  ;;  %v4392_v63 = vsel %vm4380_vm13, %v4374_v41, %v4391_v10 }
 0x409   :  { %v4169_v33 = vmul.f32 %v4168_v57, %v4164_v31  ;;  %v4176_v18 = vmul.f32 %v4175_v38, %v4164_v31  ;;  %vm4179_vm15 = vweird.f32 %v8277_v48  ;;  %vm4183_vm0 = vcmp.eq.s32.totalorder %v4181_v22, 0 }
 0x40a   :  { %v8707_v19 = vshrl.u32 %v4290_v20, 30  ;;  %vm4186_vm1 = vcmp.eq.s32.totalorder %v4181_v22, 2  ;;  %v4393_v44 = vsel %vm4379_vm14, %v4390_v40, %v4392_v63  ;;  %v8713_v6 = vshll.u32 %v4354_v39, 8 }
 0x40b   :  { %v4170_v59 = vadd.f32 1.0, %v4169_v33  ;;  %v4177_v31 = vadd.f32 1.0, %v4176_v18  ;;  %v4389_v27 = vsel %vm4379_vm14, %v4386_v35, %v4388_v34  ;;  %v4397_v3 = vand.u32 65535, %v4393_v44 }
 0x40c   :  { %v4292_v29 = vshll.u32 %v8707_v19, 30  ;;  %v4395_v2 = vand.u32 65535, %v8713_v6  ;;  %v4396_v54 = vshrl.u32 %v8713_v6, 16  ;;  %v4398_v9 = vshrl.u32 %v4393_v44, 16 }
 0x40d   :  { %v4178_v17 = vmul.f32 %v4177_v31, %v4162_v58  ;;  %v4187_v50 = vxor.u32 2147483648, %v4170_v59  ;;  %vm4182_vm2 = vcmp.lt.s32.totalorder %v4181_v22, 2  ;;  %v4420_v58 = vshrl.u32 %v4389_v27, 16 }
 0x40e   :  { %v4293_v21 = vsub.s32 %v4289_v0, %v4292_v29  ;;  %v4399_v56 = vmul.u32 %v4397_v3, %v4395_v2  ;;  %v4400_v39 = vmul.u32 %v4398_v9, %v4395_v2  ;;  %v4401_v5 = vmul.u32 %v4397_v3, %v4396_v54 }
 0x40f   :  { %v4184_v61 = vxor.u32 2147483648, %v4178_v17  ;;  %v4188_v26 = vsel %vm4186_vm1, %v4187_v50, %v4178_v17  ;;  %v4419_v55 = vand.u32 65535, %v4389_v27  ;;  %v4402_v32 = vmul.u32 %v4398_v9, %v4396_v54 }
 0x410   :  { %vm4294_vm3 = vcmp.lt.s32.totalorder %v4293_v21, 0  ;;  %v4295_v62 = vsub.s32 0, %v4293_v21  ;;  %v4403_v57 = vshll.u32 %v4400_v39, 16  ;;  %v4405_v38 = vshll.u32 %v4401_v5, 16 }
 0x411   :  { %v4185_v41 = vsel %vm4183_vm0, %v4170_v59, %v4184_v61  ;;  %v4422_v18 = vmul.u32 %v4420_v58, %v4395_v2  ;;  %v4421_v20 = vmul.u32 %v4419_v55, %v4395_v2  ;;  %v4423_v40 = vmul.u32 %v4419_v55, %v4396_v54 }
 0x412   :  { %v4189_v52 = vsel %vm4182_vm2, %v4185_v41, %v4188_v26  ;;  %v4296_v10 = vsel %vm4294_vm3, %v4295_v62, %v4293_v21  ;;  %vm4407_vm4 = vc.u32 %v4399_v56, %v4403_v57  ;;  %v4409_v0 = vadd.s32 %v4403_v57, %v4399_v56 }
 0x413   :  { %v8723_v42 = vsel %vm4179_vm15, nan, %v4189_v52  ;;  %v4297_v33 = vclz %v4296_v10  ;;  %v4408_v22 = vsel %vm4407_vm4, 1, %v5435_v8  ;;  %v4425_v63 = vshll.u32 %v4422_v18, 16 }
 0x414   :  { %4503 = vst [vmem:[#allocation3 + $0xc8] sm:$0xff] %v8723_v42  ;;  %v4410_v34 = vadd.s32 %v4408_v22, %v4402_v32  ;;  %vm4411_vm5 = vc.u32 %v4409_v0, %v4405_v38  ;;  %v4362_v48 = vshrl.u32 %v5429_v43, %v8647_v36  ;;  %v4404_v59 = vshrl.u32 %v4400_v39, 16 }
 0x415   :  { %v5374_v35 = vadd.s32 4294967294, %v4297_v33  ;;  %v4412_v31 = vsel %vm4411_vm5, 1, %v5435_v8  ;;  %v4285_v44 = vadd.s32 %v8656_v7, %v8666_v4  ;;  %v4424_v50 = vmul.u32 %v4420_v58, %v4396_v54 }
 0x416   :  { %v4414_v17 = vadd.s32 %v4412_v31, %v4410_v34  ;;  %v4427_v27 = vshll.u32 %v4423_v40, 16  ;;  %vm4429_vm7 = vc.u32 %v4421_v20, %v4425_v63  ;;  %v4431_v2 = vadd.s32 %v4425_v63, %v4421_v20 }
 0x417   :  { %vm5375_vm6 = vcmp.lt.s32.totalorder %v5374_v35, 0  ;;  %v4383_v36 = vsel %vm4381_vm12, %v8681_v15, 2102212464  ;;  %v4406_v26 = vshrl.u32 %v4401_v5, 16  ;;  %v4430_v39 = vsel %vm4429_vm7, 1, %v5435_v8 }
 0x418   :  { %v4300_v29 = vsel %vm5375_vm6, 0, %v5374_v35  ;;  %v4415_v56 = vadd.s32 %v4414_v17, %v4404_v59  ;;  %v4382_v4 = vsel %vm4378_vm11, %v4362_v48, %v8683_v46  ;;  %v4432_v54 = vadd.s32 %v4430_v39, %v4424_v50 }
 0x419   :  { %v4301_v3 = vsub.s32 32, %v4300_v29  ;;  %v4302_v9 = vshll.u32 %v4293_v21, %v4300_v29  ;;  %v4305_v61 = vsub.s32 4294967266, %v4300_v29  ;;  %v4426_v58 = vshrl.u32 %v4422_v18, 16 }
 0x41a   :  { %vm4433_vm8 = vc.u32 %v4431_v2, %v4427_v27  ;;  %v4514_v21 = vadd.f32 28672.0, %v5456_v12  ;;  %v4515_v62 = vadd.f32 28672.0, %v5458_v13  ;;  %v4384_v15 = vsel %vm4380_vm13, %v8679_v23, %v4383_v36 }
 0x41b   :  { %v4303_v41 = vshrl.u32 %v4285_v44, %v4301_v3  ;;  %v4306_v7 = vadd.s32 127, %v4305_v61  ;;  %v4434_v5 = vsel %vm4433_vm8, 1, %v5435_v8  ;;  %v4315_v32 = vsub.s32 4, %v8707_v19 }
 0x41c   :  { %v4416_v57 = vadd.s32 %v4415_v56, %v4406_v26  ;;  %v4428_v38 = vshrl.u32 %v4423_v40, 16  ;;  %v4436_v46 = vadd.s32 %v4434_v5, %v4432_v54  ;;  %v4435_v0 = vadd.s32 %v4431_v2, %v4427_v27 }
 0x41d   :  { %v4304_v55 = vor.u32 %v4303_v41, %v4302_v9  ;;  %v4307_v52 = vshll.u32 %v4306_v7, 23  ;;  %v8747_v12 = vmul.f32 %v4514_v21, %v5454_v11  ;;  %v4385_v13 = vsel %vm4379_vm14, %v4382_v4, %v4384_v15 }
 0x41e   :  { %v4437_v18 = vadd.s32 %v4436_v46, %v4426_v58  ;;  %v8752_v22 = vmul.f32 %v4515_v62, %v5454_v11  ;;  %vm4193_vm9 = vcmp.lt.s32.totalorder %v8487_v25, 0  ;;  %v4439_v16 = vmul.u32 %v8713_v6, %v4385_v13 }
 0x41f   :  { %v4308_v10 = vor.u32 4788187, %v4307_v52  ;;  %v4311_v33 = vcvt.s32.f32 %v4304_v55  ;;  %v4525_v20 = vand.u32 2139095040, %v8747_v12  ;;  %v4316_v40 = vsel %vm4193_vm9, %v4315_v32, %v8707_v19 }
 0x420   :  { %v4438_v35 = vadd.s32 %v4437_v18, %v4428_v38  ;;  %v4522_v34 = vand.u32 2147483647, %v8747_v12  ;;  %vm4441_vm10 = vc.u32 %v4416_v57, %v4435_v0  ;;  %vm4192_vm11 = vcmp.le.f32.partialorder %v4191_v24, 0.7853982 }
 0x421   :  { %v4309_v23 = vand.u32 2147483647, %v4308_v10  ;;  %v4526_v48 = vshrl.u32 %v4525_v20, 23  ;;  %v4680_v31 = vand.u32 2139095040, %v8752_v22  ;;  %v4318_v17 = vsel %vm4192_vm11, 0, %v4316_v40 }
 0x422   :  { %v4442_v59 = vadd.s32 1, %v4438_v35  ;;  %v4529_v19 = vand.u32 8388607, %v4522_v34  ;;  %v4335_v9 = vadd.s32 3, %v4318_v17  ;;  %vm4348_vm13 = vcmp.lt.s32.totalorder %v8511_v37, 0 }
 0x423   :  { %v4312_v63 = vmul.f32 %v4311_v33, %v4309_v23  ;;  %v5379_v50 = vadd.s32 4294967169, %v4526_v48  ;;  %v4681_v61 = vshrl.u32 %v4680_v31, 23  ;;  %v4440_v38 = vadd.s32 %v4435_v0, %v4416_v57 }
 0x424   :  { %v4443_v29 = vsel %vm4441_vm10, %v4442_v59, %v4438_v35  ;;  %v4530_v26 = vor.u32 8388608, %v4529_v19  ;;  %v8769_v4 = vand.u32 3, %v4335_v9  ;;  %vm4334_vm2 = vweird.f32 %v8487_v25 }
 0x425   :  { %v4313_v44 = vxor.u32 2147483648, %v4312_v63  ;;  %v4444_v2 = vadd.s32 %v4443_v29, %v4439_v16  ;;  %v4532_v6 = vadd.s32 1, %v5379_v50  ;;  %v5382_v58 = vadd.s32 4294967169, %v4681_v61 }
 0x426   :  { %v8771_v52 = vshll.u32 %v4530_v26, 8  ;;  %vm4338_vm14 = vcmp.eq.s32.totalorder %v8769_v4, 0  ;;  %vm4341_vm15 = vcmp.eq.s32.totalorder %v8769_v4, 2  ;;  %vm4337_vm0 = vcmp.lt.s32.totalorder %v8769_v4, 2 }
 0x427   :  { %v4314_v27 = vsel %vm4193_vm9, %v4313_v44, %v4312_v63  ;;  %v4445_v36 = vadd.s32 536870912, %v4444_v2  ;;  %vm4533_vm12 = vcmp.gt.s32.totalorder %v4532_v6, 0  ;;  %v8778_v10 = vadd.s32 1, %v5382_v58 }
 0x428   :  { %v4317_v3 = vsel %vm4192_vm11, %v8487_v25, %v4314_v27  ;;  %v4534_v56 = vsel %vm4533_vm12, %v4532_v6, 0  ;;  %v8785_v35 = vand.u32 65535, %v8771_v52  ;;  %v8804_v9 = vshrl.u32 %v8771_v52, 16 }
 0x429   :  { %v4319_v24 = vmul.f32 %v4317_v3, %v4317_v3  ;;  %v4446_v7 = vshrl.u32 %v4445_v36, 30  ;;  %v4536_v54 = vand.u32 31, %v4534_v56  ;;  %v8801_v6 = vshrl.u32 %v4534_v56, 5 }
 0x42a   :  { %vm8849_vm8 = vcmp.le.f32.partialorder %v4346_v1, 0.7853982  ;;  %vm4688_vm9 = vcmp.gt.s32.totalorder %v8778_v10, 0 }
 0x42b   :  { %v4320_v39 = vmul.f32 -0.001358992, %v4319_v24  ;;  %v4327_v41 = vmul.f32 -0.00019511016, %v4319_v24  ;;  %v4447_v55 = vshll.u32 %v4446_v7, 30  ;;  %v8776_v46 = vsub.s32 32, %v4536_v54 }
 0x42c   :  { %v4470_v23 = vsub.s32 4, %v4446_v7  ;;  %v4539_v20 = vshll.u32 %v5429_v43, %v4536_v54  ;;  %v4542_v40 = vshll.u32 %v5430_v45, %v4536_v54  ;;  %v4545_v16 = vshll.u32 %v5431_v47, %v4536_v54 }
 0x42d   :  { %v4321_v21 = vadd.f32 0.041655596, %v4320_v39  ;;  %v4328_v62 = vadd.f32 0.008332121, %v4327_v41  ;;  %v4448_v32 = vsub.s32 %v4444_v2, %v4447_v55  ;;  %v4540_v59 = vshrl.u32 %v5430_v45, %v8776_v46 }
 0x42e   :  { %v4543_v31 = vshrl.u32 %v5431_v47, %v8776_v46  ;;  %v4546_v44 = vshrl.u32 %v5432_v49, %v8776_v46  ;;  %v4548_v29 = vshll.u32 %v5432_v49, %v4536_v54  ;;  %v4549_v19 = vshrl.u32 %v5433_v51, %v8776_v46 }
 0x42f   :  { %v4322_v15 = vmul.f32 %v4321_v21, %v4319_v24  ;;  %v4329_v5 = vmul.f32 %v4328_v62, %v4319_v24  ;;  %vm4449_vm1 = vcmp.lt.s32.totalorder %v4448_v32, 0  ;;  %v4450_v18 = vsub.s32 0, %v4448_v32 }
 0x430   :  { %v8799_v2 = vsel %vm4348_vm13, %v4470_v23, %v4446_v7  ;;  %v4551_v36 = vshll.u32 %v5433_v51, %v4536_v54  ;;  %v4552_v26 = vshrl.u32 %v5434_v60, %v8776_v46  ;;  %v8809_v39 = vor.u32 %v4540_v59, %v4539_v20 }
 0x431   :  { %v4323_v33 = vadd.f32 -0.4999988, %v4322_v15  ;;  %v4330_v13 = vadd.f32 -0.16666654, %v4329_v5  ;;  %v4451_v63 = vsel %vm4449_vm1, %v4450_v18, %v4448_v32  ;;  %v8811_v41 = vor.u32 %v4543_v31, %v4542_v40 }
 0x432   :  { %v4452_v48 = vclz %v4451_v63  ;;  %v8813_v58 = vor.u32 %v4546_v44, %v4545_v16  ;;  %v4550_v62 = vor.u32 %v4549_v19, %v4548_v29  ;;  %v4506_v54 = vand.u32 2147483647, %v8617_v30 }
 0x433   :  { %v4324_v57 = vmul.f32 %v4323_v33, %v4319_v24  ;;  %v4331_v0 = vmul.f32 %v4330_v13, %v4319_v24  ;;  %v4553_v33 = vor.u32 %v4552_v26, %v4551_v36  ;;  %vm4554_vm4 = vcmp.lt.s32.totalorder %v8801_v6, 1 }
 0x434   :  { %v5377_v27 = vadd.s32 4294967294, %v4452_v48  ;;  %vm4557_vm5 = vcmp.lt.s32.totalorder %v8801_v6, 4  ;;  %v4513_v20 = vmax.f32 %v4506_v54, %v8482_v28  ;;  %v4507_v30 = vand.u32 2147483647, %v8723_v42 }
 0x435   :  { %v4325_v17 = vadd.f32 1.0, %v4324_v57  ;;  %v4332_v50 = vadd.f32 1.0, %v4331_v0  ;;  %vm4555_vm6 = vcmp.lt.s32.totalorder %v8801_v6, 2  ;;  %vm4556_vm7 = vcmp.lt.s32.totalorder %v8801_v6, 3 }
 0x436   :  { %vm5378_vm3 = vcmp.lt.s32.totalorder %v5377_v27, 0  ;;  %v4562_v4 = vsel %vm4554_vm4, %v8809_v39, %v8811_v41  ;;  %v4563_v28 = vsel %vm4557_vm5, %v4550_v62, 920167782  ;;  %v4566_v25 = vsel %vm4554_vm4, %v8811_v41, %v8813_v58 }
 0x437   :  { %v4333_v61 = vmul.f32 %v4332_v50, %v4317_v3  ;;  %v4342_v24 = vxor.u32 2147483648, %v4325_v17  ;;  %v4455_v21 = vsel %vm5378_vm3, 0, %v5377_v27  ;;  %v4567_v42 = vsel %vm4557_vm5, %v4553_v33, 1326507024 }
 0x438   :  { %v4456_v3 = vsub.s32 32, %v4455_v21  ;;  %v4457_v55 = vshll.u32 %v4448_v32, %v4455_v21  ;;  %v4460_v15 = vsub.s32 4294967266, %v4455_v21  ;;  %v4564_v48 = vsel %vm4556_vm7, %v8813_v58, %v4563_v28 }
 0x439   :  { %v4339_v7 = vxor.u32 2147483648, %v4333_v61  ;;  %v4343_v56 = vsel %vm4341_vm15, %v4342_v24, %v4333_v61  ;;  %v4568_v59 = vsel %vm4556_vm7, %v4550_v62, %v4567_v42  ;;  %v4677_v50 = vand.u32 2147483647, %v8752_v22 }
 0x43a   :  { %v4458_v18 = vshrl.u32 %v4440_v38, %v4456_v3  ;;  %v4461_v23 = vadd.s32 127, %v4460_v15  ;;  %v5151_v38 = vmax.f32 %v4507_v30, %v4513_v20  ;;  %v4569_v19 = vsel %vm4555_vm6, %v4566_v25, %v4568_v59 }
 0x43b   :  { %v4340_v5 = vsel %vm4338_vm14, %v4325_v17, %v4339_v7  ;;  %v4565_v17 = vsel %vm4555_vm6, %v4562_v4, %v4564_v48  ;;  %v4473_v1 = vsel %vm8849_vm8, 0, %v8799_v2  ;;  %v4573_v24 = vand.u32 65535, %v4569_v19 }
 0x43c   :  { %v4344_v13 = vsel %vm4337_vm0, %v4340_v5, %v4343_v56  ;;  %v4459_v40 = vor.u32 %v4458_v18, %v4457_v55  ;;  %v4462_v57 = vshll.u32 %v4461_v23, 23  ;;  %v4595_v27 = vand.u32 65535, %v4565_v17 }
 0x43d   :  { %v4345_v32 = vsel %vm4334_vm2, nan, %v4344_v13  ;;  %v4596_v61 = vshrl.u32 %v4565_v17, 16  ;;  %v4574_v36 = vshrl.u32 %v4569_v19, 16  ;;  %v4575_v62 = vmul.u32 %v4573_v24, %v8785_v35 }
 0x43e   :  { %4504 = vst [vmem:[#allocation3 + $0xd0] sm:$0xff] %v4345_v32  ;;  %v4508_v0 = vand.u32 2147483647, %v4345_v32  ;;  %v4463_v63 = vor.u32 4788187, %v4462_v57  ;;  %v4466_v16 = vcvt.s32.f32 %v4459_v40  ;;  %v4597_v7 = vmul.u32 %v4595_v27, %v8785_v35 }
 0x43f   :  { %v4598_v56 = vmul.u32 %v4596_v61, %v8785_v35  ;;  %v8867_v21 = vmul.u32 %v4595_v27, %v8804_v9  ;;  %v8871_v3 = vmul.u32 %v4574_v36, %v8785_v35  ;;  %v8874_v55 = vmul.u32 %v4573_v24, %v8804_v9 }
 0x440   :  { %v8853_v44 = vmax.f32 %v4508_v0, %v5151_v38  ;;  %v4464_v29 = vand.u32 2147483647, %v4463_v63  ;;  %v4600_v15 = vmul.u32 %v4596_v61, %v8804_v9  ;;  %v8879_v5 = vand.u32 8388607, %v4677_v50 }
 0x441   :  { %v4601_v54 = vshll.u32 %v4598_v56, 16  ;;  %v4490_v33 = vadd.s32 3, %v4473_v1  ;;  %v4579_v13 = vshll.u32 %v8871_v3, 16  ;;  %v4581_v18 = vshll.u32 %v8874_v55, 16 }
 0x442   :  { %v4467_v26 = vmul.f32 %v4466_v16, %v4464_v29  ;;  %v4689_v23 = vsel %vm4688_vm9, %v8778_v10, 0  ;;  %v4578_v20 = vmul.u32 %v4574_v36, %v8804_v9  ;;  %v4603_v32 = vshll.u32 %v8867_v21, 16 }
 0x443   :  { %vm4605_vm10 = vc.u32 %v4597_v7, %v4601_v54  ;;  %vm4583_vm11 = vc.u32 %v4575_v62, %v4579_v13  ;;  %v4585_v40 = vadd.s32 %v4579_v13, %v4575_v62  ;;  %v4607_v10 = vadd.s32 %v4601_v54, %v4597_v7 }
 0x444   :  { %v4468_v2 = vxor.u32 2147483648, %v4467_v26  ;;  %v4606_v57 = vsel %vm4605_vm10, 1, %v5435_v8  ;;  %v4584_v4 = vsel %vm4583_vm11, 1, %v5435_v8  ;;  %v8893_v28 = vand.u32 3, %v4490_v33 }
 0x445   :  { %v4608_v38 = vadd.s32 %v4606_v57, %v4600_v15  ;;  %v4538_v9 = vshrl.u32 %v5429_v43, %v8776_v46  ;;  %vm4587_vm12 = vc.u32 %v4585_v40, %v4581_v18  ;;  %v4691_v25 = vand.u32 31, %v4689_v23 }
 0x446   :  { %v4469_v35 = vsel %vm4348_vm13, %v4468_v2, %v4467_v26  ;;  %v4559_v16 = vsel %vm4557_vm5, %v8813_v58, 2102212464  ;;  %vm4609_vm13 = vc.u32 %v4607_v10, %v4603_v32  ;;  %v4586_v48 = vadd.s32 %v4584_v4, %v4578_v20 }
 0x447   :  { %v4472_v30 = vsel %vm8849_vm8, %v8511_v37, %v4469_v35  ;;  %v4602_v59 = vshrl.u32 %v4598_v56, 16  ;;  %v4610_v31 = vsel %vm4609_vm13, 1, %v5435_v8  ;;  %v8903_v17 = vsub.s32 32, %v4691_v25 }
 0x448   :  { %v4474_v0 = vmul.f32 %v4472_v30, %v4472_v30  ;;  %v4588_v46 = vsel %vm4587_vm12, 1, %v5435_v8  ;;  %v4612_v27 = vadd.s32 %v4610_v31, %v4608_v38  ;;  %vm4496_vm14 = vcmp.eq.s32.totalorder %v8893_v28, 2 }
 0x449   :  { %v4558_v58 = vsel %vm4554_vm4, %v4538_v9, %v8809_v39  ;;  %v4560_v61 = vsel %vm4556_vm7, %v8811_v41, %v4559_v16  ;;  %v4685_v1 = vor.u32 8388608, %v8879_v5  ;;  %v4580_v26 = vshrl.u32 %v8871_v3, 16 }
 0x44a   :  { %v4475_v42 = vmul.f32 -0.001358992, %v4474_v0  ;;  %v4482_v63 = vmul.f32 -0.00019511016, %v4474_v0  ;;  %v8915_v7 = vshrl.u32 %v4689_v23, 5  ;;  %v4590_v56 = vadd.s32 %v4588_v46, %v4586_v48 }
 0x44b   :  { %v4604_v62 = vshrl.u32 %v8867_v21, 16  ;;  %v4694_v2 = vshll.u32 %v5429_v43, %v4691_v25  ;;  %v4695_v39 = vshrl.u32 %v5430_v45, %v8903_v17  ;;  %vm4492_vm15 = vcmp.lt.s32.totalorder %v8893_v28, 2 }
 0x44c   :  { %v4476_v29 = vadd.f32 0.041655596, %v4475_v42  ;;  %v4483_v19 = vadd.f32 0.008332121, %v4482_v63  ;;  %v4613_v41 = vadd.s32 %v4612_v27, %v4602_v59  ;;  %v4697_v5 = vshll.u32 %v5430_v45, %v4691_v25 }
 0x44d   :  { %vm4489_vm0 = vweird.f32 %v8511_v37  ;;  %v4698_v3 = vshrl.u32 %v5431_v47, %v8903_v17  ;;  %v4700_v33 = vshll.u32 %v5431_v47, %v4691_v25  ;;  %v4701_v13 = vshrl.u32 %v5432_v49, %v8903_v17 }
 0x44e   :  { %v4477_v24 = vmul.f32 %v4476_v29, %v4474_v0  ;;  %v4484_v36 = vmul.f32 %v4483_v19, %v4474_v0  ;;  %v4703_v18 = vshll.u32 %v5432_v49, %v4691_v25  ;;  %v4582_v20 = vshrl.u32 %v8874_v55, 16 }
 0x44f   :  { %v4704_v40 = vshrl.u32 %v5433_v51, %v8903_v17  ;;  %v4591_v57 = vadd.s32 %v4590_v56, %v4580_v26  ;;  %v8933_v4 = vor.u32 %v4695_v39, %v4694_v2  ;;  %v4706_v38 = vshll.u32 %v5433_v51, %v4691_v25 }
 0x450   :  { %v4478_v15 = vadd.f32 -0.4999988, %v4477_v24  ;;  %v4485_v54 = vadd.f32 -0.16666654, %v4484_v36  ;;  %v4707_v9 = vshrl.u32 %v5434_v60, %v8903_v17  ;;  %v4614_v16 = vadd.s32 %v4613_v41, %v4604_v62 }
 0x451   :  { %v4705_v48 = vor.u32 %v4704_v40, %v4703_v18  ;;  %v8938_v59 = vor.u32 %v4698_v3, %v4697_v5  ;;  %vm4712_vm1 = vcmp.lt.s32.totalorder %v8915_v7, 4  ;;  %vm4493_vm2 = vcmp.eq.s32.totalorder %v8893_v28, 0 }
 0x452   :  { %v4479_v23 = vmul.f32 %v4478_v15, %v4474_v0  ;;  %v4486_v35 = vmul.f32 %v4485_v54, %v4474_v0  ;;  %v8940_v0 = vor.u32 %v4701_v13, %v4700_v33  ;;  %v4708_v55 = vor.u32 %v4707_v9, %v4706_v38 }
 0x453   :  { %vm4709_vm3 = vcmp.lt.s32.totalorder %v8915_v7, 1  ;;  %v8945_v25 = vadd.s32 %v4591_v57, %v4582_v20  ;;  %v8949_v19 = vadd.s32 %v4607_v10, %v4603_v32  ;;  %vm4711_vm4 = vcmp.lt.s32.totalorder %v8915_v7, 3 }
 0x454   :  { %v4480_v42 = vadd.f32 1.0, %v4479_v23  ;;  %v4487_v63 = vadd.f32 1.0, %v4486_v35  ;;  %v4718_v46 = vsel %vm4712_vm1, %v4705_v48, 920167782  ;;  %v4561_v24 = vsel %vm4555_vm6, %v4558_v58, %v4560_v61 }
 0x455   :  { %vm4710_vm5 = vcmp.lt.s32.totalorder %v8915_v7, 2  ;;  %v4618_v36 = vadd.s32 1, %v4614_v16  ;;  %v4717_v21 = vsel %vm4709_vm3, %v8933_v4, %v8938_v59  ;;  %v4721_v32 = vsel %vm4709_vm3, %v8938_v59, %v8940_v0 }
 0x456   :  { %v4488_v31 = vmul.f32 %v4487_v63, %v4472_v30  ;;  %v4497_v29 = vxor.u32 2147483648, %v4480_v42  ;;  %v4722_v10 = vsel %vm4712_vm1, %v4708_v55, 1326507024  ;;  %v4719_v6 = vsel %vm4711_vm4, %v8940_v0, %v4718_v46 }
 0x457   :  { %v4723_v58 = vsel %vm4711_vm4, %v4705_v48, %v4722_v10  ;;  %v8974_v61 = vshll.u32 %v4685_v1, 8  ;;  %vm4617_vm6 = vc.u32 %v8945_v25, %v8949_v19  ;;  %v4615_v41 = vmul.u32 %v8771_v52, %v4561_v24 }
 0x458   :  { %v4494_v27 = vxor.u32 2147483648, %v4488_v31  ;;  %v4498_v30 = vsel %vm4496_vm14, %v4497_v29, %v4488_v31  ;;  %v4724_v62 = vsel %vm4710_vm5, %v4721_v32, %v4723_v58  ;;  %v4720_v28 = vsel %vm4710_vm5, %v4717_v21, %v4719_v6 }
 0x459   :  { %v4726_v39 = vand.u32 65535, %v8974_v61  ;;  %v4727_v15 = vshrl.u32 %v8974_v61, 16  ;;  %v4728_v54 = vand.u32 65535, %v4724_v62  ;;  %v4729_v5 = vshrl.u32 %v4724_v62, 16 }
 0x45a   :  { %v4495_v26 = vsel %vm4493_vm2, %v4480_v42, %v4494_v27  ;;  %v4619_v3 = vsel %vm4617_vm6, %v4618_v36, %v4614_v16  ;;  %v4750_v23 = vand.u32 65535, %v4720_v28  ;;  %v4751_v35 = vshrl.u32 %v4720_v28, 16 }
 0x45b   :  { %v4499_v56 = vsel %vm4492_vm15, %v4495_v26, %v4498_v30  ;;  %v4732_v33 = vmul.u32 %v4728_v54, %v4727_v15  ;;  %v4730_v37 = vmul.u32 %v4728_v54, %v4726_v39  ;;  %v4731_v18 = vmul.u32 %v4729_v5, %v4726_v39 }
 0x45c   :  { %v4500_v2 = vsel %vm4489_vm0, nan, %v4499_v56  ;;  %v4620_v20 = vadd.s32 %v4619_v3, %v4615_v41  ;;  %v4733_v40 = vmul.u32 %v4729_v5, %v4727_v15  ;;  %v4753_v9 = vmul.u32 %v4751_v35, %v4726_v39 }
 0x45d   :  { %4505 = vst [vmem:[#allocation3 + $0xd8] sm:$0xff] %v4500_v2  ;;  %v4509_v1 = vand.u32 2147483647, %v4500_v2  ;;  %v4734_v57 = vshll.u32 %v4731_v18, 16  ;;  %v4736_v38 = vshll.u32 %v4732_v33, 16  ;;  %v4516_v52 = vadd.f32 28672.0, %v5460_v14 }
 0x45e   :  { %v4752_v63 = vmul.u32 %v4750_v23, %v4726_v39  ;;  %v4754_v48 = vmul.u32 %v4750_v23, %v4727_v15  ;;  %v4756_v55 = vshll.u32 %v4753_v9, 16  ;;  %v4755_v46 = vmul.u32 %v4751_v35, %v4727_v15 }
 0x45f   :  { %v8990_v13 = vmax.f32 %v4509_v1, %v8853_v44  ;;  %vm4738_vm7 = vc.u32 %v4730_v37, %v4734_v57  ;;  %v4740_v42 = vadd.s32 %v4734_v57, %v4730_v37  ;;  %v4621_v44 = vadd.s32 536870912, %v4620_v20 }
 0x460   :  { %v4739_v16 = vsel %vm4738_vm7, 1, %v5435_v8  ;;  %v8996_v27 = vmul.f32 %v4516_v52, %v5454_v11  ;;  %v4735_v30 = vshrl.u32 %v4731_v18, 16  ;;  %vm4760_vm9 = vc.u32 %v4752_v63, %v4756_v55 }
 0x461   :  { %v4741_v31 = vadd.s32 %v4739_v16, %v4733_v40  ;;  %vm4742_vm8 = vc.u32 %v4740_v42, %v4736_v38  ;;  %v4693_v14 = vshrl.u32 %v5429_v43, %v8903_v17  ;;  %v4758_v36 = vshll.u32 %v4754_v48, 16 }
 0x462   :  { %v4743_v29 = vsel %vm4742_vm8, 1, %v5435_v8  ;;  %v4761_v21 = vsel %vm4760_vm9, 1, %v5435_v8  ;;  %v9001_v32 = vshrl.u32 %v4621_v44, 30  ;;  %v4714_v10 = vsel %vm4712_vm1, %v8940_v0, 2102212464 }
 0x463   :  { %v4745_v24 = vadd.s32 %v4743_v29, %v4741_v31  ;;  %v4762_v26 = vadd.s32 %v4756_v55, %v4752_v63  ;;  %v4763_v6 = vadd.s32 %v4761_v21, %v4755_v46  ;;  %v4737_v58 = vshrl.u32 %v4732_v33, 16 }
 0x464   :  { %v4835_v62 = vand.u32 2139095040, %v8996_v27  ;;  %v4713_v2 = vsel %vm4709_vm3, %v4693_v14, %v8933_v4  ;;  %v4757_v17 = vshrl.u32 %v4753_v9, 16  ;;  %v4623_v39 = vshll.u32 %v9001_v32, 30 }
 0x465   :  { %v4746_v56 = vadd.s32 %v4745_v24, %v4735_v30  ;;  %vm4764_vm10 = vc.u32 %v4762_v26, %v4758_v36  ;;  %v4715_v15 = vsel %vm4711_vm4, %v8938_v59, %v4714_v10  ;;  %v4759_v1 = vshrl.u32 %v4754_v48, 16 }
 0x466   :  { %v4765_v0 = vsel %vm4764_vm10, 1, %v5435_v8  ;;  %v4836_v54 = vshrl.u32 %v4835_v62, 23  ;;  %v9017_v5 = vadd.s32 %v4762_v26, %v4758_v36  ;;  %v4716_v4 = vsel %vm4710_vm5, %v4713_v2, %v4715_v15 }
 0x467   :  { %v4767_v41 = vadd.s32 %v4765_v0, %v4763_v6  ;;  %v9015_v28 = vadd.s32 %v4746_v56, %v4737_v58  ;;  %v9021_v37 = vsub.s32 %v4620_v20, %v4623_v39  ;;  %v4517_v23 = vadd.f32 28672.0, %v5668_v53 }
 0x468   :  { %v5385_v3 = vadd.s32 4294967169, %v4836_v54  ;;  %v4770_v35 = vmul.u32 %v8974_v61, %v4716_v4  ;;  %v4832_v42 = vand.u32 2147483647, %v8996_v27 }
 0x469   :  { %v4768_v33 = vadd.s32 %v4767_v41, %v4757_v17  ;;  %vm4772_vm11 = vc.u32 %v9015_v28, %v9017_v5  ;;  %v4626_v38 = vsub.s32 0, %v9021_v37  ;;  %v9029_v7 = vmul.f32 %v4517_v23, %v5454_v11 }
 0x46a   :  { %v4842_v18 = vadd.s32 1, %v5385_v3  ;;  %vm4625_vm13 = vcmp.lt.s32.totalorder %v9021_v37, 0  ;;  %v4839_v24 = vand.u32 8388607, %v4832_v42 }
 0x46b   :  { %v4769_v59 = vadd.s32 %v4768_v33, %v4759_v1  ;;  %v4627_v61 = vsel %vm4625_vm13, %v4626_v38, %v9021_v37  ;;  %v4990_v44 = vand.u32 2139095040, %v9029_v7 }
 0x46c   :  { %vm4843_vm12 = vcmp.gt.s32.totalorder %v4842_v18, 0  ;;  %v4628_v30 = vclz %v4627_v61  ;;  %v4840_v15 = vor.u32 8388608, %v4839_v24 }
 0x46d   :  { %v4773_v40 = vadd.s32 1, %v4769_v59  ;;  %v4844_v57 = vsel %vm4843_vm12, %v4842_v18, 0  ;;  %v4991_v58 = vshrl.u32 %v4990_v44, 23  ;;  %v4616_v44 = vadd.s32 %v8949_v19, %v8945_v25 }
 0x46e   :  { %v4846_v9 = vand.u32 31, %v4844_v57  ;;  %v9045_v14 = vshrl.u32 %v4844_v57, 5  ;;  %v5380_v39 = vadd.s32 4294967294, %v4628_v30 }
 0x46f   :  { %v4774_v20 = vsel %vm4772_vm11, %v4773_v40, %v4769_v59  ;;  %v5388_v4 = vadd.s32 4294967169, %v4991_v58  ;;  %v9069_v59 = vshll.u32 %v4840_v15, 8 }
 0x470   :  { %v4775_v52 = vadd.s32 %v4774_v20, %v4770_v35  ;;  %v4847_v53 = vsub.s32 32, %v4846_v9  ;;  %v4849_v16 = vshll.u32 %v5429_v43, %v4846_v9  ;;  %v4852_v48 = vshll.u32 %v5430_v45, %v4846_v9 }
 0x471   :  { %v4858_v55 = vshll.u32 %v5432_v49, %v4846_v9  ;;  %v4855_v36 = vshll.u32 %v5431_v47, %v4846_v9  ;;  %v4861_v26 = vshll.u32 %v5433_v51, %v4846_v9  ;;  %vm4864_vm14 = vcmp.lt.s32.totalorder %v9045_v14, 1 }
 0x472   :  { %v4776_v63 = vadd.s32 536870912, %v4775_v52  ;;  %v4850_v31 = vshrl.u32 %v5430_v45, %v4847_v53  ;;  %v4853_v29 = vshrl.u32 %v5431_v47, %v4847_v53  ;;  %v4859_v46 = vshrl.u32 %v5433_v51, %v4847_v53 }
 0x473   :  { %v4856_v10 = vshrl.u32 %v5432_v49, %v4847_v53  ;;  %v4862_v6 = vshrl.u32 %v5434_v60, %v4847_v53  ;;  %vm4867_vm15 = vcmp.lt.s32.totalorder %v9045_v14, 4  ;;  %vm4866_vm1 = vcmp.lt.s32.totalorder %v9045_v14, 3 }
 0x474   :  { %v9038_v11 = vshrl.u32 %v4776_v63, 30  ;;  %v4851_v62 = vor.u32 %v4850_v31, %v4849_v16  ;;  %v4854_v2 = vor.u32 %v4853_v29, %v4852_v48  ;;  %v4860_v17 = vor.u32 %v4859_v46, %v4858_v55 }
 0x475   :  { %v4857_v54 = vor.u32 %v4856_v10, %v4855_v36  ;;  %v4863_v1 = vor.u32 %v4862_v6, %v4861_v26  ;;  %vm4865_vm2 = vcmp.lt.s32.totalorder %v9045_v14, 2  ;;  %vm5381_vm3 = vcmp.lt.s32.totalorder %v5380_v39, 0 }
 0x476   :  { %v4778_v21 = vshll.u32 %v9038_v11, 30  ;;  %v4872_v41 = vsel %vm4864_vm14, %v4851_v62, %v4854_v2  ;;  %v4873_v3 = vsel %vm4867_vm15, %v4860_v17, 920167782  ;;  %v4997_v38 = vadd.s32 1, %v5388_v4 }
 0x477   :  { %v4874_v18 = vsel %vm4866_vm1, %v4857_v54, %v4873_v3  ;;  %v4877_v23 = vsel %vm4867_vm15, %v4863_v1, 1326507024  ;;  %v4876_v40 = vsel %vm4864_vm14, %v4854_v2, %v4857_v54  ;;  %v9077_v9 = vsel %vm5381_vm3, 0, %v5380_v39 }
 0x478   :  { %v9052_v56 = vsub.s32 %v4775_v52, %v4778_v21  ;;  %v4875_v35 = vsel %vm4865_vm2, %v4872_v41, %v4874_v18  ;;  %v4878_v57 = vsel %vm4866_vm1, %v4860_v17, %v4877_v23  ;;  %v4881_v52 = vand.u32 65535, %v9069_v59 }
 0x479   :  { %v4882_v61 = vshrl.u32 %v9069_v59, 16  ;;  %v4905_v63 = vand.u32 65535, %v4875_v35  ;;  %v4906_v16 = vshrl.u32 %v4875_v35, 16  ;;  %v4848_v48 = vshrl.u32 %v5429_v43, %v4847_v53 }
 0x47a   :  { %v4781_v0 = vsub.s32 0, %v9052_v56  ;;  %vm4780_vm0 = vcmp.lt.s32.totalorder %v9052_v56, 0  ;;  %v4879_v55 = vsel %vm4865_vm2, %v4876_v40, %v4878_v57  ;;  %v4632_v31 = vsub.s32 32, %v9077_v9 }
 0x47b   :  { %vm4998_vm4 = vcmp.gt.s32.totalorder %v4997_v38, 0  ;;  %v4636_v29 = vsub.s32 4294967266, %v9077_v9  ;;  %v4869_v30 = vsel %vm4867_vm15, %v4857_v54, 2102212464  ;;  %v4883_v24 = vand.u32 65535, %v4879_v55 }
 0x47c   :  { %v4782_v33 = vsel %vm4780_vm0, %v4781_v0, %v9052_v56  ;;  %v4633_v36 = vshll.u32 %v9021_v37, %v9077_v9  ;;  %v4884_v53 = vshrl.u32 %v4879_v55, 16  ;;  %v4908_v21 = vmul.u32 %v4906_v16, %v4881_v52 }
 0x47d   :  { %v4783_v20 = vclz %v4782_v33  ;;  %v4909_v10 = vmul.u32 %v4905_v63, %v4882_v61  ;;  %v4868_v26 = vsel %vm4864_vm14, %v4848_v48, %v4851_v62  ;;  %v4887_v25 = vmul.u32 %v4883_v24, %v4882_v61 }
 0x47e   :  { %v4907_v19 = vmul.u32 %v4905_v63, %v4881_v52  ;;  %v4999_v6 = vsel %vm4998_vm4, %v4997_v38, 0  ;;  %v4870_v58 = vsel %vm4866_vm1, %v4854_v2, %v4869_v30  ;;  %v4885_v17 = vmul.u32 %v4883_v24, %v4881_v52 }
 0x47f   :  { %v5383_v46 = vadd.s32 4294967294, %v4783_v20  ;;  %v4886_v39 = vmul.u32 %v4884_v53, %v4881_v52  ;;  %v4911_v15 = vshll.u32 %v4908_v21, 16  ;;  %v9096_v0 = vshrl.u32 %v4616_v44, %v4632_v31 }
 0x480   :  { %v9098_v54 = vadd.s32 127, %v4636_v29  ;;  %v4910_v1 = vmul.u32 %v4906_v16, %v4882_v61  ;;  %v4888_v41 = vmul.u32 %v4884_v53, %v4882_v61  ;;  %v4891_v4 = vshll.u32 %v4887_v25, 16 }
 0x481   :  { %vm5384_vm5 = vcmp.lt.s32.totalorder %v5383_v46, 0  ;;  %v4889_v3 = vshll.u32 %v4886_v39, 16  ;;  %v4913_v33 = vshll.u32 %v4909_v10, 16  ;;  %v4871_v62 = vsel %vm4865_vm2, %v4868_v26, %v4870_v58 }
 0x482   :  { %vm4915_vm6 = vc.u32 %v4907_v19, %v4911_v15  ;;  %v4917_v18 = vadd.s32 %v4911_v15, %v4907_v19  ;;  %v5001_v23 = vand.u32 31, %v4999_v6  ;;  %v9102_v2 = vsel %vm5384_vm5, 0, %v5383_v46 }
 0x483   :  { %vm4893_vm7 = vc.u32 %v4885_v17, %v4889_v3  ;;  %v4895_v35 = vadd.s32 %v4889_v3, %v4885_v17  ;;  %v4916_v40 = vsel %vm4915_vm6, 1, %v5435_v8  ;;  %v4912_v38 = vshrl.u32 %v4908_v21, 16 }
 0x484   :  { %v4894_v57 = vsel %vm4893_vm7, 1, %v5435_v8  ;;  %v4918_v20 = vadd.s32 %v4916_v40, %v4910_v1  ;;  %vm4919_vm8 = vc.u32 %v4917_v18, %v4913_v33  ;;  %v4890_v52 = vshrl.u32 %v4886_v39, 16 }
 0x485   :  { %v4896_v61 = vadd.s32 %v4894_v57, %v4888_v41  ;;  %vm4897_vm9 = vc.u32 %v4895_v35, %v4891_v4  ;;  %v4920_v14 = vsel %vm4919_vm8, 1, %v5435_v8  ;;  %v4914_v16 = vshrl.u32 %v4909_v10, 16 }
 0x486   :  { %v4898_v63 = vsel %vm4897_vm9, 1, %v5435_v8  ;;  %v4922_v48 = vadd.s32 %v4920_v14, %v4918_v20  ;;  %v9108_v55 = vsub.s32 32, %v5001_v23  ;;  %v4638_v44 = vshll.u32 %v9098_v54, 23 }
 0x487   :  { %v4892_v31 = vshrl.u32 %v4887_v25, 16  ;;  %v4900_v29 = vadd.s32 %v4898_v63, %v4896_v61  ;;  %v4987_v46 = vand.u32 2147483647, %v9029_v7  ;;  %v4791_v30 = vsub.s32 4294967266, %v9102_v2 }
 0x488   :  { %v4923_v24 = vadd.s32 %v4922_v48, %v4912_v38  ;;  %v4925_v53 = vmul.u32 %v9069_v59, %v4871_v62  ;;  %v9114_v21 = vshrl.u32 %v4999_v6, 5  ;;  %v9116_v19 = vadd.s32 %v4917_v18, %v4913_v33 }
 0x489   :  { %v4901_v26 = vadd.s32 %v4900_v29, %v4890_v52  ;;  %v5004_v10 = vshll.u32 %v5429_v43, %v5001_v23  ;;  %v5007_v58 = vshll.u32 %v5430_v45, %v5001_v23  ;;  %v5005_v25 = vshrl.u32 %v5430_v45, %v9108_v55 }
 0x48a   :  { %v4924_v17 = vadd.s32 %v4923_v24, %v4914_v16  ;;  %v5008_v39 = vshrl.u32 %v5431_v47, %v9108_v55  ;;  %v5010_v15 = vshll.u32 %v5431_v47, %v5001_v23  ;;  %v5011_v59 = vshrl.u32 %v5432_v49, %v9108_v55 }
 0x48b   :  { %v9125_v54 = vadd.s32 %v4901_v26, %v4892_v31  ;;  %v5013_v6 = vshll.u32 %v5432_v49, %v5001_v23  ;;  %v5014_v1 = vshrl.u32 %v5433_v51, %v9108_v55  ;;  %v4771_v41 = vadd.s32 %v9017_v5, %v9015_v28 }
 0x48c   :  { %v4928_v3 = vadd.s32 1, %v4924_v17  ;;  %v4994_v45 = vand.u32 8388607, %v4987_v46  ;;  %v5016_v4 = vshll.u32 %v5433_v51, %v5001_v23  ;;  %v4787_v47 = vsub.s32 32, %v9102_v2 }
 0x48d   :  { %v4792_v33 = vadd.s32 127, %v4791_v30  ;;  %vm4927_vm10 = vc.u32 %v9125_v54, %v9116_v19  ;;  %v5017_v49 = vshrl.u32 %v5434_v60, %v9108_v55  ;;  %v9142_v18 = vor.u32 %v5005_v25, %v5004_v10 }
 0x48e   :  { %v4929_v62 = vsel %vm4927_vm10, %v4928_v3, %v4924_v17  ;;  %v9144_v35 = vor.u32 %v5008_v39, %v5007_v58  ;;  %vm5019_vm11 = vcmp.lt.s32.totalorder %v9114_v21, 1  ;;  %v9147_v5 = vor.u32 %v5011_v59, %v5010_v15 }
 0x48f   :  { %v4930_v28 = vadd.s32 %v4929_v62, %v4925_v53  ;;  %v5015_v51 = vor.u32 %v5014_v1, %v5013_v6  ;;  %v5018_v23 = vor.u32 %v5017_v49, %v5016_v4  ;;  %v4635_v40 = vor.u32 %v9096_v0, %v4633_v36 }
 0x490   :  { %v4639_v57 = vor.u32 4788187, %v4638_v44  ;;  %vm5022_vm12 = vcmp.lt.s32.totalorder %v9114_v21, 4  ;;  %v4788_v60 = vshll.u32 %v9052_v56, %v9102_v2  ;;  %v4995_v20 = vor.u32 8388608, %v4994_v45 }
 0x491   :  { %v4931_v38 = vadd.s32 536870912, %v4930_v28  ;;  %vm5021_vm13 = vcmp.lt.s32.totalorder %v9114_v21, 3  ;;  %v4789_v52 = vshrl.u32 %v4771_v41, %v4787_v47  ;;  %v4793_v61 = vshll.u32 %v4792_v33, 23 }
 0x492   :  { %vm5020_vm14 = vcmp.lt.s32.totalorder %v9114_v21, 2  ;;  %v5027_v37 = vsel %vm5019_vm11, %v9142_v18, %v9144_v35  ;;  %v5028_v36 = vsel %vm5022_vm12, %v5015_v51, 920167782  ;;  %v5031_v56 = vsel %vm5019_vm11, %v9144_v35, %v9147_v5 }
 0x493   :  { %v9162_v9 = vshrl.u32 %v4931_v38, 30  ;;  %v5032_v0 = vsel %vm5022_vm12, %v5018_v23, 1326507024  ;;  %v5029_v2 = vsel %vm5021_vm13, %v9147_v5, %v5028_v36  ;;  %v4640_v63 = vand.u32 2147483647, %v4639_v57 }
 0x494   :  { %v5033_v14 = vsel %vm5021_vm13, %v5015_v51, %v5032_v0  ;;  %v4642_v16 = vcvt.s32.f32 %v4635_v40  ;;  %v4790_v31 = vor.u32 %v4789_v52, %v4788_v60  ;;  %v5030_v29 = vsel %vm5020_vm14, %v5027_v37, %v5029_v2 }
 0x495   :  { %v4933_v48 = vshll.u32 %v9162_v9, 30  ;;  %v5034_v44 = vsel %vm5020_vm14, %v5031_v56, %v5033_v14  ;;  %v9182_v30 = vshll.u32 %v4995_v20, 8  ;;  %v4794_v53 = vor.u32 4788187, %v4793_v61 }
 0x496   :  { %v5038_v24 = vand.u32 65535, %v5034_v44  ;;  %v5039_v10 = vshrl.u32 %v5034_v44, 16  ;;  %v5061_v39 = vshrl.u32 %v5030_v29, 16  ;;  %v4643_v15 = vmul.f32 %v4642_v16, %v4640_v63 }
 0x497   :  { %v4934_v26 = vsub.s32 %v4930_v28, %v4933_v48  ;;  %v5036_v58 = vand.u32 65535, %v9182_v30  ;;  %v5037_v25 = vshrl.u32 %v9182_v30, 16  ;;  %v4797_v59 = vcvt.s32.f32 %v4790_v31 }
 0x498   :  { %v4795_v41 = vand.u32 2147483647, %v4794_v53  ;;  %v5060_v4 = vand.u32 65535, %v5030_v29  ;;  %vm4524_vm0 = vcmp.lt.s32.totalorder %v8747_v12, 0  ;;  %v4644_v51 = vxor.u32 2147483648, %v4643_v15 }
 0x499   :  { %vm4935_vm15 = vcmp.lt.s32.totalorder %v4934_v26, 0  ;;  %v4936_v17 = vsub.s32 0, %v4934_v26  ;;  %v5040_v6 = vmul.u32 %v5038_v24, %v5036_v58  ;;  %v5041_v1 = vmul.u32 %v5039_v10, %v5036_v58 }
 0x49a   :  { %v5042_v45 = vmul.u32 %v5038_v24, %v5037_v25  ;;  %v5043_v33 = vmul.u32 %v5039_v10, %v5037_v25  ;;  %v5063_v28 = vmul.u32 %v5061_v39, %v5036_v58  ;;  %v4798_v57 = vmul.f32 %v4797_v59, %v4795_v41 }
 0x49b   :  { %v4937_v3 = vsel %vm4935_vm15, %v4936_v17, %v4934_v26  ;;  %v5044_v49 = vshll.u32 %v5041_v1, 16  ;;  %v4926_v60 = vadd.s32 %v9116_v19, %v9125_v54  ;;  %v5062_v20 = vmul.u32 %v5060_v4, %v5036_v58 }
 0x49c   :  { %v4938_v47 = vclz %v4937_v3  ;;  %v5046_v62 = vshll.u32 %v5042_v45, 16  ;;  %v5064_v61 = vmul.u32 %v5060_v4, %v5037_v25  ;;  %v5045_v36 = vshrl.u32 %v5041_v1, 16 }
 0x49d   :  { %vm5048_vm1 = vc.u32 %v5040_v6, %v5044_v49  ;;  %v5050_v40 = vadd.s32 %v5044_v49, %v5040_v6  ;;  %v5066_v0 = vshll.u32 %v5063_v28, 16  ;;  %vm9193_vm4 = vcmp.le.f32.partialorder %v4522_v34, 0.7853982 }
 0x49e   :  { %v5386_v23 = vadd.s32 4294967294, %v4938_v47  ;;  %v5049_v38 = vsel %vm5048_vm1, 1, %v5435_v8  ;;  %v4645_v54 = vsel %vm4524_vm0, %v4644_v51, %v4643_v15  ;;  %v5003_v48 = vshrl.u32 %v5429_v43, %v9108_v55 }
 0x49f   :  { %v5051_v52 = vadd.s32 %v5049_v38, %v5043_v33  ;;  %vm5052_vm3 = vc.u32 %v5050_v40, %v5046_v62  ;;  %v5065_v44 = vmul.u32 %v5061_v39, %v5037_v25  ;;  %v4799_v31 = vxor.u32 2147483648, %v4798_v57 }
 0x4a0   :  { %vm5387_vm2 = vcmp.lt.s32.totalorder %v5386_v23, 0  ;;  %v5053_v56 = vsel %vm5052_vm3, 1, %v5435_v8  ;;  %v5068_v53 = vshll.u32 %v5064_v61, 16  ;;  %v5047_v10 = vshrl.u32 %v5042_v45, 16 }
 0x4a1   :  { %v4941_v37 = vsel %vm5387_vm2, 0, %v5386_v23  ;;  %v5055_v16 = vadd.s32 %v5053_v56, %v5051_v52  ;;  %vm5070_vm5 = vc.u32 %v5062_v20, %v5066_v0  ;;  %v5072_v34 = vadd.s32 %v5066_v0, %v5062_v20 }
 0x4a2   :  { %v4942_v2 = vsub.s32 32, %v4941_v37  ;;  %v4943_v14 = vshll.u32 %v4934_v26, %v4941_v37  ;;  %v4946_v63 = vsub.s32 4294967266, %v4941_v37  ;;  %v5024_v26 = vsel %vm5022_vm12, %v9147_v5, 2102212464 }
 0x4a3   :  { %v5056_v59 = vadd.s32 %v5055_v16, %v5045_v36  ;;  %v5071_v15 = vsel %vm5070_vm5, 1, %v5435_v8  ;;  %v5023_v43 = vsel %vm5019_vm11, %v5003_v48, %v9142_v18  ;;  %v5067_v55 = vshrl.u32 %v5063_v28, 16 }
 0x4a4   :  { %v4944_v29 = vshrl.u32 %v4926_v60, %v4942_v2  ;;  %v4947_v24 = vadd.s32 127, %v4946_v63  ;;  %v5073_v25 = vadd.s32 %v5071_v15, %v5065_v44  ;;  %vm5074_vm6 = vc.u32 %v5072_v34, %v5068_v53 }
 0x4a5   :  { %v5025_v5 = vsel %vm5021_vm13, %v9144_v35, %v5024_v26  ;;  %v5075_v1 = vsel %vm5074_vm6, 1, %v5435_v8  ;;  %vm4679_vm7 = vcmp.lt.s32.totalorder %v8752_v22, 0  ;;  %v5069_v41 = vshrl.u32 %v5064_v61, 16 }
 0x4a6   :  { %v4945_v58 = vor.u32 %v4944_v29, %v4943_v14  ;;  %v4948_v17 = vshll.u32 %v4947_v24, 23  ;;  %v5077_v3 = vadd.s32 %v5075_v1, %v5073_v25  ;;  %v9216_v45 = vsel %vm9193_vm4, %v8747_v12, %v4645_v54 }
 0x4a7   :  { %v5057_v4 = vadd.s32 %v5056_v59, %v5047_v10  ;;  %v5076_v47 = vadd.s32 %v5072_v34, %v5068_v53  ;;  %v5026_v33 = vsel %vm5020_vm14, %v5023_v43, %v5025_v5  ;;  %vm9222_vm8 = vcmp.le.f32.partialorder %v4677_v50, 0.7853982 }
 0x4a8   :  { %v4949_v39 = vor.u32 4788187, %v4948_v17  ;;  %v4952_v6 = vcvt.s32.f32 %v4945_v58  ;;  %v5078_v49 = vadd.s32 %v5077_v3, %v5067_v55  ;;  %v4800_v35 = vsel %vm4679_vm7, %v4799_v31, %v4798_v57 }
 0x4a9   :  { %v4650_v28 = vmul.f32 %v9216_v45, %v9216_v45  ;;  %vm4834_vm9 = vcmp.lt.s32.totalorder %v8996_v27, 0  ;;  %v5080_v21 = vmul.u32 %v9182_v30, %v5026_v33  ;;  %vm5082_vm10 = vc.u32 %v5057_v4, %v5076_v47 }
 0x4aa   :  { %v4950_v18 = vand.u32 2147483647, %v4949_v39  ;;  %v5079_v51 = vadd.s32 %v5078_v49, %v5069_v41  ;;  %v9235_v50 = vsel %vm9222_vm8, %v8752_v22, %v4800_v35  ;;  %vm9239_vm11 = vcmp.le.f32.partialorder %v4832_v42, 0.7853982 }
 0x4ab   :  { %v4658_v60 = vmul.f32 -0.00019511016, %v4650_v28  ;;  %v4805_v30 = vmul.f32 %v9235_v50, %v9235_v50  ;;  %v4651_v61 = vmul.f32 -0.001358992, %v4650_v28  ;;  %v4646_v16 = vsub.s32 4, %v9001_v32 }
 0x4ac   :  { %v4953_v62 = vmul.f32 %v4952_v6, %v4950_v18  ;;  %v5083_v40 = vadd.s32 1, %v5079_v51  ;;  %v4801_v34 = vsub.s32 4, %v9038_v11  ;;  %v5081_v33 = vadd.s32 %v5076_v47, %v5057_v4 }
 0x4ad   :  { %v4659_v56 = vadd.f32 0.008332121, %v4658_v60  ;;  %v4813_v42 = vmul.f32 -0.00019511016, %v4805_v30  ;;  %v4652_v14 = vadd.f32 0.041655596, %v4651_v61  ;;  %v4647_v26 = vsel %vm4524_vm0, %v4646_v16, %v9001_v32 }
 0x4ae   :  { %v4954_v23 = vxor.u32 2147483648, %v4953_v62  ;;  %v5084_v20 = vsel %vm5082_vm10, %v5083_v40, %v5079_v51  ;;  %v4806_v48 = vmul.f32 -0.001358992, %v4805_v30  ;;  %v4649_v39 = vsel %vm9193_vm4, 0, %v4647_v26 }
 0x4af   :  { %v5085_v52 = vadd.s32 %v5084_v20, %v5080_v21  ;;  %v4660_v54 = vmul.f32 %v4659_v56, %v4650_v28  ;;  %v4814_v44 = vadd.f32 0.008332121, %v4813_v42  ;;  %v4653_v24 = vmul.f32 %v4652_v14, %v4650_v28 }
 0x4b0   :  { %v4955_v38 = vsel %vm4834_vm9, %v4954_v23, %v4953_v62  ;;  %v4807_v58 = vadd.f32 0.041655596, %v4806_v48  ;;  %v4802_v32 = vsel %vm4679_vm7, %v4801_v34, %v9038_v11  ;;  %v4666_v35 = vadd.s32 3, %v4649_v39 }
 0x4b1   :  { %v9250_v37 = vsel %vm9239_vm11, %v8996_v27, %v4955_v38  ;;  %v5086_v36 = vadd.s32 536870912, %v5085_v52  ;;  %v4661_v10 = vadd.f32 -0.16666654, %v4660_v54  ;;  %v4815_v17 = vmul.f32 %v4814_v44, %v4805_v30 }
 0x4b2   :  { %v9256_v2 = vmul.f32 %v9250_v37, %v9250_v37  ;;  %v4654_v25 = vadd.f32 -0.4999988, %v4653_v24  ;;  %v4808_v1 = vmul.f32 %v4807_v58, %v4805_v30  ;;  %v4804_v40 = vsel %vm9222_vm8, 0, %v4802_v32 }
 0x4b3   :  { %v9252_v0 = vshrl.u32 %v5086_v36, 30  ;;  %v4662_v6 = vmul.f32 %v4661_v10, %v4650_v28  ;;  %v4816_v41 = vadd.f32 -0.16666654, %v4815_v17  ;;  %v4956_v11 = vsub.s32 4, %v9162_v9 }
 0x4b4   :  { %v4968_v29 = vmul.f32 -0.00019511016, %v9256_v2  ;;  %v4961_v15 = vmul.f32 -0.001358992, %v9256_v2  ;;  %v4655_v49 = vmul.f32 %v4654_v25, %v4650_v28  ;;  %v4809_v60 = vadd.f32 -0.4999988, %v4808_v1 }
 0x4b5   :  { %v5088_v63 = vshll.u32 %v9252_v0, 30  ;;  %v4663_v51 = vadd.f32 1.0, %v4662_v6  ;;  %v4817_v38 = vmul.f32 %v4816_v41, %v4805_v30  ;;  %v4667_v47 = vand.u32 3, %v4666_v35 }
 0x4b6   :  { %v4969_v43 = vadd.f32 0.008332121, %v4968_v29  ;;  %v4962_v3 = vadd.f32 0.041655596, %v4961_v15  ;;  %v4656_v28 = vadd.f32 1.0, %v4655_v49  ;;  %v4810_v14 = vmul.f32 %v4809_v60, %v4805_v30 }
 0x4b7   :  { %v5089_v31 = vsub.s32 %v5085_v52, %v5088_v63  ;;  %v4664_v36 = vmul.f32 %v4663_v51, %v9216_v45  ;;  %v4818_v63 = vadd.f32 1.0, %v4817_v38  ;;  %v4821_v16 = vadd.s32 3, %v4804_v40 }
 0x4b8   :  { %v4970_v18 = vmul.f32 %v4969_v43, %v9256_v2  ;;  %v4963_v20 = vmul.f32 %v4962_v3, %v9256_v2  ;;  %v4957_v8 = vsel %vm4834_vm9, %v4956_v11, %v9162_v9  ;;  %vm4669_vm14 = vcmp.eq.s32.totalorder %v4667_v47, 0 }
 0x4b9   :  { %vm5090_vm12 = vcmp.lt.s32.totalorder %v5089_v31, 0  ;;  %v5091_v53 = vsub.s32 0, %v5089_v31  ;;  %v4670_v29 = vxor.u32 2147483648, %v4664_v36  ;;  %v4673_v24 = vxor.u32 2147483648, %v4656_v28 }
 0x4ba   :  { %v4971_v52 = vadd.f32 -0.16666654, %v4970_v18  ;;  %v4964_v54 = vadd.f32 -0.4999988, %v4963_v20  ;;  %v4959_v45 = vsel %vm9239_vm11, 0, %v4957_v8  ;;  %vm4672_vm15 = vcmp.eq.s32.totalorder %v4667_v47, 2 }
 0x4bb   :  { %v5092_v59 = vsel %vm5090_vm12, %v5091_v53, %v5089_v31  ;;  %v4811_v30 = vadd.f32 1.0, %v4810_v14  ;;  %v4819_v26 = vmul.f32 %v4818_v63, %v9235_v50  ;;  %v4822_v10 = vand.u32 3, %v4821_v16 }
 0x4bc   :  { %v5093_v55 = vclz %v5092_v59  ;;  %v4972_v48 = vmul.f32 %v4971_v52, %v9256_v2  ;;  %v4965_v34 = vmul.f32 %v4964_v54, %v9256_v2  ;;  %v5111_v17 = vsub.s32 4, %v9252_v0 }
 0x4bd   :  { %vm4668_vm0 = vcmp.lt.s32.totalorder %v4667_v47, 2  ;;  %v4976_v59 = vadd.s32 3, %v4959_v45  ;;  %vm4989_vm1 = vcmp.lt.s32.totalorder %v9029_v7, 0  ;;  %v4671_v15 = vsel %vm4669_vm14, %v4656_v28, %v4670_v29 }
 0x4be   :  { %v5389_v5 = vadd.s32 4294967294, %v5093_v55  ;;  %v4973_v9 = vadd.f32 1.0, %v4972_v48  ;;  %v4674_v57 = vsel %vm4672_vm15, %v4673_v24, %v4664_v36  ;;  %vm9290_vm2 = vcmp.le.f32.partialorder %v4987_v46, 0.7853982 }
 0x4bf   :  { %vm4824_vm3 = vcmp.eq.s32.totalorder %v4822_v10, 0  ;;  %v4825_v2 = vxor.u32 2147483648, %v4819_v26  ;;  %vm4827_vm4 = vcmp.eq.s32.totalorder %v4822_v10, 2  ;;  %v4828_v55 = vxor.u32 2147483648, %v4811_v30 }
 0x4c0   :  { %vm5390_vm13 = vcmp.lt.s32.totalorder %v5389_v5, 0  ;;  %v4966_v25 = vadd.f32 1.0, %v4965_v34  ;;  %v4974_v39 = vmul.f32 %v4973_v9, %v9250_v37  ;;  %v4977_v32 = vand.u32 3, %v4976_v59 }
 0x4c1   :  { %v5096_v62 = vsel %vm5390_vm13, 0, %v5389_v5  ;;  %v5112_v5 = vsel %vm4989_vm1, %v5111_v17, %v9252_v0  ;;  %vm4665_vm5 = vweird.f32 %v8747_v12  ;;  %v4675_v46 = vsel %vm4668_vm0, %v4671_v15, %v4674_v57 }
 0x4c2   :  { %v5097_v23 = vsub.s32 32, %v5096_v62  ;;  %v5098_v19 = vshll.u32 %v5089_v31, %v5096_v62  ;;  %v5101_v21 = vsub.s32 4294967266, %v5096_v62  ;;  %vm4823_vm6 = vcmp.lt.s32.totalorder %v4822_v10, 2 }
 0x4c3   :  { %v4826_v3 = vsel %vm4824_vm3, %v4811_v30, %v4825_v2  ;;  %v4829_v18 = vsel %vm4827_vm4, %v4828_v55, %v4819_v26  ;;  %v4980_v37 = vxor.u32 2147483648, %v4974_v39  ;;  %v4983_v49 = vxor.u32 2147483648, %v4966_v25 }
 0x4c4   :  { %v5099_v61 = vshrl.u32 %v5081_v33, %v5097_v23  ;;  %v5102_v4 = vadd.s32 127, %v5101_v21  ;;  %v5114_v33 = vsel %vm9290_vm2, 0, %v5112_v5  ;;  %vm4979_vm7 = vcmp.eq.s32.totalorder %v4977_v32, 0  ;;  %v5183_v5 = vld [vmem:[#allocation3 + $0x10] sm:$0xff] }
 0x4c5   :  { %vm4982_vm8 = vcmp.eq.s32.totalorder %v4977_v32, 2  ;;  %v9303_v62 = vsel %vm4665_vm5, nan, %v4675_v46  ;;  %vm4820_vm9 = vweird.f32 %v8752_v22  ;;  %v4830_v12 = vsel %vm4823_vm6, %v4826_v3, %v4829_v18 }
 0x4c6   :  { %v5100_v56 = vor.u32 %v5099_v61, %v5098_v19  ;;  %v5103_v42 = vshll.u32 %v5102_v4, 23  ;;  %vm4978_vm10 = vcmp.lt.s32.totalorder %v4977_v32, 2  ;;  %v5131_v19 = vadd.s32 3, %v5114_v33 }
 0x4c7   :  { %v4981_v21 = vsel %vm4979_vm7, %v4966_v25, %v4980_v37  ;;  %v4984_v40 = vsel %vm4982_vm8, %v4983_v49, %v4974_v39  ;;  %v5147_v11 = vand.u32 2147483647, %v9303_v62  ;;  %v9307_v20 = vsel %vm4820_vm9, nan, %v4830_v12  ;;  %v5181_v25 = vld [vmem:[#allocation3] sm:$0xff]  ;;  %v5194_v37 = vld [vmem:[#allocation3 + $0x28] sm:$0xff] }
 0x4c8   :  { %v5104_v44 = vor.u32 4788187, %v5103_v42  ;;  %v5107_v31 = vcvt.s32.f32 %v5100_v56  ;;  %vm4975_vm11 = vweird.f32 %v8996_v27  ;;  %v4985_v4 = vsel %vm4978_vm10, %v4981_v21, %v4984_v40  ;;  %v5205_v12 = vld [vmem:[#allocation3 + $0x40] sm:$0xff]  ;;  %v5206_v21 = vld [vmem:[#allocation3 + $0x48] sm:$0xff] }
 0x4c9   :  { %v5132_v47 = vand.u32 3, %v5131_v19  ;;  %v5154_v22 = vmax.f32 %v5147_v11, %v8990_v13  ;;  %v5148_v56 = vand.u32 2147483647, %v9307_v20  ;;  %v9312_v42 = vsel %vm4975_vm11, nan, %v4985_v4 }
 0x4ca   :  { %v5105_v53 = vand.u32 2147483647, %v5104_v44  ;;  %v5149_v48 = vand.u32 2147483647, %v9312_v42  ;;  %vm5130_vm15 = vweird.f32 %v9029_v7 }
 0x4cb   :  { %vm5137_vm12 = vcmp.eq.s32.totalorder %v5132_v47, 2  ;;  %vm5134_vm13 = vcmp.eq.s32.totalorder %v5132_v47, 0  ;;  %v5155_v54 = vmax.f32 %v5148_v56, %v5154_v22  ;;  %vm5133_vm14 = vcmp.lt.s32.totalorder %v5132_v47, 2  ;;  %v5218_v47 = vld [vmem:[#allocation3 + $0x68] sm:$0xff]  ;;  %v5220_v22 = vld [vmem:[#allocation3 + $0x78] sm:$0xff] }
 0x4cc   :  { %v5108_v58 = vmul.f32 %v5107_v31, %v5105_v53 }
 0x4cd   :  { %v5156_v29 = vmax.f32 %v5149_v48, %v5155_v54  ;;  %v5231_v48 = vld [vmem:[#allocation3 + $0x90] sm:$0xff] }
 0x4ce   :  { %v5109_v50 = vxor.u32 2147483648, %v5108_v58 }
 0x4d0   :  { %v5110_v6 = vsel %vm4989_vm1, %v5109_v50, %v5108_v58 }
 0x4d1   :  { %v5113_v1 = vsel %vm9290_vm2, %v9029_v7, %v5110_v6  ;;  %v5182_v6 = vld [vmem:[#allocation3 + $0x8] sm:$0xff] }
 0x4d2   :  { %v5115_v41 = vmul.f32 %v5113_v1, %v5113_v1 }
 0x4d4   :  { %v5116_v35 = vmul.f32 -0.001358992, %v5115_v41  ;;  %v5123_v0 = vmul.f32 -0.00019511016, %v5115_v41 }
 0x4d6   :  { %v5117_v51 = vadd.f32 0.041655596, %v5116_v35  ;;  %v5124_v23 = vadd.f32 0.008332121, %v5123_v0  ;;  %v5195_v35 = vld [vmem:[#allocation3 + $0x30] sm:$0xff]  ;;  %v5196_v0 = vld [vmem:[#allocation3 + $0x38] sm:$0xff] }
 0x4d8   :  { %v5118_v60 = vmul.f32 %v5117_v51, %v5115_v41  ;;  %v5125_v38 = vmul.f32 %v5124_v23, %v5115_v41 }
 0x4da   :  { %v5119_v52 = vadd.f32 -0.4999988, %v5118_v60  ;;  %v5126_v61 = vadd.f32 -0.16666654, %v5125_v38  ;;  %v5207_v60 = vld [vmem:[#allocation3 + $0x50] sm:$0xff]  ;;  %v5208_v38 = vld [vmem:[#allocation3 + $0x58] sm:$0xff] }
 0x4dc   :  { %v5120_v28 = vmul.f32 %v5119_v52, %v5115_v41  ;;  %v5127_v36 = vmul.f32 %v5126_v61, %v5115_v41  ;;  %v5193_v41 = vld [vmem:[#allocation3 + $0x20] sm:$0xff] }
 0x4dd   :  { %v5217_v61 = vld [vmem:[#allocation3 + $0x60] sm:$0xff] }
 0x4de   :  { %v5121_v14 = vadd.f32 1.0, %v5120_v28  ;;  %v5128_v63 = vadd.f32 1.0, %v5127_v36  ;;  %v5219_v36 = vld [vmem:[#allocation3 + $0x70] sm:$0xff] }
 0x4e0   :  { %v5129_v16 = vmul.f32 %v5128_v63, %v5113_v1  ;;  %v5138_v8 = vxor.u32 2147483648, %v5121_v14  ;;  %v5184_v1 = vld [vmem:[#allocation3 + $0x18] sm:$0xff]  ;;  %v5229_v63 = vld [vmem:[#allocation3 + $0x80] sm:$0xff] }
 0x4e2   :  { %v5135_v27 = vxor.u32 2147483648, %v5129_v16  ;;  %v5139_v44 = vsel %vm5137_vm12, %v5138_v8, %v5129_v16  ;;  %v5230_v8 = vld [vmem:[#allocation3 + $0x88] sm:$0xff] }
 0x4e4   :  { %v5136_v31 = vsel %vm5134_vm13, %v5121_v14, %v5135_v27  ;;  %v5232_v27 = vld [vmem:[#allocation3 + $0x98] sm:$0xff] }
 0x4e5   :  { %v5140_v13 = vsel %vm5133_vm14, %v5136_v31, %v5139_v44 }
 0x4e6   :  { %v9316_v24 = vsel %vm5130_vm15, nan, %v5140_v13  ;;  %v5241_v13 = vld [vmem:[#allocation3 + $0xa0] sm:$0xff] }
 0x4e7   :  { %v5150_v45 = vand.u32 2147483647, %v9316_v24 }
 0x4e9   :  { %v5157_v53 = vmax.f32 %v5150_v45, %v5156_v29  ;;  %v5242_v45 = vld [vmem:[#allocation3 + $0xa8] sm:$0xff] }
 0x4eb   :  { %5158 = vmax.xlane.f32.xlu0 %v5157_v53 }
 0x55e   :  { %v5159_v30 = vpop.xlane.xlu0 %5158 }
 0x55f   :  { %v5160_v26 = vrot.slane %v5159_v30, 4 }
 0x561   :  { %v5161_v10 = vmax.f32 %v5159_v30, %v5160_v26  ;;  %v5243_v30 = vld [vmem:[#allocation3 + $0xb0] sm:$0xff]  ;;  %v5244_v26 = vld [vmem:[#allocation3 + $0xb8] sm:$0xff] }
 0x563   :  { %v5162_v34 = vrot.slane %v5161_v10, 2 }
 0x565   :  { %v5163_v9 = vmax.f32 %v5161_v10, %v5162_v34 }
 0x567   :  { %v5164_v58 = vrot.slane %v5163_v9, 1 }
 0x569   :  { %v5165_v17 = vmax.f32 %v5163_v9, %v5164_v58  ;;  %v5253_v9 = vld [vmem:[#allocation3 + $0xc0] sm:$0xff] }
 0x56b   :  { %v5166_v59 = vadd.f32 1e-08, %v5165_v17  ;;  %v5254_v17 = vld [vmem:[#allocation3 + $0xc8] sm:$0xff] }
 0x56d   :  { %5401 = vrcp.f32 %v5166_v59  ;;  %v5178_v43 = vand.u32 2147483648, %v5166_v59  ;;  %v5176_v2 = vand.u32 2147483647, %v5166_v59  ;;  %vm5172_vm1 = vweird.f32 %v5166_v59 }
 0x56f   :  { %v5179_v39 = vor.u32 1.1754944e-38, %v5178_v43  ;;  %vm5177_vm3 = vcmp.eq.f32.partialorder %v5176_v2, 8.507059e+37 }
 0x573   :  { %v5402_v15 = vpop.eup %5401 }
 0x574   :  { %v5168_v7 = vmul.f32 %v5402_v15, %v5166_v59  ;;  %vm5173_vm0 = vweird.f32 %v5402_v15 }
 0x575   :  { %vm5174_vm2 = vmor %vm5172_vm1, %vm5173_vm0 }
 0x576   :  { %v5169_v57 = vsub.f32 1.0, %v5168_v7  ;;  %v5256_v7 = vld [vmem:[#allocation3 + $0xd8] sm:$0xff] }
 0x578   :  { %v5170_v50 = vmul.f32 %v5402_v15, %v5169_v57 }
 0x57a   :  { %v5171_v55 = vadd.f32 %v5402_v15, %v5170_v50 }
 0x57c   :  { %v5175_v32 = vsel %vm5174_vm2, %v5402_v15, %v5171_v55  ;;  %v5255_v15 = vld [vmem:[#allocation3 + $0xd0] sm:$0xff] }
 0x57d   :  { %v9319_v46 = vsel %vm5177_vm3, %v5179_v39, %v5175_v32 }
 0x57e   :  { %v5185_v3 = vmul.f32 %v5181_v25, %v9319_v46  ;;  %v5186_v18 = vmul.f32 %v5182_v6, %v9319_v46  ;;  %v5187_v33 = vmul.f32 %v5183_v5, %v9319_v46  ;;  %v5188_v49 = vmul.f32 %v5184_v1, %v9319_v46 }
 0x57f   :  { %v5197_v51 = vmul.f32 %v5193_v41, %v9319_v46  ;;  %v5198_v23 = vmul.f32 %v5194_v37, %v9319_v46  ;;  %v5199_v19 = vmul.f32 %v5195_v35, %v9319_v46  ;;  %v5200_v40 = vmul.f32 %v5196_v0, %v9319_v46 }
 0x580   :  { %5189 = vst [vmem:[#allocation3] sm:$0xff] %v5185_v3  ;;  %v5209_v11 = vmul.f32 %v5205_v12, %v9319_v46  ;;  %v5210_v52 = vmul.f32 %v5206_v21, %v9319_v46  ;;  %v5211_v4 = vmul.f32 %v5207_v60, %v9319_v46  ;;  %v5212_v28 = vmul.f32 %v5208_v38, %v9319_v46 }
 0x581   :  { %5190 = vst [vmem:[#allocation3 + $0x8] sm:$0xff] %v5186_v18  ;;  %v5221_v56 = vmul.f32 %v5217_v61, %v9319_v46  ;;  %v5222_v14 = vmul.f32 %v5218_v47, %v9319_v46  ;;  %v5223_v16 = vmul.f32 %v5219_v36, %v9319_v46  ;;  %v5224_v54 = vmul.f32 %v5220_v22, %v9319_v46 }
 0x582   :  { %5191 = vst [vmem:[#allocation3 + $0x10] sm:$0xff] %v5187_v33  ;;  %v5233_v44 = vmul.f32 %v5229_v63, %v9319_v46  ;;  %v5234_v31 = vmul.f32 %v5230_v8, %v9319_v46  ;;  %v5235_v29 = vmul.f32 %v5231_v48, %v9319_v46  ;;  %v5236_v53 = vmul.f32 %v5232_v27, %v9319_v46 }
 0x583   :  { %5192 = vst [vmem:[#allocation3 + $0x18] sm:$0xff] %v5188_v49  ;;  %v5245_v10 = vmul.f32 %v5241_v13, %v9319_v46  ;;  %v5246_v34 = vmul.f32 %v5242_v45, %v9319_v46  ;;  %v5247_v58 = vmul.f32 %v5243_v30, %v9319_v46  ;;  %v5248_v59 = vmul.f32 %v5244_v26, %v9319_v46 }
 0x584   :  { %5201 = vst [vmem:[#allocation3 + $0x20] sm:$0xff] %v5197_v51  ;;  %v5257_v57 = vmul.f32 %v5253_v9, %v9319_v46  ;;  %v5258_v43 = vmul.f32 %v5254_v17, %v9319_v46  ;;  %v5259_v50 = vmul.f32 %v5255_v15, %v9319_v46  ;;  %v5260_v2 = vmul.f32 %v5256_v7, %v9319_v46 }
 0x585   :  { %5202 = vst [vmem:[#allocation3 + $0x28] sm:$0xff] %v5198_v23  ;;  %v5269_v55 = vmul.f32 %v9319_v46, %v9303_v62  ;;  %v5270_v25 = vmul.f32 %v9319_v46, %v9307_v20  ;;  %v5271_v39 = vmul.f32 %v9319_v46, %v9312_v42  ;;  %v5272_v6 = vmul.f32 %v9319_v46, %v9316_v24 }
 0x586   :  { %5203 = vst [vmem:[#allocation3 + $0x30] sm:$0xff] %v5199_v19 }
 0x587   :  { %5204 = vst [vmem:[#allocation3 + $0x38] sm:$0xff] %v5200_v40 }
 0x588   :  { %5213 = vst [vmem:[#allocation3 + $0x40] sm:$0xff] %v5209_v11 }
 0x589   :  { %5214 = vst [vmem:[#allocation3 + $0x48] sm:$0xff] %v5210_v52 }
 0x58a   :  { %5215 = vst [vmem:[#allocation3 + $0x50] sm:$0xff] %v5211_v4 }
 0x58b   :  { %5216 = vst [vmem:[#allocation3 + $0x58] sm:$0xff] %v5212_v28 }
 0x58c   :  { %5225 = vst [vmem:[#allocation3 + $0x60] sm:$0xff] %v5221_v56 }
 0x58d   :  { %5226 = vst [vmem:[#allocation3 + $0x68] sm:$0xff] %v5222_v14 }
 0x58e   :  { %5227 = vst [vmem:[#allocation3 + $0x70] sm:$0xff] %v5223_v16 }
 0x58f   :  { %5228 = vst [vmem:[#allocation3 + $0x78] sm:$0xff] %v5224_v54 }
 0x590   :  { %5237 = vst [vmem:[#allocation3 + $0x80] sm:$0xff] %v5233_v44 }
 0x591   :  { %5238 = vst [vmem:[#allocation3 + $0x88] sm:$0xff] %v5234_v31 }
 0x592   :  { %5239 = vst [vmem:[#allocation3 + $0x90] sm:$0xff] %v5235_v29 }
 0x593   :  { %5240 = vst [vmem:[#allocation3 + $0x98] sm:$0xff] %v5236_v53 }
 0x594   :  { %5249 = vst [vmem:[#allocation3 + $0xa0] sm:$0xff] %v5245_v10 }
 0x595   :  { %5250 = vst [vmem:[#allocation3 + $0xa8] sm:$0xff] %v5246_v34 }
 0x596   :  { %5251 = vst [vmem:[#allocation3 + $0xb0] sm:$0xff] %v5247_v58 }
 0x597   :  { %5252 = vst [vmem:[#allocation3 + $0xb8] sm:$0xff] %v5248_v59 }
 0x598   :  { %5261 = vst [vmem:[#allocation3 + $0xc0] sm:$0xff] %v5257_v57 }
 0x599   :  { %5262 = vst [vmem:[#allocation3 + $0xc8] sm:$0xff] %v5258_v43 }
 0x59a   :  { %5263 = vst [vmem:[#allocation3 + $0xd0] sm:$0xff] %v5259_v50 }
 0x59b   :  { %5264 = vst [vmem:[#allocation3 + $0xd8] sm:$0xff] %v5260_v2 }
 0x59c   :  { %5273 = vst [vmem:[#allocation3 + $0xe0] sm:$0xff] %v5269_v55 }
 0x59d   :  { %5274 = vst [vmem:[#allocation3 + $0xe8] sm:$0xff] %v5270_v25 }
 0x59e   :  { %5275 = vst [vmem:[#allocation3 + $0xf0] sm:$0xff] %v5271_v39 }
 0x59f   :  { %5276 = vst [vmem:[#allocation3 + $0xf8] sm:$0xff] %v5272_v6 }
 0x5a0   :  { %5289 = dma.vmem_to_hbm [thread:$0]  %s5282_s8, 4096, %s5284_s11, [#allocation4], %s5437_s12, %s5437_s12, %s5438_s13  }
 0x5a1   :  { %5427 = dma.done.wait [#allocation4], 4096  }
 0x5a2   :  { %5428 = vsyncadd [#allocation4], 4294963200 }
 0x5a3   :  { %5294 = vsyncpa [#allocation4], 1 }

</bundles_post_ra>
